<compile_context>
chip_gen: v7x
topology: tpu7x:2x2x1
jax: 0.10.0
libtpu: 0.0.40
codegen_flags: <defaults>
</compile_context>

<pallas_src>
import functools
import numpy as np
import jax
import jax.numpy as jnp
from jax.experimental import pallas as pl
from jax.experimental.pallas import tpu as pltpu

# ---------------- model config (small, consistent with the module) ----------------
IMG_RES = 64            # model_config['img_res'] (forward resizes every frame to 64x64)
PATCH_SIZES = [16, 32]  # model_config['patch_size_list']
NUM_CLASSES = 3
NUM_FRAMES = 2          # max_seq_len (T)
NUM_CHANNELS = 4
DIM = 32
SPATIAL_DEPTH = 1
HEADS = 4
DIM_HEAD = 8
SCALE_DIM = 2
MLP_DIM = DIM * SCALE_DIM
INNER = HEADS * DIM_HEAD
ATTN_SCALE = DIM_HEAD ** -0.5
LN_EPS = 1e-5

N_LAYER_REFS = 11  # refs per transformer layer passed to the fused kernel


def _vspec():
    return pl.BlockSpec(memory_space=pltpu.MemorySpace.VMEM)


# ---------------- in-kernel math helpers ----------------
def _layernorm(x, g, b):
    mu = jnp.mean(x, axis=-1, keepdims=True)
    var = jnp.mean(jnp.square(x - mu), axis=-1, keepdims=True)
    return (x - mu) * jax.lax.rsqrt(var + LN_EPS) * g + b


def _gelu(x):
    # tanh-approximation GELU (single EUP tanh instead of erf polynomial).
    c = 0.7978845608028654  # sqrt(2/pi)
    return 0.5 * x * (1.0 + jnp.tanh(c * (x + 0.044715 * x * x * x)))


def _transformer_layer(x, lp, bt, n):
    """One PreNorm(Attention) + PreNorm(FeedForward) block on x of shape (bt*n, DIM)."""
    (ln1g, ln1b, wqkv, wo, bo, ln2g, ln2b, w1, b1, w2, b2) = lp

    # --- PreNorm + multi-head attention ---
    h = _layernorm(x, ln1g[...], ln1b[...])                                      # (bt*n, D)
    qkv = jnp.dot(h, wqkv[...], preferred_element_type=jnp.float32)              # (bt*n, 3*INNER)
    qkv3 = qkv.reshape(bt, n, 3 * INNER)                                         # (bt, n, 3*INNER)
    head_outs = []
    for hd in range(HEADS):                                                      # static, 4 iters
        q = qkv3[:, :, hd * DIM_HEAD:(hd + 1) * DIM_HEAD]
        k = qkv3[:, :, INNER + hd * DIM_HEAD:INNER + (hd + 1) * DIM_HEAD]
        v = qkv3[:, :, 2 * INNER + hd * DIM_HEAD:2 * INNER + (hd + 1) * DIM_HEAD]
        s = jnp.einsum('bqd,bkd->bqk', q, k,
                       preferred_element_type=jnp.float32) * ATTN_SCALE          # (bt, n, n)
        s = s - jnp.max(s, axis=-1, keepdims=True)
        e = jnp.exp(s)
        attn = e / jnp.sum(e, axis=-1, keepdims=True)
        head_outs.append(jnp.einsum('bqk,bkd->bqd', attn, v,
                                    preferred_element_type=jnp.float32))         # (bt, n, dh)
    a = jnp.concatenate(head_outs, axis=-1).reshape(bt * n, INNER)               # 'b h n d -> (b n) (h d)'
    x = x + jnp.dot(a, wo[...], preferred_element_type=jnp.float32) + bo[...]    # residual 1

    # --- PreNorm + FeedForward ---
    h2 = _layernorm(x, ln2g[...], ln2b[...])
    f = jnp.dot(h2, w1[...], preferred_element_type=jnp.float32) + b1[...]
    f = _gelu(f)
    x = x + jnp.dot(f, w2[...], preferred_element_type=jnp.float32) + b2[...]    # residual 2
    return x


# ---------------- fused dual-scale pipeline kernel ----------------
def _dual_scale_kernel(*refs, depth, bt, ns):
    """Both patch scales in one kernel; transformer weights shared in VMEM.

    Per scale: patch-embed -> depth x transformer layer -> LN + mean over (b t)
    -> mlp_head LN+Linear -> lane-dense output store.
    """
    it = iter(refs)
    scale_in = [(next(it), next(it), next(it)) for _ in ns]                        # (px, pw, pb)
    layer_refs = [tuple(next(it) for _ in range(N_LAYER_REFS)) for _ in range(depth)]
    ng = next(it); nb = next(it)                                                   # final transformer LayerNorm
    heads = [(next(it), next(it), next(it), next(it)) for _ in ns]                 # (hg, hb, hw, hbias)
    outs = [next(it) for _ in ns]                                                  # (n, NUM_CLASSES*p*p) each

    for (px_ref, pw, pb), (hg, hb, hw, hbias), o_ref, n in zip(scale_in, heads, outs, ns):
        # ---- patch embedding: one matmul for all (b t) tokens ----
        x = jnp.dot(px_ref[...], pw[...], preferred_element_type=jnp.float32) + pb[...]  # (bt*n, D)

        # ---- spatial transformer (depth is static) ----
        for lp in layer_refs:
            x = _transformer_layer(x, lp, bt, n)

        # ---- final transformer LayerNorm, then mean over the (b t) axis ----
        xn = _layernorm(x, ng[...], nb[...]).reshape(bt, n, DIM)
        pooled = xn[0]
        for b_i in range(1, bt):                                                   # static, bt=2
            pooled = pooled + xn[b_i]
        pooled = pooled * (1.0 / bt)                                               # (n, D)

        # ---- mlp_head: LayerNorm + Linear; lane-dense (n, nc*p*p) store ----
        ph = _layernorm(pooled, hg[...], hb[...])
        o_ref[...] = jnp.dot(ph, hw[...], preferred_element_type=jnp.float32) + hbias[...]


def dual_scale_pipeline(px_list, params, *, ns, bt):
    """One fused pallas_call covering every patch scale.

    px_list[i]: (bt*ns[i], patch_dim_i) patch tokens.
    Returns a tuple of head outputs, one (ns[i], nc*p_i*p_i) array per scale.
    """
    depth = len(params['layers'])
    inputs = []
    for i in range(len(ns)):
        inputs += [px_list[i], params['patch_w'][i], params['patch_b'][i]]
    for lp in params['layers']:
        inputs += [lp['ln1_g'], lp['ln1_b'], lp['w_qkv'], lp['w_out'], lp['b_out'],
                   lp['ln2_g'], lp['ln2_b'], lp['w1'], lp['b1'], lp['w2'], lp['b2']]
    inputs += [params['norm_g'], params['norm_b']]
    for i in range(len(ns)):
        inputs += [params['head_lng'][i], params['head_lnb'][i],
                   params['head_w'][i], params['head_b'][i]]

    out_shapes = tuple(
        jax.ShapeDtypeStruct((ns[i], params['head_w'][i].shape[1]), jnp.float32)
        for i in range(len(ns)))
    kernel = functools.partial(_dual_scale_kernel, depth=depth, bt=bt, ns=tuple(ns))
    return pl.pallas_call(
        kernel,
        out_shape=out_shapes,
        in_specs=[_vspec()] * len(inputs),
        out_specs=tuple(_vspec() for _ in ns),
    )(*inputs)


# ---------------- bilinear resize (align_corners=False) as fused Mh @ X @ Mw^T ----------------
def bilinear_matrix(in_size, out_size):
    """Row-interpolation matrix matching torch bilinear, align_corners=False."""
    scale = in_size / out_size
    M = np.zeros((out_size, in_size), dtype=np.float32)
    for i in range(out_size):
        src = (i + 0.5) * scale - 0.5
        if src < 0.0:
            src = 0.0
        x0 = min(int(np.floor(src)), in_size - 1)
        x1 = min(x0 + 1, in_size - 1)
        w1 = src - x0
        M[i, x0] += 1.0 - w1
        M[i, x1] += w1
    return jnp.asarray(M)


def _resize_kernel(x_ref, mh_ref, mwt_ref, o_ref):
    mh = mh_ref[...]                                     # (out_h, H)
    mwt = mwt_ref[...]                                   # (W, out_w)
    for i in range(x_ref.shape[0]):                      # static slice loop (N <= 8)
        t = jnp.dot(mh, x_ref[i], preferred_element_type=jnp.float32)
        o_ref[i] = jnp.dot(t, mwt, preferred_element_type=jnp.float32)


def resize_batch(x, out_h, out_w):
    """x: (N, H, W) -> (N, out_h, out_w); both interpolation matmuls fused in one kernel."""
    N, H, W = x.shape
    mh = bilinear_matrix(H, out_h)
    mwt = jnp.transpose(bilinear_matrix(W, out_w))
    return pl.pallas_call(
        _resize_kernel,
        out_shape=jax.ShapeDtypeStruct((N, out_h, out_w), jnp.float32),
        in_specs=[_vspec()] * 3,
        out_specs=_vspec(),
    )(x, mh, mwt)


def _mean_resize_kernel(x_ref, mh_ref, mwt_ref, o_ref):
    xall = x_ref[...]                                    # (S, C, H, W)
    S = xall.shape[0]
    mh = mh_ref[...]
    mwt = mwt_ref[...]
    xm = xall[0]
    for s in range(1, S):                                # mean over scales (static, S=2)
        xm = xm + xall[s]
    xm = xm * (1.0 / S)                                  # (C, H, W)
    for c in range(xm.shape[0]):                         # static channel loop (C=3)
        t = jnp.dot(mh, xm[c], preferred_element_type=jnp.float32)
        o_ref[c] = jnp.dot(t, mwt, preferred_element_type=jnp.float32)


def mean_resize(x_stacked, out_h, out_w):
    """x_stacked: (S, C, H, W) -> mean over S then bilinear resize to (C, out_h, out_w)."""
    S, C, H, W = x_stacked.shape
    mh = bilinear_matrix(H, out_h)
    mwt = jnp.transpose(bilinear_matrix(W, out_w))
    return pl.pallas_call(
        _mean_resize_kernel,
        out_shape=jax.ShapeDtypeStruct((C, out_h, out_w), jnp.float32),
        in_specs=[_vspec()] * 3,
        out_specs=_vspec(),
    )(x_stacked, mh, mwt)


# ---------------- glue: patch extraction (einops rearrange), pure layout ----------------
def to_patches(x, p):
    # 'b t c (h p1) (w p2) -> b t (h w) (p1 p2 c)'
    B, T, C, H, W = x.shape
    h, w = H // p, W // p
    x = x.reshape(B, T, C, h, p, w, p)
    x = jnp.transpose(x, (0, 1, 3, 5, 4, 6, 2))          # b t h w p1 p2 c
    return x.reshape(B, T, h * w, p * p * C)


# ---------------- parameters ----------------
def init_params(key):
    keys = iter(jax.random.split(key, 64))

    def nrm(shape, scale=0.02):
        return (scale * jax.random.normal(next(keys), shape)).astype(jnp.float32)

    params = {'patch_w': [], 'patch_b': [], 'layers': [],
              'head_lng': [], 'head_lnb': [], 'head_w': [], 'head_b': []}
    for p in PATCH_SIZES:
        pd = NUM_CHANNELS * p * p
        params['patch_w'].append(nrm((pd, DIM)))
        params['patch_b'].append(jnp.zeros((1, DIM), jnp.float32))
    for _ in range(SPATIAL_DEPTH):
        params['layers'].append(dict(
            ln1_g=jnp.ones((1, DIM), jnp.float32), ln1_b=jnp.zeros((1, DIM), jnp.float32),
            # to_qkv (no bias); column order = [q | k | v], head-major within each chunk,
            # exactly the torch Linear(dim, 3*inner) + 'b n (h d) -> b h n d' layout.
            w_qkv=nrm((DIM, 3 * INNER)),
            w_out=nrm((INNER, DIM)), b_out=jnp.zeros((1, DIM), jnp.float32),
            ln2_g=jnp.ones((1, DIM), jnp.float32), ln2_b=jnp.zeros((1, DIM), jnp.float32),
            w1=nrm((DIM, MLP_DIM)), b1=jnp.zeros((1, MLP_DIM), jnp.float32),
            w2=nrm((MLP_DIM, DIM)), b2=jnp.zeros((1, DIM), jnp.float32),
        ))
    params['norm_g'] = jnp.ones((1, DIM), jnp.float32)
    params['norm_b'] = jnp.zeros((1, DIM), jnp.float32)
    for p in PATCH_SIZES:
        out = NUM_CLASSES * p * p
        params['head_lng'].append(jnp.ones((1, DIM), jnp.float32))
        params['head_lnb'].append(jnp.zeros((1, DIM), jnp.float32))
        params['head_w'].append(nrm((DIM, out)))
        params['head_b'].append(jnp.zeros((1, out), jnp.float32))
    return params


# ---------------- forward ----------------
def multi_svit_forward(x, params):
    # NOTE: like the PyTorch forward, this path only supports B == 1 (its reshapes
    # after `patch_x.mean(dim=0)` require it).
    B, T, C, H, W = x.shape
    # 1) bilinear resize every (H, W) slice to 64x64 — one fused Pallas kernel.
    x64 = resize_batch(x.reshape(B * T * C, H, W), 64, 64).reshape(B, T, C, 64, 64)
    H = W = 64
    BT = B * T

    # Patch tokens for every scale (pure XLA layout), then ONE fused pipeline kernel
    # covering both scales (shared transformer weights loaded into VMEM once).
    ns, px_list = [], []
    for p in PATCH_SIZES:
        n_1d = IMG_RES // p
        n = n_1d * n_1d
        ns.append(n)
        px_list.append(to_patches(x64, p).reshape(BT * n, NUM_CHANNELS * p * p))
    recs = dual_scale_pipeline(px_list, params, ns=ns, bt=BT)    # ((n16, nc*256), (n32, nc*1024))

    x_scale = []
    for i, p in enumerate(PATCH_SIZES):
        n = ns[i]
        # Same plain `.reshape()` chain as the PyTorch forward (torch reshape semantics).
        rec = recs[i].reshape(B, n, p * p, NUM_CLASSES)
        rec = rec.reshape(B, H * W, NUM_CLASSES).reshape(B, H, W, NUM_CLASSES)
        rec = jnp.transpose(rec, (0, 3, 1, 2))                   # (B, nc, H, W)
        x_scale.append(rec)

    xc = jnp.concatenate(x_scale, axis=0)                        # (num_scales*B, nc, H, W)
    # 3) mean over scales fused with the final bilinear resize to (50, 65).
    out = mean_resize(xc, 50, 65)                                # (nc, 50, 65)
    return out.reshape(B, NUM_CLASSES, 50, 65)


if __name__ == "__main__":
    key = jax.random.PRNGKey(0)
    pkey, xkey = jax.random.split(key)
    params = init_params(pkey)
    # small input consistent with the module: (B=1, T=2, C=4, H=16, W=16)
    x = jax.random.normal(xkey, (1, NUM_FRAMES, NUM_CHANNELS, 16, 16), dtype=jnp.float32)

    forward = jax.jit(multi_svit_forward)
    out = jax.block_until_ready(forward(x, params))
    assert out.shape == (1, NUM_CLASSES, 50, 65), out.shape
    assert bool(jnp.all(jnp.isfinite(out)))
    print("KERNEL_OK")
</pallas_src>

<mosaic_0001>
module attributes {stable_mosaic.version = 11 : i64} {
  func.func @_resize_kernel(%arg0: memref<8x16x16xf32, #tpu.memory_space<vmem>>, %arg1: memref<64x16xf32, #tpu.memory_space<vmem>>, %arg2: memref<16x64xf32, #tpu.memory_space<vmem>>, %arg3: memref<8x64x64xf32, #tpu.memory_space<vmem>>) attributes {dimension_semantics = [], scalar_prefetch = 0 : i64, scratch_operands = 0 : i64, tpu.core_type = #tpu.core_type<tc>} {
    %c0 = arith.constant 0 : index
    %c0_0 = arith.constant 0 : index
    %0 = vector.load %arg1[%c0, %c0_0] : memref<64x16xf32, #tpu.memory_space<vmem>>, vector<64x16xf32>
    %c0_1 = arith.constant 0 : index
    %c0_2 = arith.constant 0 : index
    %1 = vector.load %arg2[%c0_1, %c0_2] : memref<16x64xf32, #tpu.memory_space<vmem>>, vector<16x64xf32>
    %c0_3 = arith.constant 0 : index
    %c0_4 = arith.constant 0 : index
    %c0_5 = arith.constant 0 : index
    %2 = vector.load %arg0[%c0_3, %c0_4, %c0_5] : memref<8x16x16xf32, #tpu.memory_space<vmem>>, vector<1x16x16xf32>
    %3 = vector.shape_cast %2 : vector<1x16x16xf32> to vector<16x16xf32>
    %cst = arith.constant dense<0.000000e+00> : vector<64x16xf32>
    %4 = tpu.matmul %0, %3, %cst {dimension_numbers = #tpu.dot_dimension_numbers<[1], [0], [0], [1], [0, 0, 1, 1], [], []>} : vector<64x16xf32>, vector<16x16xf32>, vector<64x16xf32> -> vector<64x16xf32>
    %cst_6 = arith.constant dense<0.000000e+00> : vector<64x64xf32>
    %5 = tpu.matmul %4, %1, %cst_6 {dimension_numbers = #tpu.dot_dimension_numbers<[1], [0], [0], [1], [0, 0, 1, 1], [], []>} : vector<64x16xf32>, vector<16x64xf32>, vector<64x64xf32> -> vector<64x64xf32>
    %c0_7 = arith.constant 0 : index
    %c0_8 = arith.constant 0 : index
    %c0_9 = arith.constant 0 : index
    %6 = vector.load %arg3[%c0_7, %c0_8, %c0_9] : memref<8x64x64xf32, #tpu.memory_space<vmem>>, vector<1x64x64xf32>
    %7 = vector.shape_cast %6 : vector<1x64x64xf32> to vector<64x64xf32>
    %8 = vector.shape_cast %5 : vector<64x64xf32> to vector<1x64x64xf32>
    tpu.vector_store %arg3[%c0_7, %c0_8, %c0_9], %8 {strides = array<i32>} : memref<8x64x64xf32, #tpu.memory_space<vmem>>, vector<1x64x64xf32>,
    %c1 = arith.constant 1 : index
    %c0_10 = arith.constant 0 : index
    %c0_11 = arith.constant 0 : index
    %9 = vector.load %arg0[%c1, %c0_10, %c0_11] : memref<8x16x16xf32, #tpu.memory_space<vmem>>, vector<1x16x16xf32>
    %10 = vector.shape_cast %9 : vector<1x16x16xf32> to vector<16x16xf32>
    %cst_12 = arith.constant dense<0.000000e+00> : vector<64x16xf32>
    %11 = tpu.matmul %0, %10, %cst_12 {dimension_numbers = #tpu.dot_dimension_numbers<[1], [0], [0], [1], [0, 0, 1, 1], [], []>} : vector<64x16xf32>, vector<16x16xf32>, vector<64x16xf32> -> vector<64x16xf32>
    %cst_13 = arith.constant dense<0.000000e+00> : vector<64x64xf32>
    %12 = tpu.matmul %11, %1, %cst_13 {dimension_numbers = #tpu.dot_dimension_numbers<[1], [0], [0], [1], [0, 0, 1, 1], [], []>} : vector<64x16xf32>, vector<16x64xf32>, vector<64x64xf32> -> vector<64x64xf32>
    %c1_14 = arith.constant 1 : index
    %c0_15 = arith.constant 0 : index
    %c0_16 = arith.constant 0 : index
    %13 = vector.load %arg3[%c1_14, %c0_15, %c0_16] : memref<8x64x64xf32, #tpu.memory_space<vmem>>, vector<1x64x64xf32>
    %14 = vector.shape_cast %13 : vector<1x64x64xf32> to vector<64x64xf32>
    %15 = vector.shape_cast %12 : vector<64x64xf32> to vector<1x64x64xf32>
    tpu.vector_store %arg3[%c1_14, %c0_15, %c0_16], %15 {strides = array<i32>} : memref<8x64x64xf32, #tpu.memory_space<vmem>>, vector<1x64x64xf32>,
    %c2 = arith.constant 2 : index
    %c0_17 = arith.constant 0 : index
    %c0_18 = arith.constant 0 : index
    %16 = vector.load %arg0[%c2, %c0_17, %c0_18] : memref<8x16x16xf32, #tpu.memory_space<vmem>>, vector<1x16x16xf32>
    %17 = vector.shape_cast %16 : vector<1x16x16xf32> to vector<16x16xf32>
    %cst_19 = arith.constant dense<0.000000e+00> : vector<64x16xf32>
    %18 = tpu.matmul %0, %17, %cst_19 {dimension_numbers = #tpu.dot_dimension_numbers<[1], [0], [0], [1], [0, 0, 1, 1], [], []>} : vector<64x16xf32>, vector<16x16xf32>, vector<64x16xf32> -> vector<64x16xf32>
    %cst_20 = arith.constant dense<0.000000e+00> : vector<64x64xf32>
    %19 = tpu.matmul %18, %1, %cst_20 {dimension_numbers = #tpu.dot_dimension_numbers<[1], [0], [0], [1], [0, 0, 1, 1], [], []>} : vector<64x16xf32>, vector<16x64xf32>, vector<64x64xf32> -> vector<64x64xf32>
    %c2_21 = arith.constant 2 : index
    %c0_22 = arith.constant 0 : index
    %c0_23 = arith.constant 0 : index
    %20 = vector.load %arg3[%c2_21, %c0_22, %c0_23] : memref<8x64x64xf32, #tpu.memory_space<vmem>>, vector<1x64x64xf32>
    %21 = vector.shape_cast %20 : vector<1x64x64xf32> to vector<64x64xf32>
    %22 = vector.shape_cast %19 : vector<64x64xf32> to vector<1x64x64xf32>
    tpu.vector_store %arg3[%c2_21, %c0_22, %c0_23], %22 {strides = array<i32>} : memref<8x64x64xf32, #tpu.memory_space<vmem>>, vector<1x64x64xf32>,
    %c3 = arith.constant 3 : index
    %c0_24 = arith.constant 0 : index
    %c0_25 = arith.constant 0 : index
    %23 = vector.load %arg0[%c3, %c0_24, %c0_25] : memref<8x16x16xf32, #tpu.memory_space<vmem>>, vector<1x16x16xf32>
    %24 = vector.shape_cast %23 : vector<1x16x16xf32> to vector<16x16xf32>
    %cst_26 = arith.constant dense<0.000000e+00> : vector<64x16xf32>
    %25 = tpu.matmul %0, %24, %cst_26 {dimension_numbers = #tpu.dot_dimension_numbers<[1], [0], [0], [1], [0, 0, 1, 1], [], []>} : vector<64x16xf32>, vector<16x16xf32>, vector<64x16xf32> -> vector<64x16xf32>
    %cst_27 = arith.constant dense<0.000000e+00> : vector<64x64xf32>
    %26 = tpu.matmul %25, %1, %cst_27 {dimension_numbers = #tpu.dot_dimension_numbers<[1], [0], [0], [1], [0, 0, 1, 1], [], []>} : vector<64x16xf32>, vector<16x64xf32>, vector<64x64xf32> -> vector<64x64xf32>
    %c3_28 = arith.constant 3 : index
    %c0_29 = arith.constant 0 : index
    %c0_30 = arith.constant 0 : index
    %27 = vector.load %arg3[%c3_28, %c0_29, %c0_30] : memref<8x64x64xf32, #tpu.memory_space<vmem>>, vector<1x64x64xf32>
    %28 = vector.shape_cast %27 : vector<1x64x64xf32> to vector<64x64xf32>
    %29 = vector.shape_cast %26 : vector<64x64xf32> to vector<1x64x64xf32>
    tpu.vector_store %arg3[%c3_28, %c0_29, %c0_30], %29 {strides = array<i32>} : memref<8x64x64xf32, #tpu.memory_space<vmem>>, vector<1x64x64xf32>,
    %c4 = arith.constant 4 : index
    %c0_31 = arith.constant 0 : index
    %c0_32 = arith.constant 0 : index
    %30 = vector.load %arg0[%c4, %c0_31, %c0_32] : memref<8x16x16xf32, #tpu.memory_space<vmem>>, vector<1x16x16xf32>
    %31 = vector.shape_cast %30 : vector<1x16x16xf32> to vector<16x16xf32>
    %cst_33 = arith.constant dense<0.000000e+00> : vector<64x16xf32>
    %32 = tpu.matmul %0, %31, %cst_33 {dimension_numbers = #tpu.dot_dimension_numbers<[1], [0], [0], [1], [0, 0, 1, 1], [], []>} : vector<64x16xf32>, vector<16x16xf32>, vector<64x16xf32> -> vector<64x16xf32>
    %cst_34 = arith.constant dense<0.000000e+00> : vector<64x64xf32>
    %33 = tpu.matmul %32, %1, %cst_34 {dimension_numbers = #tpu.dot_dimension_numbers<[1], [0], [0], [1], [0, 0, 1, 1], [], []>} : vector<64x16xf32>, vector<16x64xf32>, vector<64x64xf32> -> vector<64x64xf32>
    %c4_35 = arith.constant 4 : index
    %c0_36 = arith.constant 0 : index
    %c0_37 = arith.constant 0 : index
    %34 = vector.load %arg3[%c4_35, %c0_36, %c0_37] : memref<8x64x64xf32, #tpu.memory_space<vmem>>, vector<1x64x64xf32>
    %35 = vector.shape_cast %34 : vector<1x64x64xf32> to vector<64x64xf32>
    %36 = vector.shape_cast %33 : vector<64x64xf32> to vector<1x64x64xf32>
    tpu.vector_store %arg3[%c4_35, %c0_36, %c0_37], %36 {strides = array<i32>} : memref<8x64x64xf32, #tpu.memory_space<vmem>>, vector<1x64x64xf32>,
    %c5 = arith.constant 5 : index
    %c0_38 = arith.constant 0 : index
    %c0_39 = arith.constant 0 : index
    %37 = vector.load %arg0[%c5, %c0_38, %c0_39] : memref<8x16x16xf32, #tpu.memory_space<vmem>>, vector<1x16x16xf32>
    %38 = vector.shape_cast %37 : vector<1x16x16xf32> to vector<16x16xf32>
    %cst_40 = arith.constant dense<0.000000e+00> : vector<64x16xf32>
    %39 = tpu.matmul %0, %38, %cst_40 {dimension_numbers = #tpu.dot_dimension_numbers<[1], [0], [0], [1], [0, 0, 1, 1], [], []>} : vector<64x16xf32>, vector<16x16xf32>, vector<64x16xf32> -> vector<64x16xf32>
    %cst_41 = arith.constant dense<0.000000e+00> : vector<64x64xf32>
    %40 = tpu.matmul %39, %1, %cst_41 {dimension_numbers = #tpu.dot_dimension_numbers<[1], [0], [0], [1], [0, 0, 1, 1], [], []>} : vector<64x16xf32>, vector<16x64xf32>, vector<64x64xf32> -> vector<64x64xf32>
    %c5_42 = arith.constant 5 : index
    %c0_43 = arith.constant 0 : index
    %c0_44 = arith.constant 0 : index
    %41 = vector.load %arg3[%c5_42, %c0_43, %c0_44] : memref<8x64x64xf32, #tpu.memory_space<vmem>>, vector<1x64x64xf32>
    %42 = vector.shape_cast %41 : vector<1x64x64xf32> to vector<64x64xf32>
    %43 = vector.shape_cast %40 : vector<64x64xf32> to vector<1x64x64xf32>
    tpu.vector_store %arg3[%c5_42, %c0_43, %c0_44], %43 {strides = array<i32>} : memref<8x64x64xf32, #tpu.memory_space<vmem>>, vector<1x64x64xf32>,
    %c6 = arith.constant 6 : index
    %c0_45 = arith.constant 0 : index
    %c0_46 = arith.constant 0 : index
    %44 = vector.load %arg0[%c6, %c0_45, %c0_46] : memref<8x16x16xf32, #tpu.memory_space<vmem>>, vector<1x16x16xf32>
    %45 = vector.shape_cast %44 : vector<1x16x16xf32> to vector<16x16xf32>
    %cst_47 = arith.constant dense<0.000000e+00> : vector<64x16xf32>
    %46 = tpu.matmul %0, %45, %cst_47 {dimension_numbers = #tpu.dot_dimension_numbers<[1], [0], [0], [1], [0, 0, 1, 1], [], []>} : vector<64x16xf32>, vector<16x16xf32>, vector<64x16xf32> -> vector<64x16xf32>
    %cst_48 = arith.constant dense<0.000000e+00> : vector<64x64xf32>
    %47 = tpu.matmul %46, %1, %cst_48 {dimension_numbers = #tpu.dot_dimension_numbers<[1], [0], [0], [1], [0, 0, 1, 1], [], []>} : vector<64x16xf32>, vector<16x64xf32>, vector<64x64xf32> -> vector<64x64xf32>
    %c6_49 = arith.constant 6 : index
    %c0_50 = arith.constant 0 : index
    %c0_51 = arith.constant 0 : index
    %48 = vector.load %arg3[%c6_49, %c0_50, %c0_51] : memref<8x64x64xf32, #tpu.memory_space<vmem>>, vector<1x64x64xf32>
    %49 = vector.shape_cast %48 : vector<1x64x64xf32> to vector<64x64xf32>
    %50 = vector.shape_cast %47 : vector<64x64xf32> to vector<1x64x64xf32>
    tpu.vector_store %arg3[%c6_49, %c0_50, %c0_51], %50 {strides = array<i32>} : memref<8x64x64xf32, #tpu.memory_space<vmem>>, vector<1x64x64xf32>,
    %c7 = arith.constant 7 : index
    %c0_52 = arith.constant 0 : index
    %c0_53 = arith.constant 0 : index
    %51 = vector.load %arg0[%c7, %c0_52, %c0_53] : memref<8x16x16xf32, #tpu.memory_space<vmem>>, vector<1x16x16xf32>
    %52 = vector.shape_cast %51 : vector<1x16x16xf32> to vector<16x16xf32>
    %cst_54 = arith.constant dense<0.000000e+00> : vector<64x16xf32>
    %53 = tpu.matmul %0, %52, %cst_54 {dimension_numbers = #tpu.dot_dimension_numbers<[1], [0], [0], [1], [0, 0, 1, 1], [], []>} : vector<64x16xf32>, vector<16x16xf32>, vector<64x16xf32> -> vector<64x16xf32>
    %cst_55 = arith.constant dense<0.000000e+00> : vector<64x64xf32>
    %54 = tpu.matmul %53, %1, %cst_55 {dimension_numbers = #tpu.dot_dimension_numbers<[1], [0], [0], [1], [0, 0, 1, 1], [], []>} : vector<64x16xf32>, vector<16x64xf32>, vector<64x64xf32> -> vector<64x64xf32>
    %c7_56 = arith.constant 7 : index
    %c0_57 = arith.constant 0 : index
    %c0_58 = arith.constant 0 : index
    %55 = vector.load %arg3[%c7_56, %c0_57, %c0_58] : memref<8x64x64xf32, #tpu.memory_space<vmem>>, vector<1x64x64xf32>
    %56 = vector.shape_cast %55 : vector<1x64x64xf32> to vector<64x64xf32>
    %57 = vector.shape_cast %54 : vector<64x64xf32> to vector<1x64x64xf32>
    tpu.vector_store %arg3[%c7_56, %c0_57, %c0_58], %57 {strides = array<i32>} : memref<8x64x64xf32, #tpu.memory_space<vmem>>, vector<1x64x64xf32>,
    return
  }
}

module attributes {stable_mosaic.version = 11 : i64} {
  func.func @_dual_scale_kernel(%arg0: memref<32x1024xf32, #tpu.memory_space<vmem>>, %arg1: memref<1024x32xf32, #tpu.memory_space<vmem>>, %arg2: memref<1x32xf32, #tpu.memory_space<vmem>>, %arg3: memref<8x4096xf32, #tpu.memory_space<vmem>>, %arg4: memref<4096x32xf32, #tpu.memory_space<vmem>>, %arg5: memref<1x32xf32, #tpu.memory_space<vmem>>, %arg6: memref<1x32xf32, #tpu.memory_space<vmem>>, %arg7: memref<1x32xf32, #tpu.memory_space<vmem>>, %arg8: memref<32x96xf32, #tpu.memory_space<vmem>>, %arg9: memref<32x32xf32, #tpu.memory_space<vmem>>, %arg10: memref<1x32xf32, #tpu.memory_space<vmem>>, %arg11: memref<1x32xf32, #tpu.memory_space<vmem>>, %arg12: memref<1x32xf32, #tpu.memory_space<vmem>>, %arg13: memref<32x64xf32, #tpu.memory_space<vmem>>, %arg14: memref<1x64xf32, #tpu.memory_space<vmem>>, %arg15: memref<64x32xf32, #tpu.memory_space<vmem>>, %arg16: memref<1x32xf32, #tpu.memory_space<vmem>>, %arg17: memref<1x32xf32, #tpu.memory_space<vmem>>, %arg18: memref<1x32xf32, #tpu.memory_space<vmem>>, %arg19: memref<1x32xf32, #tpu.memory_space<vmem>>, %arg20: memref<1x32xf32, #tpu.memory_space<vmem>>, %arg21: memref<32x768xf32, #tpu.memory_space<vmem>>, %arg22: memref<1x768xf32, #tpu.memory_space<vmem>>, %arg23: memref<1x32xf32, #tpu.memory_space<vmem>>, %arg24: memref<1x32xf32, #tpu.memory_space<vmem>>, %arg25: memref<32x3072xf32, #tpu.memory_space<vmem>>, %arg26: memref<1x3072xf32, #tpu.memory_space<vmem>>, %arg27: memref<16x768xf32, #tpu.memory_space<vmem>>, %arg28: memref<4x3072xf32, #tpu.memory_space<vmem>>) attributes {dimension_semantics = [], scalar_prefetch = 0 : i64, scratch_operands = 0 : i64, tpu.core_type = #tpu.core_type<tc>} {
    %c0 = arith.constant 0 : index
    %c0_0 = arith.constant 0 : index
    %0 = vector.load %arg0[%c0, %c0_0] : memref<32x1024xf32, #tpu.memory_space<vmem>>, vector<32x1024xf32>
    %c0_1 = arith.constant 0 : index
    %c0_2 = arith.constant 0 : index
    %1 = vector.load %arg1[%c0_1, %c0_2] : memref<1024x32xf32, #tpu.memory_space<vmem>>, vector<1024x32xf32>
    %cst = arith.constant dense<0.000000e+00> : vector<32x32xf32>
    %2 = tpu.matmul %0, %1, %cst {dimension_numbers = #tpu.dot_dimension_numbers<[1], [0], [0], [1], [0, 0, 1, 1], [], []>} : vector<32x1024xf32>, vector<1024x32xf32>, vector<32x32xf32> -> vector<32x32xf32>
    %c0_3 = arith.constant 0 : index
    %c0_4 = arith.constant 0 : index
    %3 = vector.load %arg2[%c0_3, %c0_4] : memref<1x32xf32, #tpu.memory_space<vmem>>, vector<1x32xf32>
    %4 = vector.broadcast %3 : vector<1x32xf32> to vector<32x32xf32>
    %5 = arith.addf %2, %4 : vector<32x32xf32>
    %c0_5 = arith.constant 0 : index
    %c0_6 = arith.constant 0 : index
    %6 = vector.load %arg6[%c0_5, %c0_6] : memref<1x32xf32, #tpu.memory_space<vmem>>, vector<1x32xf32>
    %c0_7 = arith.constant 0 : index
    %c0_8 = arith.constant 0 : index
    %7 = vector.load %arg7[%c0_7, %c0_8] : memref<1x32xf32, #tpu.memory_space<vmem>>, vector<1x32xf32>
    %cst_9 = arith.constant dense<0.000000e+00> : vector<32xf32>
    %8 = vector.multi_reduction <add>, %5, %cst_9 [1] : vector<32x32xf32> to vector<32xf32>
    %9 = vector.shape_cast %8 : vector<32xf32> to vector<32x1xf32>
    %cst_10 = arith.constant 3.200000e+01 : f32
    %10 = vector.broadcast %cst_10 : f32 to vector<32x1xf32>
    %11 = arith.divf %9, %10 : vector<32x1xf32>
    %12 = vector.broadcast %11 : vector<32x1xf32> to vector<32x32xf32>
    %13 = arith.subf %5, %12 : vector<32x32xf32>
    %14 = arith.mulf %13, %13 : vector<32x32xf32>
    %cst_11 = arith.constant dense<0.000000e+00> : vector<32xf32>
    %15 = vector.multi_reduction <add>, %14, %cst_11 [1] : vector<32x32xf32> to vector<32xf32>
    %16 = vector.shape_cast %15 : vector<32xf32> to vector<32x1xf32>
    %cst_12 = arith.constant 3.200000e+01 : f32
    %17 = vector.broadcast %cst_12 : f32 to vector<32x1xf32>
    %18 = arith.divf %16, %17 : vector<32x1xf32>
    %19 = vector.broadcast %11 : vector<32x1xf32> to vector<32x32xf32>
    %20 = arith.subf %5, %19 : vector<32x32xf32>
    %cst_13 = arith.constant 9.99999974E-6 : f32
    %21 = vector.broadcast %cst_13 : f32 to vector<32x1xf32>
    %22 = arith.addf %18, %21 : vector<32x1xf32>
    %23 = math.rsqrt %22 : vector<32x1xf32>
    %24 = vector.broadcast %23 : vector<32x1xf32> to vector<32x32xf32>
    %25 = arith.mulf %20, %24 : vector<32x32xf32>
    %26 = vector.broadcast %6 : vector<1x32xf32> to vector<32x32xf32>
    %27 = arith.mulf %25, %26 : vector<32x32xf32>
    %28 = vector.broadcast %7 : vector<1x32xf32> to vector<32x32xf32>
    %29 = arith.addf %27, %28 : vector<32x32xf32>
    %c0_14 = arith.constant 0 : index
    %c0_15 = arith.constant 0 : index
    %30 = vector.load %arg8[%c0_14, %c0_15] : memref<32x96xf32, #tpu.memory_space<vmem>>, vector<32x96xf32>
    %cst_16 = arith.constant dense<0.000000e+00> : vector<32x96xf32>
    %31 = tpu.matmul %29, %30, %cst_16 {dimension_numbers = #tpu.dot_dimension_numbers<[1], [0], [0], [1], [0, 0, 1, 1], [], []>} : vector<32x32xf32>, vector<32x96xf32>, vector<32x96xf32> -> vector<32x96xf32>
    %32 = vector.shape_cast %31 : vector<32x96xf32> to vector<2x16x96xf32>
    %33 = vector.extract_strided_slice %32 {offsets = [0, 0, 0], sizes = [2, 16, 8], strides = [1, 1, 1]} : vector<2x16x96xf32> to vector<2x16x8xf32>
    %34 = vector.extract_strided_slice %32 {offsets = [0, 0, 32], sizes = [2, 16, 8], strides = [1, 1, 1]} : vector<2x16x96xf32> to vector<2x16x8xf32>
    %35 = vector.extract_strided_slice %32 {offsets = [0, 0, 64], sizes = [2, 16, 8], strides = [1, 1, 1]} : vector<2x16x96xf32> to vector<2x16x8xf32>
    "tpu.trace_start"() <{level = 10 : i32, message = "bqd,bkd->bqk"}> : () -> ()
    %cst_17 = arith.constant dense<0.000000e+00> : vector<2x16x16xf32>
    %36 = tpu.matmul %33, %34, %cst_17 {dimension_numbers = #tpu.dot_dimension_numbers<[2], [2], [1], [1], [0, 0, 0, 1, 1, 1], [0], [0]>} : vector<2x16x8xf32>, vector<2x16x8xf32>, vector<2x16x16xf32> -> vector<2x16x16xf32>
    "tpu.trace_stop"() : () -> ()
    %cst_18 = arith.constant 0.353553385 : f32
    %37 = vector.broadcast %cst_18 : f32 to vector<2x16x16xf32>
    %38 = arith.mulf %36, %37 : vector<2x16x16xf32>
    %cst_19 = arith.constant dense<0xFF800000> : vector<2x16xf32>
    %39 = vector.multi_reduction <maximumf>, %38, %cst_19 [2] : vector<2x16x16xf32> to vector<2x16xf32>
    %40 = vector.shape_cast %39 : vector<2x16xf32> to vector<2x16x1xf32>
    %41 = vector.broadcast %40 : vector<2x16x1xf32> to vector<2x16x16xf32>
    %42 = arith.subf %38, %41 : vector<2x16x16xf32>
    %43 = math.exp %42 : vector<2x16x16xf32>
    %cst_20 = arith.constant dense<0.000000e+00> : vector<2x16xf32>
    %44 = vector.multi_reduction <add>, %43, %cst_20 [2] : vector<2x16x16xf32> to vector<2x16xf32>
    %45 = vector.shape_cast %44 : vector<2x16xf32> to vector<2x16x1xf32>
    %46 = vector.broadcast %45 : vector<2x16x1xf32> to vector<2x16x16xf32>
    %47 = arith.divf %43, %46 : vector<2x16x16xf32>
    "tpu.trace_start"() <{level = 10 : i32, message = "bqk,bkd->bqd"}> : () -> ()
    %cst_21 = arith.constant dense<0.000000e+00> : vector<2x16x8xf32>
    %48 = tpu.matmul %47, %35, %cst_21 {dimension_numbers = #tpu.dot_dimension_numbers<[2], [1], [1], [2], [0, 0, 0, 1, 1, 2], [0], [0]>} : vector<2x16x16xf32>, vector<2x16x8xf32>, vector<2x16x8xf32> -> vector<2x16x8xf32>
    "tpu.trace_stop"() : () -> ()
    %49 = vector.extract_strided_slice %32 {offsets = [0, 0, 8], sizes = [2, 16, 8], strides = [1, 1, 1]} : vector<2x16x96xf32> to vector<2x16x8xf32>
    %50 = vector.extract_strided_slice %32 {offsets = [0, 0, 40], sizes = [2, 16, 8], strides = [1, 1, 1]} : vector<2x16x96xf32> to vector<2x16x8xf32>
    %51 = vector.extract_strided_slice %32 {offsets = [0, 0, 72], sizes = [2, 16, 8], strides = [1, 1, 1]} : vector<2x16x96xf32> to vector<2x16x8xf32>
    "tpu.trace_start"() <{level = 10 : i32, message = "bqd,bkd->bqk"}> : () -> ()
    %cst_22 = arith.constant dense<0.000000e+00> : vector<2x16x16xf32>
    %52 = tpu.matmul %49, %50, %cst_22 {dimension_numbers = #tpu.dot_dimension_numbers<[2], [2], [1], [1], [0, 0, 0, 1, 1, 1], [0], [0]>} : vector<2x16x8xf32>, vector<2x16x8xf32>, vector<2x16x16xf32> -> vector<2x16x16xf32>
    "tpu.trace_stop"() : () -> ()
    %cst_23 = arith.constant 0.353553385 : f32
    %53 = vector.broadcast %cst_23 : f32 to vector<2x16x16xf32>
    %54 = arith.mulf %52, %53 : vector<2x16x16xf32>
    %cst_24 = arith.constant dense<0xFF800000> : vector<2x16xf32>
    %55 = vector.multi_reduction <maximumf>, %54, %cst_24 [2] : vector<2x16x16xf32> to vector<2x16xf32>
    %56 = vector.shape_cast %55 : vector<2x16xf32> to vector<2x16x1xf32>
    %57 = vector.broadcast %56 : vector<2x16x1xf32> to vector<2x16x16xf32>
    %58 = arith.subf %54, %57 : vector<2x16x16xf32>
    %59 = math.exp %58 : vector<2x16x16xf32>
    %cst_25 = arith.constant dense<0.000000e+00> : vector<2x16xf32>
    %60 = vector.multi_reduction <add>, %59, %cst_25 [2] : vector<2x16x16xf32> to vector<2x16xf32>
    %61 = vector.shape_cast %60 : vector<2x16xf32> to vector<2x16x1xf32>
    %62 = vector.broadcast %61 : vector<2x16x1xf32> to vector<2x16x16xf32>
    %63 = arith.divf %59, %62 : vector<2x16x16xf32>
    "tpu.trace_start"() <{level = 10 : i32, message = "bqk,bkd->bqd"}> : () -> ()
    %cst_26 = arith.constant dense<0.000000e+00> : vector<2x16x8xf32>
    %64 = tpu.matmul %63, %51, %cst_26 {dimension_numbers = #tpu.dot_dimension_numbers<[2], [1], [1], [2], [0, 0, 0, 1, 1, 2], [0], [0]>} : vector<2x16x16xf32>, vector<2x16x8xf32>, vector<2x16x8xf32> -> vector<2x16x8xf32>
    "tpu.trace_stop"() : () -> ()
    %65 = vector.extract_strided_slice %32 {offsets = [0, 0, 16], sizes = [2, 16, 8], strides = [1, 1, 1]} : vector<2x16x96xf32> to vector<2x16x8xf32>
    %66 = vector.extract_strided_slice %32 {offsets = [0, 0, 48], sizes = [2, 16, 8], strides = [1, 1, 1]} : vector<2x16x96xf32> to vector<2x16x8xf32>
    %67 = vector.extract_strided_slice %32 {offsets = [0, 0, 80], sizes = [2, 16, 8], strides = [1, 1, 1]} : vector<2x16x96xf32> to vector<2x16x8xf32>
    "tpu.trace_start"() <{level = 10 : i32, message = "bqd,bkd->bqk"}> : () -> ()
    %cst_27 = arith.constant dense<0.000000e+00> : vector<2x16x16xf32>
    %68 = tpu.matmul %65, %66, %cst_27 {dimension_numbers = #tpu.dot_dimension_numbers<[2], [2], [1], [1], [0, 0, 0, 1, 1, 1], [0], [0]>} : vector<2x16x8xf32>, vector<2x16x8xf32>, vector<2x16x16xf32> -> vector<2x16x16xf32>
    "tpu.trace_stop"() : () -> ()
    %cst_28 = arith.constant 0.353553385 : f32
    %69 = vector.broadcast %cst_28 : f32 to vector<2x16x16xf32>
    %70 = arith.mulf %68, %69 : vector<2x16x16xf32>
    %cst_29 = arith.constant dense<0xFF800000> : vector<2x16xf32>
    %71 = vector.multi_reduction <maximumf>, %70, %cst_29 [2] : vector<2x16x16xf32> to vector<2x16xf32>
    %72 = vector.shape_cast %71 : vector<2x16xf32> to vector<2x16x1xf32>
    %73 = vector.broadcast %72 : vector<2x16x1xf32> to vector<2x16x16xf32>
    %74 = arith.subf %70, %73 : vector<2x16x16xf32>
    %75 = math.exp %74 : vector<2x16x16xf32>
    %cst_30 = arith.constant dense<0.000000e+00> : vector<2x16xf32>
    %76 = vector.multi_reduction <add>, %75, %cst_30 [2] : vector<2x16x16xf32> to vector<2x16xf32>
    %77 = vector.shape_cast %76 : vector<2x16xf32> to vector<2x16x1xf32>
    %78 = vector.broadcast %77 : vector<2x16x1xf32> to vector<2x16x16xf32>
    %79 = arith.divf %75, %78 : vector<2x16x16xf32>
    "tpu.trace_start"() <{level = 10 : i32, message = "bqk,bkd->bqd"}> : () -> ()
    %cst_31 = arith.constant dense<0.000000e+00> : vector<2x16x8xf32>
    %80 = tpu.matmul %79, %67, %cst_31 {dimension_numbers = #tpu.dot_dimension_numbers<[2], [1], [1], [2], [0, 0, 0, 1, 1, 2], [0], [0]>} : vector<2x16x16xf32>, vector<2x16x8xf32>, vector<2x16x8xf32> -> vector<2x16x8xf32>
    "tpu.trace_stop"() : () -> ()
    %81 = vector.extract_strided_slice %32 {offsets = [0, 0, 24], sizes = [2, 16, 8], strides = [1, 1, 1]} : vector<2x16x96xf32> to vector<2x16x8xf32>
    %82 = vector.extract_strided_slice %32 {offsets = [0, 0, 56], sizes = [2, 16, 8], strides = [1, 1, 1]} : vector<2x16x96xf32> to vector<2x16x8xf32>
    %83 = vector.extract_strided_slice %32 {offsets = [0, 0, 88], sizes = [2, 16, 8], strides = [1, 1, 1]} : vector<2x16x96xf32> to vector<2x16x8xf32>
    "tpu.trace_start"() <{level = 10 : i32, message = "bqd,bkd->bqk"}> : () -> ()
    %cst_32 = arith.constant dense<0.000000e+00> : vector<2x16x16xf32>
    %84 = tpu.matmul %81, %82, %cst_32 {dimension_numbers = #tpu.dot_dimension_numbers<[2], [2], [1], [1], [0, 0, 0, 1, 1, 1], [0], [0]>} : vector<2x16x8xf32>, vector<2x16x8xf32>, vector<2x16x16xf32> -> vector<2x16x16xf32>
    "tpu.trace_stop"() : () -> ()
    %cst_33 = arith.constant 0.353553385 : f32
    %85 = vector.broadcast %cst_33 : f32 to vector<2x16x16xf32>
    %86 = arith.mulf %84, %85 : vector<2x16x16xf32>
    %cst_34 = arith.constant dense<0xFF800000> : vector<2x16xf32>
    %87 = vector.multi_reduction <maximumf>, %86, %cst_34 [2] : vector<2x16x16xf32> to vector<2x16xf32>
    %88 = vector.shape_cast %87 : vector<2x16xf32> to vector<2x16x1xf32>
    %89 = vector.broadcast %88 : vector<2x16x1xf32> to vector<2x16x16xf32>
    %90 = arith.subf %86, %89 : vector<2x16x16xf32>
    %91 = math.exp %90 : vector<2x16x16xf32>
    %cst_35 = arith.constant dense<0.000000e+00> : vector<2x16xf32>
    %92 = vector.multi_reduction <add>, %91, %cst_35 [2] : vector<2x16x16xf32> to vector<2x16xf32>
    %93 = vector.shape_cast %92 : vector<2x16xf32> to vector<2x16x1xf32>
    %94 = vector.broadcast %93 : vector<2x16x1xf32> to vector<2x16x16xf32>
    %95 = arith.divf %91, %94 : vector<2x16x16xf32>
    "tpu.trace_start"() <{level = 10 : i32, message = "bqk,bkd->bqd"}> : () -> ()
    %cst_36 = arith.constant dense<0.000000e+00> : vector<2x16x8xf32>
    %96 = tpu.matmul %95, %83, %cst_36 {dimension_numbers = #tpu.dot_dimension_numbers<[2], [1], [1], [2], [0, 0, 0, 1, 1, 2], [0], [0]>} : vector<2x16x16xf32>, vector<2x16x8xf32>, vector<2x16x8xf32> -> vector<2x16x8xf32>
    "tpu.trace_stop"() : () -> ()
    %97 = tpu.concatenate %48, %64, %80, %96 in 2 : vector<2x16x8xf32>, vector<2x16x8xf32>, vector<2x16x8xf32>, vector<2x16x8xf32> -> vector<2x16x32xf32>
    %98 = vector.shape_cast %97 : vector<2x16x32xf32> to vector<32x32xf32>
    %c0_37 = arith.constant 0 : index
    %c0_38 = arith.constant 0 : index
    %99 = vector.load %arg9[%c0_37, %c0_38] : memref<32x32xf32, #tpu.memory_space<vmem>>, vector<32x32xf32>
    %cst_39 = arith.constant dense<0.000000e+00> : vector<32x32xf32>
    %100 = tpu.matmul %98, %99, %cst_39 {dimension_numbers = #tpu.dot_dimension_numbers<[1], [0], [0], [1], [0, 0, 1, 1], [], []>} : vector<32x32xf32>, vector<32x32xf32>, vector<32x32xf32> -> vector<32x32xf32>
    %101 = arith.addf %5, %100 : vector<32x32xf32>
    %c0_40 = arith.constant 0 : index
    %c0_41 = arith.constant 0 : index
    %102 = vector.load %arg10[%c0_40, %c0_41] : memref<1x32xf32, #tpu.memory_space<vmem>>, vector<1x32xf32>
    %103 = vector.broadcast %102 : vector<1x32xf32> to vector<32x32xf32>
    %104 = arith.addf %101, %103 : vector<32x32xf32>
    %c0_42 = arith.constant 0 : index
    %c0_43 = arith.constant 0 : index
    %105 = vector.load %arg11[%c0_42, %c0_43] : memref<1x32xf32, #tpu.memory_space<vmem>>, vector<1x32xf32>
    %c0_44 = arith.constant 0 : index
    %c0_45 = arith.constant 0 : index
    %106 = vector.load %arg12[%c0_44, %c0_45] : memref<1x32xf32, #tpu.memory_space<vmem>>, vector<1x32xf32>
    %cst_46 = arith.constant dense<0.000000e+00> : vector<32xf32>
    %107 = vector.multi_reduction <add>, %104, %cst_46 [1] : vector<32x32xf32> to vector<32xf32>
    %108 = vector.shape_cast %107 : vector<32xf32> to vector<32x1xf32>
    %cst_47 = arith.constant 3.200000e+01 : f32
    %109 = vector.broadcast %cst_47 : f32 to vector<32x1xf32>
    %110 = arith.divf %108, %109 : vector<32x1xf32>
    %111 = vector.broadcast %110 : vector<32x1xf32> to vector<32x32xf32>
    %112 = arith.subf %104, %111 : vector<32x32xf32>
    %113 = arith.mulf %112, %112 : vector<32x32xf32>
    %cst_48 = arith.constant dense<0.000000e+00> : vector<32xf32>
    %114 = vector.multi_reduction <add>, %113, %cst_48 [1] : vector<32x32xf32> to vector<32xf32>
    %115 = vector.shape_cast %114 : vector<32xf32> to vector<32x1xf32>
    %cst_49 = arith.constant 3.200000e+01 : f32
    %116 = vector.broadcast %cst_49 : f32 to vector<32x1xf32>
    %117 = arith.divf %115, %116 : vector<32x1xf32>
    %118 = vector.broadcast %110 : vector<32x1xf32> to vector<32x32xf32>
    %119 = arith.subf %104, %118 : vector<32x32xf32>
    %cst_50 = arith.constant 9.99999974E-6 : f32
    %120 = vector.broadcast %cst_50 : f32 to vector<32x1xf32>
    %121 = arith.addf %117, %120 : vector<32x1xf32>
    %122 = math.rsqrt %121 : vector<32x1xf32>
    %123 = vector.broadcast %122 : vector<32x1xf32> to vector<32x32xf32>
    %124 = arith.mulf %119, %123 : vector<32x32xf32>
    %125 = vector.broadcast %105 : vector<1x32xf32> to vector<32x32xf32>
    %126 = arith.mulf %124, %125 : vector<32x32xf32>
    %127 = vector.broadcast %106 : vector<1x32xf32> to vector<32x32xf32>
    %128 = arith.addf %126, %127 : vector<32x32xf32>
    %c0_51 = arith.constant 0 : index
    %c0_52 = arith.constant 0 : index
    %129 = vector.load %arg13[%c0_51, %c0_52] : memref<32x64xf32, #tpu.memory_space<vmem>>, vector<32x64xf32>
    %cst_53 = arith.constant dense<0.000000e+00> : vector<32x64xf32>
    %130 = tpu.matmul %128, %129, %cst_53 {dimension_numbers = #tpu.dot_dimension_numbers<[1], [0], [0], [1], [0, 0, 1, 1], [], []>} : vector<32x32xf32>, vector<32x64xf32>, vector<32x64xf32> -> vector<32x64xf32>
    %c0_54 = arith.constant 0 : index
    %c0_55 = arith.constant 0 : index
    %131 = vector.load %arg14[%c0_54, %c0_55] : memref<1x64xf32, #tpu.memory_space<vmem>>, vector<1x64xf32>
    %132 = vector.broadcast %131 : vector<1x64xf32> to vector<32x64xf32>
    %133 = arith.addf %130, %132 : vector<32x64xf32>
    %cst_56 = arith.constant 5.000000e-01 : f32
    %134 = vector.broadcast %cst_56 : f32 to vector<32x64xf32>
    %135 = arith.mulf %134, %133 : vector<32x64xf32>
    %cst_57 = arith.constant 4.471500e-02 : f32
    %136 = vector.broadcast %cst_57 : f32 to vector<32x64xf32>
    %137 = arith.mulf %136, %133 : vector<32x64xf32>
    %138 = arith.mulf %137, %133 : vector<32x64xf32>
    %139 = arith.mulf %138, %133 : vector<32x64xf32>
    %140 = arith.addf %133, %139 : vector<32x64xf32>
    %cst_58 = arith.constant 0.797884583 : f32
    %141 = vector.broadcast %cst_58 : f32 to vector<32x64xf32>
    %142 = arith.mulf %141, %140 : vector<32x64xf32>
    %143 = math.tanh %142 : vector<32x64xf32>
    %cst_59 = arith.constant 1.000000e+00 : f32
    %144 = vector.broadcast %cst_59 : f32 to vector<32x64xf32>
    %145 = arith.addf %144, %143 : vector<32x64xf32>
    %146 = arith.mulf %135, %145 : vector<32x64xf32>
    %c0_60 = arith.constant 0 : index
    %c0_61 = arith.constant 0 : index
    %147 = vector.load %arg15[%c0_60, %c0_61] : memref<64x32xf32, #tpu.memory_space<vmem>>, vector<64x32xf32>
    %cst_62 = arith.constant dense<0.000000e+00> : vector<32x32xf32>
    %148 = tpu.matmul %146, %147, %cst_62 {dimension_numbers = #tpu.dot_dimension_numbers<[1], [0], [0], [1], [0, 0, 1, 1], [], []>} : vector<32x64xf32>, vector<64x32xf32>, vector<32x32xf32> -> vector<32x32xf32>
    %149 = arith.addf %104, %148 : vector<32x32xf32>
    %c0_63 = arith.constant 0 : index
    %c0_64 = arith.constant 0 : index
    %150 = vector.load %arg16[%c0_63, %c0_64] : memref<1x32xf32, #tpu.memory_space<vmem>>, vector<1x32xf32>
    %151 = vector.broadcast %150 : vector<1x32xf32> to vector<32x32xf32>
    %152 = arith.addf %149, %151 : vector<32x32xf32>
    %c0_65 = arith.constant 0 : index
    %c0_66 = arith.constant 0 : index
    %153 = vector.load %arg17[%c0_65, %c0_66] : memref<1x32xf32, #tpu.memory_space<vmem>>, vector<1x32xf32>
    %c0_67 = arith.constant 0 : index
    %c0_68 = arith.constant 0 : index
    %154 = vector.load %arg18[%c0_67, %c0_68] : memref<1x32xf32, #tpu.memory_space<vmem>>, vector<1x32xf32>
    %cst_69 = arith.constant dense<0.000000e+00> : vector<32xf32>
    %155 = vector.multi_reduction <add>, %152, %cst_69 [1] : vector<32x32xf32> to vector<32xf32>
    %156 = vector.shape_cast %155 : vector<32xf32> to vector<32x1xf32>
    %cst_70 = arith.constant 3.200000e+01 : f32
    %157 = vector.broadcast %cst_70 : f32 to vector<32x1xf32>
    %158 = arith.divf %156, %157 : vector<32x1xf32>
    %159 = vector.broadcast %158 : vector<32x1xf32> to vector<32x32xf32>
    %160 = arith.subf %152, %159 : vector<32x32xf32>
    %161 = arith.mulf %160, %160 : vector<32x32xf32>
    %cst_71 = arith.constant dense<0.000000e+00> : vector<32xf32>
    %162 = vector.multi_reduction <add>, %161, %cst_71 [1] : vector<32x32xf32> to vector<32xf32>
    %163 = vector.shape_cast %162 : vector<32xf32> to vector<32x1xf32>
    %cst_72 = arith.constant 3.200000e+01 : f32
    %164 = vector.broadcast %cst_72 : f32 to vector<32x1xf32>
    %165 = arith.divf %163, %164 : vector<32x1xf32>
    %166 = vector.broadcast %158 : vector<32x1xf32> to vector<32x32xf32>
    %167 = arith.subf %152, %166 : vector<32x32xf32>
    %cst_73 = arith.constant 9.99999974E-6 : f32
    %168 = vector.broadcast %cst_73 : f32 to vector<32x1xf32>
    %169 = arith.addf %165, %168 : vector<32x1xf32>
    %170 = math.rsqrt %169 : vector<32x1xf32>
    %171 = vector.broadcast %170 : vector<32x1xf32> to vector<32x32xf32>
    %172 = arith.mulf %167, %171 : vector<32x32xf32>
    %173 = vector.broadcast %153 : vector<1x32xf32> to vector<32x32xf32>
    %174 = arith.mulf %172, %173 : vector<32x32xf32>
    %175 = vector.broadcast %154 : vector<1x32xf32> to vector<32x32xf32>
    %176 = arith.addf %174, %175 : vector<32x32xf32>
    %177 = vector.shape_cast %176 : vector<32x32xf32> to vector<2x16x32xf32>
    %178 = vector.extract_strided_slice %177 {offsets = [0, 0, 0], sizes = [1, 16, 32], strides = [1, 1, 1]} : vector<2x16x32xf32> to vector<1x16x32xf32>
    %179 = vector.shape_cast %178 : vector<1x16x32xf32> to vector<16x32xf32>
    %180 = vector.extract_strided_slice %177 {offsets = [1, 0, 0], sizes = [1, 16, 32], strides = [1, 1, 1]} : vector<2x16x32xf32> to vector<1x16x32xf32>
    %181 = vector.shape_cast %180 : vector<1x16x32xf32> to vector<16x32xf32>
    %182 = arith.addf %179, %181 : vector<16x32xf32>
    %cst_74 = arith.constant 5.000000e-01 : f32
    %183 = vector.broadcast %cst_74 : f32 to vector<16x32xf32>
    %184 = arith.mulf %182, %183 : vector<16x32xf32>
    %c0_75 = arith.constant 0 : index
    %c0_76 = arith.constant 0 : index
    %185 = vector.load %arg19[%c0_75, %c0_76] : memref<1x32xf32, #tpu.memory_space<vmem>>, vector<1x32xf32>
    %c0_77 = arith.constant 0 : index
    %c0_78 = arith.constant 0 : index
    %186 = vector.load %arg20[%c0_77, %c0_78] : memref<1x32xf32, #tpu.memory_space<vmem>>, vector<1x32xf32>
    %cst_79 = arith.constant dense<0.000000e+00> : vector<16xf32>
    %187 = vector.multi_reduction <add>, %184, %cst_79 [1] : vector<16x32xf32> to vector<16xf32>
    %188 = vector.shape_cast %187 : vector<16xf32> to vector<16x1xf32>
    %cst_80 = arith.constant 3.200000e+01 : f32
    %189 = vector.broadcast %cst_80 : f32 to vector<16x1xf32>
    %190 = arith.divf %188, %189 : vector<16x1xf32>
    %191 = vector.broadcast %190 : vector<16x1xf32> to vector<16x32xf32>
    %192 = arith.subf %184, %191 : vector<16x32xf32>
    %193 = arith.mulf %192, %192 : vector<16x32xf32>
    %cst_81 = arith.constant dense<0.000000e+00> : vector<16xf32>
    %194 = vector.multi_reduction <add>, %193, %cst_81 [1] : vector<16x32xf32> to vector<16xf32>
    %195 = vector.shape_cast %194 : vector<16xf32> to vector<16x1xf32>
    %cst_82 = arith.constant 3.200000e+01 : f32
    %196 = vector.broadcast %cst_82 : f32 to vector<16x1xf32>
    %197 = arith.divf %195, %196 : vector<16x1xf32>
    %198 = vector.broadcast %190 : vector<16x1xf32> to vector<16x32xf32>
    %199 = arith.subf %184, %198 : vector<16x32xf32>
    %cst_83 = arith.constant 9.99999974E-6 : f32
    %200 = vector.broadcast %cst_83 : f32 to vector<16x1xf32>
    %201 = arith.addf %197, %200 : vector<16x1xf32>
    %202 = math.rsqrt %201 : vector<16x1xf32>
    %203 = vector.broadcast %202 : vector<16x1xf32> to vector<16x32xf32>
    %204 = arith.mulf %199, %203 : vector<16x32xf32>
    %205 = vector.broadcast %185 : vector<1x32xf32> to vector<16x32xf32>
    %206 = arith.mulf %204, %205 : vector<16x32xf32>
    %207 = vector.broadcast %186 : vector<1x32xf32> to vector<16x32xf32>
    %208 = arith.addf %206, %207 : vector<16x32xf32>
    %c0_84 = arith.constant 0 : index
    %c0_85 = arith.constant 0 : index
    %209 = vector.load %arg21[%c0_84, %c0_85] : memref<32x768xf32, #tpu.memory_space<vmem>>, vector<32x768xf32>
    %cst_86 = arith.constant dense<0.000000e+00> : vector<16x768xf32>
    %210 = tpu.matmul %208, %209, %cst_86 {dimension_numbers = #tpu.dot_dimension_numbers<[1], [0], [0], [1], [0, 0, 1, 1], [], []>} : vector<16x32xf32>, vector<32x768xf32>, vector<16x768xf32> -> vector<16x768xf32>
    %c0_87 = arith.constant 0 : index
    %c0_88 = arith.constant 0 : index
    %211 = vector.load %arg22[%c0_87, %c0_88] : memref<1x768xf32, #tpu.memory_space<vmem>>, vector<1x768xf32>
    %212 = vector.broadcast %211 : vector<1x768xf32> to vector<16x768xf32>
    %213 = arith.addf %210, %212 : vector<16x768xf32>
    %c0_89 = arith.constant 0 : index
    %c0_90 = arith.constant 0 : index
    %214 = vector.load %arg27[%c0_89, %c0_90] : memref<16x768xf32, #tpu.memory_space<vmem>>, vector<16x768xf32>
    tpu.vector_store %arg27[%c0_89, %c0_90], %213 {strides = array<i32>} : memref<16x768xf32, #tpu.memory_space<vmem>>, vector<16x768xf32>,
    %c0_91 = arith.constant 0 : index
    %c0_92 = arith.constant 0 : index
    %215 = vector.load %arg3[%c0_91, %c0_92] : memref<8x4096xf32, #tpu.memory_space<vmem>>, vector<8x4096xf32>
    %c0_93 = arith.constant 0 : index
    %c0_94 = arith.constant 0 : index
    %216 = vector.load %arg4[%c0_93, %c0_94] : memref<4096x32xf32, #tpu.memory_space<vmem>>, vector<4096x32xf32>
    %cst_95 = arith.constant dense<0.000000e+00> : vector<8x32xf32>
    %217 = tpu.matmul %215, %216, %cst_95 {dimension_numbers = #tpu.dot_dimension_numbers<[1], [0], [0], [1], [0, 0, 1, 1], [], []>} : vector<8x4096xf32>, vector<4096x32xf32>, vector<8x32xf32> -> vector<8x32xf32>
    %c0_96 = arith.constant 0 : index
    %c0_97 = arith.constant 0 : index
    %218 = vector.load %arg5[%c0_96, %c0_97] : memref<1x32xf32, #tpu.memory_space<vmem>>, vector<1x32xf32>
    %219 = vector.broadcast %218 : vector<1x32xf32> to vector<8x32xf32>
    %220 = arith.addf %217, %219 : vector<8x32xf32>
    %c0_98 = arith.constant 0 : index
    %c0_99 = arith.constant 0 : index
    %221 = vector.load %arg6[%c0_98, %c0_99] : memref<1x32xf32, #tpu.memory_space<vmem>>, vector<1x32xf32>
    %c0_100 = arith.constant 0 : index
    %c0_101 = arith.constant 0 : index
    %222 = vector.load %arg7[%c0_100, %c0_101] : memref<1x32xf32, #tpu.memory_space<vmem>>, vector<1x32xf32>
    %cst_102 = arith.constant dense<0.000000e+00> : vector<8xf32>
    %223 = vector.multi_reduction <add>, %220, %cst_102 [1] : vector<8x32xf32> to vector<8xf32>
    %224 = vector.shape_cast %223 : vector<8xf32> to vector<8x1xf32>
    %cst_103 = arith.constant 3.200000e+01 : f32
    %225 = vector.broadcast %cst_103 : f32 to vector<8x1xf32>
    %226 = arith.divf %224, %225 : vector<8x1xf32>
    %227 = vector.broadcast %226 : vector<8x1xf32> to vector<8x32xf32>
    %228 = arith.subf %220, %227 : vector<8x32xf32>
    %229 = arith.mulf %228, %228 : vector<8x32xf32>
    %cst_104 = arith.constant dense<0.000000e+00> : vector<8xf32>
    %230 = vector.multi_reduction <add>, %229, %cst_104 [1] : vector<8x32xf32> to vector<8xf32>
    %231 = vector.shape_cast %230 : vector<8xf32> to vector<8x1xf32>
    %cst_105 = arith.constant 3.200000e+01 : f32
    %232 = vector.broadcast %cst_105 : f32 to vector<8x1xf32>
    %233 = arith.divf %231, %232 : vector<8x1xf32>
    %234 = vector.broadcast %226 : vector<8x1xf32> to vector<8x32xf32>
    %235 = arith.subf %220, %234 : vector<8x32xf32>
    %cst_106 = arith.constant 9.99999974E-6 : f32
    %236 = vector.broadcast %cst_106 : f32 to vector<8x1xf32>
    %237 = arith.addf %233, %236 : vector<8x1xf32>
    %238 = math.rsqrt %237 : vector<8x1xf32>
    %239 = vector.broadcast %238 : vector<8x1xf32> to vector<8x32xf32>
    %240 = arith.mulf %235, %239 : vector<8x32xf32>
    %241 = vector.broadcast %221 : vector<1x32xf32> to vector<8x32xf32>
    %242 = arith.mulf %240, %241 : vector<8x32xf32>
    %243 = vector.broadcast %222 : vector<1x32xf32> to vector<8x32xf32>
    %244 = arith.addf %242, %243 : vector<8x32xf32>
    %c0_107 = arith.constant 0 : index
    %c0_108 = arith.constant 0 : index
    %245 = vector.load %arg8[%c0_107, %c0_108] : memref<32x96xf32, #tpu.memory_space<vmem>>, vector<32x96xf32>
    %cst_109 = arith.constant dense<0.000000e+00> : vector<8x96xf32>
    %246 = tpu.matmul %244, %245, %cst_109 {dimension_numbers = #tpu.dot_dimension_numbers<[1], [0], [0], [1], [0, 0, 1, 1], [], []>} : vector<8x32xf32>, vector<32x96xf32>, vector<8x96xf32> -> vector<8x96xf32>
    %247 = vector.shape_cast %246 : vector<8x96xf32> to vector<2x4x96xf32>
    %248 = vector.extract_strided_slice %247 {offsets = [0, 0, 0], sizes = [2, 4, 8], strides = [1, 1, 1]} : vector<2x4x96xf32> to vector<2x4x8xf32>
    %249 = vector.extract_strided_slice %247 {offsets = [0, 0, 32], sizes = [2, 4, 8], strides = [1, 1, 1]} : vector<2x4x96xf32> to vector<2x4x8xf32>
    %250 = vector.extract_strided_slice %247 {offsets = [0, 0, 64], sizes = [2, 4, 8], strides = [1, 1, 1]} : vector<2x4x96xf32> to vector<2x4x8xf32>
    "tpu.trace_start"() <{level = 10 : i32, message = "bqd,bkd->bqk"}> : () -> ()
    %cst_110 = arith.constant dense<0.000000e+00> : vector<2x4x4xf32>
    %251 = tpu.matmul %248, %249, %cst_110 {dimension_numbers = #tpu.dot_dimension_numbers<[2], [2], [1], [1], [0, 0, 0, 1, 1, 1], [0], [0]>} : vector<2x4x8xf32>, vector<2x4x8xf32>, vector<2x4x4xf32> -> vector<2x4x4xf32>
    "tpu.trace_stop"() : () -> ()
    %cst_111 = arith.constant 0.353553385 : f32
    %252 = vector.broadcast %cst_111 : f32 to vector<2x4x4xf32>
    %253 = arith.mulf %251, %252 : vector<2x4x4xf32>
    %cst_112 = arith.constant dense<0xFF800000> : vector<2x4xf32>
    %254 = vector.multi_reduction <maximumf>, %253, %cst_112 [2] : vector<2x4x4xf32> to vector<2x4xf32>
    %255 = vector.shape_cast %254 : vector<2x4xf32> to vector<2x4x1xf32>
    %256 = vector.broadcast %255 : vector<2x4x1xf32> to vector<2x4x4xf32>
    %257 = arith.subf %253, %256 : vector<2x4x4xf32>
    %258 = math.exp %257 : vector<2x4x4xf32>
    %cst_113 = arith.constant dense<0.000000e+00> : vector<2x4xf32>
    %259 = vector.multi_reduction <add>, %258, %cst_113 [2] : vector<2x4x4xf32> to vector<2x4xf32>
    %260 = vector.shape_cast %259 : vector<2x4xf32> to vector<2x4x1xf32>
    %261 = vector.broadcast %260 : vector<2x4x1xf32> to vector<2x4x4xf32>
    %262 = arith.divf %258, %261 : vector<2x4x4xf32>
    "tpu.trace_start"() <{level = 10 : i32, message = "bqk,bkd->bqd"}> : () -> ()
    %cst_114 = arith.constant dense<0.000000e+00> : vector<2x4x8xf32>
    %263 = tpu.matmul %262, %250, %cst_114 {dimension_numbers = #tpu.dot_dimension_numbers<[2], [1], [1], [2], [0, 0, 0, 1, 1, 2], [0], [0]>} : vector<2x4x4xf32>, vector<2x4x8xf32>, vector<2x4x8xf32> -> vector<2x4x8xf32>
    "tpu.trace_stop"() : () -> ()
    %264 = vector.extract_strided_slice %247 {offsets = [0, 0, 8], sizes = [2, 4, 8], strides = [1, 1, 1]} : vector<2x4x96xf32> to vector<2x4x8xf32>
    %265 = vector.extract_strided_slice %247 {offsets = [0, 0, 40], sizes = [2, 4, 8], strides = [1, 1, 1]} : vector<2x4x96xf32> to vector<2x4x8xf32>
    %266 = vector.extract_strided_slice %247 {offsets = [0, 0, 72], sizes = [2, 4, 8], strides = [1, 1, 1]} : vector<2x4x96xf32> to vector<2x4x8xf32>
    "tpu.trace_start"() <{level = 10 : i32, message = "bqd,bkd->bqk"}> : () -> ()
    %cst_115 = arith.constant dense<0.000000e+00> : vector<2x4x4xf32>
    %267 = tpu.matmul %264, %265, %cst_115 {dimension_numbers = #tpu.dot_dimension_numbers<[2], [2], [1], [1], [0, 0, 0, 1, 1, 1], [0], [0]>} : vector<2x4x8xf32>, vector<2x4x8xf32>, vector<2x4x4xf32> -> vector<2x4x4xf32>
    "tpu.trace_stop"() : () -> ()
    %cst_116 = arith.constant 0.353553385 : f32
    %268 = vector.broadcast %cst_116 : f32 to vector<2x4x4xf32>
    %269 = arith.mulf %267, %268 : vector<2x4x4xf32>
    %cst_117 = arith.constant dense<0xFF800000> : vector<2x4xf32>
    %270 = vector.multi_reduction <maximumf>, %269, %cst_117 [2] : vector<2x4x4xf32> to vector<2x4xf32>
    %271 = vector.shape_cast %270 : vector<2x4xf32> to vector<2x4x1xf32>
    %272 = vector.broadcast %271 : vector<2x4x1xf32> to vector<2x4x4xf32>
    %273 = arith.subf %269, %272 : vector<2x4x4xf32>
    %274 = math.exp %273 : vector<2x4x4xf32>
    %cst_118 = arith.constant dense<0.000000e+00> : vector<2x4xf32>
    %275 = vector.multi_reduction <add>, %274, %cst_118 [2] : vector<2x4x4xf32> to vector<2x4xf32>
    %276 = vector.shape_cast %275 : vector<2x4xf32> to vector<2x4x1xf32>
    %277 = vector.broadcast %276 : vector<2x4x1xf32> to vector<2x4x4xf32>
    %278 = arith.divf %274, %277 : vector<2x4x4xf32>
    "tpu.trace_start"() <{level = 10 : i32, message = "bqk,bkd->bqd"}> : () -> ()
    %cst_119 = arith.constant dense<0.000000e+00> : vector<2x4x8xf32>
    %279 = tpu.matmul %278, %266, %cst_119 {dimension_numbers = #tpu.dot_dimension_numbers<[2], [1], [1], [2], [0, 0, 0, 1, 1, 2], [0], [0]>} : vector<2x4x4xf32>, vector<2x4x8xf32>, vector<2x4x8xf32> -> vector<2x4x8xf32>
    "tpu.trace_stop"() : () -> ()
    %280 = vector.extract_strided_slice %247 {offsets = [0, 0, 16], sizes = [2, 4, 8], strides = [1, 1, 1]} : vector<2x4x96xf32> to vector<2x4x8xf32>
    %281 = vector.extract_strided_slice %247 {offsets = [0, 0, 48], sizes = [2, 4, 8], strides = [1, 1, 1]} : vector<2x4x96xf32> to vector<2x4x8xf32>
    %282 = vector.extract_strided_slice %247 {offsets = [0, 0, 80], sizes = [2, 4, 8], strides = [1, 1, 1]} : vector<2x4x96xf32> to vector<2x4x8xf32>
    "tpu.trace_start"() <{level = 10 : i32, message = "bqd,bkd->bqk"}> : () -> ()
    %cst_120 = arith.constant dense<0.000000e+00> : vector<2x4x4xf32>
    %283 = tpu.matmul %280, %281, %cst_120 {dimension_numbers = #tpu.dot_dimension_numbers<[2], [2], [1], [1], [0, 0, 0, 1, 1, 1], [0], [0]>} : vector<2x4x8xf32>, vector<2x4x8xf32>, vector<2x4x4xf32> -> vector<2x4x4xf32>
    "tpu.trace_stop"() : () -> ()
    %cst_121 = arith.constant 0.353553385 : f32
    %284 = vector.broadcast %cst_121 : f32 to vector<2x4x4xf32>
    %285 = arith.mulf %283, %284 : vector<2x4x4xf32>
    %cst_122 = arith.constant dense<0xFF800000> : vector<2x4xf32>
    %286 = vector.multi_reduction <maximumf>, %285, %cst_122 [2] : vector<2x4x4xf32> to vector<2x4xf32>
    %287 = vector.shape_cast %286 : vector<2x4xf32> to vector<2x4x1xf32>
    %288 = vector.broadcast %287 : vector<2x4x1xf32> to vector<2x4x4xf32>
    %289 = arith.subf %285, %288 : vector<2x4x4xf32>
    %290 = math.exp %289 : vector<2x4x4xf32>
    %cst_123 = arith.constant dense<0.000000e+00> : vector<2x4xf32>
    %291 = vector.multi_reduction <add>, %290, %cst_123 [2] : vector<2x4x4xf32> to vector<2x4xf32>
    %292 = vector.shape_cast %291 : vector<2x4xf32> to vector<2x4x1xf32>
    %293 = vector.broadcast %292 : vector<2x4x1xf32> to vector<2x4x4xf32>
    %294 = arith.divf %290, %293 : vector<2x4x4xf32>
    "tpu.trace_start"() <{level = 10 : i32, message = "bqk,bkd->bqd"}> : () -> ()
    %cst_124 = arith.constant dense<0.000000e+00> : vector<2x4x8xf32>
    %295 = tpu.matmul %294, %282, %cst_124 {dimension_numbers = #tpu.dot_dimension_numbers<[2], [1], [1], [2], [0, 0, 0, 1, 1, 2], [0], [0]>} : vector<2x4x4xf32>, vector<2x4x8xf32>, vector<2x4x8xf32> -> vector<2x4x8xf32>
    "tpu.trace_stop"() : () -> ()
    %296 = vector.extract_strided_slice %247 {offsets = [0, 0, 24], sizes = [2, 4, 8], strides = [1, 1, 1]} : vector<2x4x96xf32> to vector<2x4x8xf32>
    %297 = vector.extract_strided_slice %247 {offsets = [0, 0, 56], sizes = [2, 4, 8], strides = [1, 1, 1]} : vector<2x4x96xf32> to vector<2x4x8xf32>
    %298 = vector.extract_strided_slice %247 {offsets = [0, 0, 88], sizes = [2, 4, 8], strides = [1, 1, 1]} : vector<2x4x96xf32> to vector<2x4x8xf32>
    "tpu.trace_start"() <{level = 10 : i32, message = "bqd,bkd->bqk"}> : () -> ()
    %cst_125 = arith.constant dense<0.000000e+00> : vector<2x4x4xf32>
    %299 = tpu.matmul %296, %297, %cst_125 {dimension_numbers = #tpu.dot_dimension_numbers<[2], [2], [1], [1], [0, 0, 0, 1, 1, 1], [0], [0]>} : vector<2x4x8xf32>, vector<2x4x8xf32>, vector<2x4x4xf32> -> vector<2x4x4xf32>
    "tpu.trace_stop"() : () -> ()
    %cst_126 = arith.constant 0.353553385 : f32
    %300 = vector.broadcast %cst_126 : f32 to vector<2x4x4xf32>
    %301 = arith.mulf %299, %300 : vector<2x4x4xf32>
    %cst_127 = arith.constant dense<0xFF800000> : vector<2x4xf32>
    %302 = vector.multi_reduction <maximumf>, %301, %cst_127 [2] : vector<2x4x4xf32> to vector<2x4xf32>
    %303 = vector.shape_cast %302 : vector<2x4xf32> to vector<2x4x1xf32>
    %304 = vector.broadcast %303 : vector<2x4x1xf32> to vector<2x4x4xf32>
    %305 = arith.subf %301, %304 : vector<2x4x4xf32>
    %306 = math.exp %305 : vector<2x4x4xf32>
    %cst_128 = arith.constant dense<0.000000e+00> : vector<2x4xf32>
    %307 = vector.multi_reduction <add>, %306, %cst_128 [2] : vector<2x4x4xf32> to vector<2x4xf32>
    %308 = vector.shape_cast %307 : vector<2x4xf32> to vector<2x4x1xf32>
    %309 = vector.broadcast %308 : vector<2x4x1xf32> to vector<2x4x4xf32>
    %310 = arith.divf %306, %309 : vector<2x4x4xf32>
    "tpu.trace_start"() <{level = 10 : i32, message = "bqk,bkd->bqd"}> : () -> ()
    %cst_129 = arith.constant dense<0.000000e+00> : vector<2x4x8xf32>
    %311 = tpu.matmul %310, %298, %cst_129 {dimension_numbers = #tpu.dot_dimension_numbers<[2], [1], [1], [2], [0, 0, 0, 1, 1, 2], [0], [0]>} : vector<2x4x4xf32>, vector<2x4x8xf32>, vector<2x4x8xf32> -> vector<2x4x8xf32>
    "tpu.trace_stop"() : () -> ()
    %312 = tpu.concatenate %263, %279, %295, %311 in 2 : vector<2x4x8xf32>, vector<2x4x8xf32>, vector<2x4x8xf32>, vector<2x4x8xf32> -> vector<2x4x32xf32>
    %313 = vector.shape_cast %312 : vector<2x4x32xf32> to vector<8x32xf32>
    %c0_130 = arith.constant 0 : index
    %c0_131 = arith.constant 0 : index
    %314 = vector.load %arg9[%c0_130, %c0_131] : memref<32x32xf32, #tpu.memory_space<vmem>>, vector<32x32xf32>
    %cst_132 = arith.constant dense<0.000000e+00> : vector<8x32xf32>
    %315 = tpu.matmul %313, %314, %cst_132 {dimension_numbers = #tpu.dot_dimension_numbers<[1], [0], [0], [1], [0, 0, 1, 1], [], []>} : vector<8x32xf32>, vector<32x32xf32>, vector<8x32xf32> -> vector<8x32xf32>
    %316 = arith.addf %220, %315 : vector<8x32xf32>
    %c0_133 = arith.constant 0 : index
    %c0_134 = arith.constant 0 : index
    %317 = vector.load %arg10[%c0_133, %c0_134] : memref<1x32xf32, #tpu.memory_space<vmem>>, vector<1x32xf32>
    %318 = vector.broadcast %317 : vector<1x32xf32> to vector<8x32xf32>
    %319 = arith.addf %316, %318 : vector<8x32xf32>
    %c0_135 = arith.constant 0 : index
    %c0_136 = arith.constant 0 : index
    %320 = vector.load %arg11[%c0_135, %c0_136] : memref<1x32xf32, #tpu.memory_space<vmem>>, vector<1x32xf32>
    %c0_137 = arith.constant 0 : index
    %c0_138 = arith.constant 0 : index
    %321 = vector.load %arg12[%c0_137, %c0_138] : memref<1x32xf32, #tpu.memory_space<vmem>>, vector<1x32xf32>
    %cst_139 = arith.constant dense<0.000000e+00> : vector<8xf32>
    %322 = vector.multi_reduction <add>, %319, %cst_139 [1] : vector<8x32xf32> to vector<8xf32>
    %323 = vector.shape_cast %322 : vector<8xf32> to vector<8x1xf32>
    %cst_140 = arith.constant 3.200000e+01 : f32
    %324 = vector.broadcast %cst_140 : f32 to vector<8x1xf32>
    %325 = arith.divf %323, %324 : vector<8x1xf32>
    %326 = vector.broadcast %325 : vector<8x1xf32> to vector<8x32xf32>
    %327 = arith.subf %319, %326 : vector<8x32xf32>
    %328 = arith.mulf %327, %327 : vector<8x32xf32>
    %cst_141 = arith.constant dense<0.000000e+00> : vector<8xf32>
    %329 = vector.multi_reduction <add>, %328, %cst_141 [1] : vector<8x32xf32> to vector<8xf32>
    %330 = vector.shape_cast %329 : vector<8xf32> to vector<8x1xf32>
    %cst_142 = arith.constant 3.200000e+01 : f32
    %331 = vector.broadcast %cst_142 : f32 to vector<8x1xf32>
    %332 = arith.divf %330, %331 : vector<8x1xf32>
    %333 = vector.broadcast %325 : vector<8x1xf32> to vector<8x32xf32>
    %334 = arith.subf %319, %333 : vector<8x32xf32>
    %cst_143 = arith.constant 9.99999974E-6 : f32
    %335 = vector.broadcast %cst_143 : f32 to vector<8x1xf32>
    %336 = arith.addf %332, %335 : vector<8x1xf32>
    %337 = math.rsqrt %336 : vector<8x1xf32>
    %338 = vector.broadcast %337 : vector<8x1xf32> to vector<8x32xf32>
    %339 = arith.mulf %334, %338 : vector<8x32xf32>
    %340 = vector.broadcast %320 : vector<1x32xf32> to vector<8x32xf32>
    %341 = arith.mulf %339, %340 : vector<8x32xf32>
    %342 = vector.broadcast %321 : vector<1x32xf32> to vector<8x32xf32>
    %343 = arith.addf %341, %342 : vector<8x32xf32>
    %c0_144 = arith.constant 0 : index
    %c0_145 = arith.constant 0 : index
    %344 = vector.load %arg13[%c0_144, %c0_145] : memref<32x64xf32, #tpu.memory_space<vmem>>, vector<32x64xf32>
    %cst_146 = arith.constant dense<0.000000e+00> : vector<8x64xf32>
    %345 = tpu.matmul %343, %344, %cst_146 {dimension_numbers = #tpu.dot_dimension_numbers<[1], [0], [0], [1], [0, 0, 1, 1], [], []>} : vector<8x32xf32>, vector<32x64xf32>, vector<8x64xf32> -> vector<8x64xf32>
    %c0_147 = arith.constant 0 : index
    %c0_148 = arith.constant 0 : index
    %346 = vector.load %arg14[%c0_147, %c0_148] : memref<1x64xf32, #tpu.memory_space<vmem>>, vector<1x64xf32>
    %347 = vector.broadcast %346 : vector<1x64xf32> to vector<8x64xf32>
    %348 = arith.addf %345, %347 : vector<8x64xf32>
    %cst_149 = arith.constant 5.000000e-01 : f32
    %349 = vector.broadcast %cst_149 : f32 to vector<8x64xf32>
    %350 = arith.mulf %349, %348 : vector<8x64xf32>
    %cst_150 = arith.constant 4.471500e-02 : f32
    %351 = vector.broadcast %cst_150 : f32 to vector<8x64xf32>
    %352 = arith.mulf %351, %348 : vector<8x64xf32>
    %353 = arith.mulf %352, %348 : vector<8x64xf32>
    %354 = arith.mulf %353, %348 : vector<8x64xf32>
    %355 = arith.addf %348, %354 : vector<8x64xf32>
    %cst_151 = arith.constant 0.797884583 : f32
    %356 = vector.broadcast %cst_151 : f32 to vector<8x64xf32>
    %357 = arith.mulf %356, %355 : vector<8x64xf32>
    %358 = math.tanh %357 : vector<8x64xf32>
    %cst_152 = arith.constant 1.000000e+00 : f32
    %359 = vector.broadcast %cst_152 : f32 to vector<8x64xf32>
    %360 = arith.addf %359, %358 : vector<8x64xf32>
    %361 = arith.mulf %350, %360 : vector<8x64xf32>
    %c0_153 = arith.constant 0 : index
    %c0_154 = arith.constant 0 : index
    %362 = vector.load %arg15[%c0_153, %c0_154] : memref<64x32xf32, #tpu.memory_space<vmem>>, vector<64x32xf32>
    %cst_155 = arith.constant dense<0.000000e+00> : vector<8x32xf32>
    %363 = tpu.matmul %361, %362, %cst_155 {dimension_numbers = #tpu.dot_dimension_numbers<[1], [0], [0], [1], [0, 0, 1, 1], [], []>} : vector<8x64xf32>, vector<64x32xf32>, vector<8x32xf32> -> vector<8x32xf32>
    %364 = arith.addf %319, %363 : vector<8x32xf32>
    %c0_156 = arith.constant 0 : index
    %c0_157 = arith.constant 0 : index
    %365 = vector.load %arg16[%c0_156, %c0_157] : memref<1x32xf32, #tpu.memory_space<vmem>>, vector<1x32xf32>
    %366 = vector.broadcast %365 : vector<1x32xf32> to vector<8x32xf32>
    %367 = arith.addf %364, %366 : vector<8x32xf32>
    %c0_158 = arith.constant 0 : index
    %c0_159 = arith.constant 0 : index
    %368 = vector.load %arg17[%c0_158, %c0_159] : memref<1x32xf32, #tpu.memory_space<vmem>>, vector<1x32xf32>
    %c0_160 = arith.constant 0 : index
    %c0_161 = arith.constant 0 : index
    %369 = vector.load %arg18[%c0_160, %c0_161] : memref<1x32xf32, #tpu.memory_space<vmem>>, vector<1x32xf32>
    %cst_162 = arith.constant dense<0.000000e+00> : vector<8xf32>
    %370 = vector.multi_reduction <add>, %367, %cst_162 [1] : vector<8x32xf32> to vector<8xf32>
    %371 = vector.shape_cast %370 : vector<8xf32> to vector<8x1xf32>
    %cst_163 = arith.constant 3.200000e+01 : f32
    %372 = vector.broadcast %cst_163 : f32 to vector<8x1xf32>
    %373 = arith.divf %371, %372 : vector<8x1xf32>
    %374 = vector.broadcast %373 : vector<8x1xf32> to vector<8x32xf32>
    %375 = arith.subf %367, %374 : vector<8x32xf32>
    %376 = arith.mulf %375, %375 : vector<8x32xf32>
    %cst_164 = arith.constant dense<0.000000e+00> : vector<8xf32>
    %377 = vector.multi_reduction <add>, %376, %cst_164 [1] : vector<8x32xf32> to vector<8xf32>
    %378 = vector.shape_cast %377 : vector<8xf32> to vector<8x1xf32>
    %cst_165 = arith.constant 3.200000e+01 : f32
    %379 = vector.broadcast %cst_165 : f32 to vector<8x1xf32>
    %380 = arith.divf %378, %379 : vector<8x1xf32>
    %381 = vector.broadcast %373 : vector<8x1xf32> to vector<8x32xf32>
    %382 = arith.subf %367, %381 : vector<8x32xf32>
    %cst_166 = arith.constant 9.99999974E-6 : f32
    %383 = vector.broadcast %cst_166 : f32 to vector<8x1xf32>
    %384 = arith.addf %380, %383 : vector<8x1xf32>
    %385 = math.rsqrt %384 : vector<8x1xf32>
    %386 = vector.broadcast %385 : vector<8x1xf32> to vector<8x32xf32>
    %387 = arith.mulf %382, %386 : vector<8x32xf32>
    %388 = vector.broadcast %368 : vector<1x32xf32> to vector<8x32xf32>
    %389 = arith.mulf %387, %388 : vector<8x32xf32>
    %390 = vector.broadcast %369 : vector<1x32xf32> to vector<8x32xf32>
    %391 = arith.addf %389, %390 : vector<8x32xf32>
    %392 = vector.shape_cast %391 : vector<8x32xf32> to vector<2x4x32xf32>
    %393 = vector.extract_strided_slice %392 {offsets = [0, 0, 0], sizes = [1, 4, 32], strides = [1, 1, 1]} : vector<2x4x32xf32> to vector<1x4x32xf32>
    %394 = vector.shape_cast %393 : vector<1x4x32xf32> to vector<4x32xf32>
    %395 = vector.extract_strided_slice %392 {offsets = [1, 0, 0], sizes = [1, 4, 32], strides = [1, 1, 1]} : vector<2x4x32xf32> to vector<1x4x32xf32>
    %396 = vector.shape_cast %395 : vector<1x4x32xf32> to vector<4x32xf32>
    %397 = arith.addf %394, %396 : vector<4x32xf32>
    %cst_167 = arith.constant 5.000000e-01 : f32
    %398 = vector.broadcast %cst_167 : f32 to vector<4x32xf32>
    %399 = arith.mulf %397, %398 : vector<4x32xf32>
    %c0_168 = arith.constant 0 : index
    %c0_169 = arith.constant 0 : index
    %400 = vector.load %arg23[%c0_168, %c0_169] : memref<1x32xf32, #tpu.memory_space<vmem>>, vector<1x32xf32>
    %c0_170 = arith.constant 0 : index
    %c0_171 = arith.constant 0 : index
    %401 = vector.load %arg24[%c0_170, %c0_171] : memref<1x32xf32, #tpu.memory_space<vmem>>, vector<1x32xf32>
    %cst_172 = arith.constant dense<0.000000e+00> : vector<4xf32>
    %402 = vector.multi_reduction <add>, %399, %cst_172 [1] : vector<4x32xf32> to vector<4xf32>
    %403 = vector.shape_cast %402 : vector<4xf32> to vector<4x1xf32>
    %cst_173 = arith.constant 3.200000e+01 : f32
    %404 = vector.broadcast %cst_173 : f32 to vector<4x1xf32>
    %405 = arith.divf %403, %404 : vector<4x1xf32>
    %406 = vector.broadcast %405 : vector<4x1xf32> to vector<4x32xf32>
    %407 = arith.subf %399, %406 : vector<4x32xf32>
    %408 = arith.mulf %407, %407 : vector<4x32xf32>
    %cst_174 = arith.constant dense<0.000000e+00> : vector<4xf32>
    %409 = vector.multi_reduction <add>, %408, %cst_174 [1] : vector<4x32xf32> to vector<4xf32>
    %410 = vector.shape_cast %409 : vector<4xf32> to vector<4x1xf32>
    %cst_175 = arith.constant 3.200000e+01 : f32
    %411 = vector.broadcast %cst_175 : f32 to vector<4x1xf32>
    %412 = arith.divf %410, %411 : vector<4x1xf32>
    %413 = vector.broadcast %405 : vector<4x1xf32> to vector<4x32xf32>
    %414 = arith.subf %399, %413 : vector<4x32xf32>
    %cst_176 = arith.constant 9.99999974E-6 : f32
    %415 = vector.broadcast %cst_176 : f32 to vector<4x1xf32>
    %416 = arith.addf %412, %415 : vector<4x1xf32>
    %417 = math.rsqrt %416 : vector<4x1xf32>
    %418 = vector.broadcast %417 : vector<4x1xf32> to vector<4x32xf32>
    %419 = arith.mulf %414, %418 : vector<4x32xf32>
    %420 = vector.broadcast %400 : vector<1x32xf32> to vector<4x32xf32>
    %421 = arith.mulf %419, %420 : vector<4x32xf32>
    %422 = vector.broadcast %401 : vector<1x32xf32> to vector<4x32xf32>
    %423 = arith.addf %421, %422 : vector<4x32xf32>
    %c0_177 = arith.constant 0 : index
    %c0_178 = arith.constant 0 : index
    %424 = vector.load %arg25[%c0_177, %c0_178] : memref<32x3072xf32, #tpu.memory_space<vmem>>, vector<32x3072xf32>
    %cst_179 = arith.constant dense<0.000000e+00> : vector<4x3072xf32>
    %425 = tpu.matmul %423, %424, %cst_179 {dimension_numbers = #tpu.dot_dimension_numbers<[1], [0], [0], [1], [0, 0, 1, 1], [], []>} : vector<4x32xf32>, vector<32x3072xf32>, vector<4x3072xf32> -> vector<4x3072xf32>
    %c0_180 = arith.constant 0 : index
    %c0_181 = arith.constant 0 : index
    %426 = vector.load %arg26[%c0_180, %c0_181] : memref<1x3072xf32, #tpu.memory_space<vmem>>, vector<1x3072xf32>
    %427 = vector.broadcast %426 : vector<1x3072xf32> to vector<4x3072xf32>
    %428 = arith.addf %425, %427 : vector<4x3072xf32>
    %c0_182 = arith.constant 0 : index
    %c0_183 = arith.constant 0 : index
    %429 = vector.load %arg28[%c0_182, %c0_183] : memref<4x3072xf32, #tpu.memory_space<vmem>>, vector<4x3072xf32>
    tpu.vector_store %arg28[%c0_182, %c0_183], %428 {strides = array<i32>} : memref<4x3072xf32, #tpu.memory_space<vmem>>, vector<4x3072xf32>,
    return
  }
}

module attributes {stable_mosaic.version = 11 : i64} {
  func.func @_mean_resize_kernel(%arg0: memref<2x3x64x64xf32, #tpu.memory_space<vmem>>, %arg1: memref<50x64xf32, #tpu.memory_space<vmem>>, %arg2: memref<64x65xf32, #tpu.memory_space<vmem>>, %arg3: memref<3x50x65xf32, #tpu.memory_space<vmem>>) attributes {dimension_semantics = [], scalar_prefetch = 0 : i64, scratch_operands = 0 : i64, tpu.core_type = #tpu.core_type<tc>} {
    %c0 = arith.constant 0 : index
    %c0_0 = arith.constant 0 : index
    %c0_1 = arith.constant 0 : index
    %c0_2 = arith.constant 0 : index
    %0 = vector.load %arg0[%c0, %c0_0, %c0_1, %c0_2] : memref<2x3x64x64xf32, #tpu.memory_space<vmem>>, vector<2x3x64x64xf32>
    %c0_3 = arith.constant 0 : index
    %c0_4 = arith.constant 0 : index
    %1 = vector.load %arg1[%c0_3, %c0_4] : memref<50x64xf32, #tpu.memory_space<vmem>>, vector<50x64xf32>
    %c0_5 = arith.constant 0 : index
    %c0_6 = arith.constant 0 : index
    %2 = vector.load %arg2[%c0_5, %c0_6] : memref<64x65xf32, #tpu.memory_space<vmem>>, vector<64x65xf32>
    %3 = vector.extract_strided_slice %0 {offsets = [0, 0, 0, 0], sizes = [1, 3, 64, 64], strides = [1, 1, 1, 1]} : vector<2x3x64x64xf32> to vector<1x3x64x64xf32>
    %4 = vector.shape_cast %3 : vector<1x3x64x64xf32> to vector<3x64x64xf32>
    %5 = vector.extract_strided_slice %0 {offsets = [1, 0, 0, 0], sizes = [1, 3, 64, 64], strides = [1, 1, 1, 1]} : vector<2x3x64x64xf32> to vector<1x3x64x64xf32>
    %6 = vector.shape_cast %5 : vector<1x3x64x64xf32> to vector<3x64x64xf32>
    %7 = arith.addf %4, %6 : vector<3x64x64xf32>
    %cst = arith.constant 5.000000e-01 : f32
    %8 = vector.broadcast %cst : f32 to vector<3x64x64xf32>
    %9 = arith.mulf %7, %8 : vector<3x64x64xf32>
    %10 = vector.extract_strided_slice %9 {offsets = [0, 0, 0], sizes = [1, 64, 64], strides = [1, 1, 1]} : vector<3x64x64xf32> to vector<1x64x64xf32>
    %11 = vector.shape_cast %10 : vector<1x64x64xf32> to vector<64x64xf32>
    %cst_7 = arith.constant dense<0.000000e+00> : vector<50x64xf32>
    %12 = tpu.matmul %1, %11, %cst_7 {dimension_numbers = #tpu.dot_dimension_numbers<[1], [0], [0], [1], [0, 0, 1, 1], [], []>} : vector<50x64xf32>, vector<64x64xf32>, vector<50x64xf32> -> vector<50x64xf32>
    %cst_8 = arith.constant dense<0.000000e+00> : vector<50x65xf32>
    %13 = tpu.matmul %12, %2, %cst_8 {dimension_numbers = #tpu.dot_dimension_numbers<[1], [0], [0], [1], [0, 0, 1, 1], [], []>} : vector<50x64xf32>, vector<64x65xf32>, vector<50x65xf32> -> vector<50x65xf32>
    %c0_9 = arith.constant 0 : index
    %c0_10 = arith.constant 0 : index
    %c0_11 = arith.constant 0 : index
    %14 = vector.load %arg3[%c0_9, %c0_10, %c0_11] : memref<3x50x65xf32, #tpu.memory_space<vmem>>, vector<1x50x65xf32>
    %15 = vector.shape_cast %14 : vector<1x50x65xf32> to vector<50x65xf32>
    %16 = vector.shape_cast %13 : vector<50x65xf32> to vector<1x50x65xf32>
    tpu.vector_store %arg3[%c0_9, %c0_10, %c0_11], %16 {strides = array<i32>} : memref<3x50x65xf32, #tpu.memory_space<vmem>>, vector<1x50x65xf32>,
    %17 = vector.extract_strided_slice %9 {offsets = [1, 0, 0], sizes = [1, 64, 64], strides = [1, 1, 1]} : vector<3x64x64xf32> to vector<1x64x64xf32>
    %18 = vector.shape_cast %17 : vector<1x64x64xf32> to vector<64x64xf32>
    %cst_12 = arith.constant dense<0.000000e+00> : vector<50x64xf32>
    %19 = tpu.matmul %1, %18, %cst_12 {dimension_numbers = #tpu.dot_dimension_numbers<[1], [0], [0], [1], [0, 0, 1, 1], [], []>} : vector<50x64xf32>, vector<64x64xf32>, vector<50x64xf32> -> vector<50x64xf32>
    %cst_13 = arith.constant dense<0.000000e+00> : vector<50x65xf32>
    %20 = tpu.matmul %19, %2, %cst_13 {dimension_numbers = #tpu.dot_dimension_numbers<[1], [0], [0], [1], [0, 0, 1, 1], [], []>} : vector<50x64xf32>, vector<64x65xf32>, vector<50x65xf32> -> vector<50x65xf32>
    %c1 = arith.constant 1 : index
    %c0_14 = arith.constant 0 : index
    %c0_15 = arith.constant 0 : index
    %21 = vector.load %arg3[%c1, %c0_14, %c0_15] : memref<3x50x65xf32, #tpu.memory_space<vmem>>, vector<1x50x65xf32>
    %22 = vector.shape_cast %21 : vector<1x50x65xf32> to vector<50x65xf32>
    %23 = vector.shape_cast %20 : vector<50x65xf32> to vector<1x50x65xf32>
    tpu.vector_store %arg3[%c1, %c0_14, %c0_15], %23 {strides = array<i32>} : memref<3x50x65xf32, #tpu.memory_space<vmem>>, vector<1x50x65xf32>,
    %24 = vector.extract_strided_slice %9 {offsets = [2, 0, 0], sizes = [1, 64, 64], strides = [1, 1, 1]} : vector<3x64x64xf32> to vector<1x64x64xf32>
    %25 = vector.shape_cast %24 : vector<1x64x64xf32> to vector<64x64xf32>
    %cst_16 = arith.constant dense<0.000000e+00> : vector<50x64xf32>
    %26 = tpu.matmul %1, %25, %cst_16 {dimension_numbers = #tpu.dot_dimension_numbers<[1], [0], [0], [1], [0, 0, 1, 1], [], []>} : vector<50x64xf32>, vector<64x64xf32>, vector<50x64xf32> -> vector<50x64xf32>
    %cst_17 = arith.constant dense<0.000000e+00> : vector<50x65xf32>
    %27 = tpu.matmul %26, %2, %cst_17 {dimension_numbers = #tpu.dot_dimension_numbers<[1], [0], [0], [1], [0, 0, 1, 1], [], []>} : vector<50x64xf32>, vector<64x65xf32>, vector<50x65xf32> -> vector<50x65xf32>
    %c2 = arith.constant 2 : index
    %c0_18 = arith.constant 0 : index
    %c0_19 = arith.constant 0 : index
    %28 = vector.load %arg3[%c2, %c0_18, %c0_19] : memref<3x50x65xf32, #tpu.memory_space<vmem>>, vector<1x50x65xf32>
    %29 = vector.shape_cast %28 : vector<1x50x65xf32> to vector<50x65xf32>
    %30 = vector.shape_cast %27 : vector<50x65xf32> to vector<1x50x65xf32>
    tpu.vector_store %arg3[%c2, %c0_18, %c0_19], %30 {strides = array<i32>} : memref<3x50x65xf32, #tpu.memory_space<vmem>>, vector<1x50x65xf32>,
    return
  }
}

</mosaic_0001>

<bundles_post_ra>
// kernel: multi_svit_forward.3
= control target key start
LH: loop header
LB: loop body
LE: loop exit
PB: predicated region body
PF: predicated region fallthrough
CT: control target
= control target key end

     0   :  { %8 = vsyncpa [#allocation3], 0  ;;  %s3361_s0 = inlined_call_operand.hbm [shape: f32[8,16,16], index: 0, kind: input, shape index: {}]   ;;  %s3362_s1 = inlined_call_operand.hbm [shape: f32[64,16], index: 1, kind: input, shape index: {}]   ;;  %s3363_s2 = inlined_call_operand.hbm [shape: f32[16,64], index: 2, kind: input, shape index: {}]   ;;  %s3364_s3 = inlined_call_operand.vmem [shape: f32[8,64,64], index: 3, kind: output, shape index: {}]  }
   0x1   :  { %9 = vsyncpa [#allocation5], 0  ;;  %s2802_s12 = smov [#allocation4]   ;;  %s2803_s14 = smov [#allocation2]  }
   0x2   :  { %s27_s13 = sshll.u32 %s2802_s12, 4  ;;  %s15_s15 = sshll.u32 %s2803_s14, 4  ;;  %s28_s13 = int_to_ptr.vmem [resolvable:$true] %s27_s13  ;;  %s2827_s15 = int_to_ptr.vmem [resolvable:$true] %s15_s15 }
   0x3   :  { %s2732_s18 = scalar_lea.hbm %s3362_s1, 1024 }
   0x4   :  { %p2733_p0 = scmp.ne.s32.totalorder %s3362_s1, %s2732_s18  ;;  %p2736_p1 = scmp.lt.u32.totalorder %s2732_s18, %s3362_s1 }
   0x6   :  { %p2738_p2 = pnand %p2736_p1, %p2733_p0 }
   0x8   :  { %2741 = shalt.err (!%p2738_p2)
}
   0x9   :  { %s2742_s23 = scalar_lea.vmem %s28_s13, 1024  ;;  %p2747_p4 = scmp.lt.s32.totalorder %s28_s13, %s28_s13 }
   0xa   :  { %p2743_p3 = scmp.ne.s32.totalorder %s28_s13, %s2742_s23  ;;  %p2748_p5 = scmp.lt.s32.totalorder %s2742_s23, %s2742_s23 }
   0xc   :  { %p2749_p6 = por %p2748_p5, %p2747_p4 }
   0xe   :  { %p2750_p7 = pnand %p2749_p6, %p2743_p3 }
  0x10   :  { %2753 = shalt.err (!%p2750_p7)
}
  0x11   :  { %s2804_s24 = smov 128   ;;  %s2805_s25 = smov 8  }
  0x12   :  { %33 = dma.hbm_to_vmem [thread:$0]  %s3362_s1, 1024, %s28_s13, [#allocation5], %s2804_s24, %s2804_s24, %s2805_s25  }
  0x13   :  { %s2754_s30 = scalar_lea.hbm %s3361_s0, 2048 }
  0x14   :  { %p2755_p8 = scmp.ne.s32.totalorder %s3361_s0, %s2754_s30  ;;  %p2758_p9 = scmp.lt.u32.totalorder %s2754_s30, %s3361_s0 }
  0x16   :  { %p2760_p10 = pnand %p2758_p9, %p2755_p8 }
  0x18   :  { %2763 = shalt.err (!%p2760_p10)
}
  0x19   :  { %s2764_s8 = scalar_lea.vmem %s2827_s15, 2048  ;;  %p2769_p12 = scmp.lt.s32.totalorder %s2827_s15, %s2827_s15 }
  0x1a   :  { %p2765_p11 = scmp.ne.s32.totalorder %s2827_s15, %s2764_s8  ;;  %p2770_p13 = scmp.lt.s32.totalorder %s2764_s8, %s2764_s8 }
  0x1c   :  { %p2771_p0 = por %p2770_p13, %p2769_p12 }
  0x1e   :  { %p2772_p1 = pnand %p2771_p0, %p2765_p11 }
  0x20   :  { %2775 = shalt.err (!%p2772_p1)
}
  0x21   :  { %21 = dma.hbm_to_vmem [thread:$0]  %s3361_s0, 2048, %s2827_s15, [#allocation3], %s2804_s24, %s2804_s24, %s2805_s25  }
  0x22   :  { %s2806_s10 = smov [#allocation6]   ;;  %s2776_s14 = scalar_lea.hbm %s3363_s2, 256 }
  0x23   :  { %s39_s11 = sshll.u32 %s2806_s10, 4  ;;  %p2777_p2 = scmp.ne.s32.totalorder %s3363_s2, %s2776_s14  ;;  %s40_s11 = int_to_ptr.vmem [resolvable:$true] %s39_s11 }
  0x24   :  { %p2780_p3 = scmp.lt.u32.totalorder %s2776_s14, %s3363_s2 }
  0x26   :  { %p2782_p4 = pnand %p2780_p3, %p2777_p2 }
  0x28   :  { %2785 = shalt.err (!%p2782_p4)
}
  0x29   :  { %s2786_s20 = scalar_lea.vmem %s40_s11, 256  ;;  %p2791_p6 = scmp.lt.s32.totalorder %s40_s11, %s40_s11 }
  0x2a   :  { %p2787_p5 = scmp.ne.s32.totalorder %s40_s11, %s2786_s20  ;;  %p2792_p7 = scmp.lt.s32.totalorder %s2786_s20, %s2786_s20 }
  0x2c   :  { %p2793_p8 = por %p2792_p7, %p2791_p6 }
  0x2e   :  { %p2794_p9 = pnand %p2793_p8, %p2787_p5 }
  0x30   :  { %2797 = shalt.err (!%p2794_p9)
}
  0x31   :  { %45 = dma.hbm_to_vmem [thread:$0]  %s3363_s2, 256, %s40_s11, [#allocation5], %s2804_s24, %s2804_s24, %s2805_s25  }
  0x32   :  { %2798 = dma.done.wait [#allocation3], 2048  }
  0x33   :  { %2799 = vsyncadd [#allocation3], 4294965248 }
  0x34   :  { %2800 = dma.done.wait [#allocation5], 1280  }
  0x35   :  { %2801 = vsyncadd [#allocation5], 4294966016  ;;  %vm67_vm0 = vcmask 130048   ;;  %v65_v0 = vld [vmem:[#allocation2] sm:$0xff]  ;;  %v66_v1 = vld [vmem:[#allocation2 + $0x8] sm:$0xff]  ;;  %vm326_vm1 = vcmask 523264  }
  0x36   :  { %v2879_v2 = vld [vmem:[#allocation4] sm:$0xff]  ;;  %v2663_v3 = vpack.c.bf16 %v66_v1, %v65_v0  ;;  %v336_v4 = vld [vmem:[#allocation2 + $0x10] sm:$0xff]  ;;  %v337_v5 = vld [vmem:[#allocation2 + $0x18] sm:$0xff] }
  0x37   :  { %2411 = vmatprep.mubr.msk.f32.mxu0 %vm67_vm0, %v2879_v2  ;;  %v2671_v6 = vpack.c.bf16 %v337_v5, %v336_v4  ;;  %v2883_v7 = vld [vmem:[#allocation4 + $0x8] sm:$0xff]  ;;  %v582_v8 = vld [vmem:[#allocation2 + $0x20] sm:$0xff]  ;;  %v2885_v10 = vld [vmem:[#allocation4 + $0x10] sm:$0xff] }
  0x38   :  { %2664 = vmatprep.subr.bf16.mxu0 %v2663_v3  ;;  %v583_v9 = vld [vmem:[#allocation2 + $0x28] sm:$0xff]  ;;  %v2891_v12 = vld [vmem:[#allocation4 + $0x18] sm:$0xff]  ;;  %v63_v13 = vld [vmem:[#allocation6] sm:$0xff] }
  0x39   :  { %2666 = vmatpush3.bf16.msra.mxu0 %v2663_v3  ;;  %v2679_v11 = vpack.c.bf16 %v583_v9, %v582_v8  ;;  %v64_v14 = vld [vmem:[#allocation6 + $0x8] sm:$0xff]  ;;  %v2893_v15 = vld [vmem:[#allocation4 + $0x20] sm:$0xff]  ;;  %v2905_v18 = vld [vmem:[#allocation4 + $0x30] sm:$0xff] }
  0x3a   :  { %2672 = vmatprep.subr.bf16.mxu0 %v2671_v6  ;;  %v2895_v16 = vpack.c.bf16 %v64_v14, %v63_v13  ;;  %v2902_v17 = vld [vmem:[#allocation4 + $0x28] sm:$0xff]  ;;  %v2912_v19 = vld [vmem:[#allocation4 + $0x38] sm:$0xff]  ;;  %v828_v20 = vld [vmem:[#allocation2 + $0x30] sm:$0xff] }
  0x3b   :  { %v829_v21 = vld [vmem:[#allocation2 + $0x38] sm:$0xff]  ;;  %v1074_v23 = vld [vmem:[#allocation2 + $0x40] sm:$0xff]  ;;  %v1075_v24 = vld [vmem:[#allocation2 + $0x48] sm:$0xff] }
  0x3c   :  { %2412 = vmatmul.mubr.msk.f32.vlgmr.msra.gmra.mrb[0].mxu0 %vm67_vm0, %v2883_v7  ;;  %2668 = vmatprep.subr.bf16.mxu1 %v2895_v16  ;;  %v2687_v22 = vpack.c.bf16 %v829_v21, %v828_v20  ;;  %v2695_v25 = vpack.c.bf16 %v1075_v24, %v1074_v23  ;;  %v1320_v26 = vld [vmem:[#allocation2 + $0x50] sm:$0xff]  ;;  %v1321_v27 = vld [vmem:[#allocation2 + $0x58] sm:$0xff]  ;;  %v1566_v29 = vld [vmem:[#allocation2 + $0x60] sm:$0xff] }
  0x3d   :  { %2674 = vmatpush3.bf16.msra.mxu0 %v2671_v6  ;;  %2414 = vmatprep.mubr.msk.f32.mxu0 %vm67_vm0, %v2885_v10  ;;  %v2703_v28 = vpack.c.bf16 %v1321_v27, %v1320_v26  ;;  %v1567_v30 = vld [vmem:[#allocation2 + $0x68] sm:$0xff]  ;;  %v1812_v32 = vld [vmem:[#allocation2 + $0x70] sm:$0xff]  ;;  %v1813_v33 = vld [vmem:[#allocation2 + $0x78] sm:$0xff] }
  0x3e   :  { %2680 = vmatprep.subr.bf16.mxu0 %v2679_v11  ;;  %2670 = vmatpush3.bf16.msra.mxu1 %v2895_v16  ;;  %v2711_v31 = vpack.c.bf16 %v1567_v30, %v1566_v29  ;;  %v2719_v34 = vpack.c.bf16 %v1813_v33, %v1812_v32 }
  0x3f   :  { %2676 = vmatprep.subr.bf16.mxu1 %v2895_v16 }
  0x40   :  { %2415 = vmatmul.mubr.msk.f32.gmra.mrb[2].mxu0 %vm67_vm0, %v2891_v12 }
  0x41   :  { %2417 = vmatprep.mubr.msk.f32.mxu0 %vm67_vm0, %v2893_v15 }
  0x44   :  { %2418 = vmatmul.mubr.msk.f32.gmra.mrb[4].mxu0 %vm67_vm0, %v2902_v17 }
  0x45   :  { %2420 = vmatprep.mubr.msk.f32.mxu0 %vm67_vm0, %v2905_v18 }
  0x48   :  { %2421 = vmatmul.mubr.msk.f32.gmra.mrb[6].mxu0 %vm67_vm0, %v2912_v19 }
  0x49   :  { %2443 = vmatprep.mubr.msk.f32.mxu0 %vm67_vm0, %v2879_v2 }
  0x4c   :  { %2444 = vmatmul.mubr.msk.f32.vlgmr.msra.gmra.mrb[8].mxu0 %vm67_vm0, %v2883_v7 }
  0x4d   :  { %2682 = vmatpush3.bf16.msra.mxu0 %v2679_v11  ;;  %2446 = vmatprep.mubr.msk.f32.mxu0 %vm67_vm0, %v2885_v10 }
  0x4e   :  { %2688 = vmatprep.subr.bf16.mxu0 %v2687_v22 }
  0x50   :  { %2447 = vmatmul.mubr.msk.f32.gmra.mrb[10].mxu0 %vm67_vm0, %v2891_v12 }
  0x51   :  { %2449 = vmatprep.mubr.msk.f32.mxu0 %vm67_vm0, %v2893_v15 }
  0x54   :  { %2450 = vmatmul.mubr.msk.f32.gmra.mrb[12].mxu0 %vm67_vm0, %v2902_v17 }
  0x55   :  { %2452 = vmatprep.mubr.msk.f32.mxu0 %vm67_vm0, %v2905_v18 }
  0x58   :  { %2453 = vmatmul.mubr.msk.f32.gmra.mrb[14].mxu0 %vm67_vm0, %v2912_v19 }
  0x59   :  { %2475 = vmatprep.mubr.msk.f32.mxu0 %vm67_vm0, %v2879_v2 }
  0x5c   :  { %2476 = vmatmul.mubr.msk.f32.vlgmr.msra.gmra.mrb[16].mxu0 %vm67_vm0, %v2883_v7 }
  0x5d   :  { %2690 = vmatpush3.bf16.msra.mxu0 %v2687_v22  ;;  %2478 = vmatprep.mubr.msk.f32.mxu0 %vm67_vm0, %v2885_v10 }
  0x5e   :  { %2696 = vmatprep.subr.bf16.mxu0 %v2695_v25 }
  0x60   :  { %2479 = vmatmul.mubr.msk.f32.gmra.mrb[18].mxu0 %vm67_vm0, %v2891_v12 }
  0x61   :  { %2481 = vmatprep.mubr.msk.f32.mxu0 %vm67_vm0, %v2893_v15 }
  0x64   :  { %2482 = vmatmul.mubr.msk.f32.gmra.mrb[20].mxu0 %vm67_vm0, %v2902_v17 }
  0x65   :  { %2484 = vmatprep.mubr.msk.f32.mxu0 %vm67_vm0, %v2905_v18 }
  0x68   :  { %2485 = vmatmul.mubr.msk.f32.gmra.mrb[22].mxu0 %vm67_vm0, %v2912_v19 }
  0x69   :  { %2507 = vmatprep.mubr.msk.f32.mxu0 %vm67_vm0, %v2879_v2 }
  0x6c   :  { %2508 = vmatmul.mubr.msk.f32.vlgmr.msra.gmra.mrb[24].mxu0 %vm67_vm0, %v2883_v7 }
  0x6d   :  { %2698 = vmatpush3.bf16.msra.mxu0 %v2695_v25  ;;  %2510 = vmatprep.mubr.msk.f32.mxu0 %vm67_vm0, %v2885_v10 }
  0x6e   :  { %2704 = vmatprep.subr.bf16.mxu0 %v2703_v28 }
  0x70   :  { %2511 = vmatmul.mubr.msk.f32.gmra.mrb[26].mxu0 %vm67_vm0, %v2891_v12 }
  0x71   :  { %2513 = vmatprep.mubr.msk.f32.mxu0 %vm67_vm0, %v2893_v15 }
  0x74   :  { %2514 = vmatmul.mubr.msk.f32.gmra.mrb[28].mxu0 %vm67_vm0, %v2902_v17 }
  0x75   :  { %2516 = vmatprep.mubr.msk.f32.mxu0 %vm67_vm0, %v2905_v18 }
  0x78   :  { %2517 = vmatmul.mubr.msk.f32.gmra.mrb[30].mxu0 %vm67_vm0, %v2912_v19 }
  0x79   :  { %2539 = vmatprep.mubr.msk.f32.mxu0 %vm67_vm0, %v2879_v2 }
  0x7c   :  { %2540 = vmatmul.mubr.msk.f32.vlgmr.msra.gmra.mrb[32].mxu0 %vm67_vm0, %v2883_v7 }
  0x7d   :  { %2706 = vmatpush3.bf16.msra.mxu0 %v2703_v28  ;;  %2542 = vmatprep.mubr.msk.f32.mxu0 %vm67_vm0, %v2885_v10 }
  0x7e   :  { %2712 = vmatprep.subr.bf16.mxu0 %v2711_v31 }
  0x80   :  { %2543 = vmatmul.mubr.msk.f32.gmra.mrb[34].mxu0 %vm67_vm0, %v2891_v12 }
  0x81   :  { %2545 = vmatprep.mubr.msk.f32.mxu0 %vm67_vm0, %v2893_v15 }
  0x84   :  { %2546 = vmatmul.mubr.msk.f32.gmra.mrb[36].mxu0 %vm67_vm0, %v2902_v17 }
  0x85   :  { %2548 = vmatprep.mubr.msk.f32.mxu0 %vm67_vm0, %v2905_v18 }
  0x88   :  { %2549 = vmatmul.mubr.msk.f32.gmra.mrb[38].mxu0 %vm67_vm0, %v2912_v19 }
  0x89   :  { %2571 = vmatprep.mubr.msk.f32.mxu0 %vm67_vm0, %v2879_v2 }
  0x8c   :  { %2572 = vmatmul.mubr.msk.f32.vlgmr.msra.gmra.mrb[40].mxu0 %vm67_vm0, %v2883_v7 }
  0x8d   :  { %2714 = vmatpush3.bf16.msra.mxu0 %v2711_v31  ;;  %2574 = vmatprep.mubr.msk.f32.mxu0 %vm67_vm0, %v2885_v10 }
  0x8e   :  { %2720 = vmatprep.subr.bf16.mxu0 %v2719_v34 }
  0x90   :  { %2575 = vmatmul.mubr.msk.f32.gmra.mrb[42].mxu0 %vm67_vm0, %v2891_v12 }
  0x91   :  { %2577 = vmatprep.mubr.msk.f32.mxu0 %vm67_vm0, %v2893_v15 }
  0x94   :  { %2578 = vmatmul.mubr.msk.f32.gmra.mrb[44].mxu0 %vm67_vm0, %v2902_v17 }
  0x95   :  { %2580 = vmatprep.mubr.msk.f32.mxu0 %vm67_vm0, %v2905_v18 }
  0x98   :  { %2581 = vmatmul.mubr.msk.f32.gmra.mrb[46].mxu0 %vm67_vm0, %v2912_v19 }
  0x99   :  { %2603 = vmatprep.mubr.msk.f32.mxu0 %vm67_vm0, %v2879_v2 }
  0x9c   :  { %2604 = vmatmul.mubr.msk.f32.vlgmr.msra.gmra.mrb[48].mxu0 %vm67_vm0, %v2883_v7 }
  0x9d   :  { %2722 = vmatpush3.bf16.msra.mxu0 %v2719_v34  ;;  %2606 = vmatprep.mubr.msk.f32.mxu0 %vm67_vm0, %v2885_v10 }
  0xa0   :  { %2607 = vmatmul.mubr.msk.f32.gmra.mrb[50].mxu0 %vm67_vm0, %v2891_v12 }
  0xa1   :  { %2609 = vmatprep.mubr.msk.f32.mxu0 %vm67_vm0, %v2893_v15 }
  0xa4   :  { %2610 = vmatmul.mubr.msk.f32.gmra.mrb[52].mxu0 %vm67_vm0, %v2902_v17 }
  0xa5   :  { %2612 = vmatprep.mubr.msk.f32.mxu0 %vm67_vm0, %v2905_v18 }
  0xa8   :  { %2613 = vmatmul.mubr.msk.f32.gmra.mrb[54].mxu0 %vm67_vm0, %v2912_v19 }
  0xa9   :  { %2635 = vmatprep.mubr.msk.f32.mxu0 %vm67_vm0, %v2879_v2 }
  0xac   :  { %2636 = vmatmul.mubr.msk.f32.vlgmr.msra.gmra.mrb[56].mxu0 %vm67_vm0, %v2883_v7 }
  0xad   :  { %2638 = vmatprep.mubr.msk.f32.mxu0 %vm67_vm0, %v2885_v10 }
  0xb0   :  { %2639 = vmatmul.mubr.msk.f32.gmra.mrb[58].mxu0 %vm67_vm0, %v2891_v12 }
  0xb1   :  { %2641 = vmatprep.mubr.msk.f32.mxu0 %vm67_vm0, %v2893_v15 }
  0xb4   :  { %2642 = vmatmul.mubr.msk.f32.gmra.mrb[60].mxu0 %vm67_vm0, %v2902_v17 }
  0xb5   :  { %2644 = vmatprep.mubr.msk.f32.mxu0 %vm67_vm0, %v2905_v18 }
  0xb8   :  { %2645 = vmatmul.mubr.msk.f32.gmra.mrb[62].mxu0 %vm67_vm0, %v2912_v19 }
 0x10f   :  { %v2413_v35 = vpop.f32.mrb[0].mxu0 }
 0x110   :  { %v158_v36 = vpop.f32.mrb[1].mxu0 }
 0x111   :  { %2427 = vmatprep.mubr.msk.f32.mxu1 %vm67_vm0, %v158_v36 }
 0x112   :  { %2428 = vmatmul.mubr.msk.f32.vlgmr.msra.gmra.mrb[0].mxu1 %vm67_vm0, %v2413_v35 }
 0x113   :  { %v2416_v37 = vpop.f32.mrb[2].mxu0  ;;  %2678 = vmatpush3.bf16.msra.mxu1 %v2895_v16 }
 0x114   :  { %v168_v38 = vpop.f32.mrb[3].mxu0  ;;  %2684 = vmatprep.subr.bf16.mxu1 %v2895_v16 }
 0x115   :  { %2430 = vmatprep.mubr.msk.f32.mxu1 %vm67_vm0, %v168_v38 }
 0x116   :  { %2431 = vmatmul.mubr.msk.f32.gmra.mrb[2].mxu1 %vm67_vm0, %v2416_v37 }
 0x117   :  { %v2419_v39 = vpop.f32.mrb[4].mxu0 }
 0x118   :  { %v178_v40 = vpop.f32.mrb[5].mxu0 }
 0x119   :  { %2433 = vmatprep.mubr.msk.f32.mxu1 %vm67_vm0, %v178_v40 }
 0x11a   :  { %2434 = vmatmul.mubr.msk.f32.gmra.mrb[4].mxu1 %vm67_vm0, %v2419_v39 }
 0x11b   :  { %v2422_v41 = vpop.f32.mrb[6].mxu0 }
 0x11c   :  { %v188_v42 = vpop.f32.mrb[7].mxu0 }
 0x11d   :  { %2436 = vmatprep.mubr.msk.f32.mxu1 %vm67_vm0, %v188_v42 }
 0x11e   :  { %2437 = vmatmul.mubr.msk.f32.gmra.mrb[6].mxu1 %vm67_vm0, %v2422_v41 }
 0x11f   :  { %v2445_v43 = vpop.f32.mrb[8].mxu0 }
 0x120   :  { %v404_v44 = vpop.f32.mrb[9].mxu0 }
 0x121   :  { %2459 = vmatprep.mubr.msk.f32.mxu1 %vm67_vm0, %v404_v44 }
 0x122   :  { %2460 = vmatmul.mubr.msk.f32.vlgmr.msra.gmra.mrb[8].mxu1 %vm67_vm0, %v2445_v43 }
 0x123   :  { %v2448_v45 = vpop.f32.mrb[10].mxu0  ;;  %2686 = vmatpush3.bf16.msra.mxu1 %v2895_v16 }
 0x124   :  { %v414_v46 = vpop.f32.mrb[11].mxu0  ;;  %2692 = vmatprep.subr.bf16.mxu1 %v2895_v16 }
 0x125   :  { %2462 = vmatprep.mubr.msk.f32.mxu1 %vm67_vm0, %v414_v46 }
 0x126   :  { %2463 = vmatmul.mubr.msk.f32.gmra.mrb[10].mxu1 %vm67_vm0, %v2448_v45 }
 0x127   :  { %v2451_v47 = vpop.f32.mrb[12].mxu0 }
 0x128   :  { %v424_v48 = vpop.f32.mrb[13].mxu0 }
 0x129   :  { %2465 = vmatprep.mubr.msk.f32.mxu1 %vm67_vm0, %v424_v48 }
 0x12a   :  { %2466 = vmatmul.mubr.msk.f32.gmra.mrb[12].mxu1 %vm67_vm0, %v2451_v47 }
 0x12b   :  { %v2454_v49 = vpop.f32.mrb[14].mxu0 }
 0x12c   :  { %v434_v50 = vpop.f32.mrb[15].mxu0 }
 0x12d   :  { %2468 = vmatprep.mubr.msk.f32.mxu1 %vm67_vm0, %v434_v50 }
 0x12e   :  { %2469 = vmatmul.mubr.msk.f32.gmra.mrb[14].mxu1 %vm67_vm0, %v2454_v49 }
 0x12f   :  { %v2477_v51 = vpop.f32.mrb[16].mxu0 }
 0x130   :  { %v650_v52 = vpop.f32.mrb[17].mxu0 }
 0x131   :  { %2491 = vmatprep.mubr.msk.f32.mxu1 %vm67_vm0, %v650_v52 }
 0x132   :  { %2492 = vmatmul.mubr.msk.f32.vlgmr.msra.gmra.mrb[16].mxu1 %vm67_vm0, %v2477_v51 }
 0x133   :  { %v2480_v53 = vpop.f32.mrb[18].mxu0  ;;  %2694 = vmatpush3.bf16.msra.mxu1 %v2895_v16 }
 0x134   :  { %v660_v54 = vpop.f32.mrb[19].mxu0  ;;  %2700 = vmatprep.subr.bf16.mxu1 %v2895_v16 }
 0x135   :  { %2494 = vmatprep.mubr.msk.f32.mxu1 %vm67_vm0, %v660_v54 }
 0x136   :  { %2495 = vmatmul.mubr.msk.f32.gmra.mrb[18].mxu1 %vm67_vm0, %v2480_v53 }
 0x137   :  { %v2483_v55 = vpop.f32.mrb[20].mxu0 }
 0x138   :  { %v670_v56 = vpop.f32.mrb[21].mxu0 }
 0x139   :  { %2497 = vmatprep.mubr.msk.f32.mxu1 %vm67_vm0, %v670_v56 }
 0x13a   :  { %2498 = vmatmul.mubr.msk.f32.gmra.mrb[20].mxu1 %vm67_vm0, %v2483_v55 }
 0x13b   :  { %v2486_v57 = vpop.f32.mrb[22].mxu0 }
 0x13c   :  { %v680_v58 = vpop.f32.mrb[23].mxu0 }
 0x13d   :  { %2500 = vmatprep.mubr.msk.f32.mxu1 %vm67_vm0, %v680_v58 }
 0x13e   :  { %2501 = vmatmul.mubr.msk.f32.gmra.mrb[22].mxu1 %vm67_vm0, %v2486_v57 }
 0x13f   :  { %v2509_v59 = vpop.f32.mrb[24].mxu0 }
 0x140   :  { %v896_v60 = vpop.f32.mrb[25].mxu0 }
 0x141   :  { %2523 = vmatprep.mubr.msk.f32.mxu1 %vm67_vm0, %v896_v60 }
 0x142   :  { %2524 = vmatmul.mubr.msk.f32.vlgmr.msra.gmra.mrb[24].mxu1 %vm67_vm0, %v2509_v59 }
 0x143   :  { %v2512_v61 = vpop.f32.mrb[26].mxu0  ;;  %2702 = vmatpush3.bf16.msra.mxu1 %v2895_v16 }
 0x144   :  { %v906_v62 = vpop.f32.mrb[27].mxu0  ;;  %2708 = vmatprep.subr.bf16.mxu1 %v2895_v16 }
 0x145   :  { %2526 = vmatprep.mubr.msk.f32.mxu1 %vm67_vm0, %v906_v62 }
 0x146   :  { %2527 = vmatmul.mubr.msk.f32.gmra.mrb[26].mxu1 %vm67_vm0, %v2512_v61 }
 0x147   :  { %v2515_v63 = vpop.f32.mrb[28].mxu0 }
 0x148   :  { %v916_v0 = vpop.f32.mrb[29].mxu0 }
 0x149   :  { %2529 = vmatprep.mubr.msk.f32.mxu1 %vm67_vm0, %v916_v0 }
 0x14a   :  { %2530 = vmatmul.mubr.msk.f32.gmra.mrb[28].mxu1 %vm67_vm0, %v2515_v63 }
 0x14b   :  { %v2518_v1 = vpop.f32.mrb[30].mxu0 }
 0x14c   :  { %v926_v2 = vpop.f32.mrb[31].mxu0 }
 0x14d   :  { %2532 = vmatprep.mubr.msk.f32.mxu1 %vm67_vm0, %v926_v2 }
 0x14e   :  { %2533 = vmatmul.mubr.msk.f32.gmra.mrb[30].mxu1 %vm67_vm0, %v2518_v1 }
 0x14f   :  { %v2541_v3 = vpop.f32.mrb[32].mxu0 }
 0x150   :  { %v1142_v4 = vpop.f32.mrb[33].mxu0 }
 0x151   :  { %2555 = vmatprep.mubr.msk.f32.mxu1 %vm67_vm0, %v1142_v4 }
 0x152   :  { %2556 = vmatmul.mubr.msk.f32.vlgmr.msra.gmra.mrb[32].mxu1 %vm67_vm0, %v2541_v3 }
 0x153   :  { %v2544_v5 = vpop.f32.mrb[34].mxu0  ;;  %2710 = vmatpush3.bf16.msra.mxu1 %v2895_v16 }
 0x154   :  { %v1152_v6 = vpop.f32.mrb[35].mxu0  ;;  %2716 = vmatprep.subr.bf16.mxu1 %v2895_v16 }
 0x155   :  { %2558 = vmatprep.mubr.msk.f32.mxu1 %vm67_vm0, %v1152_v6 }
 0x156   :  { %2559 = vmatmul.mubr.msk.f32.gmra.mrb[34].mxu1 %vm67_vm0, %v2544_v5 }
 0x157   :  { %v2547_v7 = vpop.f32.mrb[36].mxu0 }
 0x158   :  { %v1162_v8 = vpop.f32.mrb[37].mxu0 }
 0x159   :  { %2561 = vmatprep.mubr.msk.f32.mxu1 %vm67_vm0, %v1162_v8 }
 0x15a   :  { %2562 = vmatmul.mubr.msk.f32.gmra.mrb[36].mxu1 %vm67_vm0, %v2547_v7 }
 0x15b   :  { %v2550_v9 = vpop.f32.mrb[38].mxu0 }
 0x15c   :  { %v1172_v10 = vpop.f32.mrb[39].mxu0 }
 0x15d   :  { %2564 = vmatprep.mubr.msk.f32.mxu1 %vm67_vm0, %v1172_v10 }
 0x15e   :  { %2565 = vmatmul.mubr.msk.f32.gmra.mrb[38].mxu1 %vm67_vm0, %v2550_v9 }
 0x15f   :  { %v2573_v11 = vpop.f32.mrb[40].mxu0 }
 0x160   :  { %v1388_v12 = vpop.f32.mrb[41].mxu0 }
 0x161   :  { %2587 = vmatprep.mubr.msk.f32.mxu1 %vm67_vm0, %v1388_v12 }
 0x162   :  { %2588 = vmatmul.mubr.msk.f32.vlgmr.msra.gmra.mrb[40].mxu1 %vm67_vm0, %v2573_v11 }
 0x163   :  { %v2576_v13 = vpop.f32.mrb[42].mxu0  ;;  %2718 = vmatpush3.bf16.msra.mxu1 %v2895_v16 }
 0x164   :  { %v1398_v14 = vpop.f32.mrb[43].mxu0  ;;  %2724 = vmatprep.subr.bf16.mxu1 %v2895_v16 }
 0x165   :  { %2590 = vmatprep.mubr.msk.f32.mxu1 %vm67_vm0, %v1398_v14 }
 0x166   :  { %2591 = vmatmul.mubr.msk.f32.gmra.mrb[42].mxu1 %vm67_vm0, %v2576_v13 }
 0x167   :  { %v2579_v15 = vpop.f32.mrb[44].mxu0 }
 0x168   :  { %v1408_v17 = vpop.f32.mrb[45].mxu0 }
 0x169   :  { %2593 = vmatprep.mubr.msk.f32.mxu1 %vm67_vm0, %v1408_v17 }
 0x16a   :  { %2594 = vmatmul.mubr.msk.f32.gmra.mrb[44].mxu1 %vm67_vm0, %v2579_v15 }
 0x16b   :  { %v2582_v18 = vpop.f32.mrb[46].mxu0 }
 0x16c   :  { %v1418_v19 = vpop.f32.mrb[47].mxu0 }
 0x16d   :  { %2596 = vmatprep.mubr.msk.f32.mxu1 %vm67_vm0, %v1418_v19 }
 0x16e   :  { %2597 = vmatmul.mubr.msk.f32.gmra.mrb[46].mxu1 %vm67_vm0, %v2582_v18 }
 0x16f   :  { %v2605_v20 = vpop.f32.mrb[48].mxu0 }
 0x170   :  { %v1634_v21 = vpop.f32.mrb[49].mxu0 }
 0x171   :  { %2619 = vmatprep.mubr.msk.f32.mxu1 %vm67_vm0, %v1634_v21 }
 0x172   :  { %2620 = vmatmul.mubr.msk.f32.vlgmr.msra.gmra.mrb[48].mxu1 %vm67_vm0, %v2605_v20 }
 0x173   :  { %v2608_v22 = vpop.f32.mrb[50].mxu0  ;;  %2726 = vmatpush3.bf16.msra.mxu1 %v2895_v16 }
 0x174   :  { %v1644_v23 = vpop.f32.mrb[51].mxu0 }
 0x175   :  { %2622 = vmatprep.mubr.msk.f32.mxu1 %vm67_vm0, %v1644_v23 }
 0x176   :  { %2623 = vmatmul.mubr.msk.f32.gmra.mrb[50].mxu1 %vm67_vm0, %v2608_v22 }
 0x177   :  { %v2611_v24 = vpop.f32.mrb[52].mxu0 }
 0x178   :  { %v1654_v25 = vpop.f32.mrb[53].mxu0 }
 0x179   :  { %2625 = vmatprep.mubr.msk.f32.mxu1 %vm67_vm0, %v1654_v25 }
 0x17a   :  { %2626 = vmatmul.mubr.msk.f32.gmra.mrb[52].mxu1 %vm67_vm0, %v2611_v24 }
 0x17b   :  { %v2614_v26 = vpop.f32.mrb[54].mxu0 }
 0x17c   :  { %v1664_v27 = vpop.f32.mrb[55].mxu0 }
 0x17d   :  { %2628 = vmatprep.mubr.msk.f32.mxu1 %vm67_vm0, %v1664_v27 }
 0x17e   :  { %2629 = vmatmul.mubr.msk.f32.gmra.mrb[54].mxu1 %vm67_vm0, %v2614_v26 }
 0x17f   :  { %v2637_v28 = vpop.f32.mrb[56].mxu0 }
 0x180   :  { %v1880_v29 = vpop.f32.mrb[57].mxu0 }
 0x181   :  { %2651 = vmatprep.mubr.msk.f32.mxu1 %vm67_vm0, %v1880_v29 }
 0x182   :  { %2652 = vmatmul.mubr.msk.f32.vlgmr.msra.gmra.mrb[56].mxu1 %vm67_vm0, %v2637_v28 }
 0x183   :  { %v2640_v16 = vpop.f32.mrb[58].mxu0 }
 0x184   :  { %v1890_v30 = vpop.f32.mrb[59].mxu0 }
 0x185   :  { %2654 = vmatprep.mubr.msk.f32.mxu1 %vm67_vm0, %v1890_v30 }
 0x186   :  { %2655 = vmatmul.mubr.msk.f32.gmra.mrb[58].mxu1 %vm67_vm0, %v2640_v16 }
 0x187   :  { %v2643_v31 = vpop.f32.mrb[60].mxu0 }
 0x188   :  { %v1900_v32 = vpop.f32.mrb[61].mxu0 }
 0x189   :  { %2657 = vmatprep.mubr.msk.f32.mxu1 %vm67_vm0, %v1900_v32 }
 0x18a   :  { %2658 = vmatmul.mubr.msk.f32.gmra.mrb[60].mxu1 %vm67_vm0, %v2643_v31 }
 0x18b   :  { %v2646_v33 = vpop.f32.mrb[62].mxu0 }
 0x18c   :  { %v1910_v34 = vpop.f32.mrb[63].mxu0 }
 0x18d   :  { %2660 = vmatprep.mubr.msk.f32.mxu1 %vm67_vm0, %v1910_v34 }
 0x18e   :  { %2661 = vmatmul.mubr.msk.f32.gmra.mrb[62].mxu1 %vm67_vm0, %v2646_v33 }
 0x1e5   :  { %v2429_v35 = vpop.f32.mrb[0].mxu1 }
 0x1e6   :  { %328 = vst.msk [vmem:[%s3364_s3 + $0x8] sm:$0xff] %vm326_vm1, %v2429_v35  ;;  %v287_v36 = vpop.f32.mrb[1].mxu1 }
 0x1e7   :  { %327 = vst.msk [vmem:[%s3364_s3] sm:$0xff] %vm326_vm1, %v287_v36 }
 0x1e9   :  { %v2432_v37 = vpop.f32.mrb[2].mxu1 }
 0x1ea   :  { %330 = vst.msk [vmem:[%s3364_s3 + $0x18] sm:$0xff] %vm326_vm1, %v2432_v37  ;;  %v297_v38 = vpop.f32.mrb[3].mxu1 }
 0x1eb   :  { %329 = vst.msk [vmem:[%s3364_s3 + $0x10] sm:$0xff] %vm326_vm1, %v297_v38 }
 0x1ed   :  { %v2435_v39 = vpop.f32.mrb[4].mxu1 }
 0x1ee   :  { %332 = vst.msk [vmem:[%s3364_s3 + $0x28] sm:$0xff] %vm326_vm1, %v2435_v39  ;;  %v307_v40 = vpop.f32.mrb[5].mxu1 }
 0x1ef   :  { %331 = vst.msk [vmem:[%s3364_s3 + $0x20] sm:$0xff] %vm326_vm1, %v307_v40 }
 0x1f1   :  { %v2438_v41 = vpop.f32.mrb[6].mxu1 }
 0x1f2   :  { %334 = vst.msk [vmem:[%s3364_s3 + $0x38] sm:$0xff] %vm326_vm1, %v2438_v41  ;;  %v317_v42 = vpop.f32.mrb[7].mxu1 }
 0x1f3   :  { %333 = vst.msk [vmem:[%s3364_s3 + $0x30] sm:$0xff] %vm326_vm1, %v317_v42 }
 0x1f5   :  { %v2461_v43 = vpop.f32.mrb[8].mxu1 }
 0x1f6   :  { %2096 = vst.msk [vmem:[%s3364_s3 + $0x48] sm:$0xff] %vm326_vm1, %v2461_v43  ;;  %v533_v44 = vpop.f32.mrb[9].mxu1 }
 0x1f7   :  { %2095 = vst.msk [vmem:[%s3364_s3 + $0x40] sm:$0xff] %vm326_vm1, %v533_v44 }
 0x1f9   :  { %v2464_v45 = vpop.f32.mrb[10].mxu1 }
 0x1fa   :  { %2098 = vst.msk [vmem:[%s3364_s3 + $0x58] sm:$0xff] %vm326_vm1, %v2464_v45  ;;  %v543_v46 = vpop.f32.mrb[11].mxu1 }
 0x1fb   :  { %2097 = vst.msk [vmem:[%s3364_s3 + $0x50] sm:$0xff] %vm326_vm1, %v543_v46 }
 0x1fd   :  { %v2467_v47 = vpop.f32.mrb[12].mxu1 }
 0x1fe   :  { %2100 = vst.msk [vmem:[%s3364_s3 + $0x68] sm:$0xff] %vm326_vm1, %v2467_v47  ;;  %v553_v48 = vpop.f32.mrb[13].mxu1 }
 0x1ff   :  { %2099 = vst.msk [vmem:[%s3364_s3 + $0x60] sm:$0xff] %vm326_vm1, %v553_v48 }
 0x201   :  { %v2470_v49 = vpop.f32.mrb[14].mxu1 }
 0x202   :  { %2102 = vst.msk [vmem:[%s3364_s3 + $0x78] sm:$0xff] %vm326_vm1, %v2470_v49  ;;  %v563_v50 = vpop.f32.mrb[15].mxu1 }
 0x203   :  { %2101 = vst.msk [vmem:[%s3364_s3 + $0x70] sm:$0xff] %vm326_vm1, %v563_v50 }
 0x205   :  { %v2493_v51 = vpop.f32.mrb[16].mxu1 }
 0x206   :  { %2120 = vst.msk [vmem:[%s3364_s3 + $0x88] sm:$0xff] %vm326_vm1, %v2493_v51  ;;  %v779_v52 = vpop.f32.mrb[17].mxu1 }
 0x207   :  { %2119 = vst.msk [vmem:[%s3364_s3 + $0x80] sm:$0xff] %vm326_vm1, %v779_v52 }
 0x209   :  { %v2496_v53 = vpop.f32.mrb[18].mxu1 }
 0x20a   :  { %2122 = vst.msk [vmem:[%s3364_s3 + $0x98] sm:$0xff] %vm326_vm1, %v2496_v53  ;;  %v789_v54 = vpop.f32.mrb[19].mxu1 }
 0x20b   :  { %2121 = vst.msk [vmem:[%s3364_s3 + $0x90] sm:$0xff] %vm326_vm1, %v789_v54 }
 0x20d   :  { %v2499_v55 = vpop.f32.mrb[20].mxu1 }
 0x20e   :  { %2124 = vst.msk [vmem:[%s3364_s3 + $0xa8] sm:$0xff] %vm326_vm1, %v2499_v55  ;;  %v799_v56 = vpop.f32.mrb[21].mxu1 }
 0x20f   :  { %2123 = vst.msk [vmem:[%s3364_s3 + $0xa0] sm:$0xff] %vm326_vm1, %v799_v56 }
 0x211   :  { %v2502_v57 = vpop.f32.mrb[22].mxu1 }
 0x212   :  { %2126 = vst.msk [vmem:[%s3364_s3 + $0xb8] sm:$0xff] %vm326_vm1, %v2502_v57  ;;  %v809_v58 = vpop.f32.mrb[23].mxu1 }
 0x213   :  { %2125 = vst.msk [vmem:[%s3364_s3 + $0xb0] sm:$0xff] %vm326_vm1, %v809_v58 }
 0x215   :  { %v2525_v59 = vpop.f32.mrb[24].mxu1 }
 0x216   :  { %2144 = vst.msk [vmem:[%s3364_s3 + $0xc8] sm:$0xff] %vm326_vm1, %v2525_v59  ;;  %v1025_v60 = vpop.f32.mrb[25].mxu1 }
 0x217   :  { %2143 = vst.msk [vmem:[%s3364_s3 + $0xc0] sm:$0xff] %vm326_vm1, %v1025_v60 }
 0x219   :  { %v2528_v61 = vpop.f32.mrb[26].mxu1 }
 0x21a   :  { %2146 = vst.msk [vmem:[%s3364_s3 + $0xd8] sm:$0xff] %vm326_vm1, %v2528_v61  ;;  %v1035_v62 = vpop.f32.mrb[27].mxu1 }
 0x21b   :  { %2145 = vst.msk [vmem:[%s3364_s3 + $0xd0] sm:$0xff] %vm326_vm1, %v1035_v62 }
 0x21d   :  { %v2531_v63 = vpop.f32.mrb[28].mxu1 }
 0x21e   :  { %2148 = vst.msk [vmem:[%s3364_s3 + $0xe8] sm:$0xff] %vm326_vm1, %v2531_v63  ;;  %v1045_v0 = vpop.f32.mrb[29].mxu1 }
 0x21f   :  { %2147 = vst.msk [vmem:[%s3364_s3 + $0xe0] sm:$0xff] %vm326_vm1, %v1045_v0 }
 0x221   :  { %v2534_v1 = vpop.f32.mrb[30].mxu1 }
 0x222   :  { %2150 = vst.msk [vmem:[%s3364_s3 + $0xf8] sm:$0xff] %vm326_vm1, %v2534_v1  ;;  %v1055_v2 = vpop.f32.mrb[31].mxu1 }
 0x223   :  { %2149 = vst.msk [vmem:[%s3364_s3 + $0xf0] sm:$0xff] %vm326_vm1, %v1055_v2 }
 0x225   :  { %v2557_v3 = vpop.f32.mrb[32].mxu1 }
 0x226   :  { %2168 = vst.msk [vmem:[%s3364_s3 + $0x108] sm:$0xff] %vm326_vm1, %v2557_v3  ;;  %v1271_v4 = vpop.f32.mrb[33].mxu1 }
 0x227   :  { %2167 = vst.msk [vmem:[%s3364_s3 + $0x100] sm:$0xff] %vm326_vm1, %v1271_v4 }
 0x229   :  { %v2560_v5 = vpop.f32.mrb[34].mxu1 }
 0x22a   :  { %2170 = vst.msk [vmem:[%s3364_s3 + $0x118] sm:$0xff] %vm326_vm1, %v2560_v5  ;;  %v1281_v6 = vpop.f32.mrb[35].mxu1 }
 0x22b   :  { %2169 = vst.msk [vmem:[%s3364_s3 + $0x110] sm:$0xff] %vm326_vm1, %v1281_v6 }
 0x22d   :  { %v2563_v7 = vpop.f32.mrb[36].mxu1 }
 0x22e   :  { %2172 = vst.msk [vmem:[%s3364_s3 + $0x128] sm:$0xff] %vm326_vm1, %v2563_v7  ;;  %v1291_v8 = vpop.f32.mrb[37].mxu1 }
 0x22f   :  { %2171 = vst.msk [vmem:[%s3364_s3 + $0x120] sm:$0xff] %vm326_vm1, %v1291_v8 }
 0x231   :  { %v2566_v9 = vpop.f32.mrb[38].mxu1 }
 0x232   :  { %2174 = vst.msk [vmem:[%s3364_s3 + $0x138] sm:$0xff] %vm326_vm1, %v2566_v9  ;;  %v1301_v10 = vpop.f32.mrb[39].mxu1 }
 0x233   :  { %2173 = vst.msk [vmem:[%s3364_s3 + $0x130] sm:$0xff] %vm326_vm1, %v1301_v10 }
 0x235   :  { %v2589_v11 = vpop.f32.mrb[40].mxu1 }
 0x236   :  { %2192 = vst.msk [vmem:[%s3364_s3 + $0x148] sm:$0xff] %vm326_vm1, %v2589_v11  ;;  %v1517_v12 = vpop.f32.mrb[41].mxu1 }
 0x237   :  { %2191 = vst.msk [vmem:[%s3364_s3 + $0x140] sm:$0xff] %vm326_vm1, %v1517_v12 }
 0x239   :  { %v2592_v13 = vpop.f32.mrb[42].mxu1 }
 0x23a   :  { %2194 = vst.msk [vmem:[%s3364_s3 + $0x158] sm:$0xff] %vm326_vm1, %v2592_v13  ;;  %v1527_v14 = vpop.f32.mrb[43].mxu1 }
 0x23b   :  { %2193 = vst.msk [vmem:[%s3364_s3 + $0x150] sm:$0xff] %vm326_vm1, %v1527_v14 }
 0x23d   :  { %v2595_v15 = vpop.f32.mrb[44].mxu1 }
 0x23e   :  { %2196 = vst.msk [vmem:[%s3364_s3 + $0x168] sm:$0xff] %vm326_vm1, %v2595_v15  ;;  %v1537_v17 = vpop.f32.mrb[45].mxu1 }
 0x23f   :  { %2195 = vst.msk [vmem:[%s3364_s3 + $0x160] sm:$0xff] %vm326_vm1, %v1537_v17 }
 0x241   :  { %v2598_v18 = vpop.f32.mrb[46].mxu1 }
 0x242   :  { %2198 = vst.msk [vmem:[%s3364_s3 + $0x178] sm:$0xff] %vm326_vm1, %v2598_v18  ;;  %v1547_v19 = vpop.f32.mrb[47].mxu1 }
 0x243   :  { %2197 = vst.msk [vmem:[%s3364_s3 + $0x170] sm:$0xff] %vm326_vm1, %v1547_v19 }
 0x245   :  { %v2621_v20 = vpop.f32.mrb[48].mxu1 }
 0x246   :  { %2216 = vst.msk [vmem:[%s3364_s3 + $0x188] sm:$0xff] %vm326_vm1, %v2621_v20  ;;  %v1763_v21 = vpop.f32.mrb[49].mxu1 }
 0x247   :  { %2215 = vst.msk [vmem:[%s3364_s3 + $0x180] sm:$0xff] %vm326_vm1, %v1763_v21 }
 0x249   :  { %v2624_v22 = vpop.f32.mrb[50].mxu1 }
 0x24a   :  { %2218 = vst.msk [vmem:[%s3364_s3 + $0x198] sm:$0xff] %vm326_vm1, %v2624_v22  ;;  %v1773_v23 = vpop.f32.mrb[51].mxu1 }
 0x24b   :  { %2217 = vst.msk [vmem:[%s3364_s3 + $0x190] sm:$0xff] %vm326_vm1, %v1773_v23 }
 0x24d   :  { %v2627_v24 = vpop.f32.mrb[52].mxu1 }
 0x24e   :  { %2220 = vst.msk [vmem:[%s3364_s3 + $0x1a8] sm:$0xff] %vm326_vm1, %v2627_v24  ;;  %v1783_v25 = vpop.f32.mrb[53].mxu1 }
 0x24f   :  { %2219 = vst.msk [vmem:[%s3364_s3 + $0x1a0] sm:$0xff] %vm326_vm1, %v1783_v25 }
 0x251   :  { %v2630_v26 = vpop.f32.mrb[54].mxu1 }
 0x252   :  { %2222 = vst.msk [vmem:[%s3364_s3 + $0x1b8] sm:$0xff] %vm326_vm1, %v2630_v26  ;;  %v1793_v27 = vpop.f32.mrb[55].mxu1 }
 0x253   :  { %2221 = vst.msk [vmem:[%s3364_s3 + $0x1b0] sm:$0xff] %vm326_vm1, %v1793_v27 }
 0x255   :  { %v2653_v28 = vpop.f32.mrb[56].mxu1 }
 0x256   :  { %2240 = vst.msk [vmem:[%s3364_s3 + $0x1c8] sm:$0xff] %vm326_vm1, %v2653_v28  ;;  %v2009_v29 = vpop.f32.mrb[57].mxu1 }
 0x257   :  { %2239 = vst.msk [vmem:[%s3364_s3 + $0x1c0] sm:$0xff] %vm326_vm1, %v2009_v29 }
 0x259   :  { %v2656_v16 = vpop.f32.mrb[58].mxu1 }
 0x25a   :  { %2242 = vst.msk [vmem:[%s3364_s3 + $0x1d8] sm:$0xff] %vm326_vm1, %v2656_v16  ;;  %v2019_v30 = vpop.f32.mrb[59].mxu1 }
 0x25b   :  { %2241 = vst.msk [vmem:[%s3364_s3 + $0x1d0] sm:$0xff] %vm326_vm1, %v2019_v30 }
 0x25d   :  { %v2659_v31 = vpop.f32.mrb[60].mxu1 }
 0x25e   :  { %2244 = vst.msk [vmem:[%s3364_s3 + $0x1e8] sm:$0xff] %vm326_vm1, %v2659_v31  ;;  %v2029_v32 = vpop.f32.mrb[61].mxu1 }
 0x25f   :  { %2243 = vst.msk [vmem:[%s3364_s3 + $0x1e0] sm:$0xff] %vm326_vm1, %v2029_v32 }
 0x261   :  { %v2662_v33 = vpop.f32.mrb[62].mxu1 }
 0x262   :  { %2246 = vst.msk [vmem:[%s3364_s3 + $0x1f8] sm:$0xff] %vm326_vm1, %v2662_v33  ;;  %v2039_v34 = vpop.f32.mrb[63].mxu1 }
 0x263   :  { %2245 = vst.msk [vmem:[%s3364_s3 + $0x1f0] sm:$0xff] %vm326_vm1, %v2039_v34 }
 0x264   :  { %2061 = vsyncpa [#allocation3], 1 }
 0x265   :  { %2062 = vsyncpa [#allocation5], 1 }

// kernel: multi_svit_forward.4
= control target key start
LH: loop header
LB: loop body
LE: loop exit
PB: predicated region body
PF: predicated region fallthrough
CT: control target
= control target key end

     0   :  { %vm597_vm0 = vcmask 261120   ;;  %vm778_vm1 = vcmask 64512   ;;  %vm955_vm3 = vcmask 130048   ;;  %s14090_s29 = smov 48   ;;  %vm2442_vm4 = vcmask 195584   ;;  %s14043_s1 = inlined_call_operand.vmem [shape: f32[1024,32], index: 1, kind: input, shape index: {}]   ;;  %s14044_s0 = inlined_call_operand.vmem [shape: f32[32,1024], index: 0, kind: input, shape index: {}]   ;;  %s14045_s2 = inlined_call_operand.vmem [shape: f32[1,32], index: 2, kind: input, shape index: {}]   ;;  %s14046_s8 = inlined_call_operand.vmem [shape: f32[32,96], index: 8, kind: input, shape index: {}]   ;;  %s14047_s6 = inlined_call_operand.vmem [shape: f32[1,32], index: 6, kind: input, shape index: {}]   ;;  %s14048_s7 = inlined_call_operand.vmem [shape: f32[1,32], index: 7, kind: input, shape index: {}]   ;;  %s14049_s9 = inlined_call_operand.vmem [shape: f32[32,32], index: 9, kind: input, shape index: {}]   ;;  %s14050_s10 = inlined_call_operand.vmem [shape: f32[1,32], index: 10, kind: input, shape index: {}]   ;;  %s14051_s13 = inlined_call_operand.vmem [shape: f32[32,64], index: 13, kind: input, shape index: {}]   ;;  %s14052_s11 = inlined_call_operand.vmem [shape: f32[1,32], index: 11, kind: input, shape index: {}]   ;;  %s14053_s12 = inlined_call_operand.vmem [shape: f32[1,32], index: 12, kind: input, shape index: {}]   ;;  %s14054_s15 = inlined_call_operand.vmem [shape: f32[64,32], index: 15, kind: input, shape index: {}]   ;;  %s14055_s14 = inlined_call_operand.vmem [shape: f32[1,64], index: 14, kind: input, shape index: {}]   ;;  %s14056_s16 = inlined_call_operand.vmem [shape: f32[1,32], index: 16, kind: input, shape index: {}]   ;;  %s14057_s17 = inlined_call_operand.vmem [shape: f32[1,32], index: 17, kind: input, shape index: {}]   ;;  %s14058_s18 = inlined_call_operand.vmem [shape: f32[1,32], index: 18, kind: input, shape index: {}]   ;;  %s14059_s21 = inlined_call_operand.vmem [shape: f32[32,768], index: 21, kind: input, shape index: {}]   ;;  %s14060_s4 = inlined_call_operand.vmem [shape: f32[4096,32], index: 4, kind: input, shape index: {}]   ;;  %s14061_s19 = inlined_call_operand.vmem [shape: f32[1,32], index: 19, kind: input, shape index: {}]   ;;  %s14062_s20 = inlined_call_operand.vmem [shape: f32[1,32], index: 20, kind: input, shape index: {}]   ;;  %s14063_s3 = inlined_call_operand.vmem [shape: f32[8,4096], index: 3, kind: input, shape index: {}]   ;;  %s14064_s22 = inlined_call_operand.vmem [shape: f32[1,768], index: 22, kind: input, shape index: {}]   ;;  %s14065_s27 = inlined_call_operand.vmem [shape: f32[16,768], index: 27, kind: output, shape index: {0}]   ;;  %s14066_s5 = inlined_call_operand.vmem [shape: f32[1,32], index: 5, kind: input, shape index: {}]   ;;  %s14067_s25 = inlined_call_operand.vmem [shape: f32[32,3072], index: 25, kind: input, shape index: {}]   ;;  %s14068_s23 = inlined_call_operand.vmem [shape: f32[1,32], index: 23, kind: input, shape index: {}]   ;;  %s14069_s24 = inlined_call_operand.vmem [shape: f32[1,32], index: 24, kind: input, shape index: {}]   ;;  %s14070_s26 = inlined_call_operand.vmem [shape: f32[1,3072], index: 26, kind: input, shape index: {}]   ;;  %s14071_s28 = inlined_call_operand.vmem [shape: f32[4,3072], index: 28, kind: output, shape index: {1}]  }
   0x1   :  { %14116 = sst [smem:[#allocation2_spill]] %s14043_s1  ;;  %vm11190_vm2 = vmpackc.low %vm778_vm1, %vm778_vm1  ;;  %s14086_s1 = smov 40   ;;  %vm2789_vm5 = vcmask 523264   ;;  %vm10489_vm6 = vmmov 0   ;;  %vm5262_vm7 = vcmask 27648   ;;  %vm5291_vm8 = vcmask 1043456  }
   0x2   :  { %14117 = sst [smem:[#allocation3_spill]] %s14044_s0  ;;  %s14094_s0 = smov 80   ;;  %vm5287_vm9 = vcmask 31744   ;;  %vm6809_vm10 = vcmask 257024  }
   0x3   :  { %14118 = sst [smem:[#allocation4_spill]] %s14045_s2  ;;  %s14136_s30 = sld [smem:[#allocation3_spill]] }
   0x4   :  { %14119 = sst [smem:[#allocation5_spill]] %s14046_s8  ;;  %s14088_s2 = smov 72  }
   0x5   :  { %14120 = sst [smem:[#allocation6_spill]] %s14047_s6  ;;  %s14138_s8 = sld [smem:[#allocation5_spill]] }
   0x6   :  { %14121 = sst [smem:[#allocation7_spill]] %s14048_s7  ;;  %s14102_s7 = smov 64  }
   0x7   :  { %14122 = sst [smem:[#allocation8_spill]] %s14049_s9  ;;  %s14100_s9 = smov 88  }
   0x8   :  { %14123 = sst [smem:[#allocation9_spill]] %s14050_s10  ;;  %s14084_s10 = smov 104  }
   0x9   :  { %14124 = sst [smem:[#allocation10_spill]] %s14051_s13  ;;  %s14137_s13 = sld [smem:[#allocation4_spill]] }
   0xa   :  { %14125 = sst [smem:[#allocation11_spill]] %s14052_s11  ;;  %s14135_s11 = sld [smem:[#allocation2_spill]] }
   0xb   :  { %14126 = sst [smem:[#allocation12_spill]] %s14053_s12  ;;  %s14096_s12 = smov 56  }
   0xc   :  { %14127 = sst [smem:[#allocation13_spill]] %s14054_s15  ;;  %s14092_s15 = smov 112  }
   0xd   :  { %14128 = sst [smem:[#allocation14_spill]] %s14055_s14  ;;  %s14108_s6 = smov 8  }
   0xe   :  { %14129 = sst [smem:[#allocation15_spill]] %s14058_s18  ;;  %s14139_s14 = sld [smem:[#allocation6_spill]] }
   0xf   :  { %14130 = sst [smem:[#allocation16_spill]] %s14067_s25  ;;  %s14156_s25 = smov 112  }
  0x10   :  { %14131 = sst [smem:[#allocation17_spill]] %s14068_s23  ;;  %v136_v0 = vld [vmem:[%s14135_s11 + $0x80] sm:$0xff]  ;;  %v137_v1 = vld [vmem:[%s14135_s11 + $0x88] sm:$0xff]  ;;  %v138_v11 = vld [vmem:[%s14135_s11 + $0x90] sm:$0xff]  ;;  %s14153_s23 = smov 120  }
  0x11   :  { %14132 = sst [smem:[#allocation18_spill]] %s14069_s24  ;;  %v120_v2 = vld [vmem:[%s14135_s11] sm:$0xff]  ;;  %v9324_v3 = vpack.c.bf16 %v137_v1, %v136_v0  ;;  %v121_v4 = vld [vmem:[%s14135_s11 + $0x8] sm:$0xff]  ;;  %v139_v13 = vld [vmem:[%s14135_s11 + $0x98] sm:$0xff]  ;;  %s14149_s24 = sld [smem:[#allocation14_spill]] }
  0x12   :  { %14133 = sst [smem:[#allocation19_spill]] %s14070_s26  ;;  %v168_v5 = vld [vmem:[%s14135_s11 + $0x180] sm:$0xff]  ;;  %v169_v6 = vld [vmem:[%s14135_s11 + $0x188] sm:$0xff]  ;;  %v9326_v7 = vpack.c.bf16 %v121_v4, %v120_v2  ;;  %v122_v14 = vld [vmem:[%s14135_s11 + $0x10] sm:$0xff]  ;;  %v9328_v16 = vpack.c.bf16 %v139_v13, %v138_v11  ;;  %s14159_s26 = smov 104  }
  0x13   :  { %14134 = sst [smem:[#allocation20_spill]] %s14071_s28  ;;  %v9356_v8 = vpack.c.bf16 %v169_v6, %v168_v5  ;;  %v152_v9 = vld [vmem:[%s14135_s11 + $0x100] sm:$0xff]  ;;  %v153_v10 = vld [vmem:[%s14135_s11 + $0x108] sm:$0xff]  ;;  %9325 = vmatprep.subr.bf16.mxu0 %v9324_v3  ;;  %v123_v15 = vld [vmem:[%s14135_s11 + $0x18] sm:$0xff]  ;;  %s14162_s28 = smov 16  }
  0x14   :  { %v9358_v12 = vpack.c.bf16 %v153_v10, %v152_v9  ;;  %9327 = vmatpush3.bf16.msra.mxu0 %v9326_v7  ;;  %v9330_v17 = vpack.c.bf16 %v123_v15, %v122_v14  ;;  %v170_v18 = vld [vmem:[%s14135_s11 + $0x190] sm:$0xff]  ;;  %v171_v19 = vld [vmem:[%s14135_s11 + $0x198] sm:$0xff]  ;;  %v140_v23 = vld [vmem:[%s14135_s11 + $0xa0] sm:$0xff] }
  0x15   :  { %9357 = vmatprep.subr.bf16.mxu1 %v9356_v8  ;;  %v154_v20 = vld [vmem:[%s14135_s11 + $0x110] sm:$0xff]  ;;  %v9360_v21 = vpack.c.bf16 %v171_v19, %v170_v18  ;;  %v155_v22 = vld [vmem:[%s14135_s11 + $0x118] sm:$0xff]  ;;  %v141_v24 = vld [vmem:[%s14135_s11 + $0xa8] sm:$0xff]  ;;  %9329 = vmatprep.subr.bf16.mxu0 %v9328_v16 }
  0x16   :  { %9359 = vmatpush3.bf16.msra.mxu1 %v9358_v12  ;;  %v9362_v25 = vpack.c.bf16 %v155_v22, %v154_v20  ;;  %v9332_v26 = vpack.c.bf16 %v141_v24, %v140_v23  ;;  %v124_v27 = vld [vmem:[%s14135_s11 + $0x20] sm:$0xff]  ;;  %v125_v28 = vld [vmem:[%s14135_s11 + $0x28] sm:$0xff]  ;;  %v142_v35 = vld [vmem:[%s14135_s11 + $0xb0] sm:$0xff] }
  0x17   :  { %v172_v29 = vld [vmem:[%s14135_s11 + $0x1a0] sm:$0xff]  ;;  %9361 = vmatprep.subr.bf16.mxu1 %v9360_v21  ;;  %v173_v30 = vld [vmem:[%s14135_s11 + $0x1a8] sm:$0xff]  ;;  %v9334_v33 = vpack.c.bf16 %v125_v28, %v124_v27  ;;  %v143_v36 = vld [vmem:[%s14135_s11 + $0xb8] sm:$0xff] }
  0x18   :  { %v156_v31 = vld [vmem:[%s14135_s11 + $0x120] sm:$0xff]  ;;  %v157_v32 = vld [vmem:[%s14135_s11 + $0x128] sm:$0xff]  ;;  %9331 = vmatpush3.bf16.msra.mxu0 %v9330_v17  ;;  %v9364_v34 = vpack.c.bf16 %v173_v30, %v172_v29  ;;  %v126_v37 = vld [vmem:[%s14135_s11 + $0x30] sm:$0xff]  ;;  %v9336_v39 = vpack.c.bf16 %v143_v36, %v142_v35 }
  0x19   :  { %9333 = vmatprep.subr.bf16.mxu0 %v9332_v26  ;;  %v9366_v38 = vpack.c.bf16 %v157_v32, %v156_v31  ;;  %v127_v40 = vld [vmem:[%s14135_s11 + $0x38] sm:$0xff]  ;;  %v174_v41 = vld [vmem:[%s14135_s11 + $0x1b0] sm:$0xff]  ;;  %v144_v46 = vld [vmem:[%s14135_s11 + $0xc0] sm:$0xff] }
  0x1a   :  { %9363 = vmatpush3.bf16.msra.mxu1 %v9362_v25  ;;  %v175_v42 = vld [vmem:[%s14135_s11 + $0x1b8] sm:$0xff]  ;;  %v158_v44 = vld [vmem:[%s14135_s11 + $0x130] sm:$0xff]  ;;  %v145_v47 = vld [vmem:[%s14135_s11 + $0xc8] sm:$0xff]  ;;  %v9338_v48 = vpack.c.bf16 %v127_v40, %v126_v37 }
  0x1b   :  { %9365 = vmatprep.subr.bf16.mxu1 %v9364_v34  ;;  %v9368_v43 = vpack.c.bf16 %v175_v42, %v174_v41  ;;  %v159_v45 = vld [vmem:[%s14135_s11 + $0x138] sm:$0xff]  ;;  %v176_v49 = vld [vmem:[%s14135_s11 + $0x1c0] sm:$0xff]  ;;  %v177_v50 = vld [vmem:[%s14135_s11 + $0x1c8] sm:$0xff]  ;;  %v9340_v52 = vpack.c.bf16 %v145_v47, %v144_v46 }
  0x1c   :  { %9335 = vmatpush3.bf16.msra.mxu0 %v9334_v33  ;;  %v9370_v51 = vpack.c.bf16 %v159_v45, %v158_v44  ;;  %v128_v53 = vld [vmem:[%s14135_s11 + $0x40] sm:$0xff]  ;;  %v129_v54 = vld [vmem:[%s14135_s11 + $0x48] sm:$0xff]  ;;  %v9372_v56 = vpack.c.bf16 %v177_v50, %v176_v49  ;;  %v146_v58 = vld [vmem:[%s14135_s11 + $0xd0] sm:$0xff] }
  0x1d   :  { %9337 = vmatprep.subr.bf16.mxu0 %v9336_v39  ;;  %v160_v55 = vld [vmem:[%s14135_s11 + $0x140] sm:$0xff]  ;;  %v161_v57 = vld [vmem:[%s14135_s11 + $0x148] sm:$0xff]  ;;  %v147_v59 = vld [vmem:[%s14135_s11 + $0xd8] sm:$0xff]  ;;  %v9342_v62 = vpack.c.bf16 %v129_v54, %v128_v53 }
  0x1e   :  { %9367 = vmatpush3.bf16.msra.mxu1 %v9366_v38  ;;  %v178_v60 = vld [vmem:[%s14135_s11 + $0x1d0] sm:$0xff]  ;;  %v179_v61 = vld [vmem:[%s14135_s11 + $0x1d8] sm:$0xff]  ;;  %v9374_v63 = vpack.c.bf16 %v161_v57, %v160_v55  ;;  %v9344_v0 = vpack.c.bf16 %v147_v59, %v146_v58  ;;  %v148_v6 = vld [vmem:[%s14135_s11 + $0xe0] sm:$0xff] }
  0x1f   :  { %9369 = vmatprep.subr.bf16.mxu1 %v9368_v43  ;;  %v130_v1 = vld [vmem:[%s14135_s11 + $0x50] sm:$0xff]  ;;  %v131_v2 = vld [vmem:[%s14135_s11 + $0x58] sm:$0xff]  ;;  %v9376_v4 = vpack.c.bf16 %v179_v61, %v178_v60  ;;  %v149_v7 = vld [vmem:[%s14135_s11 + $0xe8] sm:$0xff] }
  0x20   :  { %9339 = vmatpush3.bf16.msra.mxu0 %v9338_v48  ;;  %v162_v3 = vld [vmem:[%s14135_s11 + $0x150] sm:$0xff]  ;;  %v163_v5 = vld [vmem:[%s14135_s11 + $0x158] sm:$0xff]  ;;  %v180_v8 = vld [vmem:[%s14135_s11 + $0x1e0] sm:$0xff]  ;;  %v9346_v10 = vpack.c.bf16 %v131_v2, %v130_v1  ;;  %v9348_v14 = vpack.c.bf16 %v149_v7, %v148_v6 }
  0x21   :  { %9341 = vmatprep.subr.bf16.mxu0 %v9340_v52  ;;  %v181_v9 = vld [vmem:[%s14135_s11 + $0x1e8] sm:$0xff]  ;;  %v132_v11 = vld [vmem:[%s14135_s11 + $0x60] sm:$0xff]  ;;  %v9378_v13 = vpack.c.bf16 %v163_v5, %v162_v3  ;;  %v150_v19 = vld [vmem:[%s14135_s11 + $0xf0] sm:$0xff] }
  0x22   :  { %9371 = vmatpush3.bf16.msra.mxu1 %v9370_v51  ;;  %v133_v12 = vld [vmem:[%s14135_s11 + $0x68] sm:$0xff]  ;;  %v164_v15 = vld [vmem:[%s14135_s11 + $0x160] sm:$0xff]  ;;  %v9380_v18 = vpack.c.bf16 %v181_v9, %v180_v8  ;;  %v151_v20 = vld [vmem:[%s14135_s11 + $0xf8] sm:$0xff] }
  0x23   :  { %9373 = vmatprep.subr.bf16.mxu1 %v9372_v56  ;;  %v165_v16 = vld [vmem:[%s14135_s11 + $0x168] sm:$0xff]  ;;  %v91_v21 = vld [vmem:[%s14136_s30 + $0x18] sm:$0xff]  ;;  %v182_v22 = vld [vmem:[%s14135_s11 + $0x1f0] sm:$0xff]  ;;  %v9350_v24 = vpack.c.bf16 %v133_v12, %v132_v11  ;;  %v9352_v26 = vpack.c.bf16 %v151_v20, %v150_v19 }
  0x24   :  { %9343 = vmatpush3.bf16.msra.mxu0 %v9342_v62  ;;  %v89_v17 = vld [vmem:[%s14136_s30 + $0x8] sm:$0xff]  ;;  %v183_v23 = vld [vmem:[%s14135_s11 + $0x1f8] sm:$0xff]  ;;  %404 = vmatprep.mubr.f32.mxu1 %v91_v21  ;;  %v9382_v25 = vpack.c.bf16 %v165_v16, %v164_v15  ;;  %v134_v27 = vld [vmem:[%s14135_s11 + $0x70] sm:$0xff] }
  0x25   :  { %9345 = vmatprep.subr.bf16.mxu0 %v9344_v0  ;;  %319 = vmatprep.mubr.f32.mxu0 %v89_v17  ;;  %v135_v28 = vld [vmem:[%s14135_s11 + $0x78] sm:$0xff]  ;;  %v166_v29 = vld [vmem:[%s14135_s11 + $0x170] sm:$0xff]  ;;  %v9384_v30 = vpack.c.bf16 %v183_v23, %v182_v22  ;;  %v200_v32 = vld [vmem:[%s14135_s11 + $0x280] sm:$0xff] }
  0x26   :  { %9375 = vmatpush3.bf16.msra.mxu1 %v9374_v63  ;;  %v167_v31 = vld [vmem:[%s14135_s11 + $0x178] sm:$0xff]  ;;  %v201_v33 = vld [vmem:[%s14135_s11 + $0x288] sm:$0xff]  ;;  %v232_v34 = vld [vmem:[%s14135_s11 + $0x380] sm:$0xff]  ;;  %v9354_v36 = vpack.c.bf16 %v135_v28, %v134_v27 }
  0x27   :  { %9377 = vmatprep.subr.bf16.mxu1 %v9376_v4  ;;  %v233_v35 = vld [vmem:[%s14135_s11 + $0x388] sm:$0xff]  ;;  %v9386_v37 = vpack.c.bf16 %v167_v31, %v166_v29  ;;  %v9388_v38 = vpack.c.bf16 %v201_v33, %v200_v32  ;;  %v184_v39 = vld [vmem:[%s14135_s11 + $0x200] sm:$0xff]  ;;  %v202_v44 = vld [vmem:[%s14135_s11 + $0x290] sm:$0xff] }
  0x28   :  { %9347 = vmatpush3.bf16.msra.mxu0 %v9346_v10  ;;  %v185_v40 = vld [vmem:[%s14135_s11 + $0x208] sm:$0xff]  ;;  %v216_v41 = vld [vmem:[%s14135_s11 + $0x300] sm:$0xff]  ;;  %v9420_v42 = vpack.c.bf16 %v233_v35, %v232_v34  ;;  %v203_v45 = vld [vmem:[%s14135_s11 + $0x298] sm:$0xff] }
  0x29   :  { %9349 = vmatprep.subr.bf16.mxu0 %v9348_v14  ;;  %v217_v43 = vld [vmem:[%s14135_s11 + $0x308] sm:$0xff]  ;;  %v234_v46 = vld [vmem:[%s14135_s11 + $0x390] sm:$0xff]  ;;  %v235_v47 = vld [vmem:[%s14135_s11 + $0x398] sm:$0xff]  ;;  %v9390_v49 = vpack.c.bf16 %v185_v40, %v184_v39  ;;  %v9392_v52 = vpack.c.bf16 %v203_v45, %v202_v44 }
  0x2a   :  { %9379 = vmatpush3.bf16.msra.mxu1 %v9378_v13  ;;  %v88_v48 = vld [vmem:[%s14136_s30] sm:$0xff]  ;;  %v90_v50 = vld [vmem:[%s14136_s30 + $0x10] sm:$0xff]  ;;  %v9422_v51 = vpack.c.bf16 %v217_v43, %v216_v41  ;;  %v187_v54 = vld [vmem:[%s14135_s11 + $0x218] sm:$0xff]  ;;  %v9424_v56 = vpack.c.bf16 %v235_v47, %v234_v46 }
  0x2b   :  { %9381 = vmatprep.subr.bf16.mxu1 %v9380_v18  ;;  %v186_v53 = vld [vmem:[%s14135_s11 + $0x210] sm:$0xff]  ;;  %v219_v57 = vld [vmem:[%s14135_s11 + $0x318] sm:$0xff]  ;;  %v204_v58 = vld [vmem:[%s14135_s11 + $0x2a0] sm:$0xff] }
  0x2c   :  { %9351 = vmatpush3.bf16.msra.mxu0 %v9350_v24  ;;  %v218_v55 = vld [vmem:[%s14135_s11 + $0x310] sm:$0xff]  ;;  %v205_v59 = vld [vmem:[%s14135_s11 + $0x2a8] sm:$0xff]  ;;  %v236_v60 = vld [vmem:[%s14135_s11 + $0x3a0] sm:$0xff]  ;;  %v9394_v63 = vpack.c.bf16 %v187_v54, %v186_v53 }
  0x2d   :  { %9353 = vmatprep.subr.bf16.mxu0 %v9352_v26  ;;  %v237_v61 = vld [vmem:[%s14135_s11 + $0x3a8] sm:$0xff]  ;;  %v188_v0 = vld [vmem:[%s14135_s11 + $0x220] sm:$0xff]  ;;  %v99_v2 = vld [vmem:[%s14136_s30 + $0x58] sm:$0xff]  ;;  %v9426_v3 = vpack.c.bf16 %v219_v57, %v218_v55  ;;  %v9396_v4 = vpack.c.bf16 %v205_v59, %v204_v58 }
  0x2e   :  { %9383 = vmatpush3.bf16.msra.mxu1 %v9382_v25  ;;  %v97_v62 = vld [vmem:[%s14136_s30 + $0x48] sm:$0xff]  ;;  %v96_v1 = vld [vmem:[%s14136_s30 + $0x40] sm:$0xff]  ;;  %v98_v7 = vld [vmem:[%s14136_s30 + $0x50] sm:$0xff]  ;;  %v9428_v8 = vpack.c.bf16 %v237_v61, %v236_v60 }
  0x2f   :  { %9385 = vmatprep.subr.bf16.mxu1 %v9384_v30  ;;  %v189_v5 = vld [vmem:[%s14135_s11 + $0x228] sm:$0xff]  ;;  %v220_v6 = vld [vmem:[%s14135_s11 + $0x320] sm:$0xff]  ;;  %v206_v10 = vld [vmem:[%s14135_s11 + $0x2b0] sm:$0xff] }
  0x30   :  { %9355 = vmatpush3.bf16.msra.mxu0 %v9354_v36  ;;  %v221_v9 = vld [vmem:[%s14135_s11 + $0x328] sm:$0xff]  ;;  %v207_v11 = vld [vmem:[%s14135_s11 + $0x2b8] sm:$0xff]  ;;  %v238_v12 = vld [vmem:[%s14135_s11 + $0x3b0] sm:$0xff]  ;;  %v9398_v15 = vpack.c.bf16 %v189_v5, %v188_v0 }
  0x31   :  { %9389 = vmatprep.subr.bf16.mxu0 %v9388_v38  ;;  %v239_v13 = vld [vmem:[%s14135_s11 + $0x3b8] sm:$0xff]  ;;  %v105_v14 = vld [vmem:[%s14136_s30 + $0x88] sm:$0xff]  ;;  %v190_v16 = vld [vmem:[%s14135_s11 + $0x230] sm:$0xff]  ;;  %v9430_v19 = vpack.c.bf16 %v221_v9, %v220_v6  ;;  %v9400_v20 = vpack.c.bf16 %v207_v11, %v206_v10 }
  0x32   :  { %9387 = vmatpush3.bf16.msra.mxu1 %v9386_v37  ;;  %v104_v17 = vld [vmem:[%s14136_s30 + $0x80] sm:$0xff]  ;;  %v107_v18 = vld [vmem:[%s14136_s30 + $0x98] sm:$0xff]  ;;  %v222_v22 = vld [vmem:[%s14135_s11 + $0x330] sm:$0xff]  ;;  %v9432_v24 = vpack.c.bf16 %v239_v13, %v238_v12 }
  0x33   :  { %9421 = vmatprep.subr.bf16.mxu1 %v9420_v42  ;;  %320 = vmatmul.mubr.f32.vlgmr.msra.gmra.mrb[0].mxu0 %v88_v48  ;;  %v191_v21 = vld [vmem:[%s14135_s11 + $0x238] sm:$0xff]  ;;  %v106_v23 = vld [vmem:[%s14136_s30 + $0x90] sm:$0xff]  ;;  %v208_v26 = vld [vmem:[%s14135_s11 + $0x2c0] sm:$0xff] }
  0x34   :  { %9391 = vmatpush3.bf16.msra.mxu0 %v9390_v49  ;;  %324 = vmatprep.mubr.f32.mxu0 %v97_v62  ;;  %v223_v25 = vld [vmem:[%s14135_s11 + $0x338] sm:$0xff]  ;;  %v209_v27 = vld [vmem:[%s14135_s11 + $0x2c8] sm:$0xff]  ;;  %v240_v28 = vld [vmem:[%s14135_s11 + $0x3c0] sm:$0xff]  ;;  %v9402_v31 = vpack.c.bf16 %v191_v21, %v190_v16 }
  0x35   :  { %405 = vmatmul.mubr.f32.vlgmr.msra.gmra.mrb[0].mxu1 %v90_v50  ;;  %9393 = vmatprep.subr.bf16.mxu0 %v9392_v52  ;;  %v241_v29 = vld [vmem:[%s14135_s11 + $0x3c8] sm:$0xff]  ;;  %v192_v32 = vld [vmem:[%s14135_s11 + $0x240] sm:$0xff]  ;;  %v115_v34 = vld [vmem:[%s14136_s30 + $0xd8] sm:$0xff]  ;;  %v9434_v35 = vpack.c.bf16 %v223_v25, %v222_v22  ;;  %v9404_v36 = vpack.c.bf16 %v209_v27, %v208_v26 }
  0x36   :  { %9423 = vmatpush3.bf16.msra.mxu1 %v9422_v51  ;;  %409 = vmatprep.mubr.f32.mxu1 %v99_v2  ;;  %v113_v30 = vld [vmem:[%s14136_s30 + $0xc8] sm:$0xff]  ;;  %v112_v33 = vld [vmem:[%s14136_s30 + $0xc0] sm:$0xff]  ;;  %v114_v39 = vld [vmem:[%s14136_s30 + $0xd0] sm:$0xff]  ;;  %v9436_v40 = vpack.c.bf16 %v241_v29, %v240_v28 }
  0x37   :  { %9425 = vmatprep.subr.bf16.mxu1 %v9424_v56  ;;  %325 = vmatmul.mubr.f32.gmra.mrb[2].mxu0 %v96_v1  ;;  %v193_v37 = vld [vmem:[%s14135_s11 + $0x248] sm:$0xff]  ;;  %v224_v38 = vld [vmem:[%s14135_s11 + $0x340] sm:$0xff]  ;;  %v210_v42 = vld [vmem:[%s14135_s11 + $0x2d0] sm:$0xff] }
  0x38   :  { %9395 = vmatpush3.bf16.msra.mxu0 %v9394_v63  ;;  %329 = vmatprep.mubr.f32.mxu0 %v105_v14  ;;  %v225_v41 = vld [vmem:[%s14135_s11 + $0x348] sm:$0xff]  ;;  %v211_v43 = vld [vmem:[%s14135_s11 + $0x2d8] sm:$0xff]  ;;  %v242_v44 = vld [vmem:[%s14135_s11 + $0x3d0] sm:$0xff]  ;;  %v9406_v46 = vpack.c.bf16 %v193_v37, %v192_v32 }
  0x39   :  { %410 = vmatmul.mubr.f32.gmra.mrb[2].mxu1 %v98_v7  ;;  %9397 = vmatprep.subr.bf16.mxu0 %v9396_v4  ;;  %v243_v45 = vld [vmem:[%s14135_s11 + $0x3d8] sm:$0xff]  ;;  %v93_v47 = vld [vmem:[%s14136_s30 + $0x28] sm:$0xff]  ;;  %v9438_v49 = vpack.c.bf16 %v225_v41, %v224_v38  ;;  %v9408_v50 = vpack.c.bf16 %v211_v43, %v210_v42  ;;  %v194_v51 = vld [vmem:[%s14135_s11 + $0x250] sm:$0xff] }
  0x3a   :  { %9427 = vmatpush3.bf16.msra.mxu1 %v9426_v3  ;;  %414 = vmatprep.mubr.f32.mxu1 %v107_v18  ;;  %v95_v48 = vld [vmem:[%s14136_s30 + $0x38] sm:$0xff]  ;;  %v226_v53 = vld [vmem:[%s14135_s11 + $0x350] sm:$0xff]  ;;  %v9440_v54 = vpack.c.bf16 %v243_v45, %v242_v44  ;;  %v212_v56 = vld [vmem:[%s14135_s11 + $0x2e0] sm:$0xff] }
  0x3b   :  { %9429 = vmatprep.subr.bf16.mxu1 %v9428_v8  ;;  %330 = vmatmul.mubr.f32.gmra.mrb[4].mxu0 %v104_v17  ;;  %v195_v52 = vld [vmem:[%s14135_s11 + $0x258] sm:$0xff]  ;;  %v213_v57 = vld [vmem:[%s14135_s11 + $0x2e8] sm:$0xff]  ;;  %v244_v58 = vld [vmem:[%s14135_s11 + $0x3e0] sm:$0xff] }
  0x3c   :  { %9399 = vmatpush3.bf16.msra.mxu0 %v9398_v15  ;;  %334 = vmatprep.mubr.f32.mxu0 %v113_v30  ;;  %v227_v55 = vld [vmem:[%s14135_s11 + $0x358] sm:$0xff]  ;;  %v245_v59 = vld [vmem:[%s14135_s11 + $0x3e8] sm:$0xff]  ;;  %v9410_v60 = vpack.c.bf16 %v195_v52, %v194_v51  ;;  %v9412_v62 = vpack.c.bf16 %v213_v57, %v212_v56  ;;  %v196_v63 = vld [vmem:[%s14135_s11 + $0x260] sm:$0xff] }
  0x3d   :  { %415 = vmatmul.mubr.f32.gmra.mrb[4].mxu1 %v106_v23  ;;  %9401 = vmatprep.subr.bf16.mxu0 %v9400_v20  ;;  %v9442_v61 = vpack.c.bf16 %v227_v55, %v226_v53  ;;  %v197_v0 = vld [vmem:[%s14135_s11 + $0x268] sm:$0xff]  ;;  %v228_v1 = vld [vmem:[%s14135_s11 + $0x360] sm:$0xff]  ;;  %v9444_v2 = vpack.c.bf16 %v245_v59, %v244_v58  ;;  %v214_v4 = vld [vmem:[%s14135_s11 + $0x2f0] sm:$0xff] }
  0x3e   :  { %9431 = vmatpush3.bf16.msra.mxu1 %v9430_v19  ;;  %419 = vmatprep.mubr.f32.mxu1 %v115_v34  ;;  %v229_v3 = vld [vmem:[%s14135_s11 + $0x368] sm:$0xff]  ;;  %v215_v5 = vld [vmem:[%s14135_s11 + $0x2f8] sm:$0xff]  ;;  %v246_v6 = vld [vmem:[%s14135_s11 + $0x3f0] sm:$0xff]  ;;  %v9414_v8 = vpack.c.bf16 %v197_v0, %v196_v63 }
  0x3f   :  { %9433 = vmatprep.subr.bf16.mxu1 %v9432_v24  ;;  %335 = vmatmul.mubr.f32.gmra.mrb[6].mxu0 %v112_v33  ;;  %v247_v7 = vld [vmem:[%s14135_s11 + $0x3f8] sm:$0xff]  ;;  %v9446_v9 = vpack.c.bf16 %v229_v3, %v228_v1  ;;  %v9416_v10 = vpack.c.bf16 %v215_v5, %v214_v4  ;;  %v198_v11 = vld [vmem:[%s14135_s11 + $0x270] sm:$0xff]  ;;  %v92_v18 = vld [vmem:[%s14136_s30 + $0x20] sm:$0xff] }
  0x40   :  { %9403 = vmatpush3.bf16.msra.mxu0 %v9402_v31  ;;  %489 = vmatprep.mubr.f32.mxu0 %v93_v47  ;;  %v199_v12 = vld [vmem:[%s14135_s11 + $0x278] sm:$0xff]  ;;  %v9448_v13 = vpack.c.bf16 %v247_v7, %v246_v6  ;;  %v230_v14 = vld [vmem:[%s14135_s11 + $0x370] sm:$0xff]  ;;  %v101_v20 = vld [vmem:[%s14136_s30 + $0x68] sm:$0xff] }
  0x41   :  { %420 = vmatmul.mubr.f32.gmra.mrb[6].mxu1 %v114_v39  ;;  %9405 = vmatprep.subr.bf16.mxu0 %v9404_v36  ;;  %v231_v15 = vld [vmem:[%s14135_s11 + $0x378] sm:$0xff]  ;;  %v9418_v16 = vpack.c.bf16 %v199_v12, %v198_v11  ;;  %v94_v19 = vld [vmem:[%s14136_s30 + $0x30] sm:$0xff]  ;;  %v100_v22 = vld [vmem:[%s14136_s30 + $0x60] sm:$0xff]  ;;  %s14098_s11 = smov 120  }
  0x42   :  { %9435 = vmatpush3.bf16.msra.mxu1 %v9434_v35  ;;  %574 = vmatprep.mubr.f32.mxu1 %v95_v48  ;;  %v9450_v17 = vpack.c.bf16 %v231_v15, %v230_v14  ;;  %v103_v21 = vld [vmem:[%s14136_s30 + $0x78] sm:$0xff]  ;;  %v102_v23 = vld [vmem:[%s14136_s30 + $0x70] sm:$0xff]  ;;  %v109_v24 = vld [vmem:[%s14136_s30 + $0xa8] sm:$0xff] }
  0x43   :  { %9437 = vmatprep.subr.bf16.mxu1 %v9436_v40  ;;  %v111_v25 = vld [vmem:[%s14136_s30 + $0xb8] sm:$0xff]  ;;  %v108_v26 = vld [vmem:[%s14136_s30 + $0xa0] sm:$0xff]  ;;  %v110_v27 = vld [vmem:[%s14136_s30 + $0xb0] sm:$0xff] }
  0x44   :  { %9407 = vmatpush3.bf16.msra.mxu0 %v9406_v46  ;;  %v117_v28 = vld [vmem:[%s14136_s30 + $0xe8] sm:$0xff]  ;;  %v119_v29 = vld [vmem:[%s14136_s30 + $0xf8] sm:$0xff]  ;;  %v116_v30 = vld [vmem:[%s14136_s30 + $0xe0] sm:$0xff] }
  0x45   :  { %9409 = vmatprep.subr.bf16.mxu0 %v9408_v50  ;;  %v118_v31 = vld [vmem:[%s14136_s30 + $0xf0] sm:$0xff]  ;;  %v7982_v33 = vld [vmem:[%s14137_s13] ss:$0 sm:$0xff]  ;;  %s14140_s13 = sld [smem:[#allocation7_spill]]  ;;  %s14110_s30 = smov 96  }
  0x46   :  { %9439 = vmatpush3.bf16.msra.mxu1 %v9438_v49 }
  0x47   :  { %9441 = vmatprep.subr.bf16.mxu1 %v9440_v54 }
  0x48   :  { %9411 = vmatpush3.bf16.msra.mxu0 %v9410_v60 }
  0x49   :  { %9413 = vmatprep.subr.bf16.mxu0 %v9412_v62 }
  0x4a   :  { %9443 = vmatpush3.bf16.msra.mxu1 %v9442_v61 }
  0x4b   :  { %9445 = vmatprep.subr.bf16.mxu1 %v9444_v2 }
  0x4c   :  { %9415 = vmatpush3.bf16.msra.mxu0 %v9414_v8 }
  0x4d   :  { %9417 = vmatprep.subr.bf16.mxu0 %v9416_v10 }
  0x4e   :  { %9447 = vmatpush3.bf16.msra.mxu1 %v9446_v9 }
  0x4f   :  { %9449 = vmatprep.subr.bf16.mxu1 %v9448_v13 }
  0x50   :  { %9419 = vmatpush3.bf16.msra.mxu0 %v9418_v16 }
  0x52   :  { %9451 = vmatpush3.bf16.msra.mxu1 %v9450_v17 }
  0x53   :  { %490 = vmatmul.mubr.f32.vlgmr.msra.gmra.mrb[8].mxu0 %v92_v18 }
  0x54   :  { %494 = vmatprep.mubr.f32.mxu0 %v101_v20 }
  0x55   :  { %575 = vmatmul.mubr.f32.vlgmr.msra.gmra.mrb[8].mxu1 %v94_v19 }
  0x56   :  { %579 = vmatprep.mubr.f32.mxu1 %v103_v21 }
  0x57   :  { %495 = vmatmul.mubr.f32.gmra.mrb[10].mxu0 %v100_v22 }
  0x58   :  { %499 = vmatprep.mubr.f32.mxu0 %v109_v24 }
  0x59   :  { %580 = vmatmul.mubr.f32.gmra.mrb[10].mxu1 %v102_v23 }
  0x5a   :  { %584 = vmatprep.mubr.f32.mxu1 %v111_v25 }
  0x5b   :  { %500 = vmatmul.mubr.f32.gmra.mrb[12].mxu0 %v108_v26 }
  0x5c   :  { %504 = vmatprep.mubr.f32.mxu0 %v117_v28 }
  0x5d   :  { %585 = vmatmul.mubr.f32.gmra.mrb[12].mxu1 %v110_v27 }
  0x5e   :  { %589 = vmatprep.mubr.f32.mxu1 %v119_v29 }
  0x5f   :  { %505 = vmatmul.mubr.f32.gmra.mrb[14].mxu0 %v116_v30 }
  0x61   :  { %590 = vmatmul.mubr.f32.gmra.mrb[14].mxu1 %v118_v31 }
 0x106   :  { %v8156_v32 = vpop.f32.mrb[0].mxu0 }
 0x107   :  { %v8157_v34 = vpop.f32.mrb[1].mxu0 }
 0x108   :  { %v8200_v35 = vpop.f32.mrb[0].mxu1  ;;  %v8158_v36 = vadd.f32 %v8157_v34, %v8156_v32 }
 0x109   :  { %v8201_v37 = vpop.f32.mrb[1].mxu1 }
 0x10a   :  { %v8202_v38 = vadd.f32 %v8201_v37, %v8200_v35  ;;  %v322_v39 = vadd.f32 %v8158_v36, %v7982_v33  ;;  %v8159_v40 = vpop.f32.mrb[2].mxu0 }
 0x10b   :  { %v8160_v41 = vpop.f32.mrb[3].mxu0 }
 0x10c   :  { %v8203_v42 = vpop.f32.mrb[2].mxu1  ;;  %v407_v43 = vadd.f32 %v8202_v38, %v322_v39  ;;  %v8161_v44 = vadd.f32 %v8160_v41, %v8159_v40 }
 0x10d   :  { %v8204_v45 = vpop.f32.mrb[3].mxu1 }
 0x10e   :  { %v8205_v46 = vadd.f32 %v8204_v45, %v8203_v42  ;;  %v327_v47 = vadd.f32 %v8161_v44, %v7982_v33  ;;  %v8162_v48 = vpop.f32.mrb[4].mxu0 }
 0x10f   :  { %v8163_v49 = vpop.f32.mrb[5].mxu0 }
 0x110   :  { %v8206_v50 = vpop.f32.mrb[4].mxu1  ;;  %v412_v51 = vadd.f32 %v8205_v46, %v327_v47  ;;  %v8164_v52 = vadd.f32 %v8163_v49, %v8162_v48 }
 0x111   :  { %v8207_v53 = vpop.f32.mrb[5].mxu1 }
 0x112   :  { %v8208_v54 = vadd.f32 %v8207_v53, %v8206_v50  ;;  %v332_v55 = vadd.f32 %v8164_v52, %v7982_v33  ;;  %v8165_v56 = vpop.f32.mrb[6].mxu0 }
 0x113   :  { %v8166_v57 = vpop.f32.mrb[7].mxu0 }
 0x114   :  { %v8209_v58 = vpop.f32.mrb[6].mxu1  ;;  %v417_v59 = vadd.f32 %v8208_v54, %v332_v55  ;;  %v8167_v60 = vadd.f32 %v8166_v57, %v8165_v56  ;;  %v671_v57 = vld [vmem:[%s14138_s8] sm:$0xff] }
 0x115   :  { %v8210_v61 = vpop.f32.mrb[7].mxu1 }
 0x116   :  { %v8211_v62 = vadd.f32 %v8210_v61, %v8209_v58  ;;  %v337_v63 = vadd.f32 %v8167_v60, %v7982_v33  ;;  %v672_v58 = vld [vmem:[%s14138_s8 + $0x8] sm:$0xff]  ;;  %v673_v60 = vld [vmem:[%s14138_s8 + $0x10] sm:$0xff]  ;;  %v674_v61 = vld [vmem:[%s14138_s8 + $0x18] sm:$0xff] }
 0x118   :  { %v422_v0 = vadd.f32 %v8211_v62, %v337_v63  ;;  %v9456_v62 = vpack.c.bf16 %v674_v61, %v673_v60 }
 0x126   :  { %v8244_v1 = vpop.f32.mrb[8].mxu0 }
 0x127   :  { %v8245_v2 = vpop.f32.mrb[9].mxu0 }
 0x128   :  { %v8288_v3 = vpop.f32.mrb[8].mxu1  ;;  %v8246_v4 = vadd.f32 %v8245_v2, %v8244_v1 }
 0x129   :  { %v8289_v5 = vpop.f32.mrb[9].mxu1 }
 0x12a   :  { %v8290_v6 = vadd.f32 %v8289_v5, %v8288_v3  ;;  %v492_v7 = vadd.f32 %v8246_v4, %v407_v43  ;;  %v8247_v8 = vpop.f32.mrb[10].mxu0 }
 0x12b   :  { %v8248_v9 = vpop.f32.mrb[11].mxu0 }
 0x12c   :  { %v8291_v10 = vpop.f32.mrb[10].mxu1  ;;  %v11118_v11 = vadd.f32 %v8290_v6, %v492_v7  ;;  %v8249_v12 = vadd.f32 %v8248_v9, %v8247_v8 }
 0x12d   :  { %v8292_v13 = vpop.f32.mrb[11].mxu1 }
 0x12e   :  { %v8293_v14 = vadd.f32 %v8292_v13, %v8291_v10  ;;  %v497_v15 = vadd.f32 %v8249_v12, %v412_v51  ;;  %v8250_v16 = vpop.f32.mrb[12].mxu0  ;;  %v598_v17 = vsel %vm597_vm0, %v11118_v11, 0.0  ;;  %v7983_v13 = vld [vmem:[%s14139_s14] ss:$0 sm:$0xff] }
 0x12f   :  { %v8251_v18 = vpop.f32.mrb[13].mxu0  ;;  %599 = vadd.xlane.f32.xlu0 %v598_v17 }
 0x130   :  { %v8294_v19 = vpop.f32.mrb[12].mxu1  ;;  %v11122_v20 = vadd.f32 %v8293_v14, %v497_v15  ;;  %v8252_v21 = vadd.f32 %v8251_v18, %v8250_v16  ;;  %v7984_v15 = vld [vmem:[%s14140_s13] ss:$0 sm:$0xff] }
 0x131   :  { %v8295_v22 = vpop.f32.mrb[13].mxu1 }
 0x132   :  { %v8296_v23 = vadd.f32 %v8295_v22, %v8294_v19  ;;  %v502_v24 = vadd.f32 %v8252_v21, %v417_v59  ;;  %v8253_v25 = vpop.f32.mrb[14].mxu0  ;;  %v601_v26 = vsel %vm597_vm0, %v11122_v20, 0.0  ;;  %v9452_v59 = vpack.c.bf16 %v672_v58, %v671_v57 }
 0x133   :  { %v8254_v27 = vpop.f32.mrb[15].mxu0  ;;  %602 = vadd.xlane.f32.xlu0 %v601_v26 }
 0x134   :  { %v8297_v28 = vpop.f32.mrb[14].mxu1  ;;  %v11126_v29 = vadd.f32 %v8296_v23, %v502_v24  ;;  %v8255_v30 = vadd.f32 %v8254_v27, %v8253_v25  ;;  %9453 = vmatprep.subr.bf16.mxu0 %v9452_v59 }
 0x135   :  { %v8298_v31 = vpop.f32.mrb[15].mxu1  ;;  %9455 = vmatpush3.bf16.msra.mxu0 %v9452_v59 }
 0x136   :  { %v8299_v32 = vadd.f32 %v8298_v31, %v8297_v28  ;;  %v507_v33 = vadd.f32 %v8255_v30, %v422_v0  ;;  %v604_v34 = vsel %vm597_vm0, %v11126_v29, 0.0  ;;  %9457 = vmatprep.subr.bf16.mxu0 %v9456_v62 }
 0x137   :  { %605 = vadd.xlane.f32.xlu1 %v604_v34 }
 0x138   :  { %v11130_v35 = vadd.f32 %v8299_v32, %v507_v33 }
 0x139   :  { %9459 = vmatpush3.bf16.msra.mxu0 %v9456_v62 }
 0x13a   :  { %v607_v36 = vsel %vm597_vm0, %v11130_v35, 0.0 }
 0x13b   :  { %608 = vadd.xlane.f32.xlu1 %v607_v36 }
 0x1bc   :  { %v600_v37 = vpop.xlane.xlu0 %599 }
 0x1bd   :  { %v611_v38 = vmul.f32 0.03125, %v600_v37 }
 0x1bf   :  { %v615_v39 = vsub.f32 %v11118_v11, %v611_v38 }
 0x1c0   :  { %v603_v40 = vpop.xlane.xlu0 %602 }
 0x1c1   :  { %v612_v41 = vmul.f32 0.03125, %v603_v40  ;;  %v619_v42 = vmul.f32 %v615_v39, %v615_v39 }
 0x1c3   :  { %v616_v43 = vsub.f32 %v11122_v20, %v612_v41  ;;  %v623_v44 = vsel %vm597_vm0, %v619_v42, 0.0 }
 0x1c4   :  { %v606_v45 = vpop.xlane.xlu1 %605  ;;  %624 = vadd.xlane.f32.xlu0 %v623_v44 }
 0x1c5   :  { %v613_v46 = vmul.f32 0.03125, %v606_v45  ;;  %v620_v47 = vmul.f32 %v616_v43, %v616_v43 }
 0x1c7   :  { %v617_v48 = vsub.f32 %v11126_v29, %v613_v46  ;;  %v626_v49 = vsel %vm597_vm0, %v620_v47, 0.0 }
 0x1c8   :  { %v609_v50 = vpop.xlane.xlu1 %608  ;;  %627 = vadd.xlane.f32.xlu1 %v626_v49 }
 0x1c9   :  { %v614_v51 = vmul.f32 0.03125, %v609_v50  ;;  %v621_v52 = vmul.f32 %v617_v48, %v617_v48 }
 0x1cb   :  { %v618_v53 = vsub.f32 %v11130_v35, %v614_v51  ;;  %v629_v54 = vsel %vm597_vm0, %v621_v52, 0.0 }
 0x1cc   :  { %630 = vadd.xlane.f32.xlu0 %v629_v54 }
 0x1cd   :  { %v622_v55 = vmul.f32 %v618_v53, %v618_v53 }
 0x1cf   :  { %v632_v56 = vsel %vm597_vm0, %v622_v55, 0.0 }
 0x1d0   :  { %633 = vadd.xlane.f32.xlu1 %v632_v56 }
 0x251   :  { %v625_v63 = vpop.xlane.xlu0 %624 }
 0x252   :  { %v635_v0 = vmul.f32 0.03125, %v625_v63 }
 0x254   :  { %v639_v1 = vadd.f32 1e-05, %v635_v0 }
 0x255   :  { %v628_v2 = vpop.xlane.xlu1 %627 }
 0x256   :  { %10331 = vrsqrt.f32 %v639_v1  ;;  %v636_v3 = vmul.f32 0.03125, %v628_v2 }
 0x258   :  { %v640_v4 = vadd.f32 1e-05, %v636_v3 }
 0x259   :  { %v631_v5 = vpop.xlane.xlu0 %630 }
 0x25a   :  { %10333 = vrsqrt.f32 %v640_v4  ;;  %v637_v6 = vmul.f32 0.03125, %v631_v5 }
 0x25c   :  { %v641_v7 = vadd.f32 1e-05, %v637_v6 }
 0x25d   :  { %v634_v8 = vpop.xlane.xlu1 %633 }
 0x25e   :  { %10335 = vrsqrt.f32 %v641_v7  ;;  %v638_v9 = vmul.f32 0.03125, %v634_v8 }
 0x260   :  { %v10332_v10 = vpop.eup %10331  ;;  %v642_v12 = vadd.f32 1e-05, %v638_v9 }
 0x261   :  { %v647_v14 = vmul.f32 %v10332_v10, %v615_v39 }
 0x262   :  { %10337 = vrsqrt.f32 %v642_v12 }
 0x263   :  { %v657_v16 = vmul.f32 %v7983_v13, %v647_v14 }
 0x264   :  { %v10334_v17 = vpop.eup %10333 }
 0x265   :  { %v648_v18 = vmul.f32 %v10334_v17, %v616_v43  ;;  %v667_v19 = vadd.f32 %v7984_v15, %v657_v16 }
 0x267   :  { %v658_v21 = vmul.f32 %v7983_v13, %v648_v18  ;;  %9024 = vmatprep.mubr.msk.f32.mxu0 %vm597_vm0, %v667_v19 }
 0x268   :  { %v10336_v22 = vpop.eup %10335 }
 0x269   :  { %v668_v23 = vadd.f32 %v7984_v15, %v658_v21  ;;  %v649_v24 = vmul.f32 %v10336_v22, %v617_v48 }
 0x26b   :  { %9025 = vmatmul.mubr.msk.f32.vlgmr.msra.gmra.mrb[16].mxu0 %vm597_vm0, %v668_v23  ;;  %v659_v25 = vmul.f32 %v7983_v13, %v649_v24 }
 0x26c   :  { %v10338_v26 = vpop.eup %10337 }
 0x26d   :  { %v669_v27 = vadd.f32 %v7984_v15, %v659_v25  ;;  %v650_v28 = vmul.f32 %v10338_v26, %v618_v53 }
 0x26f   :  { %9027 = vmatprep.mubr.msk.f32.mxu0 %vm597_vm0, %v669_v27  ;;  %v660_v30 = vmul.f32 %v7983_v13, %v650_v28 }
 0x271   :  { %v670_v31 = vadd.f32 %v7984_v15, %v660_v30 }
 0x273   :  { %9028 = vmatmul.mubr.msk.f32.gmra.mrb[18].mxu0 %vm597_vm0, %v670_v31 }
 0x33e   :  { %v11164_v32 = vpop.f32.mrb[16].mxu0 }
 0x33f   :  { %v11166_v33 = vpop.f32.mrb[17].mxu0 }
 0x340   :  { %9034 = vmatprep.mubr.msk.f32.mxu1 %vm778_vm1, %v11166_v33  ;;  %v11172_v34 = vpack.i.bf16 %v11164_v32, %v11166_v33 }
 0x342   :  { %10252 = vrot.lane.b32.xlu0 %v11172_v34, %s14110_s30 }
 0x346   :  { %v11176_v36 = vpop.f32.mrb[18].mxu0 }
 0x347   :  { %v11178_v37 = vpop.f32.mrb[19].mxu0 }
 0x348   :  { %9041 = vmatprep.mubr.msk.f32.mxu0 %vm778_vm1, %v11178_v37  ;;  %v11184_v38 = vpack.i.bf16 %v11176_v36, %v11178_v37 }
 0x34a   :  { %10257 = vrot.lane.b32.xlu1 %v11184_v38, %s14110_s30  ;;  %s14163_s30 = smov 24  }
 0x3b4   :  { %v10253_v39 = vpop.permute.xlu0 %10252 }
 0x3b5   :  { %v10255_v40 = vunpack.i.h.bf16 %v10253_v39  ;;  %v10254_v41 = vunpack.i.l.bf16 %v10253_v39 }
 0x3b7   :  { %v9460_v43 = vpack.c.bf16 %v10255_v40, %v10254_v41 }
 0x3b9   :  { %9462 = vmatprep.subr.msk.bf16.mxu1 %vm11190_vm2, %v9460_v43 }
 0x3ba   :  { %9465 = vmatpush3.bf16.xpose.msk.msra.mxu1 %vm11190_vm2, %v9460_v43 }
 0x3bc   :  { %v10258_v44 = vpop.permute.xlu1 %10257 }
 0x3bd   :  { %v10260_v45 = vunpack.i.h.bf16 %v10258_v44  ;;  %v10259_v46 = vunpack.i.l.bf16 %v10258_v44 }
 0x3bf   :  { %v9466_v47 = vpack.c.bf16 %v10260_v45, %v10259_v46 }
 0x3c1   :  { %9035 = vmatmul.mubr.msk.f32.vlgmr.msra.gmra.mrb[16].mxu1 %vm778_vm1, %v11164_v32  ;;  %9468 = vmatprep.subr.msk.bf16.mxu0 %vm11190_vm2, %v9466_v47 }
 0x3c2   :  { %9471 = vmatpush3.bf16.xpose.msk.msra.mxu0 %vm11190_vm2, %v9466_v47 }
 0x3c9   :  { %9042 = vmatmul.mubr.msk.f32.vlgmr.msra.gmra.mrb[20].mxu0 %vm778_vm1, %v11176_v36 }
 0x494   :  { %v9036_v48 = vpop.f32.mrb[16].mxu1 }
 0x495   :  { %v952_v49 = vmul.f32 0.35355338, %v9036_v48  ;;  %v853_v50 = vpop.f32.mrb[17].mxu1 }
 0x496   :  { %v951_v51 = vmul.f32 0.35355338, %v853_v50 }
 0x497   :  { %v959_v52 = vsel %vm955_vm3, %v952_v49, -inf }
 0x498   :  { %960 = vmax.xlane.f32.xlu0 %v959_v52  ;;  %v956_v53 = vsel %vm955_vm3, %v951_v51, -inf }
 0x499   :  { %957 = vmax.xlane.f32.xlu1 %v956_v53 }
 0x49c   :  { %v9043_v54 = vpop.f32.mrb[20].mxu0 }
 0x49d   :  { %v954_v55 = vmul.f32 0.35355338, %v9043_v54  ;;  %v942_v56 = vpop.f32.mrb[21].mxu0 }
 0x49e   :  { %v953_v57 = vmul.f32 0.35355338, %v942_v56 }
 0x49f   :  { %v965_v58 = vsel %vm955_vm3, %v954_v55, -inf }
 0x4a0   :  { %966 = vmax.xlane.f32.xlu1 %v965_v58  ;;  %v962_v59 = vsel %vm955_vm3, %v953_v57, -inf }
 0x4a1   :  { %963 = vmax.xlane.f32.xlu0 %v962_v59 }
 0x525   :  { %v961_v60 = vpop.xlane.xlu0 %960 }
 0x526   :  { %v969_v61 = vsub.f32 %v952_v49, %v961_v60  ;;  %v958_v62 = vpop.xlane.xlu1 %957 }
 0x527   :  { %v968_v63 = vsub.f32 %v951_v51, %v958_v62 }
 0x528   :  { %v974_v0 = vmul.f32 1.442695, %v969_v61 }
 0x529   :  { %v972_v1 = vmul.f32 1.442695, %v968_v63 }
 0x52a   :  { %10339 = vpow2.f32 %v974_v0 }
 0x52b   :  { %10341 = vpow2.f32 %v972_v1 }
 0x52d   :  { %v967_v8 = vpop.xlane.xlu1 %966 }
 0x52e   :  { %v964_v6 = vpop.xlane.xlu0 %963  ;;  %v971_v10 = vsub.f32 %v954_v55, %v967_v8 }
 0x52f   :  { %v970_v7 = vsub.f32 %v953_v57, %v964_v6 }
 0x530   :  { %v978_v12 = vmul.f32 1.442695, %v971_v10 }
 0x531   :  { %v976_v9 = vmul.f32 1.442695, %v970_v7 }
 0x533   :  { %10343 = vpow2.f32 %v976_v9 }
 0x534   :  { %v10340_v2 = vpop.eup %10339  ;;  %10345 = vpow2.f32 %v978_v12 }
 0x535   :  { %v10342_v3 = vpop.eup %10341  ;;  %v983_v4 = vsel %vm955_vm3, %v10340_v2, 0.0 }
 0x536   :  { %984 = vadd.xlane.f32.xlu1 %v983_v4  ;;  %v980_v5 = vsel %vm955_vm3, %v10342_v3, 0.0 }
 0x537   :  { %981 = vadd.xlane.f32.xlu0 %v980_v5 }
 0x53d   :  { %v10344_v13 = vpop.eup %10343 }
 0x53e   :  { %v986_v14 = vsel %vm955_vm3, %v10344_v13, 0.0  ;;  %v10346_v15 = vpop.eup %10345 }
 0x53f   :  { %v989_v16 = vsel %vm955_vm3, %v10346_v15, 0.0 }
 0x547   :  { %10267 = vrot.lane.b32.xlu1 %v11184_v38, %s14102_s7 }
 0x54b   :  { %10272 = vrot.lane.b32.xlu1 %v11172_v34, %s14100_s9 }
 0x54d   :  { %10262 = vrot.lane.b32.xlu0 %v11172_v34, %s14102_s7 }
 0x54f   :  { %10277 = vrot.lane.b32.xlu1 %v11184_v38, %s14100_s9 }
 0x56c   :  { %987 = vadd.xlane.f32.xlu0 %v986_v14 }
 0x573   :  { %990 = vadd.xlane.f32.xlu1 %v989_v16 }
 0x582   :  { %1174 = vrot.lane.b32.xlu0 %v11166_v33, %s14098_s11 }
 0x584   :  { %1176 = vrot.lane.b32.xlu1 %v11164_v32, %s14098_s11 }
 0x586   :  { %1265 = vrot.lane.b32.xlu0 %v11178_v37, %s14098_s11 }
 0x588   :  { %1267 = vrot.lane.b32.xlu1 %v11176_v36, %s14098_s11  ;;  %s14144_s11 = sld [smem:[#allocation9_spill]] }
 0x5c3   :  { %v985_v17 = vpop.xlane.xlu1 %984 }
 0x5c4   :  { %10347 = vrcp.f32 %v985_v17  ;;  %v982_v18 = vpop.xlane.xlu0 %981 }
 0x5c5   :  { %10349 = vrcp.f32 %v982_v18 }
 0x5c7   :  { %v10268_v19 = vpop.permute.xlu1 %10267 }
 0x5c8   :  { %v10263_v21 = vpop.permute.xlu0 %10262  ;;  %v10270_v22 = vunpack.i.h.bf16 %v10268_v19  ;;  %v10269_v23 = vunpack.i.l.bf16 %v10268_v19 }
 0x5c9   :  { %v10265_v24 = vunpack.i.h.bf16 %v10263_v21  ;;  %v10264_v25 = vunpack.i.l.bf16 %v10263_v21 }
 0x5ca   :  { %v9476_v31 = vpack.c.bf16 %v10270_v22, %v10269_v23 }
 0x5cb   :  { %v10273_v26 = vpop.permute.xlu1 %10272  ;;  %v9472_v27 = vpack.c.bf16 %v10265_v24, %v10264_v25 }
 0x5cc   :  { %v10275_v28 = vunpack.i.h.bf16 %v10273_v26  ;;  %v10274_v30 = vunpack.i.l.bf16 %v10273_v26 }
 0x5cd   :  { %9473 = vmatprep.subr.bf16.mxu1 %v9472_v27 }
 0x5ce   :  { %v10348_v39 = vpop.eup %10347  ;;  %v9480_v40 = vpack.c.bf16 %v10275_v28, %v10274_v30  ;;  %9475 = vmatpush3.bf16.msra.mxu1 %v9472_v27 }
 0x5cf   :  { %v10350_v41 = vpop.eup %10349  ;;  %v10278_v43 = vpop.permute.xlu1 %10277  ;;  %9477 = vmatprep.subr.bf16.mxu1 %v9476_v31  ;;  %v995_v47 = vmul.f32 %v10348_v39, %v10340_v2 }
 0x5d0   :  { %v10280_v44 = vunpack.i.h.bf16 %v10278_v43  ;;  %v10279_v45 = vunpack.i.l.bf16 %v10278_v43  ;;  %9482 = vmatprep.subr.msk.bf16.mxu0 %vm11190_vm2, %v9480_v40  ;;  %v993_v46 = vmul.f32 %v10350_v41, %v10342_v3 }
 0x5d1   :  { %9485 = vmatpush3.bf16.xpose.msk.msra.mxu0 %vm11190_vm2, %v9480_v40 }
 0x5d2   :  { %v9486_v48 = vpack.c.bf16 %v10280_v44, %v10279_v45  ;;  %9048 = vmatprep.mubr.msk.f32.mxu1 %vm955_vm3, %v993_v46 }
 0x5d3   :  { %9049 = vmatmul.mubr.msk.f32.vlgmr.msra.gmra.mrb[18].mxu1 %vm955_vm3, %v995_v47 }
 0x5d4   :  { %9479 = vmatpush3.bf16.msra.mxu1 %v9476_v31 }
 0x5d5   :  { %9488 = vmatprep.subr.msk.bf16.mxu1 %vm11190_vm2, %v9486_v48 }
 0x5f9   :  { %v988_v49 = vpop.xlane.xlu0 %987 }
 0x5fa   :  { %10351 = vrcp.f32 %v988_v49 }
 0x5fd   :  { %v1175_v50 = vpop.permute.xlu0 %1174 }
 0x5fe   :  { %9062 = vmatprep.mubr.msk.f32.mxu0 %vm778_vm1, %v1175_v50 }
 0x600   :  { %v991_v51 = vpop.xlane.xlu1 %990 }
 0x601   :  { %10353 = vrcp.f32 %v991_v51  ;;  %v1266_v57 = vpop.permute.xlu0 %1265 }
 0x604   :  { %v10352_v52 = vpop.eup %10351  ;;  %v1177_v53 = vpop.permute.xlu1 %1176 }
 0x605   :  { %9063 = vmatmul.mubr.msk.f32.vlgmr.msra.gmra.mrb[22].mxu0 %vm778_vm1, %v1177_v53  ;;  %v997_v54 = vmul.f32 %v10352_v52, %v10344_v13 }
 0x607   :  { %9055 = vmatprep.mubr.msk.f32.mxu1 %vm955_vm3, %v997_v54 }
 0x608   :  { %v1268_v58 = vpop.permute.xlu1 %1267 }
 0x60b   :  { %v10354_v55 = vpop.eup %10353 }
 0x60c   :  { %v999_v56 = vmul.f32 %v10354_v55, %v10346_v15 }
 0x60e   :  { %9056 = vmatmul.mubr.msk.f32.vlgmr.msra.gmra.mrb[20].mxu1 %vm955_vm3, %v999_v56 }
 0x60f   :  { %9491 = vmatpush3.bf16.xpose.msk.msra.mxu1 %vm11190_vm2, %v9486_v48  ;;  %9069 = vmatprep.mubr.msk.f32.mxu1 %vm778_vm1, %v1266_v57 }
 0x616   :  { %9070 = vmatmul.mubr.msk.f32.vlgmr.msra.gmra.mrb[22].mxu1 %vm778_vm1, %v1268_v58 }
 0x6a6   :  { %v11246_v59 = vpop.f32.mrb[18].mxu1 }
 0x6a7   :  { %v11248_v60 = vpop.f32.mrb[19].mxu1 }
 0x6d8   :  { %v9064_v61 = vpop.f32.mrb[22].mxu0 }
 0x6d9   :  { %v1357_v62 = vmul.f32 0.35355338, %v9064_v61  ;;  %v1256_v63 = vpop.f32.mrb[23].mxu0 }
 0x6da   :  { %v1356_v0 = vmul.f32 0.35355338, %v1256_v63 }
 0x6db   :  { %v1363_v1 = vsel %vm955_vm3, %v1357_v62, -inf }
 0x6dc   :  { %1364 = vmax.xlane.f32.xlu1 %v1363_v1  ;;  %v1360_v2 = vsel %vm955_vm3, %v1356_v0, -inf }
 0x6dd   :  { %1361 = vmax.xlane.f32.xlu0 %v1360_v2 }
 0x6e1   :  { %v11252_v3 = vpop.f32.mrb[20].mxu1 }
 0x6e2   :  { %v11254_v4 = vpop.f32.mrb[21].mxu1 }
 0x6e9   :  { %v9071_v5 = vpop.f32.mrb[22].mxu1 }
 0x6ea   :  { %v1347_v6 = vpop.f32.mrb[23].mxu1  ;;  %v1359_v8 = vmul.f32 0.35355338, %v9071_v5 }
 0x6eb   :  { %v1358_v7 = vmul.f32 0.35355338, %v1347_v6 }
 0x6ec   :  { %v1369_v10 = vsel %vm955_vm3, %v1359_v8, -inf }
 0x6ed   :  { %v1366_v9 = vsel %vm955_vm3, %v1358_v7, -inf }
 0x6ee   :  { %1367 = vmax.xlane.f32.xlu0 %v1366_v9 }
 0x6f2   :  { %1370 = vmax.xlane.f32.xlu0 %v1369_v10 }
 0x769   :  { %v1365_v12 = vpop.xlane.xlu1 %1364 }
 0x76a   :  { %v1373_v13 = vsub.f32 %v1357_v62, %v1365_v12  ;;  %v1362_v14 = vpop.xlane.xlu0 %1361 }
 0x76b   :  { %v1372_v15 = vsub.f32 %v1356_v0, %v1362_v14 }
 0x76c   :  { %v1378_v16 = vmul.f32 1.442695, %v1373_v13 }
 0x76d   :  { %v1376_v17 = vmul.f32 1.442695, %v1372_v15 }
 0x76e   :  { %10355 = vpow2.f32 %v1378_v16 }
 0x76f   :  { %10357 = vpow2.f32 %v1376_v17 }
 0x778   :  { %v10356_v18 = vpop.eup %10355 }
 0x779   :  { %v10358_v19 = vpop.eup %10357  ;;  %v1387_v21 = vsel %vm955_vm3, %v10356_v18, 0.0 }
 0x77a   :  { %1388 = vadd.xlane.f32.xlu1 %v1387_v21  ;;  %v1384_v22 = vsel %vm955_vm3, %v10358_v19, 0.0 }
 0x77b   :  { %1385 = vadd.xlane.f32.xlu0 %v1384_v22  ;;  %v1368_v23 = vpop.xlane.xlu0 %1367 }
 0x77c   :  { %v1374_v24 = vsub.f32 %v1358_v7, %v1368_v23 }
 0x77e   :  { %v1380_v25 = vmul.f32 1.442695, %v1374_v24 }
 0x77f   :  { %v1371_v26 = vpop.xlane.xlu0 %1370 }
 0x780   :  { %v1375_v27 = vsub.f32 %v1359_v8, %v1371_v26  ;;  %10359 = vpow2.f32 %v1380_v25 }
 0x782   :  { %v1382_v28 = vmul.f32 1.442695, %v1375_v27 }
 0x784   :  { %10361 = vpow2.f32 %v1382_v28 }
 0x78a   :  { %v10360_v30 = vpop.eup %10359 }
 0x78b   :  { %10287 = vrot.lane.b32.xlu1 %v11184_v38, %s14096_s12  ;;  %v1390_v31 = vsel %vm955_vm3, %v10360_v30, 0.0 }
 0x78e   :  { %v10362_v39 = vpop.eup %10361 }
 0x78f   :  { %10292 = vrot.lane.b32.xlu1 %v11172_v34, %s14094_s0  ;;  %v1393_v40 = vsel %vm955_vm3, %v10362_v39, 0.0 }
 0x791   :  { %10282 = vrot.lane.b32.xlu0 %v11172_v34, %s14096_s12 }
 0x793   :  { %10297 = vrot.lane.b32.xlu1 %v11184_v38, %s14094_s0  ;;  %s14146_s0 = sld [smem:[#allocation11_spill]] }
 0x7b0   :  { %1391 = vadd.xlane.f32.xlu0 %v1390_v31 }
 0x7b7   :  { %1394 = vadd.xlane.f32.xlu1 %v1393_v40 }
 0x7c6   :  { %1578 = vrot.lane.b32.xlu0 %v11166_v33, %s14092_s15 }
 0x7c8   :  { %1580 = vrot.lane.b32.xlu1 %v11164_v32, %s14092_s15 }
 0x7ca   :  { %1669 = vrot.lane.b32.xlu0 %v11178_v37, %s14092_s15 }
 0x7cc   :  { %1671 = vrot.lane.b32.xlu1 %v11176_v36, %s14092_s15  ;;  %s14145_s15 = sld [smem:[#allocation10_spill]] }
 0x807   :  { %v1389_v41 = vpop.xlane.xlu1 %1388 }
 0x808   :  { %10363 = vrcp.f32 %v1389_v41  ;;  %v1386_v43 = vpop.xlane.xlu0 %1385 }
 0x809   :  { %10365 = vrcp.f32 %v1386_v43 }
 0x80b   :  { %v10288_v44 = vpop.permute.xlu1 %10287 }
 0x80c   :  { %v10290_v45 = vunpack.i.h.bf16 %v10288_v44  ;;  %v10289_v46 = vunpack.i.l.bf16 %v10288_v44  ;;  %v10283_v47 = vpop.permute.xlu0 %10282 }
 0x80d   :  { %v10285_v48 = vunpack.i.h.bf16 %v10283_v47  ;;  %v10284_v49 = vunpack.i.l.bf16 %v10283_v47 }
 0x80e   :  { %v9496_v50 = vpack.c.bf16 %v10290_v45, %v10289_v46 }
 0x80f   :  { %v10293_v51 = vpop.permute.xlu1 %10292  ;;  %v9492_v52 = vpack.c.bf16 %v10285_v48, %v10284_v49 }
 0x810   :  { %v10295_v53 = vunpack.i.h.bf16 %v10293_v51  ;;  %v10294_v54 = vunpack.i.l.bf16 %v10293_v51  ;;  %9497 = vmatprep.subr.bf16.mxu1 %v9496_v50 }
 0x811   :  { %9493 = vmatprep.subr.bf16.mxu0 %v9492_v52  ;;  %9499 = vmatpush3.bf16.msra.mxu1 %v9496_v50 }
 0x812   :  { %v10364_v55 = vpop.eup %10363  ;;  %v9500_v56 = vpack.c.bf16 %v10295_v53, %v10294_v54  ;;  %9495 = vmatpush3.bf16.msra.mxu0 %v9492_v52 }
 0x813   :  { %v10366_v57 = vpop.eup %10365  ;;  %v10298_v58 = vpop.permute.xlu1 %10297  ;;  %v1399_v0 = vmul.f32 %v10364_v55, %v10356_v18 }
 0x814   :  { %v10300_v61 = vunpack.i.h.bf16 %v10298_v58  ;;  %v10299_v62 = vunpack.i.l.bf16 %v10298_v58  ;;  %9502 = vmatprep.subr.msk.bf16.mxu0 %vm11190_vm2, %v9500_v56  ;;  %v1397_v63 = vmul.f32 %v10366_v57, %v10358_v19 }
 0x816   :  { %v9506_v1 = vpack.c.bf16 %v10300_v61, %v10299_v62  ;;  %9076 = vmatprep.mubr.msk.f32.mxu0 %vm955_vm3, %v1397_v63 }
 0x817   :  { %9077 = vmatmul.mubr.msk.f32.vlgmr.msra.gmra.mrb[24].mxu0 %vm955_vm3, %v1399_v0 }
 0x818   :  { %9508 = vmatprep.subr.msk.bf16.mxu1 %vm11190_vm2, %v9506_v1 }
 0x81b   :  { %9505 = vmatpush3.bf16.xpose.msk.msra.mxu0 %vm11190_vm2, %v9500_v56 }
 0x83d   :  { %v1392_v2 = vpop.xlane.xlu0 %1391 }
 0x83e   :  { %10367 = vrcp.f32 %v1392_v2 }
 0x841   :  { %v1579_v5 = vpop.permute.xlu0 %1578 }
 0x842   :  { %9090 = vmatprep.mubr.msk.f32.mxu0 %vm778_vm1, %v1579_v5 }
 0x844   :  { %v1395_v6 = vpop.xlane.xlu1 %1394 }
 0x845   :  { %10369 = vrcp.f32 %v1395_v6  ;;  %v1670_v13 = vpop.permute.xlu0 %1669 }
 0x848   :  { %v10368_v7 = vpop.eup %10367  ;;  %v1581_v8 = vpop.permute.xlu1 %1580 }
 0x849   :  { %9091 = vmatmul.mubr.msk.f32.vlgmr.msra.gmra.mrb[26].mxu0 %vm778_vm1, %v1581_v8  ;;  %v1401_v9 = vmul.f32 %v10368_v7, %v10360_v30 }
 0x84b   :  { %9083 = vmatprep.mubr.msk.f32.mxu1 %vm955_vm3, %v1401_v9 }
 0x84c   :  { %v1672_v14 = vpop.permute.xlu1 %1671 }
 0x84f   :  { %v10370_v10 = vpop.eup %10369 }
 0x850   :  { %v1403_v12 = vmul.f32 %v10370_v10, %v10362_v39 }
 0x852   :  { %9084 = vmatmul.mubr.msk.f32.vlgmr.msra.gmra.mrb[24].mxu1 %vm955_vm3, %v1403_v12 }
 0x853   :  { %9511 = vmatpush3.bf16.xpose.msk.msra.mxu1 %vm11190_vm2, %v9506_v1  ;;  %9097 = vmatprep.mubr.msk.f32.mxu1 %vm778_vm1, %v1670_v13 }
 0x85a   :  { %9098 = vmatmul.mubr.msk.f32.vlgmr.msra.gmra.mrb[26].mxu1 %vm778_vm1, %v1672_v14 }
 0x8ea   :  { %v11294_v15 = vpop.f32.mrb[24].mxu0 }
 0x8eb   :  { %v11296_v16 = vpop.f32.mrb[25].mxu0 }
 0x91c   :  { %v9092_v17 = vpop.f32.mrb[26].mxu0 }
 0x91d   :  { %v1761_v18 = vmul.f32 0.35355338, %v9092_v17  ;;  %v1660_v19 = vpop.f32.mrb[27].mxu0 }
 0x91e   :  { %v1760_v21 = vmul.f32 0.35355338, %v1660_v19 }
 0x91f   :  { %v1767_v22 = vsel %vm955_vm3, %v1761_v18, -inf }
 0x920   :  { %1768 = vmax.xlane.f32.xlu1 %v1767_v22  ;;  %v1764_v23 = vsel %vm955_vm3, %v1760_v21, -inf }
 0x921   :  { %1765 = vmax.xlane.f32.xlu0 %v1764_v23 }
 0x925   :  { %v11300_v24 = vpop.f32.mrb[24].mxu1 }
 0x926   :  { %v11302_v25 = vpop.f32.mrb[25].mxu1 }
 0x92d   :  { %v9099_v26 = vpop.f32.mrb[26].mxu1 }
 0x92e   :  { %v1751_v27 = vpop.f32.mrb[27].mxu1  ;;  %v1763_v30 = vmul.f32 0.35355338, %v9099_v26 }
 0x92f   :  { %v1762_v28 = vmul.f32 0.35355338, %v1751_v27 }
 0x930   :  { %v1773_v39 = vsel %vm955_vm3, %v1763_v30, -inf }
 0x931   :  { %v1770_v31 = vsel %vm955_vm3, %v1762_v28, -inf }
 0x932   :  { %1771 = vmax.xlane.f32.xlu0 %v1770_v31 }
 0x936   :  { %1774 = vmax.xlane.f32.xlu0 %v1773_v39 }
 0x9ad   :  { %v1769_v40 = vpop.xlane.xlu1 %1768 }
 0x9ae   :  { %v1777_v41 = vsub.f32 %v1761_v18, %v1769_v40  ;;  %v1766_v43 = vpop.xlane.xlu0 %1765 }
 0x9af   :  { %v1776_v44 = vsub.f32 %v1760_v21, %v1766_v43 }
 0x9b0   :  { %v1782_v45 = vmul.f32 1.442695, %v1777_v41 }
 0x9b1   :  { %v1780_v46 = vmul.f32 1.442695, %v1776_v44 }
 0x9b2   :  { %10371 = vpow2.f32 %v1782_v45 }
 0x9b3   :  { %10373 = vpow2.f32 %v1780_v46 }
 0x9bc   :  { %v10372_v47 = vpop.eup %10371 }
 0x9bd   :  { %v10374_v48 = vpop.eup %10373  ;;  %v1791_v49 = vsel %vm955_vm3, %v10372_v47, 0.0 }
 0x9be   :  { %1792 = vadd.xlane.f32.xlu1 %v1791_v49  ;;  %v1788_v50 = vsel %vm955_vm3, %v10374_v48, 0.0 }
 0x9bf   :  { %1789 = vadd.xlane.f32.xlu0 %v1788_v50  ;;  %v1772_v51 = vpop.xlane.xlu0 %1771 }
 0x9c0   :  { %v1778_v52 = vsub.f32 %v1762_v28, %v1772_v51 }
 0x9c2   :  { %v1784_v53 = vmul.f32 1.442695, %v1778_v52 }
 0x9c3   :  { %v1775_v54 = vpop.xlane.xlu0 %1774 }
 0x9c4   :  { %v1779_v55 = vsub.f32 %v1763_v30, %v1775_v54  ;;  %10375 = vpow2.f32 %v1784_v53 }
 0x9c6   :  { %v1786_v56 = vmul.f32 1.442695, %v1779_v55 }
 0x9c8   :  { %10377 = vpow2.f32 %v1786_v56 }
 0x9ce   :  { %v10376_v57 = vpop.eup %10375 }
 0x9cf   :  { %10307 = vrot.lane.b32.xlu1 %v11184_v38, %s14090_s29  ;;  %v1794_v58 = vsel %vm955_vm3, %v10376_v57, 0.0 }
 0x9d2   :  { %v10378_v61 = vpop.eup %10377 }
 0x9d3   :  { %10312 = vrot.lane.b32.xlu1 %v11172_v34, %s14088_s2  ;;  %v1797_v62 = vsel %vm955_vm3, %v10378_v61, 0.0 }
 0x9d5   :  { %10302 = vrot.lane.b32.xlu0 %v11172_v34, %s14090_s29  ;;  %s14143_s29 = sld [smem:[#allocation8_spill]] }
 0x9d7   :  { %10317 = vrot.lane.b32.xlu1 %v11184_v38, %s14088_s2  ;;  %s14104_s2 = smov 24  }
 0x9f4   :  { %1795 = vadd.xlane.f32.xlu0 %v1794_v58 }
 0x9fb   :  { %1798 = vadd.xlane.f32.xlu1 %v1797_v62 }
 0xa0a   :  { %1982 = vrot.lane.b32.xlu0 %v11166_v33, %s14084_s10 }
 0xa0c   :  { %1984 = vrot.lane.b32.xlu1 %v11164_v32, %s14084_s10 }
 0xa0e   :  { %2073 = vrot.lane.b32.xlu0 %v11178_v37, %s14084_s10 }
 0xa10   :  { %2075 = vrot.lane.b32.xlu1 %v11176_v36, %s14084_s10  ;;  %s14106_s10 = smov 16  }
 0xa4b   :  { %v1793_v63 = vpop.xlane.xlu1 %1792 }
 0xa4c   :  { %10379 = vrcp.f32 %v1793_v63  ;;  %v1790_v0 = vpop.xlane.xlu0 %1789 }
 0xa4d   :  { %10381 = vrcp.f32 %v1790_v0 }
 0xa4f   :  { %v10308_v1 = vpop.permute.xlu1 %10307 }
 0xa50   :  { %v10310_v2 = vunpack.i.h.bf16 %v10308_v1  ;;  %v10309_v5 = vunpack.i.l.bf16 %v10308_v1  ;;  %v10303_v6 = vpop.permute.xlu0 %10302 }
 0xa51   :  { %v10305_v7 = vunpack.i.h.bf16 %v10303_v6  ;;  %v10304_v8 = vunpack.i.l.bf16 %v10303_v6 }
 0xa52   :  { %v9516_v33 = vpack.c.bf16 %v10310_v2, %v10309_v5 }
 0xa53   :  { %v10313_v9 = vpop.permute.xlu1 %10312  ;;  %v9512_v10 = vpack.c.bf16 %v10305_v7, %v10304_v8 }
 0xa54   :  { %v10315_v32 = vunpack.i.h.bf16 %v10313_v9  ;;  %v10314_v12 = vunpack.i.l.bf16 %v10313_v9  ;;  %9517 = vmatprep.subr.bf16.mxu1 %v9516_v33 }
 0xa55   :  { %9513 = vmatprep.subr.bf16.mxu0 %v9512_v10  ;;  %9519 = vmatpush3.bf16.msra.mxu1 %v9516_v33 }
 0xa56   :  { %v10380_v37 = vpop.eup %10379  ;;  %v9520_v36 = vpack.c.bf16 %v10315_v32, %v10314_v12  ;;  %9515 = vmatpush3.bf16.msra.mxu0 %v9512_v10 }
 0xa57   :  { %v10382_v13 = vpop.eup %10381  ;;  %v10318_v14 = vpop.permute.xlu1 %10317  ;;  %v1803_v21 = vmul.f32 %v10380_v37, %v10372_v47 }
 0xa58   :  { %v10320_v17 = vunpack.i.h.bf16 %v10318_v14  ;;  %v10319_v18 = vunpack.i.l.bf16 %v10318_v14  ;;  %9522 = vmatprep.subr.msk.bf16.mxu0 %vm11190_vm2, %v9520_v36  ;;  %v1801_v19 = vmul.f32 %v10382_v13, %v10374_v48 }
 0xa5a   :  { %v9526_v22 = vpack.c.bf16 %v10320_v17, %v10319_v18  ;;  %9104 = vmatprep.mubr.msk.f32.mxu0 %vm955_vm3, %v1801_v19 }
 0xa5b   :  { %9105 = vmatmul.mubr.msk.f32.vlgmr.msra.gmra.mrb[28].mxu0 %vm955_vm3, %v1803_v21 }
 0xa5c   :  { %9528 = vmatprep.subr.msk.bf16.mxu1 %vm11190_vm2, %v9526_v22 }
 0xa5f   :  { %9525 = vmatpush3.bf16.xpose.msk.msra.mxu0 %vm11190_vm2, %v9520_v36 }
 0xa81   :  { %v1796_v23 = vpop.xlane.xlu0 %1795 }
 0xa82   :  { %10383 = vrcp.f32 %v1796_v23 }
 0xa85   :  { %v1983_v26 = vpop.permute.xlu0 %1982 }
 0xa86   :  { %9118 = vmatprep.mubr.msk.f32.mxu0 %vm778_vm1, %v1983_v26 }
 0xa88   :  { %v1799_v27 = vpop.xlane.xlu1 %1798 }
 0xa89   :  { %10385 = vrcp.f32 %v1799_v27  ;;  %v2074_v41 = vpop.permute.xlu0 %2073 }
 0xa8c   :  { %v10384_v28 = vpop.eup %10383  ;;  %v1985_v30 = vpop.permute.xlu1 %1984 }
 0xa8d   :  { %9119 = vmatmul.mubr.msk.f32.vlgmr.msra.gmra.mrb[30].mxu0 %vm778_vm1, %v1985_v30  ;;  %v1805_v31 = vmul.f32 %v10384_v28, %v10376_v57 }
 0xa8f   :  { %9111 = vmatprep.mubr.msk.f32.mxu1 %vm955_vm3, %v1805_v31 }
 0xa90   :  { %v2076_v43 = vpop.permute.xlu1 %2075 }
 0xa93   :  { %v10386_v39 = vpop.eup %10385 }
 0xa94   :  { %v1807_v40 = vmul.f32 %v10386_v39, %v10378_v61 }
 0xa96   :  { %9112 = vmatmul.mubr.msk.f32.vlgmr.msra.gmra.mrb[28].mxu1 %vm955_vm3, %v1807_v40 }
 0xa97   :  { %9531 = vmatpush3.bf16.xpose.msk.msra.mxu1 %vm11190_vm2, %v9526_v22  ;;  %9125 = vmatprep.mubr.msk.f32.mxu1 %vm778_vm1, %v2074_v41 }
 0xa9e   :  { %9126 = vmatmul.mubr.msk.f32.vlgmr.msra.gmra.mrb[30].mxu1 %vm778_vm1, %v2076_v43 }
 0xb2e   :  { %v9106_v44 = vpop.f32.mrb[28].mxu0 }
 0xb2f   :  { %v1886_v45 = vpop.f32.mrb[29].mxu0 }
 0xb60   :  { %v9120_v46 = vpop.f32.mrb[30].mxu0 }
 0xb61   :  { %v2165_v47 = vmul.f32 0.35355338, %v9120_v46  ;;  %v2064_v48 = vpop.f32.mrb[31].mxu0  ;;  %v2447_v46 = vld [vmem:[%s14143_s29] sm:$0xff] }
 0xb62   :  { %v2164_v49 = vmul.f32 0.35355338, %v2064_v48  ;;  %v2449_v48 = vld [vmem:[%s14143_s29 + $0x10] sm:$0xff] }
 0xb63   :  { %v2171_v50 = vsel %vm955_vm3, %v2165_v47, -inf }
 0xb64   :  { %2172 = vmax.xlane.f32.xlu1 %v2171_v50  ;;  %v2168_v51 = vsel %vm955_vm3, %v2164_v49, -inf  ;;  %v2450_v50 = vld [vmem:[%s14143_s29 + $0x18] sm:$0xff] }
 0xb65   :  { %2169 = vmax.xlane.f32.xlu0 %v2168_v51  ;;  %v9544_v51 = vpack.c.bf16 %v2450_v50, %v2449_v48 }
 0xb69   :  { %v11344_v52 = vpop.f32.mrb[28].mxu1 }
 0xb6a   :  { %v11346_v42 = vpop.f32.mrb[29].mxu1 }
 0xb71   :  { %v9127_v53 = vpop.f32.mrb[30].mxu1 }
 0xb72   :  { %v2155_v54 = vpop.f32.mrb[31].mxu1  ;;  %v2167_v56 = vmul.f32 0.35355338, %v9127_v53 }
 0xb73   :  { %v2166_v55 = vmul.f32 0.35355338, %v2155_v54 }
 0xb74   :  { %v2177_v58 = vsel %vm955_vm3, %v2167_v56, -inf }
 0xb75   :  { %v2174_v57 = vsel %vm955_vm3, %v2166_v55, -inf }
 0xb76   :  { %2175 = vmax.xlane.f32.xlu0 %v2174_v57 }
 0xb7a   :  { %2178 = vmax.xlane.f32.xlu0 %v2177_v58 }
 0xbf1   :  { %v2173_v61 = vpop.xlane.xlu1 %2172 }
 0xbf2   :  { %v2181_v62 = vsub.f32 %v2165_v47, %v2173_v61  ;;  %v2170_v63 = vpop.xlane.xlu0 %2169  ;;  %v2448_v47 = vld [vmem:[%s14143_s29 + $0x8] sm:$0xff] }
 0xbf3   :  { %v2180_v0 = vsub.f32 %v2164_v49, %v2170_v63  ;;  %v9540_v49 = vpack.c.bf16 %v2448_v47, %v2447_v46 }
 0xbf4   :  { %v2186_v1 = vmul.f32 1.442695, %v2181_v62 }
 0xbf5   :  { %v2184_v2 = vmul.f32 1.442695, %v2180_v0 }
 0xbf6   :  { %10387 = vpow2.f32 %v2186_v1 }
 0xbf7   :  { %10389 = vpow2.f32 %v2184_v2 }
 0xc00   :  { %v10388_v5 = vpop.eup %10387 }
 0xc01   :  { %v10390_v6 = vpop.eup %10389  ;;  %v2195_v7 = vsel %vm955_vm3, %v10388_v5, 0.0 }
 0xc02   :  { %2196 = vadd.xlane.f32.xlu1 %v2195_v7  ;;  %v2192_v8 = vsel %vm955_vm3, %v10390_v6, 0.0 }
 0xc03   :  { %v2176_v33 = vpop.xlane.xlu0 %2175  ;;  %2193 = vadd.xlane.f32.xlu0 %v2192_v8 }
 0xc04   :  { %v2182_v9 = vsub.f32 %v2166_v55, %v2176_v33 }
 0xc06   :  { %v2188_v10 = vmul.f32 1.442695, %v2182_v9 }
 0xc07   :  { %v2179_v32 = vpop.xlane.xlu0 %2178 }
 0xc08   :  { %10391 = vpow2.f32 %v2188_v10  ;;  %v2183_v12 = vsub.f32 %v2167_v56, %v2179_v32 }
 0xc0a   :  { %v2190_v37 = vmul.f32 1.442695, %v2183_v12 }
 0xc0c   :  { %10393 = vpow2.f32 %v2190_v37 }
 0xc12   :  { %v10392_v36 = vpop.eup %10391 }
 0xc13   :  { %v2198_v13 = vsel %vm955_vm3, %v10392_v36, 0.0 }
 0xc14   :  { %2199 = vadd.xlane.f32.xlu0 %v2198_v13 }
 0xc16   :  { %v10394_v14 = vpop.eup %10393 }
 0xc17   :  { %v2201_v17 = vsel %vm955_vm3, %v10394_v14, 0.0 }
 0xc18   :  { %2202 = vadd.xlane.f32.xlu1 %v2201_v17 }
 0xc29   :  { %10327 = vrot.lane.b32.xlu1 %v11184_v38, %s14086_s1 }
 0xc2a   :  { %10322 = vrot.lane.b32.xlu0 %v11172_v34, %s14086_s1  ;;  %s14147_s1 = sld [smem:[#allocation12_spill]] }
 0xc2d   :  { %2390 = vrot.lane.b32.xlu1 %v11296_v16, %s14108_s6 }
 0xc2e   :  { %2406 = vrot.lane.b32.xlu0 %v1886_v45, %s14106_s10 }
 0xc31   :  { %2392 = vrot.lane.b32.xlu1 %v11294_v15, %s14108_s6 }
 0xc35   :  { %2408 = vrot.lane.b32.xlu1 %v9106_v44, %s14106_s10 }
 0xc8f   :  { %v2197_v21 = vpop.xlane.xlu1 %2196 }
 0xc90   :  { %v2194_v18 = vpop.xlane.xlu0 %2193 }
 0xc91   :  { %10395 = vrcp.f32 %v2194_v18 }
 0xc92   :  { %10397 = vrcp.f32 %v2197_v21 }
 0xc9b   :  { %v10396_v19 = vpop.eup %10395 }
 0xc9c   :  { %v2205_v38 = vmul.f32 %v10396_v19, %v10390_v6  ;;  %v10398_v28 = vpop.eup %10397 }
 0xc9d   :  { %v2207_v40 = vmul.f32 %v10398_v28, %v10388_v5 }
 0xc9e   :  { %9132 = vmatprep.mubr.msk.f32.mxu0 %vm955_vm3, %v2205_v38 }
 0xca1   :  { %v2200_v34 = vpop.xlane.xlu0 %2199 }
 0xca2   :  { %10399 = vrcp.f32 %v2200_v34 }
 0xca5   :  { %v2203_v22 = vpop.xlane.xlu1 %2202  ;;  %v10323_v16 = vpop.permute.xlu0 %10322 }
 0xca6   :  { %10401 = vrcp.f32 %v2203_v22  ;;  %v10325_v23 = vunpack.i.h.bf16 %v10323_v16  ;;  %v10324_v26 = vunpack.i.l.bf16 %v10323_v16 }
 0xca8   :  { %v9532_v27 = vpack.c.bf16 %v10325_v23, %v10324_v26 }
 0xca9   :  { %v10328_v15 = vpop.permute.xlu1 %10327  ;;  %v2407_v62 = vpop.permute.xlu0 %2406 }
 0xcaa   :  { %v10330_v30 = vunpack.i.h.bf16 %v10328_v15  ;;  %v10329_v31 = vunpack.i.l.bf16 %v10328_v15  ;;  %9533 = vmatprep.subr.bf16.mxu0 %v9532_v27 }
 0xcab   :  { %9535 = vmatpush3.bf16.msra.mxu0 %v9532_v27 }
 0xcac   :  { %v10400_v39 = vpop.eup %10399  ;;  %v9536_v41 = vpack.c.bf16 %v10330_v30, %v10329_v31  ;;  %9541 = vmatprep.subr.bf16.mxu0 %v9540_v49 }
 0xcad   :  { %v2209_v43 = vmul.f32 %v10400_v39, %v10392_v36  ;;  %v2391_v57 = vpop.permute.xlu1 %2390 }
 0xcae   :  { %9133 = vmatmul.mubr.msk.f32.vlgmr.msra.gmra.mrb[32].mxu0 %vm955_vm3, %v2207_v40  ;;  %9537 = vmatprep.subr.bf16.mxu1 %v9536_v41 }
 0xcaf   :  { %9539 = vmatpush3.bf16.msra.mxu1 %v9536_v41  ;;  %9139 = vmatprep.mubr.msk.f32.mxu1 %vm955_vm3, %v2209_v43 }
 0xcb0   :  { %v10402_v44 = vpop.eup %10401  ;;  %9543 = vmatpush3.bf16.msra.mxu0 %v9540_v49 }
 0xcb1   :  { %v2211_v45 = vmul.f32 %v10402_v44, %v10394_v14  ;;  %9545 = vmatprep.subr.bf16.mxu0 %v9544_v51  ;;  %v2393_v58 = vpop.permute.xlu1 %2392 }
 0xcb3   :  { %9140 = vmatmul.mubr.msk.f32.vlgmr.msra.gmra.mrb[32].mxu1 %vm955_vm3, %v2211_v45 }
 0xcb4   :  { %9547 = vmatpush3.bf16.msra.mxu0 %v9544_v51 }
 0xcb5   :  { %v2409_v61 = vpop.permute.xlu1 %2408 }
 0xd81   :  { %v9134_v53 = vpop.f32.mrb[32].mxu0 }
 0xd82   :  { %2424 = vrot.lane.b32.xlu1 %v9134_v53, %s14104_s2  ;;  %v2290_v54 = vpop.f32.mrb[33].mxu0 }
 0xd83   :  { %2422 = vrot.lane.b32.xlu0 %v2290_v54, %s14104_s2  ;;  %v2637_v54 = vld [vmem:[%s14145_s15] sm:$0xff] }
 0xd86   :  { %v9141_v55 = vpop.f32.mrb[32].mxu1  ;;  %2396 = vrot.lane.b32.xlu1 %v11300_v24, %s14108_s6  ;;  %v2434_v24 = vsel %vm778_vm1, %v11248_v60, %v2391_v57  ;;  %v2639_v57 = vld [vmem:[%s14145_s15 + $0x10] sm:$0xff] }
 0xd87   :  { %v2377_v56 = vpop.f32.mrb[33].mxu1  ;;  %2394 = vrot.lane.b32.xlu0 %v11302_v25, %s14108_s6  ;;  %v2435_v25 = vsel %vm778_vm1, %v11246_v59, %v2393_v58  ;;  %v2640_v58 = vld [vmem:[%s14145_s15 + $0x18] sm:$0xff]  ;;  %s14150_s6 = smov 96  }
 0xd8a   :  { %2412 = vrot.lane.b32.xlu1 %v11344_v52, %s14106_s10  ;;  %v2438_v52 = vsel %vm955_vm3, %v2434_v24, %v2407_v62 }
 0xd8b   :  { %2410 = vrot.lane.b32.xlu0 %v11346_v42, %s14106_s10  ;;  %v2439_v42 = vsel %vm955_vm3, %v2435_v25, %v2409_v61  ;;  %v9552_v61 = vpack.c.bf16 %v2640_v58, %v2639_v57  ;;  %s14167_s10 = sld [smem:[#allocation18_spill]] }
 0xd8e   :  { %2428 = vrot.lane.b32.xlu1 %v9141_v55, %s14104_s2  ;;  %v2638_v55 = vld [vmem:[%s14145_s15 + $0x8] sm:$0xff] }
 0xd8f   :  { %2426 = vrot.lane.b32.xlu0 %v2377_v56, %s14104_s2  ;;  %v9548_v56 = vpack.c.bf16 %v2638_v55, %v2637_v54  ;;  %s14148_s2 = sld [smem:[#allocation13_spill]] }
 0xd91   :  { %9549 = vmatprep.subr.bf16.mxu1 %v9548_v56 }
 0xd92   :  { %9551 = vmatpush3.bf16.msra.mxu1 %v9548_v56 }
 0xd93   :  { %9553 = vmatprep.subr.bf16.mxu1 %v9552_v61 }
 0xd96   :  { %9555 = vmatpush3.bf16.msra.mxu1 %v9552_v61 }
 0xdf4   :  { %v2425_v63 = vpop.permute.xlu1 %2424 }
 0xdf5   :  { %v2423_v0 = vpop.permute.xlu0 %2422  ;;  %v2444_v2 = vsel %vm2442_vm4, %v2439_v42, %v2425_v63 }
 0xdf6   :  { %v2443_v1 = vsel %vm2442_vm4, %v2438_v52, %v2423_v0 }
 0xdf7   :  { %9150 = vmatprep.mubr.msk.f32.mxu0 %vm597_vm0, %v2443_v1 }
 0xdf8   :  { %v2397_v5 = vpop.permute.xlu1 %2396  ;;  %9151 = vmatmul.mubr.msk.f32.vlgmr.msra.gmra.mrb[34].mxu0 %vm597_vm0, %v2444_v2 }
 0xdf9   :  { %v2395_v60 = vpop.permute.xlu0 %2394  ;;  %v2437_v33 = vsel %vm778_vm1, %v11252_v3, %v2397_v5  ;;  %v8042_v5 = vld [vmem:[%s14146_s0] ss:$0 sm:$0xff] }
 0xdfa   :  { %v2436_v59 = vsel %vm778_vm1, %v11254_v4, %v2395_v60  ;;  %v8041_v4 = vld [vmem:[%s14144_s11] ss:$0 sm:$0xff] }
 0xdfc   :  { %v2413_v6 = vpop.permute.xlu1 %2412 }
 0xdfd   :  { %v2411_v7 = vpop.permute.xlu0 %2410  ;;  %v2441_v32 = vsel %vm955_vm3, %v2437_v33, %v2413_v6 }
 0xdfe   :  { %v2440_v9 = vsel %vm955_vm3, %v2436_v59, %v2411_v7 }
 0xe00   :  { %v2429_v8 = vpop.permute.xlu1 %2428 }
 0xe01   :  { %v2427_v10 = vpop.permute.xlu0 %2426  ;;  %v2446_v37 = vsel %vm2442_vm4, %v2441_v32, %v2429_v8 }
 0xe02   :  { %v2445_v12 = vsel %vm2442_vm4, %v2440_v9, %v2427_v10  ;;  %v8043_v9 = vld [vmem:[%s14147_s1] ss:$0 sm:$0xff] }
 0xe03   :  { %9153 = vmatprep.mubr.msk.f32.mxu0 %vm597_vm0, %v2445_v12 }
 0xe04   :  { %9154 = vmatmul.mubr.msk.f32.gmra.mrb[36].mxu0 %vm597_vm0, %v2446_v37 }
 0xecb   :  { %v9152_v36 = vpop.f32.mrb[34].mxu0 }
 0xecc   :  { %v2549_v3 = vadd.f32 %v9152_v36, %v11122_v20  ;;  %v2529_v13 = vpop.f32.mrb[35].mxu0 }
 0xecd   :  { %v2548_v14 = vadd.f32 %v2529_v13, %v11118_v11 }
 0xece   :  { %v11417_v17 = vadd.f32 %v8041_v4, %v2549_v3 }
 0xecf   :  { %v11419_v18 = vadd.f32 %v8041_v4, %v2548_v14 }
 0xed0   :  { %v2568_v19 = vsel %vm597_vm0, %v11417_v17, 0.0 }
 0xed1   :  { %2569 = vadd.xlane.f32.xlu1 %v2568_v19  ;;  %v2565_v21 = vsel %vm597_vm0, %v11419_v18, 0.0 }
 0xed2   :  { %2566 = vadd.xlane.f32.xlu0 %v2565_v21 }
 0xed7   :  { %v9155_v38 = vpop.f32.mrb[36].mxu0 }
 0xed8   :  { %v2539_v34 = vpop.f32.mrb[37].mxu0  ;;  %v2551_v22 = vadd.f32 %v9155_v38, %v11130_v35 }
 0xed9   :  { %v2550_v20 = vadd.f32 %v2539_v34, %v11126_v29 }
 0xeda   :  { %v11429_v11 = vadd.f32 %v8041_v4, %v2551_v22  ;;  %v2781_v22 = vld [vmem:[%s14148_s2] sm:$0xff] }
 0xedb   :  { %v11427_v16 = vadd.f32 %v8041_v4, %v2550_v20  ;;  %v2782_v20 = vld [vmem:[%s14148_s2 + $0x8] sm:$0xff] }
 0xedc   :  { %v2574_v26 = vsel %vm597_vm0, %v11429_v11, 0.0 }
 0xedd   :  { %v2571_v23 = vsel %vm597_vm0, %v11427_v16, 0.0 }
 0xede   :  { %2572 = vadd.xlane.f32.xlu0 %v2571_v23  ;;  %v9556_v23 = vpack.c.bf16 %v2782_v20, %v2781_v22 }
 0xee0   :  { %9557 = vmatprep.subr.bf16.mxu0 %v9556_v23 }
 0xee1   :  { %9559 = vmatpush3.bf16.msra.mxu0 %v9556_v23 }
 0xee2   :  { %2575 = vadd.xlane.f32.xlu0 %v2574_v26  ;;  %v2783_v26 = vld [vmem:[%s14148_s2 + $0x10] sm:$0xff] }
 0xf5e   :  { %v2570_v27 = vpop.xlane.xlu1 %2569 }
 0xf5f   :  { %v2578_v28 = vmul.f32 0.03125, %v2570_v27  ;;  %v2567_v15 = vpop.xlane.xlu0 %2566  ;;  %v2784_v27 = vld [vmem:[%s14148_s2 + $0x18] sm:$0xff] }
 0xf60   :  { %v2577_v30 = vmul.f32 0.03125, %v2567_v15  ;;  %v2785_v15 = vld [vmem:[%s14148_s2 + $0x20] sm:$0xff] }
 0xf61   :  { %v2582_v35 = vsub.f32 %v11417_v17, %v2578_v28  ;;  %v9560_v28 = vpack.c.bf16 %v2784_v27, %v2783_v26 }
 0xf62   :  { %v2581_v29 = vsub.f32 %v11419_v18, %v2577_v30  ;;  %v2786_v30 = vld [vmem:[%s14148_s2 + $0x28] sm:$0xff] }
 0xf63   :  { %v2586_v31 = vmul.f32 %v2582_v35, %v2582_v35  ;;  %9561 = vmatprep.subr.bf16.mxu0 %v9560_v28 }
 0xf64   :  { %v2585_v39 = vmul.f32 %v2581_v29, %v2581_v29  ;;  %9563 = vmatpush3.bf16.msra.mxu0 %v9560_v28 }
 0xf65   :  { %v2592_v40 = vsel %vm597_vm0, %v2586_v31, 0.0  ;;  %v2788_v31 = vld [vmem:[%s14148_s2 + $0x38] sm:$0xff] }
 0xf66   :  { %2593 = vadd.xlane.f32.xlu1 %v2592_v40  ;;  %v2589_v41 = vsel %vm597_vm0, %v2585_v39, 0.0  ;;  %v8044_v40 = vld [vmem:[%s14149_s24] ss:$0 sm:$0xff] }
 0xf67   :  { %2590 = vadd.xlane.f32.xlu0 %v2589_v41 }
 0xf6b   :  { %v2573_v43 = vpop.xlane.xlu0 %2572 }
 0xf6c   :  { %v2579_v44 = vmul.f32 0.03125, %v2573_v43 }
 0xf6e   :  { %v2583_v45 = vsub.f32 %v11427_v16, %v2579_v44 }
 0xf6f   :  { %v2576_v46 = vpop.xlane.xlu0 %2575 }
 0xf70   :  { %v2580_v47 = vmul.f32 0.03125, %v2576_v46  ;;  %v2587_v48 = vmul.f32 %v2583_v45, %v2583_v45 }
 0xf72   :  { %v2584_v49 = vsub.f32 %v11429_v11, %v2580_v47  ;;  %v2595_v50 = vsel %vm597_vm0, %v2587_v48, 0.0 }
 0xf73   :  { %2596 = vadd.xlane.f32.xlu0 %v2595_v50 }
 0xf74   :  { %v2588_v51 = vmul.f32 %v2584_v49, %v2584_v49 }
 0xf76   :  { %v2598_v53 = vsel %vm597_vm0, %v2588_v51, 0.0 }
 0xf77   :  { %2599 = vadd.xlane.f32.xlu1 %v2598_v53 }
 0xff3   :  { %v2594_v62 = vpop.xlane.xlu1 %2593 }
 0xff4   :  { %v2602_v24 = vmul.f32 0.03125, %v2594_v62  ;;  %v2591_v63 = vpop.xlane.xlu0 %2590 }
 0xff5   :  { %v2601_v25 = vmul.f32 0.03125, %v2591_v63 }
 0xff6   :  { %v2606_v52 = vadd.f32 1e-05, %v2602_v24 }
 0xff7   :  { %v2605_v0 = vadd.f32 1e-05, %v2601_v25 }
 0xff8   :  { %10403 = vrsqrt.f32 %v2606_v52 }
 0xff9   :  { %10405 = vrsqrt.f32 %v2605_v0 }
0x1000   :  { %v2597_v42 = vpop.xlane.xlu0 %2596 }
0x1001   :  { %v2603_v1 = vmul.f32 0.03125, %v2597_v42 }
0x1002   :  { %v10404_v2 = vpop.eup %10403 }
0x1003   :  { %v10406_v60 = vpop.eup %10405  ;;  %v2614_v6 = vmul.f32 %v10404_v2, %v2582_v35  ;;  %v2607_v7 = vadd.f32 1e-05, %v2603_v1  ;;  %v9564_v35 = vpack.c.bf16 %v2786_v30, %v2785_v15 }
0x1004   :  { %v2600_v59 = vpop.xlane.xlu1 %2599  ;;  %v2613_v8 = vmul.f32 %v10406_v60, %v2581_v29  ;;  %v2787_v29 = vld [vmem:[%s14148_s2 + $0x30] sm:$0xff] }
0x1005   :  { %10407 = vrsqrt.f32 %v2607_v7  ;;  %v2604_v33 = vmul.f32 0.03125, %v2600_v59  ;;  %v2624_v10 = vmul.f32 %v8042_v5, %v2614_v6  ;;  %9565 = vmatprep.subr.bf16.mxu0 %v9564_v35  ;;  %v9568_v39 = vpack.c.bf16 %v2788_v31, %v2787_v29 }
0x1006   :  { %v2623_v32 = vmul.f32 %v8042_v5, %v2613_v8  ;;  %9567 = vmatpush3.bf16.msra.mxu0 %v9564_v35 }
0x1007   :  { %v2608_v12 = vadd.f32 1e-05, %v2604_v33  ;;  %v2634_v36 = vadd.f32 %v8043_v9, %v2624_v10  ;;  %9569 = vmatprep.subr.bf16.mxu0 %v9568_v39 }
0x1008   :  { %v2633_v37 = vadd.f32 %v8043_v9, %v2623_v32 }
0x1009   :  { %10409 = vrsqrt.f32 %v2608_v12 }
0x100a   :  { %9164 = vmatprep.mubr.msk.f32.mxu1 %vm597_vm0, %v2633_v37  ;;  %9571 = vmatpush3.bf16.msra.mxu0 %v9568_v39 }
0x100b   :  { %9165 = vmatmul.mubr.msk.f32.vlgmr.msra.gmra.mrb[34].mxu1 %vm597_vm0, %v2634_v36 }
0x100f   :  { %v10408_v4 = vpop.eup %10407 }
0x1010   :  { %v2615_v3 = vmul.f32 %v10408_v4, %v2583_v45 }
0x1012   :  { %v2625_v13 = vmul.f32 %v8042_v5, %v2615_v3 }
0x1013   :  { %v10410_v14 = vpop.eup %10409 }
0x1014   :  { %v2635_v19 = vadd.f32 %v8043_v9, %v2625_v13  ;;  %v2616_v21 = vmul.f32 %v10410_v14, %v2584_v49 }
0x1016   :  { %9167 = vmatprep.mubr.msk.f32.mxu1 %vm597_vm0, %v2635_v19  ;;  %v2626_v38 = vmul.f32 %v8042_v5, %v2616_v21 }
0x1018   :  { %v2636_v34 = vadd.f32 %v8043_v9, %v2626_v38 }
0x101a   :  { %9168 = vmatmul.mubr.msk.f32.gmra.mrb[36].mxu1 %vm597_vm0, %v2636_v34  ;;  %v8053_v34 = vld [vmem:[%s14056_s16] ss:$0 sm:$0xff] }
0x10de   :  { %v9166_v41 = vpop.f32.mrb[34].mxu1 }
0x10df   :  { %v2732_v43 = vadd.f32 %v9166_v41, %v8044_v40  ;;  %v2726_v44 = vpop.f32.mrb[35].mxu1 }
0x10e0   :  { %v2727_v45 = vadd.f32 %v8044_v40, %v2726_v44 }
0x10e1   :  { %v2750_v46 = vmul.f32 0.044715, %v2732_v43  ;;  %v2746_v8 = vmul.f32 0.5, %v2732_v43 }
0x10e2   :  { %v2749_v47 = vmul.f32 0.044715, %v2727_v45  ;;  %v2745_v7 = vmul.f32 0.5, %v2727_v45 }
0x10e3   :  { %v2754_v48 = vmul.f32 %v2750_v46, %v2732_v43 }
0x10e4   :  { %v2753_v49 = vmul.f32 %v2749_v47, %v2727_v45 }
0x10e5   :  { %v2758_v50 = vmul.f32 %v2754_v48, %v2732_v43 }
0x10e6   :  { %v2757_v51 = vmul.f32 %v2753_v49, %v2727_v45 }
0x10e7   :  { %v2762_v53 = vadd.f32 %v2758_v50, %v2732_v43 }
0x10e8   :  { %v2761_v54 = vadd.f32 %v2757_v51, %v2727_v45 }
0x10e9   :  { %v2766_v55 = vmul.f32 0.7978846, %v2762_v53 }
0x10ea   :  { %v2765_v56 = vmul.f32 0.7978846, %v2761_v54 }
0x10eb   :  { %10411 = vtanh.f32 %v2766_v55 }
0x10ec   :  { %10413 = vtanh.f32 %v2765_v56 }
0x10ed   :  { %v9169_v57 = vpop.f32.mrb[36].mxu1 }
0x10ee   :  { %v2742_v58 = vadd.f32 %v9169_v57, %v8044_v40  ;;  %v2736_v61 = vpop.f32.mrb[37].mxu1 }
0x10ef   :  { %v2737_v62 = vadd.f32 %v8044_v40, %v2736_v61 }
0x10f0   :  { %v2752_v24 = vmul.f32 0.044715, %v2742_v58  ;;  %v2748_v13 = vmul.f32 0.5, %v2742_v58 }
0x10f1   :  { %v2751_v63 = vmul.f32 0.044715, %v2737_v62  ;;  %v2747_v4 = vmul.f32 0.5, %v2737_v62 }
0x10f2   :  { %v2756_v25 = vmul.f32 %v2752_v24, %v2742_v58 }
0x10f3   :  { %v2755_v52 = vmul.f32 %v2751_v63, %v2737_v62 }
0x10f4   :  { %v2760_v0 = vmul.f32 %v2756_v25, %v2742_v58 }
0x10f5   :  { %v10412_v42 = vpop.eup %10411  ;;  %v2759_v1 = vmul.f32 %v2755_v52, %v2737_v62 }
0x10f6   :  { %v10414_v2 = vpop.eup %10413  ;;  %v2774_v5 = vadd.f32 1.0, %v10412_v42  ;;  %v2764_v60 = vadd.f32 %v2760_v0, %v2742_v58 }
0x10f7   :  { %v2763_v6 = vadd.f32 %v2759_v1, %v2737_v62  ;;  %v2773_v59 = vadd.f32 1.0, %v10414_v2 }
0x10f8   :  { %v2768_v33 = vmul.f32 0.7978846, %v2764_v60  ;;  %v2778_v32 = vmul.f32 %v2774_v5, %v2746_v8 }
0x10f9   :  { %v2777_v9 = vmul.f32 %v2773_v59, %v2745_v7  ;;  %v2767_v10 = vmul.f32 0.7978846, %v2763_v6 }
0x10fa   :  { %10415 = vtanh.f32 %v2768_v33  ;;  %v8054_v33 = vld [vmem:[%s14057_s17] ss:$0 sm:$0xff] }
0x10fb   :  { %9186 = vmatprep.mubr.msk.f32.mxu0 %vm2789_vm5, %v2777_v9  ;;  %10417 = vtanh.f32 %v2767_v10 }
0x10fc   :  { %9187 = vmatmul.mubr.msk.f32.vlgmr.msra.gmra.mrb[38].mxu0 %vm2789_vm5, %v2778_v32 }
0x1104   :  { %v10416_v12 = vpop.eup %10415 }
0x1105   :  { %v10418_v37 = vpop.eup %10417  ;;  %v2776_v36 = vadd.f32 1.0, %v10416_v12 }
0x1106   :  { %v2775_v3 = vadd.f32 1.0, %v10418_v37  ;;  %v8055_v37 = vld [vmem:[%s14058_s18] ss:$0 sm:$0xff]  ;;  %s14166_s18 = sld [smem:[#allocation17_spill]] }
0x1107   :  { %v2780_v19 = vmul.f32 %v2776_v36, %v2748_v13 }
0x1108   :  { %v2779_v14 = vmul.f32 %v2775_v3, %v2747_v4 }
0x110a   :  { %9189 = vmatprep.mubr.msk.f32.mxu0 %vm2789_vm5, %v2779_v14 }
0x110b   :  { %9190 = vmatmul.mubr.msk.f32.gmra.mrb[40].mxu0 %vm2789_vm5, %v2780_v19 }
0x11cf   :  { %v9188_v21 = vpop.f32.mrb[38].mxu0 }
0x11d0   :  { %v2868_v38 = vpop.f32.mrb[39].mxu0  ;;  %v2888_v22 = vadd.f32 %v9188_v21, %v11417_v17 }
0x11d1   :  { %v2887_v20 = vadd.f32 %v2868_v38, %v11419_v18 }
0x11d2   :  { %v2899_v27 = vadd.f32 %v8053_v34, %v2888_v22 }
0x11d3   :  { %v2898_v23 = vadd.f32 %v8053_v34, %v2887_v20 }
0x11d4   :  { %v2907_v28 = vsel %vm597_vm0, %v2899_v27, 0.0 }
0x11d5   :  { %v2904_v26 = vsel %vm597_vm0, %v2898_v23, 0.0 }
0x11d6   :  { %2905 = vadd.xlane.f32.xlu0 %v2904_v26 }
0x11da   :  { %2908 = vadd.xlane.f32.xlu0 %v2907_v28 }
0x11de   :  { %v9191_v15 = vpop.f32.mrb[40].mxu0 }
0x11df   :  { %v2878_v30 = vpop.f32.mrb[41].mxu0  ;;  %v2890_v35 = vadd.f32 %v9191_v15, %v11429_v11 }
0x11e0   :  { %v2889_v29 = vadd.f32 %v2878_v30, %v11427_v16 }
0x11e1   :  { %v2901_v17 = vadd.f32 %v8053_v34, %v2890_v35 }
0x11e2   :  { %v2900_v31 = vadd.f32 %v8053_v34, %v2889_v29 }
0x11e3   :  { %v2913_v18 = vsel %vm597_vm0, %v2901_v17, 0.0 }
0x11e4   :  { %v2910_v39 = vsel %vm597_vm0, %v2900_v31, 0.0 }
0x11e5   :  { %2911 = vadd.xlane.f32.xlu1 %v2910_v39 }
0x11e9   :  { %2914 = vadd.xlane.f32.xlu1 %v2913_v18 }
0x1263   :  { %v2906_v40 = vpop.xlane.xlu0 %2905 }
0x1264   :  { %v2916_v41 = vmul.f32 0.03125, %v2906_v40 }
0x1266   :  { %v2920_v43 = vsub.f32 %v2898_v23, %v2916_v41 }
0x1267   :  { %v2909_v44 = vpop.xlane.xlu0 %2908 }
0x1268   :  { %v2917_v45 = vmul.f32 0.03125, %v2909_v44  ;;  %v2924_v46 = vmul.f32 %v2920_v43, %v2920_v43  ;;  %v3031_v44 = vld [vmem:[%s14059_s21 + $0x38] sm:$0xff] }
0x126a   :  { %v2921_v47 = vsub.f32 %v2899_v27, %v2917_v45  ;;  %v2928_v48 = vsel %vm597_vm0, %v2924_v46, 0.0  ;;  %v3024_v46 = vld [vmem:[%s14059_s21] sm:$0xff] }
0x126b   :  { %2929 = vadd.xlane.f32.xlu0 %v2928_v48  ;;  %v3029_v48 = vld [vmem:[%s14059_s21 + $0x28] sm:$0xff] }
0x126c   :  { %v2925_v11 = vmul.f32 %v2921_v47, %v2921_v47 }
0x126e   :  { %v2931_v16 = vsel %vm597_vm0, %v2925_v11, 0.0 }
0x126f   :  { %2932 = vadd.xlane.f32.xlu0 %v2931_v16  ;;  %v3035_v16 = vld [vmem:[%s14059_s21 + $0x58] sm:$0xff] }
0x1272   :  { %v2912_v49 = vpop.xlane.xlu1 %2911 }
0x1273   :  { %v2918_v50 = vmul.f32 0.03125, %v2912_v49  ;;  %v3028_v49 = vld [vmem:[%s14059_s21 + $0x20] sm:$0xff] }
0x1275   :  { %v2922_v51 = vsub.f32 %v2900_v31, %v2918_v50  ;;  %v3034_v50 = vld [vmem:[%s14059_s21 + $0x50] sm:$0xff] }
0x1276   :  { %v2915_v53 = vpop.xlane.xlu1 %2914 }
0x1277   :  { %v2919_v54 = vmul.f32 0.03125, %v2915_v53  ;;  %v2926_v55 = vmul.f32 %v2922_v51, %v2922_v51  ;;  %v9590_v53 = vpack.c.bf16 %v3034_v50, %v3028_v49  ;;  %v3380_v49 = vld [vmem:[%s14060_s4 + $0x98] sm:$0xff] }
0x1279   :  { %v2923_v56 = vsub.f32 %v2901_v17, %v2919_v54  ;;  %v2934_v57 = vsel %vm597_vm0, %v2926_v55, 0.0  ;;  %v3037_v54 = vld [vmem:[%s14059_s21 + $0x68] sm:$0xff]  ;;  %v3043_v55 = vld [vmem:[%s14059_s21 + $0x98] sm:$0xff] }
0x127a   :  { %2935 = vadd.xlane.f32.xlu1 %v2934_v57  ;;  %v3036_v57 = vld [vmem:[%s14059_s21 + $0x60] sm:$0xff] }
0x127b   :  { %v2927_v58 = vmul.f32 %v2923_v56, %v2923_v56 }
0x127d   :  { %v2937_v61 = vsel %vm597_vm0, %v2927_v58, 0.0  ;;  %v3042_v58 = vld [vmem:[%s14059_s21 + $0x90] sm:$0xff] }
0x127e   :  { %2938 = vadd.xlane.f32.xlu1 %v2937_v61  ;;  %v3041_v61 = vld [vmem:[%s14059_s21 + $0x88] sm:$0xff] }
0x12f8   :  { %v2930_v62 = vpop.xlane.xlu0 %2929 }
0x12f9   :  { %v2940_v24 = vmul.f32 0.03125, %v2930_v62  ;;  %v9578_v62 = vpack.c.bf16 %v3042_v58, %v3036_v57  ;;  %v3415_v57 = vld [vmem:[%s14060_s4 + $0x1b0] sm:$0xff]  ;;  %v3416_v58 = vld [vmem:[%s14060_s4 + $0x1b8] sm:$0xff] }
0x12fb   :  { %v2944_v25 = vadd.f32 1e-05, %v2940_v24  ;;  %v3047_v24 = vld [vmem:[%s14059_s21 + $0xb8] sm:$0xff] }
0x12fc   :  { %v2933_v63 = vpop.xlane.xlu0 %2932 }
0x12fd   :  { %v2941_v52 = vmul.f32 0.03125, %v2933_v63  ;;  %10419 = vrsqrt.f32 %v2944_v25  ;;  %v3040_v63 = vld [vmem:[%s14059_s21 + $0x80] sm:$0xff]  ;;  %v3046_v25 = vld [vmem:[%s14059_s21 + $0xb0] sm:$0xff] }
0x12ff   :  { %v2945_v0 = vadd.f32 1e-05, %v2941_v52  ;;  %v9592_v52 = vpack.c.bf16 %v3047_v24, %v3041_v61  ;;  %v3364_v24 = vld [vmem:[%s14060_s4 + $0x18] sm:$0xff] }
0x1301   :  { %10421 = vrsqrt.f32 %v2945_v0  ;;  %v9594_v0 = vpack.c.bf16 %v3046_v25, %v3040_v63  ;;  %v3381_v63 = vld [vmem:[%s14060_s4 + $0xa0] sm:$0xff]  ;;  %v3382_v25 = vld [vmem:[%s14060_s4 + $0xa8] sm:$0xff] }
0x1307   :  { %v2936_v42 = vpop.xlane.xlu1 %2935  ;;  %v10420_v7 = vpop.eup %10419 }
0x1308   :  { %v2942_v1 = vmul.f32 0.03125, %v2936_v42  ;;  %v2952_v59 = vmul.f32 %v10420_v7, %v2920_v43  ;;  %v3025_v43 = vld [vmem:[%s14059_s21 + $0x8] sm:$0xff]  ;;  %v3027_v42 = vld [vmem:[%s14059_s21 + $0x18] sm:$0xff] }
0x1309   :  { %v9572_v45 = vpack.c.bf16 %v3031_v44, %v3025_v43  ;;  %v3413_v43 = vld [vmem:[%s14060_s4 + $0x1a0] sm:$0xff]  ;;  %v3414_v44 = vld [vmem:[%s14060_s4 + $0x1a8] sm:$0xff] }
0x130a   :  { %v2946_v2 = vadd.f32 1e-05, %v2942_v1  ;;  %v2962_v32 = vmul.f32 %v8054_v33, %v2952_v59  ;;  %v3033_v1 = vld [vmem:[%s14059_s21 + $0x48] sm:$0xff] }
0x130b   :  { %v2939_v5 = vpop.xlane.xlu1 %2938  ;;  %v10422_v8 = vpop.eup %10421  ;;  %9573 = vmatprep.subr.bf16.mxu1 %v9572_v45 }
0x130c   :  { %10423 = vrsqrt.f32 %v2946_v2  ;;  %v2943_v60 = vmul.f32 0.03125, %v2939_v5  ;;  %v2953_v12 = vmul.f32 %v10422_v8, %v2921_v47  ;;  %v2972_v3 = vadd.f32 %v8055_v37, %v2962_v32  ;;  %v3030_v47 = vld [vmem:[%s14059_s21 + $0x30] sm:$0xff] }
0x130d   :  { %v9574_v11 = vpack.c.bf16 %v3030_v47, %v3024_v46  ;;  %v9580_v2 = vpack.c.bf16 %v3033_v1, %v3027_v42  ;;  %v10487_v5 = vmov 0.0   ;;  %v3361_v47 = vld [vmem:[%s14060_s4] sm:$0xff]  ;;  %v3399_v42 = vld [vmem:[%s14060_s4 + $0x130] sm:$0xff]  ;;  %v3400_v1 = vld [vmem:[%s14060_s4 + $0x138] sm:$0xff] }
0x130e   :  { %v2947_v6 = vadd.f32 1e-05, %v2943_v60  ;;  %v2963_v19 = vmul.f32 %v8054_v33, %v2953_v12  ;;  %3150 = vmatprep.mubr.f32.mxu1 %v10487_v5  ;;  %3304 = vmatprep.mubr.f32.mxu0 %v10487_v5  ;;  %v3409_v60 = vld [vmem:[%s14060_s4 + $0x180] sm:$0xff] }
0x130f   :  { %9575 = vmatpush1.bf16.msra.mxu1 %v9574_v11 }
0x1310   :  { %10425 = vrsqrt.f32 %v2947_v6  ;;  %v2973_v22 = vadd.f32 %v8055_v37, %v2963_v19  ;;  %v3410_v6 = vld [vmem:[%s14060_s4 + $0x188] sm:$0xff] }
0x1311   :  { %v9628_v7 = vpack.c.bf16 %v3410_v6, %v3409_v60  ;;  %v3045_v19 = vld [vmem:[%s14059_s21 + $0xa8] sm:$0xff]  ;;  %v3417_v60 = vld [vmem:[%s14060_s4 + $0x1c0] sm:$0xff] }
0x1312   :  { %v3418_v6 = vld [vmem:[%s14060_s4 + $0x1c8] sm:$0xff] }
0x1316   :  { %v10424_v9 = vpop.eup %10423 }
0x1317   :  { %v2954_v10 = vmul.f32 %v10424_v9, %v2922_v51  ;;  %v9588_v51 = vpack.c.bf16 %v3035_v16, %v3029_v48  ;;  %v3362_v48 = vld [vmem:[%s14060_s4 + $0x8] sm:$0xff]  ;;  %v3379_v16 = vld [vmem:[%s14060_s4 + $0x90] sm:$0xff] }
0x1318   :  { %v9600_v61 = vpack.c.bf16 %v3380_v49, %v3379_v16  ;;  %v3390_v16 = vld [vmem:[%s14060_s4 + $0xe8] sm:$0xff] }
0x1319   :  { %v2964_v36 = vmul.f32 %v8054_v33, %v2954_v10  ;;  %9589 = vmatprep.subr.bf16.mxu0 %v9588_v51  ;;  %v9636_v51 = vpack.c.bf16 %v3414_v44, %v3413_v43  ;;  %v3423_v44 = vld [vmem:[%s14060_s4 + $0x1f0] sm:$0xff] }
0x131a   :  { %v10426_v4 = vpop.eup %10425  ;;  %9591 = vmatpush1.bf16.msra.mxu0 %v9590_v53  ;;  %v3397_v53 = vld [vmem:[%s14060_s4 + $0x120] sm:$0xff] }
0x131b   :  { %v2974_v13 = vadd.f32 %v8055_v37, %v2964_v36  ;;  %v2955_v14 = vmul.f32 %v10426_v4, %v2923_v56  ;;  %v9576_v56 = vpack.c.bf16 %v3043_v55, %v3037_v54  ;;  %9593 = vmatprep.subr.bf16.mxu0 %v9592_v52  ;;  %v3026_v4 = vld [vmem:[%s14059_s21 + $0x10] sm:$0xff]  ;;  %v3398_v54 = vld [vmem:[%s14060_s4 + $0x128] sm:$0xff]  ;;  %v3332_v55 = vld [vmem:[%s14063_s3 + $0x18] sm:$0xff] }
0x131c   :  { %v9638_v52 = vpack.c.bf16 %v3398_v54, %v3397_v53  ;;  %v3408_v53 = vld [vmem:[%s14060_s4 + $0x178] sm:$0xff] }
0x131d   :  { %v2976_v21 = vadd.f32 %v2974_v13, %v2972_v3  ;;  %v2965_v38 = vmul.f32 %v8054_v33, %v2955_v14  ;;  %9577 = vmatprep.subr.bf16.mxu1 %v9576_v56  ;;  %v3032_v3 = vld [vmem:[%s14059_s21 + $0x40] sm:$0xff]  ;;  %v3039_v14 = vld [vmem:[%s14059_s21 + $0x78] sm:$0xff]  ;;  %v9598_v56 = vpack.c.bf16 %v3362_v48, %v3361_v47  ;;  %v3371_v47 = vld [vmem:[%s14060_s4 + $0x50] sm:$0xff] }
0x131e   :  { %9579 = vmatpush1.bf16.msra.mxu1 %v9578_v62  ;;  %9595 = vmatpush1.bf16.msra.mxu0 %v9594_v0  ;;  %v8057_v13 = vld [vmem:[%s14062_s20] ss:$0 sm:$0xff]  ;;  %v3363_v62 = vld [vmem:[%s14060_s4 + $0x10] sm:$0xff]  ;;  %v9640_v0 = vpack.c.bf16 %v3416_v58, %v3415_v57  ;;  %v3372_v48 = vld [vmem:[%s14060_s4 + $0x58] sm:$0xff] }
0x131f   :  { %v2978_v34 = vmul.f32 0.5, %v2976_v21  ;;  %v2975_v20 = vadd.f32 %v8055_v37, %v2965_v38  ;;  %9581 = vmatprep.subr.bf16.mxu1 %v9580_v2  ;;  %9629 = vmatprep.subr.bf16.mxu0 %v9628_v7  ;;  %v8056_v37 = vld [vmem:[%s14061_s19] ss:$0 sm:$0xff]  ;;  %v9602_v2 = vpack.c.bf16 %v3364_v24, %v3363_v62  ;;  %v9604_v7 = vpack.c.bf16 %v3382_v25, %v3381_v63  ;;  %v3391_v62 = vld [vmem:[%s14060_s4 + $0xf0] sm:$0xff]  ;;  %v3392_v24 = vld [vmem:[%s14060_s4 + $0xf8] sm:$0xff]  ;;  %s14155_s19 = smov 80  }
0x1320   :  { %v3393_v38 = vld [vmem:[%s14060_s4 + $0x100] sm:$0xff]  ;;  %v9618_v54 = vpack.c.bf16 %v3372_v48, %v3371_v47 }
0x1321   :  { %v2982_v23 = vsel %vm597_vm0, %v2978_v34, 0.0  ;;  %v2977_v26 = vadd.f32 %v2975_v20, %v2973_v22  ;;  %v9582_v20 = vpack.c.bf16 %v3032_v3, %v3026_v4  ;;  %v3419_v3 = vld [vmem:[%s14060_s4 + $0x1d0] sm:$0xff]  ;;  %v3373_v58 = vld [vmem:[%s14060_s4 + $0x60] sm:$0xff] }
0x1322   :  { %2983 = vadd.xlane.f32.xlu0 %v2982_v23  ;;  %v3429_v48 = vld [vmem:[%s14060_s4 + $0x220] sm:$0xff] }
0x1323   :  { %v2979_v27 = vmul.f32 0.5, %v2977_v26  ;;  %v9584_v26 = vpack.c.bf16 %v3045_v19, %v3039_v14  ;;  %v3367_v19 = vld [vmem:[%s14060_s4 + $0x30] sm:$0xff] }
0x1325   :  { %v2985_v28 = vsel %vm597_vm0, %v2979_v27, 0.0 }
0x1326   :  { %2986 = vadd.xlane.f32.xlu1 %v2985_v28  ;;  %v3038_v28 = vld [vmem:[%s14059_s21 + $0x70] sm:$0xff] }
0x13af   :  { %v2984_v15 = vpop.xlane.xlu0 %2983 }
0x13b0   :  { %v2988_v30 = vmul.f32 0.03125, %v2984_v15  ;;  %v3044_v15 = vld [vmem:[%s14059_s21 + $0xa0] sm:$0xff] }
0x13b2   :  { %v11519_v35 = vsub.f32 %v2978_v34, %v2988_v30  ;;  %v3394_v34 = vld [vmem:[%s14060_s4 + $0x108] sm:$0xff]  ;;  %v3377_v30 = vld [vmem:[%s14060_s4 + $0x80] sm:$0xff] }
0x13b3   :  { %v2987_v29 = vpop.xlane.xlu1 %2986 }
0x13b4   :  { %v2989_v31 = vmul.f32 0.03125, %v2987_v29  ;;  %v2992_v39 = vmul.f32 %v11519_v35, %v11519_v35  ;;  %v9630_v29 = vpack.c.bf16 %v3394_v34, %v3393_v38  ;;  %v3385_v38 = vld [vmem:[%s14060_s4 + $0xc0] sm:$0xff]  ;;  %v3386_v34 = vld [vmem:[%s14060_s4 + $0xc8] sm:$0xff] }
0x13b6   :  { %v11523_v17 = vsub.f32 %v2979_v27, %v2989_v31  ;;  %v2994_v18 = vsel %vm597_vm0, %v2992_v39, 0.0  ;;  %v3411_v31 = vld [vmem:[%s14060_s4 + $0x190] sm:$0xff]  ;;  %v3412_v39 = vld [vmem:[%s14060_s4 + $0x198] sm:$0xff] }
0x13b7   :  { %2995 = vadd.xlane.f32.xlu0 %v2994_v18  ;;  %v3395_v18 = vld [vmem:[%s14060_s4 + $0x110] sm:$0xff]  ;;  %v9632_v11 = vpack.c.bf16 %v3412_v39, %v3411_v31  ;;  %v3388_v39 = vld [vmem:[%s14060_s4 + $0xd8] sm:$0xff] }
0x13b8   :  { %v2993_v40 = vmul.f32 %v11523_v17, %v11523_v17  ;;  %v3387_v31 = vld [vmem:[%s14060_s4 + $0xd0] sm:$0xff] }
0x13ba   :  { %v2997_v41 = vsel %vm597_vm0, %v2993_v40, 0.0  ;;  %v3396_v40 = vld [vmem:[%s14060_s4 + $0x118] sm:$0xff] }
0x13bb   :  { %2998 = vadd.xlane.f32.xlu1 %v2997_v41  ;;  %v9586_v41 = vpack.c.bf16 %v3044_v15, %v3038_v28  ;;  %v9634_v50 = vpack.c.bf16 %v3396_v40, %v3395_v18  ;;  %v3421_v28 = vld [vmem:[%s14060_s4 + $0x1e0] sm:$0xff]  ;;  %v3422_v15 = vld [vmem:[%s14060_s4 + $0x1e8] sm:$0xff] }
0x13bc   :  { %v9652_v18 = vpack.c.bf16 %v3422_v15, %v3421_v28  ;;  %v3405_v40 = vld [vmem:[%s14060_s4 + $0x160] sm:$0xff]  ;;  %v3479_v28 = vld [vmem:[%s14060_s4 + $0x3b0] sm:$0xff]  ;;  %v3480_v15 = vld [vmem:[%s14060_s4 + $0x3b8] sm:$0xff] }
0x1444   :  { %v2996_v59 = vpop.xlane.xlu0 %2995 }
0x1445   :  { %v3000_v8 = vmul.f32 0.03125, %v2996_v59  ;;  %v3365_v59 = vld [vmem:[%s14060_s4 + $0x20] sm:$0xff] }
0x1447   :  { %v3002_v33 = vadd.f32 1e-05, %v3000_v8  ;;  %v3366_v8 = vld [vmem:[%s14060_s4 + $0x28] sm:$0xff] }
0x1448   :  { %v2999_v9 = vpop.xlane.xlu1 %2998  ;;  %v9606_v4 = vpack.c.bf16 %v3366_v8, %v3365_v59  ;;  %v3441_v59 = vld [vmem:[%s14060_s4 + $0x280] sm:$0xff]  ;;  %v3442_v8 = vld [vmem:[%s14060_s4 + $0x288] sm:$0xff] }
0x1449   :  { %10427 = vrsqrt.f32 %v3002_v33  ;;  %v3001_v10 = vmul.f32 0.03125, %v2999_v9  ;;  %v3330_v33 = vld [vmem:[%s14063_s3 + $0x8] sm:$0xff]  ;;  %v3383_v9 = vld [vmem:[%s14060_s4 + $0xb0] sm:$0xff] }
0x144b   :  { %v3003_v32 = vadd.f32 1e-05, %v3001_v10  ;;  %v3384_v10 = vld [vmem:[%s14060_s4 + $0xb8] sm:$0xff] }
0x144c   :  { %v9608_v14 = vpack.c.bf16 %v3384_v10, %v3383_v9 }
0x144d   :  { %10429 = vrsqrt.f32 %v3003_v32  ;;  %v9642_v32 = vpack.c.bf16 %v3400_v1, %v3399_v42  ;;  %v3475_v1 = vld [vmem:[%s14060_s4 + $0x390] sm:$0xff] }
0x1453   :  { %v10428_v12 = vpop.eup %10427 }
0x1454   :  { %v3006_v36 = vmul.f32 %v10428_v12, %v11519_v35  ;;  %v3378_v35 = vld [vmem:[%s14060_s4 + $0x88] sm:$0xff]  ;;  %v9644_v12 = vpack.c.bf16 %v3418_v6, %v3417_v60  ;;  %v9624_v60 = vpack.c.bf16 %v3392_v24, %v3391_v62  ;;  %v3375_v6 = vld [vmem:[%s14060_s4 + $0x70] sm:$0xff]  ;;  %v3432_v62 = vld [vmem:[%s14060_s4 + $0x238] sm:$0xff] }
0x1455   :  { %v9596_v46 = vpack.c.bf16 %v3378_v35, %v3377_v30  ;;  %v9612_v30 = vpack.c.bf16 %v3386_v34, %v3385_v38  ;;  %v3369_v35 = vld [vmem:[%s14060_s4 + $0x40] sm:$0xff]  ;;  %v3444_v38 = vld [vmem:[%s14060_s4 + $0x298] sm:$0xff] }
0x1456   :  { %v3014_v21 = vmul.f32 %v8056_v37, %v3006_v36  ;;  %v3402_v36 = vld [vmem:[%s14060_s4 + $0x148] sm:$0xff]  ;;  %v3449_v24 = vld [vmem:[%s14060_s4 + $0x2c0] sm:$0xff] }
0x1457   :  { %v10430_v22 = vpop.eup %10429 }
0x1458   :  { %v3022_v23 = vadd.f32 %v8057_v13, %v3014_v21  ;;  %v3007_v27 = vmul.f32 %v10430_v22, %v11523_v17  ;;  %v3368_v21 = vld [vmem:[%s14060_s4 + $0x38] sm:$0xff] }
0x145a   :  { %8058 = vmatmul.mubr.msk.f32.vlgmr.msra.gmra.mrb[38].mxu1 %vm597_vm0, %v3022_v23  ;;  %8062 = vmatmul.mubr.msk.f32.vlgmr.msra.gmra.mrb[42].mxu0 %vm597_vm0, %v3022_v23  ;;  %v3015_v17 = vmul.f32 %v8056_v37, %v3007_v27  ;;  %v3401_v37 = vld [vmem:[%s14060_s4 + $0x140] sm:$0xff]  ;;  %v9610_v27 = vpack.c.bf16 %v3368_v21, %v3367_v19  ;;  %v3426_v19 = vld [vmem:[%s14060_s4 + $0x208] sm:$0xff]  ;;  %v3443_v21 = vld [vmem:[%s14060_s4 + $0x290] sm:$0xff] }
0x145b   :  { %9583 = vmatpush1.bf16.msra.mxu1 %v9582_v20  ;;  %3156 = vmatprep.mubr.f32.mxu1 %v10487_v5  ;;  %v9646_v22 = vpack.c.bf16 %v3402_v36, %v3401_v37  ;;  %v3336_v37 = vld [vmem:[%s14063_s3 + $0x38] sm:$0xff] }
0x145c   :  { %9585 = vmatprep.subr.bf16.mxu1 %v9584_v26  ;;  %3310 = vmatprep.mubr.f32.mxu0 %v10487_v5  ;;  %v3023_v45 = vadd.f32 %v8057_v13, %v3015_v17  ;;  %v3420_v13 = vld [vmem:[%s14060_s4 + $0x1d8] sm:$0xff] }
0x145d   :  { %9631 = vmatpush3.bf16.msra.mxu0 %v9630_v29  ;;  %v9648_v20 = vpack.c.bf16 %v3420_v13, %v3419_v3  ;;  %v3404_v26 = vld [vmem:[%s14060_s4 + $0x158] sm:$0xff]  ;;  %v3370_v29 = vld [vmem:[%s14060_s4 + $0x48] sm:$0xff]  ;;  %v9660_v13 = vpack.c.bf16 %v3442_v8, %v3441_v59  ;;  %v3451_v8 = vld [vmem:[%s14060_s4 + $0x2d0] sm:$0xff] }
0x145e   :  { %8059 = vmatmul.mubr.msk.f32.gmra.mrb[40].mxu1 %vm597_vm0, %v3023_v45  ;;  %8063 = vmatmul.mubr.msk.f32.gmra.mrb[44].mxu0 %vm597_vm0, %v3023_v45  ;;  %v9614_v43 = vpack.c.bf16 %v3370_v29, %v3369_v35  ;;  %v3478_v3 = vld [vmem:[%s14060_s4 + $0x3a8] sm:$0xff]  ;;  %v3427_v35 = vld [vmem:[%s14060_s4 + $0x210] sm:$0xff]  ;;  %v3428_v29 = vld [vmem:[%s14060_s4 + $0x218] sm:$0xff] }
0x145f   :  { %9587 = vmatpush1.bf16.msra.mxu1 %v9586_v41  ;;  %3227 = vmatprep.mubr.f32.mxu1 %v10487_v5  ;;  %v3406_v41 = vld [vmem:[%s14060_s4 + $0x168] sm:$0xff] }
0x1460   :  { %9597 = vmatprep.subr.bf16.mxu1 %v9596_v46  ;;  %9633 = vmatprep.subr.bf16.mxu0 %v9632_v11  ;;  %v9616_v46 = vpack.c.bf16 %v3388_v39, %v3387_v31  ;;  %v3389_v11 = vld [vmem:[%s14060_s4 + $0xe0] sm:$0xff]  ;;  %v9654_v49 = vpack.c.bf16 %v3406_v41, %v3405_v40  ;;  %v3334_v31 = vld [vmem:[%s14063_s3 + $0x28] sm:$0xff]  ;;  %v9704_v40 = vpack.c.bf16 %v3480_v15, %v3479_v28  ;;  %v3463_v41 = vld [vmem:[%s14060_s4 + $0x330] sm:$0xff] }
0x1461   :  { %9635 = vmatpush3.bf16.msra.mxu0 %v9634_v50  ;;  %4014 = vmatprep.mubr.f32.mxu0 %v3332_v55  ;;  %v3473_v55 = vld [vmem:[%s14060_s4 + $0x380] sm:$0xff]  ;;  %v9620_v57 = vpack.c.bf16 %v3390_v16, %v3389_v11  ;;  %v3430_v11 = vld [vmem:[%s14060_s4 + $0x228] sm:$0xff]  ;;  %v3447_v16 = vld [vmem:[%s14060_s4 + $0x2b0] sm:$0xff] }
0x1462   :  { %8060 = vmatmul.mubr.msk.f32.vlgmr.msra.gmra.mrb[42].mxu1 %vm597_vm0, %v3022_v23  ;;  %9637 = vmatprep.subr.bf16.mxu0 %v9636_v51  ;;  %v3403_v23 = vld [vmem:[%s14060_s4 + $0x150] sm:$0xff]  ;;  %v3445_v39 = vld [vmem:[%s14060_s4 + $0x2a0] sm:$0xff]  ;;  %v3434_v59 = vld [vmem:[%s14060_s4 + $0x248] sm:$0xff] }
0x1463   :  { %9599 = vmatpush3.bf16.msra.mxu1 %v9598_v56  ;;  %3233 = vmatprep.mubr.f32.mxu1 %v10487_v5  ;;  %v9650_v17 = vpack.c.bf16 %v3404_v26, %v3403_v23  ;;  %v3407_v51 = vld [vmem:[%s14060_s4 + $0x170] sm:$0xff]  ;;  %v3474_v56 = vld [vmem:[%s14060_s4 + $0x388] sm:$0xff]  ;;  %v3329_v26 = vld [vmem:[%s14063_s3] sm:$0xff] }
0x1464   :  { %9601 = vmatprep.subr.bf16.mxu1 %v9600_v61  ;;  %v3374_v61 = vld [vmem:[%s14060_s4 + $0x68] sm:$0xff]  ;;  %v9658_v63 = vpack.c.bf16 %v3408_v53, %v3407_v51  ;;  %v9692_v25 = vpack.c.bf16 %v3474_v56, %v3473_v55  ;;  %v3465_v53 = vld [vmem:[%s14060_s4 + $0x340] sm:$0xff]  ;;  %v9670_v55 = vpack.c.bf16 %v3430_v11, %v3429_v48  ;;  %v3483_v56 = vld [vmem:[%s14060_s4 + $0x3d0] sm:$0xff] }
0x1465   :  { %9639 = vmatpush3.bf16.msra.mxu0 %v9638_v52  ;;  %v3457_v52 = vld [vmem:[%s14060_s4 + $0x300] sm:$0xff]  ;;  %v9622_v42 = vpack.c.bf16 %v3374_v61, %v3373_v58  ;;  %v3462_v23 = vld [vmem:[%s14060_s4 + $0x328] sm:$0xff]  ;;  %v3431_v61 = vld [vmem:[%s14060_s4 + $0x230] sm:$0xff] }
0x1466   :  { %8061 = vmatmul.mubr.msk.f32.gmra.mrb[44].mxu1 %vm597_vm0, %v3023_v45  ;;  %9641 = vmatprep.subr.bf16.mxu0 %v9640_v0  ;;  %v3424_v45 = vld [vmem:[%s14060_s4 + $0x1f8] sm:$0xff]  ;;  %v3458_v0 = vld [vmem:[%s14060_s4 + $0x308] sm:$0xff]  ;;  %v3437_v15 = vld [vmem:[%s14060_s4 + $0x260] sm:$0xff] }
0x1467   :  { %9603 = vmatpush3.bf16.msra.mxu1 %v9602_v2  ;;  %3944 = vmatprep.mubr.f32.mxu1 %v3330_v33  ;;  %v9656_v50 = vpack.c.bf16 %v3424_v45, %v3423_v44  ;;  %v3476_v2 = vld [vmem:[%s14060_s4 + $0x398] sm:$0xff]  ;;  %v3331_v33 = vld [vmem:[%s14063_s3 + $0x10] sm:$0xff]  ;;  %v9694_v9 = vpack.c.bf16 %v3458_v0, %v3457_v52  ;;  %v9666_v44 = vpack.c.bf16 %v3428_v29, %v3427_v35  ;;  %v3481_v45 = vld [vmem:[%s14060_s4 + $0x3c0] sm:$0xff] }
0x1468   :  { %9605 = vmatprep.subr.bf16.mxu1 %v9604_v7  ;;  %v3376_v7 = vld [vmem:[%s14060_s4 + $0x78] sm:$0xff]  ;;  %v9696_v10 = vpack.c.bf16 %v3476_v2, %v3475_v1  ;;  %v3467_v0 = vld [vmem:[%s14060_s4 + $0x350] sm:$0xff]  ;;  %v9674_v1 = vpack.c.bf16 %v3432_v62, %v3431_v61  ;;  %v3485_v2 = vld [vmem:[%s14060_s4 + $0x3e0] sm:$0xff] }
0x1469   :  { %9643 = vmatpush3.bf16.msra.mxu0 %v9642_v32  ;;  %v3459_v32 = vld [vmem:[%s14060_s4 + $0x310] sm:$0xff]  ;;  %v9626_v36 = vpack.c.bf16 %v3376_v7, %v3375_v6  ;;  %v3433_v7 = vld [vmem:[%s14060_s4 + $0x240] sm:$0xff]  ;;  %v3456_v29 = vld [vmem:[%s14060_s4 + $0x2f8] sm:$0xff] }
0x146a   :  { %9645 = vmatprep.subr.bf16.mxu0 %v9644_v12  ;;  %v3460_v12 = vld [vmem:[%s14060_s4 + $0x318] sm:$0xff]  ;;  %v3455_v35 = vld [vmem:[%s14060_s4 + $0x2f0] sm:$0xff]  ;;  %v3506_v48 = vld [vmem:[%s14060_s4 + $0x488] sm:$0xff] }
0x146b   :  { %9607 = vmatpush3.bf16.msra.mxu1 %v9606_v4  ;;  %v3477_v4 = vld [vmem:[%s14060_s4 + $0x3a0] sm:$0xff]  ;;  %v9698_v34 = vpack.c.bf16 %v3460_v12, %v3459_v32  ;;  %v3470_v12 = vld [vmem:[%s14060_s4 + $0x368] sm:$0xff]  ;;  %v3335_v11 = vld [vmem:[%s14063_s3 + $0x30] sm:$0xff] }
0x146c   :  { %9609 = vmatprep.subr.bf16.mxu1 %v9608_v14  ;;  %v3425_v14 = vld [vmem:[%s14060_s4 + $0x200] sm:$0xff]  ;;  %v3490_v61 = vld [vmem:[%s14060_s4 + $0x408] sm:$0xff]  ;;  %v3507_v62 = vld [vmem:[%s14060_s4 + $0x490] sm:$0xff] }
0x146d   :  { %9647 = vmatpush3.bf16.msra.mxu0 %v9646_v22  ;;  %v9700_v22 = vpack.c.bf16 %v3478_v3, %v3477_v4  ;;  %v3469_v32 = vld [vmem:[%s14060_s4 + $0x360] sm:$0xff]  ;;  %v3488_v4 = vld [vmem:[%s14060_s4 + $0x3f8] sm:$0xff] }
0x146e   :  { %9649 = vmatprep.subr.bf16.mxu0 %v9648_v20  ;;  %v3461_v20 = vld [vmem:[%s14060_s4 + $0x320] sm:$0xff] }
0x146f   :  { %9611 = vmatpush3.bf16.msra.mxu1 %v9610_v27  ;;  %v9662_v27 = vpack.c.bf16 %v3426_v19, %v3425_v14  ;;  %v3436_v14 = vld [vmem:[%s14060_s4 + $0x258] sm:$0xff]  ;;  %v3453_v19 = vld [vmem:[%s14060_s4 + $0x2e0] sm:$0xff] }
0x1470   :  { %9613 = vmatprep.subr.bf16.mxu1 %v9612_v30  ;;  %v9664_v30 = vpack.c.bf16 %v3444_v38, %v3443_v21  ;;  %v3454_v21 = vld [vmem:[%s14060_s4 + $0x2e8] sm:$0xff]  ;;  %v9718_v38 = vpack.c.bf16 %v3470_v12, %v3469_v32  ;;  %v3527_v12 = vld [vmem:[%s14060_s4 + $0x530] sm:$0xff] }
0x1471   :  { %9651 = vmatpush3.bf16.msra.mxu0 %v9650_v17  ;;  %v3446_v17 = vld [vmem:[%s14060_s4 + $0x2a8] sm:$0xff]  ;;  %v9684_v28 = vpack.c.bf16 %v3454_v21, %v3453_v19  ;;  %v3511_v21 = vld [vmem:[%s14060_s4 + $0x4b0] sm:$0xff] }
0x1472   :  { %9653 = vmatprep.subr.bf16.mxu0 %v9652_v18  ;;  %v9702_v18 = vpack.c.bf16 %v3462_v23, %v3461_v20  ;;  %v9668_v47 = vpack.c.bf16 %v3446_v17, %v3445_v39  ;;  %v3472_v20 = vld [vmem:[%s14060_s4 + $0x378] sm:$0xff]  ;;  %v3521_v17 = vld [vmem:[%s14060_s4 + $0x500] sm:$0xff]  ;;  %v3494_v19 = vld [vmem:[%s14060_s4 + $0x428] sm:$0xff] }
0x1473   :  { %9615 = vmatpush3.bf16.msra.mxu1 %v9614_v43  ;;  %v3464_v43 = vld [vmem:[%s14060_s4 + $0x338] sm:$0xff] }
0x1474   :  { %9617 = vmatprep.subr.bf16.mxu1 %v9616_v46  ;;  %v3482_v46 = vld [vmem:[%s14060_s4 + $0x3c8] sm:$0xff] }
0x1475   :  { %9655 = vmatpush3.bf16.msra.mxu0 %v9654_v49  ;;  %v3448_v49 = vld [vmem:[%s14060_s4 + $0x2b8] sm:$0xff]  ;;  %v9708_v51 = vpack.c.bf16 %v3482_v46, %v3481_v45  ;;  %v3439_v45 = vld [vmem:[%s14060_s4 + $0x270] sm:$0xff] }
0x1476   :  { %9657 = vmatprep.subr.bf16.mxu0 %v9656_v50  ;;  %v9706_v50 = vpack.c.bf16 %v3464_v43, %v3463_v41  ;;  %v9672_v58 = vpack.c.bf16 %v3448_v49, %v3447_v16  ;;  %v3539_v41 = vld [vmem:[%s14060_s4 + $0x590] sm:$0xff]  ;;  %v3540_v43 = vld [vmem:[%s14060_s4 + $0x598] sm:$0xff] }
0x1477   :  { %9619 = vmatpush3.bf16.msra.mxu1 %v9618_v54  ;;  %v3466_v54 = vld [vmem:[%s14060_s4 + $0x348] sm:$0xff]  ;;  %v3440_v46 = vld [vmem:[%s14060_s4 + $0x278] sm:$0xff]  ;;  %v9760_v49 = vpack.c.bf16 %v3540_v43, %v3539_v41  ;;  %v3549_v43 = vld [vmem:[%s14060_s4 + $0x5e0] sm:$0xff] }
0x1478   :  { %9621 = vmatprep.subr.bf16.mxu1 %v9620_v57  ;;  %v3484_v57 = vld [vmem:[%s14060_s4 + $0x3d8] sm:$0xff] }
0x1479   :  { %9659 = vmatpush3.bf16.msra.mxu0 %v9658_v63  ;;  %v3450_v63 = vld [vmem:[%s14060_s4 + $0x2c8] sm:$0xff]  ;;  %v9712_v52 = vpack.c.bf16 %v3484_v57, %v3483_v56 }
0x147a   :  { %9693 = vmatprep.subr.bf16.mxu0 %v9692_v25  ;;  %v9710_v25 = vpack.c.bf16 %v3466_v54, %v3465_v53  ;;  %v9676_v6 = vpack.c.bf16 %v3450_v63, %v3449_v24  ;;  %v3340_v53 = vld [vmem:[%s14063_s3 + $0x58] sm:$0xff]  ;;  %v9690_v54 = vpack.c.bf16 %v3440_v46, %v3439_v45  ;;  %v3542_v56 = vld [vmem:[%s14060_s4 + $0x5a8] sm:$0xff]  ;;  %v3497_v46 = vld [vmem:[%s14060_s4 + $0x440] sm:$0xff] }
0x147b   :  { %9623 = vmatpush3.bf16.msra.mxu1 %v9622_v42  ;;  %v3468_v42 = vld [vmem:[%s14060_s4 + $0x358] sm:$0xff] }
0x147c   :  { %9625 = vmatprep.subr.bf16.mxu1 %v9624_v60  ;;  %4015 = vmatmul.mubr.f32.vlgmr.msra.gmra.mrb[46].mxu0 %v3331_v33  ;;  %v3486_v60 = vld [vmem:[%s14060_s4 + $0x3e8] sm:$0xff]  ;;  %v3452_v33 = vld [vmem:[%s14060_s4 + $0x2d8] sm:$0xff] }
0x147d   :  { %9695 = vmatpush3.bf16.msra.mxu0 %v9694_v9  ;;  %4154 = vmatprep.mubr.f32.mxu0 %v3336_v37  ;;  %v9714_v9 = vpack.c.bf16 %v3468_v42, %v3467_v0  ;;  %v9678_v37 = vpack.c.bf16 %v3434_v59, %v3433_v7  ;;  %v9680_v3 = vpack.c.bf16 %v3452_v33, %v3451_v8  ;;  %v3508_v24 = vld [vmem:[%s14060_s4 + $0x498] sm:$0xff]  ;;  %v3526_v0 = vld [vmem:[%s14060_s4 + $0x528] sm:$0xff]  ;;  %v3333_v42 = vld [vmem:[%s14063_s3 + $0x20] sm:$0xff] }
0x147e   :  { %9697 = vmatprep.subr.bf16.mxu0 %v9696_v10  ;;  %v9716_v10 = vpack.c.bf16 %v3486_v60, %v3485_v2  ;;  %v3543_v2 = vld [vmem:[%s14060_s4 + $0x5b0] sm:$0xff]  ;;  %v3544_v60 = vld [vmem:[%s14060_s4 + $0x5b8] sm:$0xff]  ;;  %v3338_v8 = vld [vmem:[%s14063_s3 + $0x48] sm:$0xff] }
0x147f   :  { %9627 = vmatpush3.bf16.msra.mxu1 %v9626_v36  ;;  %v3487_v36 = vld [vmem:[%s14060_s4 + $0x3f0] sm:$0xff]  ;;  %v3492_v59 = vld [vmem:[%s14060_s4 + $0x418] sm:$0xff]  ;;  %v3509_v33 = vld [vmem:[%s14060_s4 + $0x4a0] sm:$0xff]  ;;  %v9768_v32 = vpack.c.bf16 %v3544_v60, %v3543_v2 }
0x1480   :  { %9661 = vmatprep.subr.bf16.mxu1 %v9660_v13  ;;  %v3435_v13 = vld [vmem:[%s14060_s4 + $0x250] sm:$0xff]  ;;  %v3501_v60 = vld [vmem:[%s14060_s4 + $0x460] sm:$0xff] }
0x1481   :  { %9699 = vmatpush3.bf16.msra.mxu0 %v9698_v34  ;;  %v9720_v34 = vpack.c.bf16 %v3488_v4, %v3487_v36  ;;  %v9682_v23 = vpack.c.bf16 %v3436_v14, %v3435_v13  ;;  %v3491_v7 = vld [vmem:[%s14060_s4 + $0x410] sm:$0xff]  ;;  %v3545_v4 = vld [vmem:[%s14060_s4 + $0x5c0] sm:$0xff] }
0x1482   :  { %3945 = vmatmul.mubr.f32.vlgmr.msra.gmra.mrb[46].mxu1 %v3329_v26  ;;  %9701 = vmatprep.subr.bf16.mxu0 %v9700_v22  ;;  %v3471_v22 = vld [vmem:[%s14060_s4 + $0x370] sm:$0xff]  ;;  %v3537_v26 = vld [vmem:[%s14060_s4 + $0x580] sm:$0xff]  ;;  %v9730_v36 = vpack.c.bf16 %v3492_v59, %v3491_v7  ;;  %v3520_v59 = vld [vmem:[%s14060_s4 + $0x4f8] sm:$0xff] }
0x1483   :  { %9663 = vmatpush3.bf16.msra.mxu1 %v9662_v27  ;;  %4084 = vmatprep.mubr.f32.mxu1 %v3334_v31  ;;  %v3538_v27 = vld [vmem:[%s14060_s4 + $0x588] sm:$0xff]  ;;  %v9722_v31 = vpack.c.bf16 %v3472_v20, %v3471_v22  ;;  %v3493_v14 = vld [vmem:[%s14060_s4 + $0x420] sm:$0xff]  ;;  %v3519_v7 = vld [vmem:[%s14060_s4 + $0x4f0] sm:$0xff] }
0x1484   :  { %9665 = vmatprep.subr.bf16.mxu1 %v9664_v30  ;;  %v3438_v30 = vld [vmem:[%s14060_s4 + $0x268] sm:$0xff]  ;;  %v9756_v39 = vpack.c.bf16 %v3538_v27, %v3537_v26  ;;  %v3529_v20 = vld [vmem:[%s14060_s4 + $0x540] sm:$0xff]  ;;  %v9734_v26 = vpack.c.bf16 %v3494_v19, %v3493_v14  ;;  %v3547_v27 = vld [vmem:[%s14060_s4 + $0x5d0] sm:$0xff] }
0x1485   :  { %9703 = vmatpush3.bf16.msra.mxu0 %v9702_v18  ;;  %v3522_v18 = vld [vmem:[%s14060_s4 + $0x508] sm:$0xff]  ;;  %v3339_v19 = vld [vmem:[%s14063_s3 + $0x50] sm:$0xff] }
0x1486   :  { %9705 = vmatprep.subr.bf16.mxu0 %v9704_v40  ;;  %v9686_v40 = vpack.c.bf16 %v3438_v30, %v3437_v15  ;;  %v9758_v16 = vpack.c.bf16 %v3522_v18, %v3521_v17  ;;  %v3495_v30 = vld [vmem:[%s14060_s4 + $0x430] sm:$0xff]  ;;  %v3570_v14 = vld [vmem:[%s14060_s4 + $0x688] sm:$0xff] }
0x1487   :  { %9667 = vmatpush3.bf16.msra.mxu1 %v9666_v44  ;;  %v9688_v44 = vpack.c.bf16 %v3456_v29, %v3455_v35  ;;  %v3496_v35 = vld [vmem:[%s14060_s4 + $0x438] sm:$0xff]  ;;  %v3513_v29 = vld [vmem:[%s14060_s4 + $0x4c0] sm:$0xff]  ;;  %v3531_v18 = vld [vmem:[%s14060_s4 + $0x550] sm:$0xff] }
0x1488   :  { %9669 = vmatprep.subr.bf16.mxu1 %v9668_v47  ;;  %v3505_v47 = vld [vmem:[%s14060_s4 + $0x480] sm:$0xff]  ;;  %v9738_v41 = vpack.c.bf16 %v3496_v35, %v3495_v30  ;;  %v3554_v30 = vld [vmem:[%s14060_s4 + $0x608] sm:$0xff]  ;;  %v3571_v35 = vld [vmem:[%s14060_s4 + $0x690] sm:$0xff] }
0x1489   :  { %9707 = vmatpush3.bf16.msra.mxu0 %v9706_v50  ;;  %v3523_v50 = vld [vmem:[%s14060_s4 + $0x510] sm:$0xff]  ;;  %v9724_v57 = vpack.c.bf16 %v3506_v48, %v3505_v47  ;;  %v3498_v47 = vld [vmem:[%s14060_s4 + $0x448] sm:$0xff] }
0x148a   :  { %9709 = vmatprep.subr.bf16.mxu0 %v9708_v51  ;;  %v3524_v51 = vld [vmem:[%s14060_s4 + $0x518] sm:$0xff]  ;;  %v3515_v48 = vld [vmem:[%s14060_s4 + $0x4d0] sm:$0xff] }
0x148b   :  { %9671 = vmatpush3.bf16.msra.mxu1 %v9670_v55  ;;  %v3541_v55 = vld [vmem:[%s14060_s4 + $0x5a0] sm:$0xff]  ;;  %v9762_v63 = vpack.c.bf16 %v3524_v51, %v3523_v50  ;;  %v3534_v51 = vld [vmem:[%s14060_s4 + $0x568] sm:$0xff] }
0x148c   :  { %9673 = vmatprep.subr.bf16.mxu1 %v9672_v58  ;;  %v3489_v58 = vld [vmem:[%s14060_s4 + $0x400] sm:$0xff] }
0x148d   :  { %9711 = vmatpush3.bf16.msra.mxu0 %v9710_v25  ;;  %v9764_v25 = vpack.c.bf16 %v3542_v56, %v3541_v55  ;;  %v3533_v50 = vld [vmem:[%s14060_s4 + $0x560] sm:$0xff]  ;;  %v3552_v55 = vld [vmem:[%s14060_s4 + $0x5f8] sm:$0xff] }
0x148e   :  { %9713 = vmatprep.subr.bf16.mxu0 %v9712_v52  ;;  %v3525_v52 = vld [vmem:[%s14060_s4 + $0x520] sm:$0xff] }
0x148f   :  { %9675 = vmatpush3.bf16.msra.mxu1 %v9674_v1  ;;  %v9726_v1 = vpack.c.bf16 %v3490_v61, %v3489_v58  ;;  %v3500_v58 = vld [vmem:[%s14060_s4 + $0x458] sm:$0xff]  ;;  %v3517_v61 = vld [vmem:[%s14060_s4 + $0x4e0] sm:$0xff] }
0x1490   :  { %9677 = vmatprep.subr.bf16.mxu1 %v9676_v6  ;;  %v9728_v6 = vpack.c.bf16 %v3508_v24, %v3507_v62  ;;  %v3518_v62 = vld [vmem:[%s14060_s4 + $0x4e8] sm:$0xff]  ;;  %v9782_v24 = vpack.c.bf16 %v3534_v51, %v3533_v50  ;;  %v3591_v51 = vld [vmem:[%s14060_s4 + $0x730] sm:$0xff] }
0x1491   :  { %9715 = vmatpush3.bf16.msra.mxu0 %v9714_v9  ;;  %v3510_v9 = vld [vmem:[%s14060_s4 + $0x4a8] sm:$0xff]  ;;  %v9748_v2 = vpack.c.bf16 %v3518_v62, %v3517_v61  ;;  %v3575_v62 = vld [vmem:[%s14060_s4 + $0x6b0] sm:$0xff] }
0x1492   :  { %9717 = vmatprep.subr.bf16.mxu0 %v9716_v10  ;;  %v9766_v10 = vpack.c.bf16 %v3526_v0, %v3525_v52  ;;  %v9732_v13 = vpack.c.bf16 %v3510_v9, %v3509_v33  ;;  %v3536_v52 = vld [vmem:[%s14060_s4 + $0x578] sm:$0xff]  ;;  %v3585_v9 = vld [vmem:[%s14060_s4 + $0x700] sm:$0xff]  ;;  %v3558_v61 = vld [vmem:[%s14060_s4 + $0x628] sm:$0xff] }
0x1493   :  { %9679 = vmatpush3.bf16.msra.mxu1 %v9678_v37  ;;  %v3528_v37 = vld [vmem:[%s14060_s4 + $0x538] sm:$0xff] }
0x1494   :  { %9681 = vmatprep.subr.bf16.mxu1 %v9680_v3  ;;  %v3546_v3 = vld [vmem:[%s14060_s4 + $0x5c8] sm:$0xff] }
0x1495   :  { %9719 = vmatpush3.bf16.msra.mxu0 %v9718_v38  ;;  %v3512_v38 = vld [vmem:[%s14060_s4 + $0x4b8] sm:$0xff]  ;;  %v9772_v22 = vpack.c.bf16 %v3546_v3, %v3545_v4  ;;  %v3503_v4 = vld [vmem:[%s14060_s4 + $0x470] sm:$0xff] }
0x1496   :  { %9721 = vmatprep.subr.bf16.mxu0 %v9720_v34  ;;  %v9770_v34 = vpack.c.bf16 %v3528_v37, %v3527_v12  ;;  %v9736_v15 = vpack.c.bf16 %v3512_v38, %v3511_v21  ;;  %v3603_v12 = vld [vmem:[%s14060_s4 + $0x790] sm:$0xff]  ;;  %v3604_v37 = vld [vmem:[%s14060_s4 + $0x798] sm:$0xff] }
0x1497   :  { %9683 = vmatpush3.bf16.msra.mxu1 %v9682_v23  ;;  %v3530_v23 = vld [vmem:[%s14060_s4 + $0x548] sm:$0xff]  ;;  %v3504_v3 = vld [vmem:[%s14060_s4 + $0x478] sm:$0xff]  ;;  %v9824_v38 = vpack.c.bf16 %v3604_v37, %v3603_v12  ;;  %v3613_v37 = vld [vmem:[%s14060_s4 + $0x7e0] sm:$0xff] }
0x1498   :  { %9685 = vmatprep.subr.bf16.mxu1 %v9684_v28  ;;  %v3548_v28 = vld [vmem:[%s14060_s4 + $0x5d8] sm:$0xff] }
0x1499   :  { %9723 = vmatpush3.bf16.msra.mxu0 %v9722_v31  ;;  %v3514_v31 = vld [vmem:[%s14060_s4 + $0x4c8] sm:$0xff]  ;;  %v9776_v17 = vpack.c.bf16 %v3548_v28, %v3547_v27 }
0x149a   :  { %9757 = vmatprep.subr.bf16.mxu0 %v9756_v39  ;;  %v9774_v39 = vpack.c.bf16 %v3530_v23, %v3529_v20  ;;  %v9740_v45 = vpack.c.bf16 %v3514_v31, %v3513_v29  ;;  %v3344_v20 = vld [vmem:[%s14063_s3 + $0x78] sm:$0xff]  ;;  %v9754_v23 = vpack.c.bf16 %v3504_v3, %v3503_v4  ;;  %v3606_v27 = vld [vmem:[%s14060_s4 + $0x7a8] sm:$0xff]  ;;  %v3561_v3 = vld [vmem:[%s14060_s4 + $0x640] sm:$0xff] }
0x149b   :  { %9687 = vmatpush3.bf16.msra.mxu1 %v9686_v40  ;;  %v3532_v40 = vld [vmem:[%s14060_s4 + $0x558] sm:$0xff] }
0x149c   :  { %9689 = vmatprep.subr.bf16.mxu1 %v9688_v44  ;;  %4155 = vmatmul.mubr.f32.vlgmr.msra.gmra.mrb[48].mxu0 %v3335_v11  ;;  %v3550_v44 = vld [vmem:[%s14060_s4 + $0x5e8] sm:$0xff]  ;;  %v3516_v11 = vld [vmem:[%s14060_s4 + $0x4d8] sm:$0xff] }
0x149d   :  { %9759 = vmatpush3.bf16.msra.mxu0 %v9758_v16  ;;  %4294 = vmatprep.mubr.f32.mxu0 %v3340_v53  ;;  %v9778_v16 = vpack.c.bf16 %v3532_v40, %v3531_v18  ;;  %v9742_v53 = vpack.c.bf16 %v3498_v47, %v3497_v46  ;;  %v9744_v56 = vpack.c.bf16 %v3516_v11, %v3515_v48  ;;  %v3572_v29 = vld [vmem:[%s14060_s4 + $0x698] sm:$0xff]  ;;  %v3590_v18 = vld [vmem:[%s14060_s4 + $0x728] sm:$0xff]  ;;  %v3337_v40 = vld [vmem:[%s14063_s3 + $0x40] sm:$0xff] }
0x149e   :  { %9761 = vmatprep.subr.bf16.mxu0 %v9760_v49  ;;  %v9780_v49 = vpack.c.bf16 %v3550_v44, %v3549_v43  ;;  %v3607_v43 = vld [vmem:[%s14060_s4 + $0x7b0] sm:$0xff]  ;;  %v3608_v44 = vld [vmem:[%s14060_s4 + $0x7b8] sm:$0xff]  ;;  %v3342_v48 = vld [vmem:[%s14063_s3 + $0x68] sm:$0xff] }
0x149f   :  { %9691 = vmatpush3.bf16.msra.mxu1 %v9690_v54  ;;  %v3551_v54 = vld [vmem:[%s14060_s4 + $0x5f0] sm:$0xff]  ;;  %v3556_v47 = vld [vmem:[%s14060_s4 + $0x618] sm:$0xff]  ;;  %v3573_v11 = vld [vmem:[%s14060_s4 + $0x6a0] sm:$0xff]  ;;  %v9832_v50 = vpack.c.bf16 %v3608_v44, %v3607_v43 }
0x14a0   :  { %9725 = vmatprep.subr.bf16.mxu1 %v9724_v57  ;;  %v3499_v57 = vld [vmem:[%s14060_s4 + $0x450] sm:$0xff]  ;;  %v3565_v44 = vld [vmem:[%s14060_s4 + $0x660] sm:$0xff] }
0x14a1   :  { %9763 = vmatpush3.bf16.msra.mxu0 %v9762_v63  ;;  %v9784_v63 = vpack.c.bf16 %v3552_v55, %v3551_v54  ;;  %v9746_v0 = vpack.c.bf16 %v3500_v58, %v3499_v57  ;;  %v3555_v46 = vld [vmem:[%s14060_s4 + $0x610] sm:$0xff]  ;;  %v3609_v55 = vld [vmem:[%s14060_s4 + $0x7c0] sm:$0xff] }
0x14a2   :  { %4085 = vmatmul.mubr.f32.vlgmr.msra.gmra.mrb[48].mxu1 %v3333_v42  ;;  %9765 = vmatprep.subr.bf16.mxu0 %v9764_v25  ;;  %v3535_v25 = vld [vmem:[%s14060_s4 + $0x570] sm:$0xff]  ;;  %v3601_v42 = vld [vmem:[%s14060_s4 + $0x780] sm:$0xff]  ;;  %v9794_v54 = vpack.c.bf16 %v3556_v47, %v3555_v46  ;;  %v3584_v47 = vld [vmem:[%s14060_s4 + $0x6f8] sm:$0xff] }
0x14a3   :  { %9727 = vmatpush3.bf16.msra.mxu1 %v9726_v1  ;;  %4224 = vmatprep.mubr.f32.mxu1 %v3338_v8  ;;  %v3602_v1 = vld [vmem:[%s14060_s4 + $0x788] sm:$0xff]  ;;  %v9786_v8 = vpack.c.bf16 %v3536_v52, %v3535_v25  ;;  %v3557_v58 = vld [vmem:[%s14060_s4 + $0x620] sm:$0xff]  ;;  %v3583_v46 = vld [vmem:[%s14060_s4 + $0x6f0] sm:$0xff] }
0x14a4   :  { %9729 = vmatprep.subr.bf16.mxu1 %v9728_v6  ;;  %v3502_v6 = vld [vmem:[%s14060_s4 + $0x468] sm:$0xff]  ;;  %v9820_v33 = vpack.c.bf16 %v3602_v1, %v3601_v42  ;;  %v3593_v52 = vld [vmem:[%s14060_s4 + $0x740] sm:$0xff]  ;;  %v9798_v42 = vpack.c.bf16 %v3558_v61, %v3557_v58  ;;  %v3611_v1 = vld [vmem:[%s14060_s4 + $0x7d0] sm:$0xff] }
0x14a5   :  { %9767 = vmatpush3.bf16.msra.mxu0 %v9766_v10  ;;  %v3586_v10 = vld [vmem:[%s14060_s4 + $0x708] sm:$0xff]  ;;  %v3343_v61 = vld [vmem:[%s14063_s3 + $0x70] sm:$0xff] }
0x14a6   :  { %9769 = vmatprep.subr.bf16.mxu0 %v9768_v32  ;;  %v9750_v32 = vpack.c.bf16 %v3502_v6, %v3501_v60  ;;  %v9822_v21 = vpack.c.bf16 %v3586_v10, %v3585_v9  ;;  %v3559_v6 = vld [vmem:[%s14060_s4 + $0x630] sm:$0xff]  ;;  %v3634_v58 = vld [vmem:[%s14060_s4 + $0x888] sm:$0xff] }
0x14a7   :  { %9731 = vmatpush3.bf16.msra.mxu1 %v9730_v36  ;;  %v9752_v36 = vpack.c.bf16 %v3520_v59, %v3519_v7  ;;  %v3560_v7 = vld [vmem:[%s14060_s4 + $0x638] sm:$0xff]  ;;  %v3577_v59 = vld [vmem:[%s14060_s4 + $0x6c0] sm:$0xff]  ;;  %v3595_v10 = vld [vmem:[%s14060_s4 + $0x750] sm:$0xff] }
0x14a8   :  { %9733 = vmatprep.subr.bf16.mxu1 %v9732_v13  ;;  %v3569_v13 = vld [vmem:[%s14060_s4 + $0x680] sm:$0xff]  ;;  %v9802_v12 = vpack.c.bf16 %v3560_v7, %v3559_v6  ;;  %v3618_v6 = vld [vmem:[%s14060_s4 + $0x808] sm:$0xff]  ;;  %v3635_v7 = vld [vmem:[%s14060_s4 + $0x890] sm:$0xff] }
0x14a9   :  { %9771 = vmatpush3.bf16.msra.mxu0 %v9770_v34  ;;  %v3587_v34 = vld [vmem:[%s14060_s4 + $0x710] sm:$0xff]  ;;  %v9788_v28 = vpack.c.bf16 %v3570_v14, %v3569_v13  ;;  %v3562_v13 = vld [vmem:[%s14060_s4 + $0x648] sm:$0xff] }
0x14aa   :  { %9773 = vmatprep.subr.bf16.mxu0 %v9772_v22  ;;  %v3588_v22 = vld [vmem:[%s14060_s4 + $0x718] sm:$0xff]  ;;  %v3579_v14 = vld [vmem:[%s14060_s4 + $0x6d0] sm:$0xff] }
0x14ab   :  { %9735 = vmatpush3.bf16.msra.mxu1 %v9734_v26  ;;  %v3605_v26 = vld [vmem:[%s14060_s4 + $0x7a0] sm:$0xff]  ;;  %v9826_v31 = vpack.c.bf16 %v3588_v22, %v3587_v34  ;;  %v3598_v22 = vld [vmem:[%s14060_s4 + $0x768] sm:$0xff] }
0x14ac   :  { %9737 = vmatprep.subr.bf16.mxu1 %v9736_v15  ;;  %v3553_v15 = vld [vmem:[%s14060_s4 + $0x600] sm:$0xff] }
0x14ad   :  { %9775 = vmatpush3.bf16.msra.mxu0 %v9774_v39  ;;  %v9828_v39 = vpack.c.bf16 %v3606_v27, %v3605_v26  ;;  %v3597_v34 = vld [vmem:[%s14060_s4 + $0x760] sm:$0xff]  ;;  %v3616_v26 = vld [vmem:[%s14060_s4 + $0x7f8] sm:$0xff] }
0x14ae   :  { %9777 = vmatprep.subr.bf16.mxu0 %v9776_v17  ;;  %v3589_v17 = vld [vmem:[%s14060_s4 + $0x720] sm:$0xff] }
0x14af   :  { %9739 = vmatpush3.bf16.msra.mxu1 %v9738_v41  ;;  %v9790_v41 = vpack.c.bf16 %v3554_v30, %v3553_v15  ;;  %v3564_v15 = vld [vmem:[%s14060_s4 + $0x658] sm:$0xff]  ;;  %v3581_v30 = vld [vmem:[%s14060_s4 + $0x6e0] sm:$0xff] }
0x14b0   :  { %9741 = vmatprep.subr.bf16.mxu1 %v9740_v45  ;;  %v9792_v45 = vpack.c.bf16 %v3572_v29, %v3571_v35  ;;  %v3582_v35 = vld [vmem:[%s14060_s4 + $0x6e8] sm:$0xff]  ;;  %v9846_v29 = vpack.c.bf16 %v3598_v22, %v3597_v34  ;;  %v3655_v22 = vld [vmem:[%s14060_s4 + $0x930] sm:$0xff] }
0x14b1   :  { %9779 = vmatpush3.bf16.msra.mxu0 %v9778_v16  ;;  %v3574_v16 = vld [vmem:[%s14060_s4 + $0x6a8] sm:$0xff]  ;;  %v9812_v43 = vpack.c.bf16 %v3582_v35, %v3581_v30  ;;  %v3639_v35 = vld [vmem:[%s14060_s4 + $0x8b0] sm:$0xff] }
0x14b2   :  { %9781 = vmatprep.subr.bf16.mxu0 %v9780_v49  ;;  %v9830_v49 = vpack.c.bf16 %v3590_v18, %v3589_v17  ;;  %v9796_v57 = vpack.c.bf16 %v3574_v16, %v3573_v11  ;;  %v3600_v17 = vld [vmem:[%s14060_s4 + $0x778] sm:$0xff]  ;;  %v3649_v16 = vld [vmem:[%s14060_s4 + $0x900] sm:$0xff]  ;;  %v3622_v30 = vld [vmem:[%s14060_s4 + $0x828] sm:$0xff] }
0x14b3   :  { %9743 = vmatpush3.bf16.msra.mxu1 %v9742_v53  ;;  %v3592_v53 = vld [vmem:[%s14060_s4 + $0x738] sm:$0xff] }
0x14b4   :  { %9745 = vmatprep.subr.bf16.mxu1 %v9744_v56  ;;  %v3610_v56 = vld [vmem:[%s14060_s4 + $0x7c8] sm:$0xff] }
0x14b5   :  { %9783 = vmatpush3.bf16.msra.mxu0 %v9782_v24  ;;  %v3576_v24 = vld [vmem:[%s14060_s4 + $0x6b8] sm:$0xff]  ;;  %v9836_v25 = vpack.c.bf16 %v3610_v56, %v3609_v55  ;;  %v3567_v55 = vld [vmem:[%s14060_s4 + $0x670] sm:$0xff] }
0x14b6   :  { %9785 = vmatprep.subr.bf16.mxu0 %v9784_v63  ;;  %v9834_v63 = vpack.c.bf16 %v3592_v53, %v3591_v51  ;;  %v9800_v60 = vpack.c.bf16 %v3576_v24, %v3575_v62  ;;  %v3667_v51 = vld [vmem:[%s14060_s4 + $0x990] sm:$0xff]  ;;  %v3668_v53 = vld [vmem:[%s14060_s4 + $0x998] sm:$0xff] }
0x14b7   :  { %9747 = vmatpush3.bf16.msra.mxu1 %v9746_v0  ;;  %v3594_v0 = vld [vmem:[%s14060_s4 + $0x748] sm:$0xff]  ;;  %v3568_v56 = vld [vmem:[%s14060_s4 + $0x678] sm:$0xff]  ;;  %v9888_v24 = vpack.c.bf16 %v3668_v53, %v3667_v51  ;;  %v3677_v53 = vld [vmem:[%s14060_s4 + $0x9e0] sm:$0xff] }
0x14b8   :  { %9749 = vmatprep.subr.bf16.mxu1 %v9748_v2  ;;  %v3612_v2 = vld [vmem:[%s14060_s4 + $0x7d8] sm:$0xff] }
0x14b9   :  { %9787 = vmatpush3.bf16.msra.mxu0 %v9786_v8  ;;  %v3578_v8 = vld [vmem:[%s14060_s4 + $0x6c8] sm:$0xff]  ;;  %v9840_v9 = vpack.c.bf16 %v3612_v2, %v3611_v1 }
0x14ba   :  { %9821 = vmatprep.subr.bf16.mxu0 %v9820_v33  ;;  %v9838_v33 = vpack.c.bf16 %v3594_v0, %v3593_v52  ;;  %v9804_v4 = vpack.c.bf16 %v3578_v8, %v3577_v59  ;;  %v3348_v52 = vld [vmem:[%s14063_s3 + $0x98] sm:$0xff]  ;;  %v9818_v0 = vpack.c.bf16 %v3568_v56, %v3567_v55  ;;  %v3670_v1 = vld [vmem:[%s14060_s4 + $0x9a8] sm:$0xff]  ;;  %v3625_v56 = vld [vmem:[%s14060_s4 + $0x840] sm:$0xff] }
0x14bb   :  { %9751 = vmatpush3.bf16.msra.mxu1 %v9750_v32  ;;  %v3596_v32 = vld [vmem:[%s14060_s4 + $0x758] sm:$0xff] }
0x14bc   :  { %9753 = vmatprep.subr.bf16.mxu1 %v9752_v36  ;;  %4295 = vmatmul.mubr.f32.vlgmr.msra.gmra.mrb[50].mxu0 %v3339_v19  ;;  %v3614_v36 = vld [vmem:[%s14060_s4 + $0x7e8] sm:$0xff]  ;;  %v3580_v19 = vld [vmem:[%s14060_s4 + $0x6d8] sm:$0xff] }
0x14bd   :  { %9823 = vmatpush3.bf16.msra.mxu0 %v9822_v21  ;;  %4434 = vmatprep.mubr.f32.mxu0 %v3344_v20  ;;  %v9842_v21 = vpack.c.bf16 %v3596_v32, %v3595_v10  ;;  %v9806_v20 = vpack.c.bf16 %v3562_v13, %v3561_v3  ;;  %v9808_v27 = vpack.c.bf16 %v3580_v19, %v3579_v14  ;;  %v3636_v59 = vld [vmem:[%s14060_s4 + $0x898] sm:$0xff]  ;;  %v3654_v10 = vld [vmem:[%s14060_s4 + $0x928] sm:$0xff]  ;;  %v3341_v32 = vld [vmem:[%s14063_s3 + $0x60] sm:$0xff] }
0x14be   :  { %9825 = vmatprep.subr.bf16.mxu0 %v9824_v38  ;;  %v9844_v38 = vpack.c.bf16 %v3614_v36, %v3613_v37  ;;  %v3671_v37 = vld [vmem:[%s14060_s4 + $0x9b0] sm:$0xff]  ;;  %v3672_v36 = vld [vmem:[%s14060_s4 + $0x9b8] sm:$0xff]  ;;  %v3346_v14 = vld [vmem:[%s14063_s3 + $0x88] sm:$0xff] }
0x14bf   :  { %9755 = vmatpush3.bf16.msra.mxu1 %v9754_v23  ;;  %v3615_v23 = vld [vmem:[%s14060_s4 + $0x7f0] sm:$0xff]  ;;  %v3620_v13 = vld [vmem:[%s14060_s4 + $0x818] sm:$0xff]  ;;  %v3637_v19 = vld [vmem:[%s14060_s4 + $0x8a0] sm:$0xff]  ;;  %v9896_v34 = vpack.c.bf16 %v3672_v36, %v3671_v37 }
0x14c0   :  { %9789 = vmatprep.subr.bf16.mxu1 %v9788_v28  ;;  %v3563_v28 = vld [vmem:[%s14060_s4 + $0x650] sm:$0xff]  ;;  %v3629_v36 = vld [vmem:[%s14060_s4 + $0x860] sm:$0xff] }
0x14c1   :  { %9827 = vmatpush3.bf16.msra.mxu0 %v9826_v31  ;;  %v9848_v31 = vpack.c.bf16 %v3616_v26, %v3615_v23  ;;  %v9810_v18 = vpack.c.bf16 %v3564_v15, %v3563_v28  ;;  %v3619_v3 = vld [vmem:[%s14060_s4 + $0x810] sm:$0xff]  ;;  %v3673_v26 = vld [vmem:[%s14060_s4 + $0x9c0] sm:$0xff] }
0x14c2   :  { %4225 = vmatmul.mubr.f32.vlgmr.msra.gmra.mrb[50].mxu1 %v3337_v40  ;;  %9829 = vmatprep.subr.bf16.mxu0 %v9828_v39  ;;  %v3599_v39 = vld [vmem:[%s14060_s4 + $0x770] sm:$0xff]  ;;  %v3665_v40 = vld [vmem:[%s14060_s4 + $0x980] sm:$0xff]  ;;  %v9858_v23 = vpack.c.bf16 %v3620_v13, %v3619_v3  ;;  %v3648_v13 = vld [vmem:[%s14060_s4 + $0x8f8] sm:$0xff] }
0x14c3   :  { %9791 = vmatpush3.bf16.msra.mxu1 %v9790_v41  ;;  %4364 = vmatprep.mubr.f32.mxu1 %v3342_v48  ;;  %v3666_v41 = vld [vmem:[%s14060_s4 + $0x988] sm:$0xff]  ;;  %v9850_v48 = vpack.c.bf16 %v3600_v17, %v3599_v39  ;;  %v3621_v15 = vld [vmem:[%s14060_s4 + $0x820] sm:$0xff]  ;;  %v3647_v3 = vld [vmem:[%s14060_s4 + $0x8f0] sm:$0xff] }
0x14c4   :  { %9793 = vmatprep.subr.bf16.mxu1 %v9792_v45  ;;  %v3566_v45 = vld [vmem:[%s14060_s4 + $0x668] sm:$0xff]  ;;  %v9884_v11 = vpack.c.bf16 %v3666_v41, %v3665_v40  ;;  %v3657_v17 = vld [vmem:[%s14060_s4 + $0x940] sm:$0xff]  ;;  %v9862_v40 = vpack.c.bf16 %v3622_v30, %v3621_v15  ;;  %v3675_v41 = vld [vmem:[%s14060_s4 + $0x9d0] sm:$0xff] }
0x14c5   :  { %9831 = vmatpush3.bf16.msra.mxu0 %v9830_v49  ;;  %v3650_v49 = vld [vmem:[%s14060_s4 + $0x908] sm:$0xff]  ;;  %v3347_v30 = vld [vmem:[%s14063_s3 + $0x90] sm:$0xff] }
0x14c6   :  { %9833 = vmatprep.subr.bf16.mxu0 %v9832_v50  ;;  %v9814_v50 = vpack.c.bf16 %v3566_v45, %v3565_v44  ;;  %v9886_v62 = vpack.c.bf16 %v3650_v49, %v3649_v16  ;;  %v3623_v45 = vld [vmem:[%s14060_s4 + $0x830] sm:$0xff]  ;;  %v3698_v15 = vld [vmem:[%s14060_s4 + $0xa88] sm:$0xff] }
0x14c7   :  { %9795 = vmatpush3.bf16.msra.mxu1 %v9794_v54  ;;  %v9816_v54 = vpack.c.bf16 %v3584_v47, %v3583_v46  ;;  %v3624_v46 = vld [vmem:[%s14060_s4 + $0x838] sm:$0xff]  ;;  %v3641_v47 = vld [vmem:[%s14060_s4 + $0x8c0] sm:$0xff]  ;;  %v3659_v49 = vld [vmem:[%s14060_s4 + $0x950] sm:$0xff] }
0x14c8   :  { %9797 = vmatprep.subr.bf16.mxu1 %v9796_v57  ;;  %v3633_v57 = vld [vmem:[%s14060_s4 + $0x880] sm:$0xff]  ;;  %v9866_v51 = vpack.c.bf16 %v3624_v46, %v3623_v45  ;;  %v3682_v45 = vld [vmem:[%s14060_s4 + $0xa08] sm:$0xff]  ;;  %v3699_v46 = vld [vmem:[%s14060_s4 + $0xa90] sm:$0xff] }
0x14c9   :  { %9835 = vmatpush3.bf16.msra.mxu0 %v9834_v63  ;;  %v3651_v63 = vld [vmem:[%s14060_s4 + $0x910] sm:$0xff]  ;;  %v9852_v2 = vpack.c.bf16 %v3634_v58, %v3633_v57  ;;  %v3626_v57 = vld [vmem:[%s14060_s4 + $0x848] sm:$0xff] }
0x14ca   :  { %9837 = vmatprep.subr.bf16.mxu0 %v9836_v25  ;;  %v3652_v25 = vld [vmem:[%s14060_s4 + $0x918] sm:$0xff]  ;;  %v3643_v58 = vld [vmem:[%s14060_s4 + $0x8d0] sm:$0xff] }
0x14cb   :  { %9799 = vmatpush3.bf16.msra.mxu1 %v9798_v42  ;;  %v3669_v42 = vld [vmem:[%s14060_s4 + $0x9a0] sm:$0xff]  ;;  %v9890_v8 = vpack.c.bf16 %v3652_v25, %v3651_v63  ;;  %v3662_v25 = vld [vmem:[%s14060_s4 + $0x968] sm:$0xff] }
0x14cc   :  { %9801 = vmatprep.subr.bf16.mxu1 %v9800_v60  ;;  %v3617_v60 = vld [vmem:[%s14060_s4 + $0x800] sm:$0xff] }
0x14cd   :  { %9839 = vmatpush3.bf16.msra.mxu0 %v9838_v33  ;;  %v9892_v33 = vpack.c.bf16 %v3670_v1, %v3669_v42  ;;  %v3661_v63 = vld [vmem:[%s14060_s4 + $0x960] sm:$0xff]  ;;  %v3680_v42 = vld [vmem:[%s14060_s4 + $0x9f8] sm:$0xff] }
0x14ce   :  { %9841 = vmatprep.subr.bf16.mxu0 %v9840_v9  ;;  %v3653_v9 = vld [vmem:[%s14060_s4 + $0x920] sm:$0xff] }
0x14cf   :  { %9803 = vmatpush3.bf16.msra.mxu1 %v9802_v12  ;;  %v9854_v12 = vpack.c.bf16 %v3618_v6, %v3617_v60  ;;  %v3628_v60 = vld [vmem:[%s14060_s4 + $0x858] sm:$0xff]  ;;  %v3645_v6 = vld [vmem:[%s14060_s4 + $0x8e0] sm:$0xff] }
0x14d0   :  { %9805 = vmatprep.subr.bf16.mxu1 %v9804_v4  ;;  %v9856_v4 = vpack.c.bf16 %v3636_v59, %v3635_v7  ;;  %v3646_v7 = vld [vmem:[%s14060_s4 + $0x8e8] sm:$0xff]  ;;  %v9910_v59 = vpack.c.bf16 %v3662_v25, %v3661_v63  ;;  %v3719_v25 = vld [vmem:[%s14060_s4 + $0xb30] sm:$0xff] }
0x14d1   :  { %9843 = vmatpush3.bf16.msra.mxu0 %v9842_v21  ;;  %v3638_v21 = vld [vmem:[%s14060_s4 + $0x8a8] sm:$0xff]  ;;  %v9876_v37 = vpack.c.bf16 %v3646_v7, %v3645_v6  ;;  %v3703_v7 = vld [vmem:[%s14060_s4 + $0xab0] sm:$0xff] }
0x14d2   :  { %9845 = vmatprep.subr.bf16.mxu0 %v9844_v38  ;;  %v9894_v38 = vpack.c.bf16 %v3654_v10, %v3653_v9  ;;  %v9860_v28 = vpack.c.bf16 %v3638_v21, %v3637_v19  ;;  %v3664_v9 = vld [vmem:[%s14060_s4 + $0x978] sm:$0xff]  ;;  %v3713_v21 = vld [vmem:[%s14060_s4 + $0xb00] sm:$0xff]  ;;  %v3686_v6 = vld [vmem:[%s14060_s4 + $0xa28] sm:$0xff] }
0x14d3   :  { %9807 = vmatpush3.bf16.msra.mxu1 %v9806_v20  ;;  %v3656_v20 = vld [vmem:[%s14060_s4 + $0x938] sm:$0xff] }
0x14d4   :  { %9809 = vmatprep.subr.bf16.mxu1 %v9808_v27  ;;  %v3674_v27 = vld [vmem:[%s14060_s4 + $0x9c8] sm:$0xff] }
0x14d5   :  { %9847 = vmatpush3.bf16.msra.mxu0 %v9846_v29  ;;  %v3640_v29 = vld [vmem:[%s14060_s4 + $0x8b8] sm:$0xff]  ;;  %v9900_v39 = vpack.c.bf16 %v3674_v27, %v3673_v26  ;;  %v3631_v26 = vld [vmem:[%s14060_s4 + $0x870] sm:$0xff] }
0x14d6   :  { %9849 = vmatprep.subr.bf16.mxu0 %v9848_v31  ;;  %v9898_v31 = vpack.c.bf16 %v3656_v20, %v3655_v22  ;;  %v9864_v44 = vpack.c.bf16 %v3640_v29, %v3639_v35  ;;  %v3731_v22 = vld [vmem:[%s14060_s4 + $0xb90] sm:$0xff]  ;;  %v3732_v20 = vld [vmem:[%s14060_s4 + $0xb98] sm:$0xff] }
0x14d7   :  { %9811 = vmatpush3.bf16.msra.mxu1 %v9810_v18  ;;  %v3658_v18 = vld [vmem:[%s14060_s4 + $0x948] sm:$0xff]  ;;  %v3632_v27 = vld [vmem:[%s14060_s4 + $0x878] sm:$0xff]  ;;  %v9952_v29 = vpack.c.bf16 %v3732_v20, %v3731_v22  ;;  %v3741_v20 = vld [vmem:[%s14060_s4 + $0xbe0] sm:$0xff] }
0x14d8   :  { %9813 = vmatprep.subr.bf16.mxu1 %v9812_v43  ;;  %v3676_v43 = vld [vmem:[%s14060_s4 + $0x9d8] sm:$0xff] }
0x14d9   :  { %9851 = vmatpush3.bf16.msra.mxu0 %v9850_v48  ;;  %v3642_v48 = vld [vmem:[%s14060_s4 + $0x8c8] sm:$0xff]  ;;  %v9904_v16 = vpack.c.bf16 %v3676_v43, %v3675_v41 }
0x14da   :  { %9885 = vmatprep.subr.bf16.mxu0 %v9884_v11  ;;  %v9902_v11 = vpack.c.bf16 %v3658_v18, %v3657_v17  ;;  %v9868_v55 = vpack.c.bf16 %v3642_v48, %v3641_v47  ;;  %v3352_v17 = vld [vmem:[%s14063_s3 + $0xb8] sm:$0xff]  ;;  %v9882_v18 = vpack.c.bf16 %v3632_v27, %v3631_v26  ;;  %v3734_v41 = vld [vmem:[%s14060_s4 + $0xba8] sm:$0xff]  ;;  %v3689_v27 = vld [vmem:[%s14060_s4 + $0xa40] sm:$0xff] }
0x14db   :  { %9815 = vmatpush3.bf16.msra.mxu1 %v9814_v50  ;;  %v3660_v50 = vld [vmem:[%s14060_s4 + $0x958] sm:$0xff] }
0x14dc   :  { %9817 = vmatprep.subr.bf16.mxu1 %v9816_v54  ;;  %4435 = vmatmul.mubr.f32.vlgmr.msra.gmra.mrb[52].mxu0 %v3343_v61  ;;  %v3678_v54 = vld [vmem:[%s14060_s4 + $0x9e8] sm:$0xff]  ;;  %v3644_v61 = vld [vmem:[%s14060_s4 + $0x8d8] sm:$0xff] }
0x14dd   :  { %9887 = vmatpush3.bf16.msra.mxu0 %v9886_v62  ;;  %4574 = vmatprep.mubr.f32.mxu0 %v3348_v52  ;;  %v9906_v62 = vpack.c.bf16 %v3660_v50, %v3659_v49  ;;  %v9870_v52 = vpack.c.bf16 %v3626_v57, %v3625_v56  ;;  %v9872_v1 = vpack.c.bf16 %v3644_v61, %v3643_v58  ;;  %v3700_v47 = vld [vmem:[%s14060_s4 + $0xa98] sm:$0xff]  ;;  %v3718_v49 = vld [vmem:[%s14060_s4 + $0xb28] sm:$0xff]  ;;  %v3345_v50 = vld [vmem:[%s14063_s3 + $0x80] sm:$0xff] }
0x14de   :  { %9889 = vmatprep.subr.bf16.mxu0 %v9888_v24  ;;  %v9908_v24 = vpack.c.bf16 %v3678_v54, %v3677_v53  ;;  %v3735_v53 = vld [vmem:[%s14060_s4 + $0xbb0] sm:$0xff]  ;;  %v3736_v54 = vld [vmem:[%s14060_s4 + $0xbb8] sm:$0xff]  ;;  %v3350_v58 = vld [vmem:[%s14063_s3 + $0xa8] sm:$0xff] }
0x14df   :  { %9819 = vmatpush3.bf16.msra.mxu1 %v9818_v0  ;;  %v3679_v0 = vld [vmem:[%s14060_s4 + $0x9f0] sm:$0xff]  ;;  %v3684_v57 = vld [vmem:[%s14060_s4 + $0xa18] sm:$0xff]  ;;  %v3701_v61 = vld [vmem:[%s14060_s4 + $0xaa0] sm:$0xff]  ;;  %v9960_v63 = vpack.c.bf16 %v3736_v54, %v3735_v53 }
0x14e0   :  { %9853 = vmatprep.subr.bf16.mxu1 %v9852_v2  ;;  %v3627_v2 = vld [vmem:[%s14060_s4 + $0x850] sm:$0xff]  ;;  %v3693_v54 = vld [vmem:[%s14060_s4 + $0xa60] sm:$0xff] }
0x14e1   :  { %9891 = vmatpush3.bf16.msra.mxu0 %v9890_v8  ;;  %v9912_v8 = vpack.c.bf16 %v3680_v42, %v3679_v0  ;;  %v9874_v10 = vpack.c.bf16 %v3628_v60, %v3627_v2  ;;  %v3683_v56 = vld [vmem:[%s14060_s4 + $0xa10] sm:$0xff]  ;;  %v3737_v42 = vld [vmem:[%s14060_s4 + $0xbc0] sm:$0xff] }
0x14e2   :  { %4365 = vmatmul.mubr.f32.vlgmr.msra.gmra.mrb[52].mxu1 %v3341_v32  ;;  %9893 = vmatprep.subr.bf16.mxu0 %v9892_v33  ;;  %v3663_v33 = vld [vmem:[%s14060_s4 + $0x970] sm:$0xff]  ;;  %v3729_v32 = vld [vmem:[%s14060_s4 + $0xb80] sm:$0xff]  ;;  %v9922_v0 = vpack.c.bf16 %v3684_v57, %v3683_v56  ;;  %v3712_v57 = vld [vmem:[%s14060_s4 + $0xaf8] sm:$0xff] }
0x14e3   :  { %9855 = vmatpush3.bf16.msra.mxu1 %v9854_v12  ;;  %4504 = vmatprep.mubr.f32.mxu1 %v3346_v14  ;;  %v3730_v12 = vld [vmem:[%s14060_s4 + $0xb88] sm:$0xff]  ;;  %v9914_v14 = vpack.c.bf16 %v3664_v9, %v3663_v33  ;;  %v3685_v60 = vld [vmem:[%s14060_s4 + $0xa20] sm:$0xff]  ;;  %v3711_v56 = vld [vmem:[%s14060_s4 + $0xaf0] sm:$0xff] }
0x14e4   :  { %9857 = vmatprep.subr.bf16.mxu1 %v9856_v4  ;;  %v3630_v4 = vld [vmem:[%s14060_s4 + $0x868] sm:$0xff]  ;;  %v9948_v19 = vpack.c.bf16 %v3730_v12, %v3729_v32  ;;  %v3721_v9 = vld [vmem:[%s14060_s4 + $0xb40] sm:$0xff]  ;;  %v9926_v32 = vpack.c.bf16 %v3686_v6, %v3685_v60  ;;  %v3739_v12 = vld [vmem:[%s14060_s4 + $0xbd0] sm:$0xff] }
0x14e5   :  { %9895 = vmatpush3.bf16.msra.mxu0 %v9894_v38  ;;  %v3714_v38 = vld [vmem:[%s14060_s4 + $0xb08] sm:$0xff]  ;;  %v3351_v6 = vld [vmem:[%s14063_s3 + $0xb0] sm:$0xff] }
0x14e6   :  { %9897 = vmatprep.subr.bf16.mxu0 %v9896_v34  ;;  %v9878_v34 = vpack.c.bf16 %v3630_v4, %v3629_v36  ;;  %v9950_v35 = vpack.c.bf16 %v3714_v38, %v3713_v21  ;;  %v3687_v4 = vld [vmem:[%s14060_s4 + $0xa30] sm:$0xff]  ;;  %v3762_v60 = vld [vmem:[%s14060_s4 + $0xc88] sm:$0xff] }
0x14e7   :  { %9859 = vmatpush3.bf16.msra.mxu1 %v9858_v23  ;;  %v9880_v23 = vpack.c.bf16 %v3648_v13, %v3647_v3  ;;  %v3688_v3 = vld [vmem:[%s14060_s4 + $0xa38] sm:$0xff]  ;;  %v3705_v13 = vld [vmem:[%s14060_s4 + $0xac0] sm:$0xff]  ;;  %v3723_v38 = vld [vmem:[%s14060_s4 + $0xb50] sm:$0xff] }
0x14e8   :  { %9861 = vmatprep.subr.bf16.mxu1 %v9860_v28  ;;  %v3697_v28 = vld [vmem:[%s14060_s4 + $0xa80] sm:$0xff]  ;;  %v9930_v22 = vpack.c.bf16 %v3688_v3, %v3687_v4  ;;  %v3746_v4 = vld [vmem:[%s14060_s4 + $0xc08] sm:$0xff]  ;;  %v3763_v3 = vld [vmem:[%s14060_s4 + $0xc90] sm:$0xff] }
0x14e9   :  { %9899 = vmatpush3.bf16.msra.mxu0 %v9898_v31  ;;  %v3715_v31 = vld [vmem:[%s14060_s4 + $0xb10] sm:$0xff]  ;;  %v9916_v43 = vpack.c.bf16 %v3698_v15, %v3697_v28  ;;  %v3690_v28 = vld [vmem:[%s14060_s4 + $0xa48] sm:$0xff] }
0x14ea   :  { %9901 = vmatprep.subr.bf16.mxu0 %v9900_v39  ;;  %v3716_v39 = vld [vmem:[%s14060_s4 + $0xb18] sm:$0xff]  ;;  %v3707_v15 = vld [vmem:[%s14060_s4 + $0xad0] sm:$0xff] }
0x14eb   :  { %9863 = vmatpush3.bf16.msra.mxu1 %v9862_v40  ;;  %v3733_v40 = vld [vmem:[%s14060_s4 + $0xba0] sm:$0xff]  ;;  %v9954_v48 = vpack.c.bf16 %v3716_v39, %v3715_v31  ;;  %v3726_v39 = vld [vmem:[%s14060_s4 + $0xb68] sm:$0xff] }
0x14ec   :  { %9865 = vmatprep.subr.bf16.mxu1 %v9864_v44  ;;  %v3681_v44 = vld [vmem:[%s14060_s4 + $0xa00] sm:$0xff] }
0x14ed   :  { %9903 = vmatpush3.bf16.msra.mxu0 %v9902_v11  ;;  %v9956_v11 = vpack.c.bf16 %v3734_v41, %v3733_v40  ;;  %v3725_v31 = vld [vmem:[%s14060_s4 + $0xb60] sm:$0xff]  ;;  %v3744_v40 = vld [vmem:[%s14060_s4 + $0xbf8] sm:$0xff] }
0x14ee   :  { %9905 = vmatprep.subr.bf16.mxu0 %v9904_v16  ;;  %v3717_v16 = vld [vmem:[%s14060_s4 + $0xb20] sm:$0xff] }
0x14ef   :  { %9867 = vmatpush3.bf16.msra.mxu1 %v9866_v51  ;;  %v9918_v51 = vpack.c.bf16 %v3682_v45, %v3681_v44  ;;  %v3692_v44 = vld [vmem:[%s14060_s4 + $0xa58] sm:$0xff]  ;;  %v3709_v45 = vld [vmem:[%s14060_s4 + $0xae0] sm:$0xff] }
0x14f0   :  { %9869 = vmatprep.subr.bf16.mxu1 %v9868_v55  ;;  %v9920_v55 = vpack.c.bf16 %v3700_v47, %v3699_v46  ;;  %v3710_v46 = vld [vmem:[%s14060_s4 + $0xae8] sm:$0xff]  ;;  %v9974_v47 = vpack.c.bf16 %v3726_v39, %v3725_v31 }
0x14f1   :  { %9907 = vmatpush3.bf16.msra.mxu0 %v9906_v62  ;;  %v3702_v62 = vld [vmem:[%s14060_s4 + $0xaa8] sm:$0xff]  ;;  %v9940_v53 = vpack.c.bf16 %v3710_v46, %v3709_v45  ;;  %v3749_v46 = vld [vmem:[%s14060_s4 + $0xc20] sm:$0xff] }
0x14f2   :  { %9909 = vmatprep.subr.bf16.mxu0 %v9908_v24  ;;  %v9958_v24 = vpack.c.bf16 %v3718_v49, %v3717_v16  ;;  %v9924_v2 = vpack.c.bf16 %v3702_v62, %v3701_v61  ;;  %v3728_v16 = vld [vmem:[%s14060_s4 + $0xb78] sm:$0xff]  ;;  %v3777_v62 = vld [vmem:[%s14060_s4 + $0xd00] sm:$0xff] }
0x14f3   :  { %9871 = vmatpush3.bf16.msra.mxu1 %v9870_v52  ;;  %v3720_v52 = vld [vmem:[%s14060_s4 + $0xb38] sm:$0xff] }
0x14f4   :  { %9873 = vmatprep.subr.bf16.mxu1 %v9872_v1  ;;  %v3738_v1 = vld [vmem:[%s14060_s4 + $0xbc8] sm:$0xff] }
0x14f5   :  { %9911 = vmatpush3.bf16.msra.mxu0 %v9910_v59  ;;  %v3704_v59 = vld [vmem:[%s14060_s4 + $0xab8] sm:$0xff]  ;;  %v9964_v33 = vpack.c.bf16 %v3738_v1, %v3737_v42  ;;  %v3695_v42 = vld [vmem:[%s14060_s4 + $0xa70] sm:$0xff] }
0x14f6   :  { %9913 = vmatprep.subr.bf16.mxu0 %v9912_v8  ;;  %v9962_v8 = vpack.c.bf16 %v3720_v52, %v3719_v25  ;;  %v9928_v36 = vpack.c.bf16 %v3704_v59, %v3703_v7  ;;  %v3795_v25 = vld [vmem:[%s14060_s4 + $0xd90] sm:$0xff]  ;;  %v3796_v52 = vld [vmem:[%s14060_s4 + $0xd98] sm:$0xff] }
0x14f7   :  { %9875 = vmatpush3.bf16.msra.mxu1 %v9874_v10  ;;  %v3722_v10 = vld [vmem:[%s14060_s4 + $0xb48] sm:$0xff]  ;;  %v3696_v1 = vld [vmem:[%s14060_s4 + $0xa78] sm:$0xff]  ;;  %v10016_v59 = vpack.c.bf16 %v3796_v52, %v3795_v25  ;;  %v3769_v52 = vld [vmem:[%s14060_s4 + $0xcc0] sm:$0xff] }
0x14f8   :  { %9877 = vmatprep.subr.bf16.mxu1 %v9876_v37  ;;  %v3740_v37 = vld [vmem:[%s14060_s4 + $0xbd8] sm:$0xff] }
0x14f9   :  { %9915 = vmatpush3.bf16.msra.mxu0 %v9914_v14  ;;  %v3706_v14 = vld [vmem:[%s14060_s4 + $0xac8] sm:$0xff]  ;;  %v9968_v21 = vpack.c.bf16 %v3740_v37, %v3739_v12  ;;  %v3752_v25 = vld [vmem:[%s14060_s4 + $0xc38] sm:$0xff] }
0x14fa   :  { %9949 = vmatprep.subr.bf16.mxu0 %v9948_v19  ;;  %v9966_v19 = vpack.c.bf16 %v3722_v10, %v3721_v9  ;;  %v9932_v26 = vpack.c.bf16 %v3706_v14, %v3705_v13  ;;  %v3356_v9 = vld [vmem:[%s14063_s3 + $0xd8] sm:$0xff]  ;;  %v9946_v10 = vpack.c.bf16 %v3696_v1, %v3695_v42  ;;  %v3798_v12 = vld [vmem:[%s14060_s4 + $0xda8] sm:$0xff] }
0x14fb   :  { %9879 = vmatpush3.bf16.msra.mxu1 %v9878_v34  ;;  %v3724_v34 = vld [vmem:[%s14060_s4 + $0xb58] sm:$0xff] }
0x14fc   :  { %9881 = vmatprep.subr.bf16.mxu1 %v9880_v23  ;;  %4575 = vmatmul.mubr.f32.vlgmr.msra.gmra.mrb[54].mxu0 %v3347_v30  ;;  %v3742_v23 = vld [vmem:[%s14060_s4 + $0xbe8] sm:$0xff]  ;;  %v3708_v30 = vld [vmem:[%s14060_s4 + $0xad8] sm:$0xff] }
0x14fd   :  { %9951 = vmatpush3.bf16.msra.mxu0 %v9950_v35  ;;  %4714 = vmatprep.mubr.f32.mxu0 %v3352_v17  ;;  %v9970_v35 = vpack.c.bf16 %v3724_v34, %v3723_v38  ;;  %v9934_v17 = vpack.c.bf16 %v3690_v28, %v3689_v27  ;;  %v9936_v41 = vpack.c.bf16 %v3708_v30, %v3707_v15  ;;  %v3764_v13 = vld [vmem:[%s14060_s4 + $0xc98] sm:$0xff]  ;;  %v3782_v38 = vld [vmem:[%s14060_s4 + $0xd28] sm:$0xff]  ;;  %v3050_v34 = vlaneseq  ;;  %v3747_v28 = vld [vmem:[%s14060_s4 + $0xc10] sm:$0xff] }
0x14fe   :  { %9953 = vmatprep.subr.bf16.mxu0 %v9952_v29  ;;  %v9972_v29 = vpack.c.bf16 %v3742_v23, %v3741_v20  ;;  %v3799_v23 = vld [vmem:[%s14060_s4 + $0xdb0] sm:$0xff]  ;;  %v9984_v27 = vpack.c.bf16 %v3764_v13, %v3763_v3  ;;  %v3748_v15 = vld [vmem:[%s14060_s4 + $0xc18] sm:$0xff]  ;;  %v3354_v30 = vld [vmem:[%s14063_s3 + $0xc8] sm:$0xff] }
0x14ff   :  { %9883 = vmatpush3.bf16.msra.mxu1 %v9882_v18  ;;  %v3743_v18 = vld [vmem:[%s14060_s4 + $0xbf0] sm:$0xff]  ;;  %v12923_v39 = vshrl.u32 %v3050_v34, 7  ;;  %v3772_v13 = vld [vmem:[%s14060_s4 + $0xcd8] sm:$0xff] }
0x1500   :  { %9917 = vmatprep.subr.bf16.mxu1 %v9916_v43  ;;  %v3691_v43 = vld [vmem:[%s14060_s4 + $0xa50] sm:$0xff] }
0x1501   :  { %9955 = vmatpush3.bf16.msra.mxu0 %v9954_v48  ;;  %v9976_v48 = vpack.c.bf16 %v3744_v40, %v3743_v18  ;;  %v9938_v49 = vpack.c.bf16 %v3692_v44, %v3691_v43  ;;  %v3783_v18 = vld [vmem:[%s14060_s4 + $0xd30] sm:$0xff]  ;;  %v3784_v40 = vld [vmem:[%s14060_s4 + $0xd38] sm:$0xff]  ;;  %v3801_v43 = vld [vmem:[%s14060_s4 + $0xdc0] sm:$0xff] }
0x1502   :  { %4505 = vmatmul.mubr.f32.vlgmr.msra.gmra.mrb[54].mxu1 %v3345_v50  ;;  %9957 = vmatprep.subr.bf16.mxu0 %v9956_v11  ;;  %v3727_v11 = vld [vmem:[%s14060_s4 + $0xb70] sm:$0xff]  ;;  %v3793_v50 = vld [vmem:[%s14060_s4 + $0xd80] sm:$0xff]  ;;  %v3802_v44 = vld [vmem:[%s14060_s4 + $0xdc8] sm:$0xff] }
0x1503   :  { %9919 = vmatpush3.bf16.msra.mxu1 %v9918_v51  ;;  %4644 = vmatprep.mubr.f32.mxu1 %v3350_v58  ;;  %v3794_v51 = vld [vmem:[%s14060_s4 + $0xd88] sm:$0xff]  ;;  %v9978_v58 = vpack.c.bf16 %v3728_v16, %v3727_v11  ;;  %v3768_v11 = vld [vmem:[%s14060_s4 + $0xcb8] sm:$0xff]  ;;  %v10026_v16 = vpack.c.bf16 %v3784_v40, %v3783_v18  ;;  %v3771_v3 = vld [vmem:[%s14060_s4 + $0xcd0] sm:$0xff] }
0x1504   :  { %9921 = vmatprep.subr.bf16.mxu1 %v9920_v55  ;;  %v3694_v55 = vld [vmem:[%s14060_s4 + $0xa68] sm:$0xff]  ;;  %v10012_v61 = vpack.c.bf16 %v3794_v51, %v3793_v50  ;;  %v12953_v50 = vsub.s32 4, %v12923_v39  ;;  %v10028_v51 = vpack.c.bf16 %v3802_v44, %v3801_v43  ;;  %v3756_v18 = vld [vmem:[%s14060_s4 + $0xc58] sm:$0xff]  ;;  %v3773_v43 = vld [vmem:[%s14060_s4 + $0xce0] sm:$0xff] }
0x1505   :  { %9959 = vmatpush3.bf16.msra.mxu0 %v9958_v24  ;;  %v3778_v24 = vld [vmem:[%s14060_s4 + $0xd08] sm:$0xff] }
0x1506   :  { %9961 = vmatprep.subr.bf16.mxu0 %v9960_v63  ;;  %v9942_v63 = vpack.c.bf16 %v3694_v55, %v3693_v54  ;;  %v10014_v7 = vpack.c.bf16 %v3778_v24, %v3777_v62  ;;  %v3786_v54 = vld [vmem:[%s14060_s4 + $0xd48] sm:$0xff]  ;;  %v3804_v62 = vld [vmem:[%s14060_s4 + $0xdd8] sm:$0xff] }
0x1507   :  { %9923 = vmatpush3.bf16.msra.mxu1 %v9922_v0  ;;  %v9944_v0 = vpack.c.bf16 %v3712_v57, %v3711_v56  ;;  %v12964_v56 = vld [vmem:[%s14064_s22] sm:$0x3f]  ;;  %v12967_v57 = vsub.s32 1, %v12923_v39  ;;  %v3774_v44 = vld [vmem:[%s14060_s4 + $0xce8] sm:$0xff]  ;;  %s14157_s22 = smov 48  }
0x1508   :  { %9925 = vmatprep.subr.bf16.mxu1 %v9924_v2  ;;  %v3761_v2 = vld [vmem:[%s14060_s4 + $0xc80] sm:$0xff] }
0x1509   :  { %9963 = vmatpush3.bf16.msra.mxu0 %v9962_v8  ;;  %v3779_v8 = vld [vmem:[%s14060_s4 + $0xd10] sm:$0xff]  ;;  %v9980_v37 = vpack.c.bf16 %v3762_v60, %v3761_v2  ;;  %v3069_v2 = vrot.slane %v12964_v56, %v12953_v50 }
0x150a   :  { %9965 = vmatprep.subr.bf16.mxu0 %v9964_v33  ;;  %v3780_v33 = vld [vmem:[%s14060_s4 + $0xd18] sm:$0xff] }
0x150b   :  { %9927 = vmatpush3.bf16.msra.mxu1 %v9926_v32  ;;  %v3797_v32 = vld [vmem:[%s14060_s4 + $0xda0] sm:$0xff]  ;;  %v10018_v14 = vpack.c.bf16 %v3780_v33, %v3779_v8 }
0x150c   :  { %9929 = vmatprep.subr.bf16.mxu1 %v9928_v36  ;;  %v3745_v36 = vld [vmem:[%s14060_s4 + $0xc00] sm:$0xff] }
0x150d   :  { %9967 = vmatpush3.bf16.msra.mxu0 %v9966_v19  ;;  %v10020_v19 = vpack.c.bf16 %v3798_v12, %v3797_v32  ;;  %v9982_v20 = vpack.c.bf16 %v3746_v4, %v3745_v36  ;;  %v3753_v12 = vld [vmem:[%s14060_s4 + $0xc40] sm:$0xff] }
0x150e   :  { %9969 = vmatprep.subr.bf16.mxu0 %v9968_v21  ;;  %v3781_v21 = vld [vmem:[%s14060_s4 + $0xd20] sm:$0xff] }
0x150f   :  { %9931 = vmatpush3.bf16.msra.mxu1 %v9930_v22  ;;  %v3349_v22 = vld [vmem:[%s14063_s3 + $0xa0] sm:$0xff]  ;;  %v10022_v31 = vpack.c.bf16 %v3782_v38, %v3781_v21 }
0x1510   :  { %9933 = vmatprep.subr.bf16.mxu1 %v9932_v26  ;;  %v3800_v26 = vld [vmem:[%s14060_s4 + $0xdb8] sm:$0xff] }
0x1511   :  { %9971 = vmatpush3.bf16.msra.mxu0 %v9970_v35  ;;  %v3765_v35 = vld [vmem:[%s14060_s4 + $0xca0] sm:$0xff] }
0x1512   :  { %9973 = vmatprep.subr.bf16.mxu0 %v9972_v29  ;;  %v3766_v29 = vld [vmem:[%s14060_s4 + $0xca8] sm:$0xff] }
0x1513   :  { %9935 = vmatpush3.bf16.msra.mxu1 %v9934_v17  ;;  %v10024_v17 = vpack.c.bf16 %v3800_v26, %v3799_v23  ;;  %v9988_v45 = vpack.c.bf16 %v3766_v29, %v3765_v35  ;;  %v3789_v23 = vld [vmem:[%s14060_s4 + $0xd60] sm:$0xff]  ;;  %v3790_v26 = vld [vmem:[%s14060_s4 + $0xd68] sm:$0xff]  ;;  %v3807_v35 = vld [vmem:[%s14060_s4 + $0xdf0] sm:$0xff] }
0x1514   :  { %9937 = vmatprep.subr.bf16.mxu1 %v9936_v41  ;;  %v9986_v41 = vpack.c.bf16 %v3748_v15, %v3747_v28  ;;  %v3808_v29 = vld [vmem:[%s14060_s4 + $0xdf8] sm:$0xff] }
0x1515   :  { %9975 = vmatpush3.bf16.msra.mxu0 %v9974_v47  ;;  %v3750_v47 = vld [vmem:[%s14060_s4 + $0xc28] sm:$0xff] }
0x1516   :  { %9977 = vmatprep.subr.bf16.mxu0 %v9976_v48  ;;  %v3767_v48 = vld [vmem:[%s14060_s4 + $0xcb0] sm:$0xff]  ;;  %v9990_v55 = vpack.c.bf16 %v3750_v47, %v3749_v46 }
0x1517   :  { %9939 = vmatpush3.bf16.msra.mxu1 %v9938_v49  ;;  %v12950_v49 = vsub.s32 0, %v12923_v39  ;;  %v9992_v24 = vpack.c.bf16 %v3768_v11, %v3767_v48 }
0x1518   :  { %9941 = vmatprep.subr.bf16.mxu1 %v9940_v53  ;;  %v3785_v53 = vld [vmem:[%s14060_s4 + $0xd40] sm:$0xff] }
0x1519   :  { %9979 = vmatpush3.bf16.msra.mxu0 %v9978_v58  ;;  %v12970_v58 = vsub.s32 5, %v12923_v39  ;;  %v10030_v42 = vpack.c.bf16 %v3786_v54, %v3785_v53  ;;  %v3053_v1 = vrot.slane %v12964_v56, %v12950_v49  ;;  %v3791_v53 = vld [vmem:[%s14060_s4 + $0xd70] sm:$0xff]  ;;  %v3792_v54 = vld [vmem:[%s14060_s4 + $0xd78] sm:$0xff] }
0x151a   :  { %10013 = vmatprep.subr.bf16.mxu0 %v10012_v61  ;;  %v3803_v61 = vld [vmem:[%s14060_s4 + $0xdd0] sm:$0xff] }
0x151b   :  { %9943 = vmatpush3.bf16.msra.mxu1 %v9942_v63  ;;  %v3751_v63 = vld [vmem:[%s14060_s4 + $0xc30] sm:$0xff]  ;;  %v10032_v60 = vpack.c.bf16 %v3804_v62, %v3803_v61  ;;  %v3073_v8 = vrot.slane %v12964_v56, %v12970_v58 }
0x151c   :  { %9945 = vmatprep.subr.bf16.mxu1 %v9944_v0  ;;  %4715 = vmatmul.mubr.f32.vlgmr.msra.gmra.mrb[56].mxu0 %v3351_v6  ;;  %v3770_v0 = vld [vmem:[%s14060_s4 + $0xcc8] sm:$0xff]  ;;  %v3787_v6 = vld [vmem:[%s14060_s4 + $0xd50] sm:$0xff]  ;;  %v9994_v33 = vpack.c.bf16 %v3752_v25, %v3751_v63  ;;  %v3857_v63 = vld [vmem:[%s14060_s4 + $0xf80] sm:$0xff] }
0x151d   :  { %10015 = vmatpush3.bf16.msra.mxu0 %v10014_v7  ;;  %4854 = vmatprep.mubr.f32.mxu0 %v3356_v9  ;;  %v3788_v7 = vld [vmem:[%s14060_s4 + $0xd58] sm:$0xff]  ;;  %v3805_v9 = vld [vmem:[%s14060_s4 + $0xde0] sm:$0xff]  ;;  %v9996_v32 = vpack.c.bf16 %v3770_v0, %v3769_v52  ;;  %v3858_v25 = vld [vmem:[%s14060_s4 + $0xf88] sm:$0xff]  ;;  %v10004_v52 = vpack.c.bf16 %v3774_v44, %v3773_v43 }
0x151e   :  { %10017 = vmatprep.subr.bf16.mxu0 %v10016_v59  ;;  %v3057_v59 = vrot.slane %v12964_v56, %v12967_v57  ;;  %v3758_v0 = vld [vmem:[%s14060_s4 + $0xc68] sm:$0xff] }
0x151f   :  { %9947 = vmatpush3.bf16.msra.mxu1 %v9946_v10  ;;  %v3806_v10 = vld [vmem:[%s14060_s4 + $0xde8] sm:$0xff] }
0x1520   :  { %9981 = vmatprep.subr.bf16.mxu1 %v9980_v37  ;;  %v3754_v37 = vld [vmem:[%s14060_s4 + $0xc48] sm:$0xff] }
0x1521   :  { %10019 = vmatpush3.bf16.msra.mxu0 %v10018_v14  ;;  %v10034_v14 = vpack.c.bf16 %v3788_v7, %v3787_v6  ;;  %v9998_v15 = vpack.c.bf16 %v3754_v37, %v3753_v12  ;;  %v3860_v12 = vld [vmem:[%s14060_s4 + $0xf98] sm:$0xff] }
0x1522   :  { %4645 = vmatmul.mubr.f32.vlgmr.msra.gmra.mrb[56].mxu1 %v3349_v22  ;;  %10021 = vmatprep.subr.bf16.mxu0 %v10020_v19  ;;  %v13023_v22 = vsub.s32 2, %v12923_v39 }
0x1523   :  { %9983 = vmatpush3.bf16.msra.mxu1 %v9982_v20  ;;  %4784 = vmatprep.mubr.f32.mxu1 %v3354_v30  ;;  %v10036_v20 = vpack.c.bf16 %v3806_v10, %v3805_v9  ;;  %v13032_v30 = vsub.s32 3, %v12923_v39 }
0x1524   :  { %9985 = vmatprep.subr.bf16.mxu1 %v9984_v27 }
0x1525   :  { %10023 = vmatpush3.bf16.msra.mxu0 %v10022_v31  ;;  %v10000_v31 = vpack.c.bf16 %v3772_v13, %v3771_v3  ;;  %v3065_v62 = vrot.slane %v12964_v56, %v13032_v30  ;;  %v3825_v13 = vld [vmem:[%s14060_s4 + $0xe80] sm:$0xff] }
0x1526   :  { %10025 = vmatprep.subr.bf16.mxu0 %v10024_v17  ;;  %v3755_v17 = vld [vmem:[%s14060_s4 + $0xc50] sm:$0xff] }
0x1527   :  { %9987 = vmatpush3.bf16.msra.mxu1 %v9986_v41 }
0x1528   :  { %9989 = vmatprep.subr.bf16.mxu1 %v9988_v45  ;;  %v10038_v45 = vpack.c.bf16 %v3790_v26, %v3789_v23  ;;  %v3843_v23 = vld [vmem:[%s14060_s4 + $0xf10] sm:$0xff]  ;;  %v3844_v26 = vld [vmem:[%s14060_s4 + $0xf18] sm:$0xff] }
0x1529   :  { %10027 = vmatpush3.bf16.msra.mxu0 %v10026_v16  ;;  %v3061_v16 = vrot.slane %v12964_v56, %v13023_v22  ;;  %v3757_v56 = vld [vmem:[%s14060_s4 + $0xc60] sm:$0xff]  ;;  %v10082_v43 = vpack.c.bf16 %v3844_v26, %v3843_v23  ;;  %v3870_v23 = vld [vmem:[%s14060_s4 + $0xfe8] sm:$0xff] }
0x152a   :  { %10029 = vmatprep.subr.bf16.mxu0 %v10028_v51  ;;  %v10040_v51 = vpack.c.bf16 %v3808_v29, %v3807_v35  ;;  %v10006_v10 = vpack.c.bf16 %v3758_v0, %v3757_v56  ;;  %v3861_v35 = vld [vmem:[%s14060_s4 + $0xfa0] sm:$0xff]  ;;  %v3862_v29 = vld [vmem:[%s14060_s4 + $0xfa8] sm:$0xff] }
0x152b   :  { %9991 = vmatpush3.bf16.msra.mxu1 %v9990_v55  ;;  %v10084_v44 = vpack.c.bf16 %v3862_v29, %v3861_v35  ;;  %v3865_v0 = vld [vmem:[%s14060_s4 + $0xfc0] sm:$0xff]  ;;  %v3836_v35 = vld [vmem:[%s14060_s4 + $0xed8] sm:$0xff] }
0x152c   :  { %9993 = vmatprep.subr.bf16.mxu1 %v9992_v24  ;;  %v10002_v24 = vpack.c.bf16 %v3756_v18, %v3755_v17  ;;  %v3809_v17 = vld [vmem:[%s14060_s4 + $0xe00] sm:$0xff]  ;;  %v3810_v18 = vld [vmem:[%s14060_s4 + $0xe08] sm:$0xff] }
0x152d   :  { %v3152_v36 = vpop.f32.mrb[38].mxu1  ;;  %v3306_v4 = vpop.f32.mrb[42].mxu0  ;;  %10031 = vmatpush3.bf16.msra.mxu0 %v10030_v42 }
0x152e   :  { %v3153_v19 = vadd.f32 %v3152_v36, %v3053_v1  ;;  %v3307_v21 = vadd.f32 %v3306_v4, %v3069_v2  ;;  %v3154_v38 = vpop.f32.mrb[39].mxu1  ;;  %v3308_v34 = vpop.f32.mrb[43].mxu0  ;;  %10033 = vmatprep.subr.bf16.mxu0 %v10032_v60  ;;  %v10042_v60 = vpack.c.bf16 %v3792_v54, %v3791_v53  ;;  %v3759_v36 = vld [vmem:[%s14060_s4 + $0xc70] sm:$0xff]  ;;  %v3760_v4 = vld [vmem:[%s14060_s4 + $0xc78] sm:$0xff] }
0x152f   :  { %v3155_v27 = vadd.f32 %v3154_v38, %v3057_v59  ;;  %v3309_v28 = vadd.f32 %v3308_v34, %v3073_v8  ;;  %9995 = vmatpush3.bf16.msra.mxu1 %v9994_v33  ;;  %v3842_v33 = vld [vmem:[%s14060_s4 + $0xf08] sm:$0xff]  ;;  %v3811_v53 = vld [vmem:[%s14060_s4 + $0xe10] sm:$0xff]  ;;  %v3812_v54 = vld [vmem:[%s14060_s4 + $0xe18] sm:$0xff] }
0x1530   :  { %3317 = vst [vmem:[%s14065_s27] sm:$0xff] %v3153_v19  ;;  %3321 = vst [vmem:[%s14065_s27 + $0x20] sm:$0xff] %v3307_v21  ;;  %9997 = vmatprep.subr.bf16.mxu1 %v9996_v32  ;;  %v3859_v32 = vld [vmem:[%s14060_s4 + $0xf90] sm:$0xff]  ;;  %v10050_v56 = vpack.c.bf16 %v3812_v54, %v3811_v53 }
0x1531   :  { %3318 = vst [vmem:[%s14065_s27 + $0x8] sm:$0xff] %v3155_v27  ;;  %3322 = vst [vmem:[%s14065_s27 + $0x28] sm:$0xff] %v3309_v28  ;;  %v3158_v40 = vpop.f32.mrb[40].mxu1  ;;  %v3312_v41 = vpop.f32.mrb[44].mxu0  ;;  %10035 = vmatpush3.bf16.msra.mxu0 %v10034_v14  ;;  %v3826_v14 = vld [vmem:[%s14060_s4 + $0xe88] sm:$0xff]  ;;  %v3355_v19 = vld [vmem:[%s14063_s3 + $0xd0] sm:$0xff] }
0x1532   :  { %v3159_v46 = vadd.f32 %v3158_v40, %v3053_v1  ;;  %v3313_v47 = vadd.f32 %v3312_v41, %v3069_v2  ;;  %v3160_v48 = vpop.f32.mrb[41].mxu1  ;;  %v3314_v11 = vpop.f32.mrb[45].mxu0  ;;  %10037 = vmatprep.subr.bf16.mxu0 %v10036_v20  ;;  %v3775_v1 = vld [vmem:[%s14060_s4 + $0xcf0] sm:$0xff]  ;;  %v3776_v2 = vld [vmem:[%s14060_s4 + $0xcf8] sm:$0xff]  ;;  %v10080_v20 = vpack.c.bf16 %v3860_v12, %v3859_v32 }
0x1533   :  { %v3161_v55 = vadd.f32 %v3160_v48, %v3057_v59  ;;  %v3315_v61 = vadd.f32 %v3314_v11, %v3073_v8  ;;  %9999 = vmatpush3.bf16.msra.mxu1 %v9998_v15  ;;  %v10076_v59 = vpack.c.bf16 %v3858_v25, %v3857_v63  ;;  %v3841_v8 = vld [vmem:[%s14060_s4 + $0xf00] sm:$0xff]  ;;  %v10008_v37 = vpack.c.bf16 %v3776_v2, %v3775_v1  ;;  %v3360_v27 = vld [vmem:[%s14063_s3 + $0xf8] sm:$0xff]  ;;  %v3827_v40 = vld [vmem:[%s14060_s4 + $0xe90] sm:$0xff] }
0x1534   :  { %3323 = vst [vmem:[%s14065_s27 + $0x30] sm:$0xff] %v3159_v46  ;;  %3327 = vst [vmem:[%s14065_s27 + $0x50] sm:$0xff] %v3313_v47  ;;  %10001 = vmatprep.subr.bf16.mxu1 %v10000_v31  ;;  %v10078_v21 = vpack.c.bf16 %v3842_v33, %v3841_v8  ;;  %v10010_v15 = vpack.c.bf16 %v3760_v4, %v3759_v36  ;;  %v10044_v31 = vpack.c.bf16 %v3826_v14, %v3825_v13  ;;  %v3828_v41 = vld [vmem:[%s14060_s4 + $0xe98] sm:$0xff]  ;;  %v3846_v46 = vld [vmem:[%s14060_s4 + $0xf28] sm:$0xff] }
0x1535   :  { %3324 = vst [vmem:[%s14065_s27 + $0x38] sm:$0xff] %v3161_v55  ;;  %3328 = vst [vmem:[%s14065_s27 + $0x58] sm:$0xff] %v3315_v61  ;;  %v3229_v42 = vpop.f32.mrb[42].mxu1  ;;  %10039 = vmatpush3.bf16.msra.mxu0 %v10038_v45  ;;  %v3845_v45 = vld [vmem:[%s14060_s4 + $0xf20] sm:$0xff]  ;;  %v10046_v48 = vpack.c.bf16 %v3810_v18, %v3809_v17  ;;  %v3863_v11 = vld [vmem:[%s14060_s4 + $0xfb0] sm:$0xff] }
0x1536   :  { %v3230_v6 = vadd.f32 %v3229_v42, %v3061_v16  ;;  %v3231_v7 = vpop.f32.mrb[43].mxu1  ;;  %10041 = vmatprep.subr.bf16.mxu0 %v10040_v51  ;;  %v3353_v47 = vld [vmem:[%s14063_s3 + $0xc0] sm:$0xff]  ;;  %v10048_v51 = vpack.c.bf16 %v3828_v41, %v3827_v40  ;;  %v3358_v55 = vld [vmem:[%s14063_s3 + $0xe8] sm:$0xff]  ;;  %v3847_v25 = vld [vmem:[%s14060_s4 + $0xf30] sm:$0xff] }
0x1537   :  { %v3232_v9 = vadd.f32 %v3231_v7, %v3065_v62  ;;  %10003 = vmatpush3.bf16.msra.mxu1 %v10002_v24  ;;  %v3829_v61 = vld [vmem:[%s14060_s4 + $0xea0] sm:$0xff]  ;;  %v10086_v24 = vpack.c.bf16 %v3846_v46, %v3845_v45  ;;  %v3866_v42 = vld [vmem:[%s14060_s4 + $0xfc8] sm:$0xff]  ;;  %v3832_v7 = vld [vmem:[%s14060_s4 + $0xeb8] sm:$0xff] }
0x1538   :  { %3319 = vst [vmem:[%s14065_s27 + $0x10] sm:$0xff] %v3230_v6  ;;  %10005 = vmatprep.subr.bf16.mxu1 %v10004_v52  ;;  %v3848_v52 = vld [vmem:[%s14060_s4 + $0xf38] sm:$0xff]  ;;  %v3813_v2 = vld [vmem:[%s14060_s4 + $0xe20] sm:$0xff]  ;;  %v3831_v6 = vld [vmem:[%s14060_s4 + $0xeb0] sm:$0xff]  ;;  %v10092_v8 = vpack.c.bf16 %v3866_v42, %v3865_v0 }
0x1539   :  { %3320 = vst [vmem:[%s14065_s27 + $0x18] sm:$0xff] %v3232_v9  ;;  %v3235_v3 = vpop.f32.mrb[44].mxu1  ;;  %10043 = vmatpush3.bf16.msra.mxu0 %v10042_v60  ;;  %v3814_v60 = vld [vmem:[%s14060_s4 + $0xe28] sm:$0xff]  ;;  %v3849_v33 = vld [vmem:[%s14060_s4 + $0xf40] sm:$0xff]  ;;  %v3867_v32 = vld [vmem:[%s14060_s4 + $0xfd0] sm:$0xff] }
0x153a   :  { %v3236_v38 = vadd.f32 %v3235_v3, %v3061_v16  ;;  %v3237_v34 = vpop.f32.mrb[45].mxu1  ;;  %10077 = vmatprep.subr.bf16.mxu0 %v10076_v59  ;;  %v3864_v16 = vld [vmem:[%s14060_s4 + $0xfb8] sm:$0xff]  ;;  %v10090_v59 = vpack.c.bf16 %v3848_v52, %v3847_v25  ;;  %v3850_v9 = vld [vmem:[%s14060_s4 + $0xf48] sm:$0xff]  ;;  %v3815_v36 = vld [vmem:[%s14060_s4 + $0xe30] sm:$0xff] }
0x153b   :  { %v3238_v28 = vadd.f32 %v3237_v34, %v3065_v62  ;;  %10007 = vmatpush3.bf16.msra.mxu1 %v10006_v10  ;;  %v3830_v62 = vld [vmem:[%s14060_s4 + $0xea8] sm:$0xff]  ;;  %v10088_v63 = vpack.c.bf16 %v3864_v16, %v3863_v11  ;;  %v10054_v10 = vpack.c.bf16 %v3814_v60, %v3813_v2  ;;  %v3868_v12 = vld [vmem:[%s14060_s4 + $0xfd8] sm:$0xff]  ;;  %v3833_v3 = vld [vmem:[%s14060_s4 + $0xec0] sm:$0xff]  ;;  %v10094_v14 = vpack.c.bf16 %v3850_v9, %v3849_v33 }
0x153c   :  { %3325 = vst [vmem:[%s14065_s27 + $0x40] sm:$0xff] %v3236_v38  ;;  %10009 = vmatprep.subr.bf16.mxu1 %v10008_v37  ;;  %4855 = vmatmul.mubr.f32.vlgmr.msra.gmra.mrb[58].mxu0 %v3355_v19  ;;  %v10052_v1 = vpack.c.bf16 %v3830_v62, %v3829_v61  ;;  %v10056_v37 = vpack.c.bf16 %v3832_v7, %v3831_v6  ;;  %v3816_v4 = vld [vmem:[%s14060_s4 + $0xe38] sm:$0xff]  ;;  %v3834_v13 = vld [vmem:[%s14060_s4 + $0xec8] sm:$0xff]  ;;  %v3853_v17 = vld [vmem:[%s14060_s4 + $0xf60] sm:$0xff] }
0x153d   :  { %3326 = vst [vmem:[%s14065_s27 + $0x48] sm:$0xff] %v3238_v28  ;;  %10079 = vmatpush3.bf16.msra.mxu0 %v10078_v21  ;;  %4994 = vmatprep.mubr.f32.mxu0 %v3360_v27  ;;  %v10096_v19 = vpack.c.bf16 %v3868_v12, %v3867_v32  ;;  %v3851_v21 = vld [vmem:[%s14060_s4 + $0xf50] sm:$0xff]  ;;  %v3852_v38 = vld [vmem:[%s14060_s4 + $0xf58] sm:$0xff]  ;;  %v10058_v34 = vpack.c.bf16 %v3816_v4, %v3815_v36  ;;  %v3817_v27 = vld [vmem:[%s14060_s4 + $0xe40] sm:$0xff]  ;;  %s14154_s27 = smov 56  }
0x153e   :  { %10081 = vmatprep.subr.bf16.mxu0 %v10080_v20  ;;  %v3869_v20 = vld [vmem:[%s14060_s4 + $0xfe0] sm:$0xff]  ;;  %v10060_v26 = vpack.c.bf16 %v3834_v13, %v3833_v3  ;;  %v3818_v28 = vld [vmem:[%s14060_s4 + $0xe48] sm:$0xff]  ;;  %v10098_v29 = vpack.c.bf16 %v3852_v38, %v3851_v21  ;;  %v3819_v46 = vld [vmem:[%s14060_s4 + $0xe50] sm:$0xff] }
0x153f   :  { %10011 = vmatpush3.bf16.msra.mxu1 %v10010_v15  ;;  %v3835_v15 = vld [vmem:[%s14060_s4 + $0xed0] sm:$0xff]  ;;  %v3854_v18 = vld [vmem:[%s14060_s4 + $0xf68] sm:$0xff]  ;;  %v10062_v40 = vpack.c.bf16 %v3818_v28, %v3817_v27  ;;  %v3837_v11 = vld [vmem:[%s14060_s4 + $0xee0] sm:$0xff] }
0x1540   :  { %10045 = vmatprep.subr.bf16.mxu1 %v10044_v31  ;;  %v10100_v31 = vpack.c.bf16 %v3870_v23, %v3869_v20  ;;  %v10064_v45 = vpack.c.bf16 %v3836_v35, %v3835_v15  ;;  %v3838_v16 = vld [vmem:[%s14060_s4 + $0xee8] sm:$0xff]  ;;  %v3856_v61 = vld [vmem:[%s14060_s4 + $0xf78] sm:$0xff]  ;;  %v3359_v9 = vld [vmem:[%s14063_s3 + $0xf0] sm:$0xff] }
0x1541   :  { %10083 = vmatpush3.bf16.msra.mxu0 %v10082_v43  ;;  %v3871_v43 = vld [vmem:[%s14060_s4 + $0xff0] sm:$0xff]  ;;  %v3822_v25 = vld [vmem:[%s14060_s4 + $0xe68] sm:$0xff]  ;;  %v3840_v0 = vld [vmem:[%s14060_s4 + $0xef8] sm:$0xff] }
0x1542   :  { %4785 = vmatmul.mubr.f32.vlgmr.msra.gmra.mrb[58].mxu1 %v3353_v47  ;;  %10085 = vmatprep.subr.bf16.mxu0 %v10084_v44  ;;  %v3872_v44 = vld [vmem:[%s14060_s4 + $0xff8] sm:$0xff]  ;;  %v3357_v12 = vld [vmem:[%s14063_s3 + $0xe0] sm:$0xff]  ;;  %s14160_s3 = smov 40  }
0x1543   :  { %10047 = vmatpush3.bf16.msra.mxu1 %v10046_v48  ;;  %4924 = vmatprep.mubr.f32.mxu1 %v3358_v55  ;;  %v3820_v47 = vld [vmem:[%s14060_s4 + $0xe58] sm:$0xff]  ;;  %v10104_v54 = vpack.c.bf16 %v3872_v44, %v3871_v43  ;;  %v3855_v55 = vld [vmem:[%s14060_s4 + $0xf70] sm:$0xff] }
0x1544   :  { %10049 = vmatprep.subr.bf16.mxu1 %v10048_v51  ;;  %v10102_v51 = vpack.c.bf16 %v3854_v18, %v3853_v17  ;;  %v10066_v62 = vpack.c.bf16 %v3820_v47, %v3819_v46  ;;  %v10106_v42 = vpack.c.bf16 %v3856_v61, %v3855_v55 }
0x1545   :  { %10087 = vmatpush3.bf16.msra.mxu0 %v10086_v24  ;;  %v10068_v24 = vpack.c.bf16 %v3838_v16, %v3837_v11 }
0x1546   :  { %10089 = vmatprep.subr.bf16.mxu0 %v10088_v63  ;;  %v3821_v63 = vld [vmem:[%s14060_s4 + $0xe60] sm:$0xff] }
0x1547   :  { %10051 = vmatpush3.bf16.msra.mxu1 %v10050_v56  ;;  %v3839_v56 = vld [vmem:[%s14060_s4 + $0xef0] sm:$0xff]  ;;  %v10070_v60 = vpack.c.bf16 %v3822_v25, %v3821_v63 }
0x1548   :  { %10053 = vmatprep.subr.bf16.mxu1 %v10052_v1  ;;  %v8064_v1 = vld [vmem:[%s14066_s5] ss:$0 sm:$0xff]  ;;  %v10072_v7 = vpack.c.bf16 %v3840_v0, %v3839_v56  ;;  %s14158_s5 = smov 72  }
0x1549   :  { %10091 = vmatpush3.bf16.msra.mxu0 %v10090_v59  ;;  %v3823_v59 = vld [vmem:[%s14060_s4 + $0xe70] sm:$0xff] }
0x154a   :  { %10093 = vmatprep.subr.bf16.mxu0 %v10092_v8  ;;  %v3824_v8 = vld [vmem:[%s14060_s4 + $0xe78] sm:$0xff]  ;;  %s14161_s4 = smov 8  }
0x154b   :  { %10055 = vmatpush3.bf16.msra.mxu1 %v10054_v10  ;;  %v10074_v10 = vpack.c.bf16 %v3824_v8, %v3823_v59 }
0x154c   :  { %10057 = vmatprep.subr.bf16.mxu1 %v10056_v37 }
0x154d   :  { %10095 = vmatpush3.bf16.msra.mxu0 %v10094_v14 }
0x154e   :  { %10097 = vmatprep.subr.bf16.mxu0 %v10096_v19 }
0x154f   :  { %10059 = vmatpush3.bf16.msra.mxu1 %v10058_v34  ;;  %v8467_v41 = vpop.f32.mrb[46].mxu0 }
0x1550   :  { %10061 = vmatprep.subr.bf16.mxu1 %v10060_v26  ;;  %v8468_v48 = vpop.f32.mrb[47].mxu0 }
0x1551   :  { %10099 = vmatpush3.bf16.msra.mxu0 %v10098_v29  ;;  %v8469_v53 = vadd.f32 %v8468_v48, %v8467_v41 }
0x1552   :  { %10101 = vmatprep.subr.bf16.mxu0 %v10100_v31 }
0x1553   :  { %10063 = vmatpush3.bf16.msra.mxu1 %v10062_v40 }
0x1554   :  { %10065 = vmatprep.subr.bf16.mxu1 %v10064_v45 }
0x1555   :  { %v8432_v52 = vpop.f32.mrb[46].mxu1  ;;  %10103 = vmatpush3.bf16.msra.mxu0 %v10102_v51 }
0x1556   :  { %v8433_v2 = vpop.f32.mrb[47].mxu1  ;;  %10105 = vmatprep.subr.bf16.mxu0 %v10104_v54 }
0x1557   :  { %10067 = vmatpush3.bf16.msra.mxu1 %v10066_v62  ;;  %v8434_v6 = vadd.f32 %v8433_v2, %v8432_v52 }
0x1558   :  { %10069 = vmatprep.subr.bf16.mxu1 %v10068_v24 }
0x1559   :  { %v3947_v33 = vadd.f32 %v8434_v6, %v8064_v1  ;;  %10107 = vmatpush3.bf16.msra.mxu0 %v10106_v42 }
0x155a   :  { %9203 = vmatprep.subr.mxu0 %v10487_v5 }
0x155b   :  { %10071 = vmatpush3.bf16.msra.mxu1 %v10070_v60  ;;  %v4017_v32 = vadd.f32 %v8469_v53, %v3947_v33 }
0x155c   :  { %10073 = vmatprep.subr.bf16.mxu1 %v10072_v7  ;;  %4995 = vmatmul.mubr.f32.vlgmr.msra.gmra.mrb[60].mxu0 %v3359_v9 }
0x155d   :  { %9205 = vmatprep.mubr.msk.f32.mxu0 %vm10489_vm6, %v10487_v5 }
0x155f   :  { %10075 = vmatpush3.bf16.msra.mxu1 %v10074_v10 }
0x1562   :  { %4925 = vmatmul.mubr.f32.vlgmr.msra.gmra.mrb[60].mxu1 %v3357_v12 }
0x1563   :  { %9200 = vmatprep.mubr.msk.f32.mxu1 %vm10489_vm6, %v10487_v5 }
0x156f   :  { %v8537_v37 = vpop.f32.mrb[48].mxu0 }
0x1570   :  { %v8538_v36 = vpop.f32.mrb[49].mxu0 }
0x1571   :  { %v8539_v4 = vadd.f32 %v8538_v36, %v8537_v37 }
0x1575   :  { %v8502_v3 = vpop.f32.mrb[48].mxu1 }
0x1576   :  { %v8503_v13 = vpop.f32.mrb[49].mxu1 }
0x1577   :  { %v8504_v14 = vadd.f32 %v8503_v13, %v8502_v3 }
0x1579   :  { %v4087_v19 = vadd.f32 %v8504_v14, %v4017_v32 }
0x157b   :  { %v4157_v21 = vadd.f32 %v8539_v4, %v4087_v19  ;;  %v5029_v19 = vld [vmem:[%s14138_s8] sm:$0xff] }
0x158f   :  { %v8607_v38 = vpop.f32.mrb[50].mxu0 }
0x1590   :  { %v8608_v34 = vpop.f32.mrb[51].mxu0 }
0x1591   :  { %v8609_v20 = vadd.f32 %v8608_v34, %v8607_v38  ;;  %v10488_v34 = vmov 0.0|0.0  }
0x1592   :  { %10108 = vmatprep.subr.bf16.mxu1 %v10488_v34 }
0x1595   :  { %v8572_v23 = vpop.f32.mrb[50].mxu1 }
0x1596   :  { %v8573_v26 = vpop.f32.mrb[51].mxu1 }
0x1597   :  { %v8574_v27 = vadd.f32 %v8573_v26, %v8572_v23  ;;  %v5032_v23 = vld [vmem:[%s14138_s8 + $0x18] sm:$0xff] }
0x1599   :  { %v4227_v28 = vadd.f32 %v8574_v27, %v4157_v21  ;;  %v5030_v21 = vld [vmem:[%s14138_s8 + $0x8] sm:$0xff] }
0x159a   :  { %v10109_v38 = vpack.c.bf16 %v5030_v21, %v5029_v19 }
0x159b   :  { %v4297_v15 = vadd.f32 %v8609_v20, %v4227_v28  ;;  %v5031_v20 = vld [vmem:[%s14138_s8 + $0x10] sm:$0xff] }
0x159c   :  { %10110 = vmatpush3.bf16.msra.mxu1 %v10109_v38  ;;  %v10112_v26 = vpack.c.bf16 %v5032_v23, %v5031_v20 }
0x159d   :  { %10111 = vmatprep.subr.bf16.mxu1 %v10488_v34 }
0x15a0   :  { %10113 = vmatpush3.bf16.msra.mxu1 %v10112_v26 }
0x15a1   :  { %9208 = vmatprep.subr.mxu1 %v10487_v5 }
0x15af   :  { %v8677_v35 = vpop.f32.mrb[52].mxu0 }
0x15b0   :  { %v8678_v29 = vpop.f32.mrb[53].mxu0 }
0x15b1   :  { %v8679_v31 = vadd.f32 %v8678_v29, %v8677_v35  ;;  %v8065_v29 = vld [vmem:[%s14139_s14] ss:$0 sm:$0xff]  ;;  %s14151_s14 = smov 64  }
0x15b5   :  { %v8642_v17 = vpop.f32.mrb[52].mxu1 }
0x15b6   :  { %v8643_v18 = vpop.f32.mrb[53].mxu1 }
0x15b7   :  { %v8644_v40 = vadd.f32 %v8643_v18, %v8642_v17  ;;  %v8066_v17 = vld [vmem:[%s14140_s13] ss:$0 sm:$0xff]  ;;  %s14152_s13 = smov 88  }
0x15b9   :  { %v4367_v41 = vadd.f32 %v8644_v40, %v4297_v15 }
0x15bb   :  { %v4437_v43 = vadd.f32 %v8679_v31, %v4367_v41 }
0x15cf   :  { %v8747_v44 = vpop.f32.mrb[54].mxu0 }
0x15d0   :  { %v8748_v45 = vpop.f32.mrb[55].mxu0 }
0x15d1   :  { %v8749_v46 = vadd.f32 %v8748_v45, %v8747_v44 }
0x15d5   :  { %v8712_v47 = vpop.f32.mrb[54].mxu1 }
0x15d6   :  { %v8713_v48 = vpop.f32.mrb[55].mxu1 }
0x15d7   :  { %v8714_v11 = vadd.f32 %v8713_v48, %v8712_v47 }
0x15d9   :  { %v4507_v16 = vadd.f32 %v8714_v11, %v4437_v43 }
0x15db   :  { %v4577_v51 = vadd.f32 %v8749_v46, %v4507_v16 }
0x15ef   :  { %v8817_v53 = vpop.f32.mrb[56].mxu0 }
0x15f0   :  { %v8818_v54 = vpop.f32.mrb[57].mxu0 }
0x15f1   :  { %v8819_v55 = vadd.f32 %v8818_v54, %v8817_v53 }
0x15f5   :  { %v8782_v61 = vpop.f32.mrb[56].mxu1 }
0x15f6   :  { %v8783_v62 = vpop.f32.mrb[57].mxu1 }
0x15f7   :  { %v8784_v24 = vadd.f32 %v8783_v62, %v8782_v61 }
0x15f9   :  { %v4647_v63 = vadd.f32 %v8784_v24, %v4577_v51 }
0x15fb   :  { %v4717_v25 = vadd.f32 %v8819_v55, %v4647_v63 }
0x160f   :  { %v8887_v52 = vpop.f32.mrb[58].mxu0 }
0x1610   :  { %v8888_v56 = vpop.f32.mrb[59].mxu0 }
0x1611   :  { %v8889_v0 = vadd.f32 %v8888_v56, %v8887_v52 }
0x1615   :  { %v8852_v42 = vpop.f32.mrb[58].mxu1 }
0x1616   :  { %v8853_v1 = vpop.f32.mrb[59].mxu1 }
0x1617   :  { %v8854_v2 = vadd.f32 %v8853_v1, %v8852_v42 }
0x1619   :  { %v4787_v60 = vadd.f32 %v8854_v2, %v4717_v25 }
0x161b   :  { %v4857_v6 = vadd.f32 %v8889_v0, %v4787_v60 }
0x162f   :  { %v8957_v7 = vpop.f32.mrb[60].mxu0 }
0x1630   :  { %v8958_v59 = vpop.f32.mrb[61].mxu0 }
0x1631   :  { %v8959_v8 = vadd.f32 %v8958_v59, %v8957_v7 }
0x1635   :  { %v8922_v33 = vpop.f32.mrb[60].mxu1 }
0x1636   :  { %v8923_v9 = vpop.f32.mrb[61].mxu1 }
0x1637   :  { %v8924_v10 = vadd.f32 %v8923_v9, %v8922_v33 }
0x1639   :  { %v4927_v32 = vadd.f32 %v8924_v10, %v4857_v6 }
0x163b   :  { %v13330_v12 = vadd.f32 %v8959_v8, %v4927_v32 }
0x163d   :  { %v5002_v37 = vsel %vm597_vm0, %v13330_v12, 0.0 }
0x163e   :  { %5003 = vadd.xlane.f32.xlu0 %v5002_v37 }
0x16cb   :  { %v5004_v36 = vpop.xlane.xlu0 %5003 }
0x16cc   :  { %v5005_v4 = vmul.f32 0.03125, %v5004_v36 }
0x16ce   :  { %v5006_v3 = vsub.f32 %v13330_v12, %v5005_v4 }
0x16d0   :  { %v5007_v13 = vmul.f32 %v5006_v3, %v5006_v3 }
0x16d2   :  { %v5008_v14 = vsel %vm597_vm0, %v5007_v13, 0.0 }
0x16d3   :  { %5009 = vadd.xlane.f32.xlu1 %v5008_v14 }
0x1760   :  { %v5010_v27 = vpop.xlane.xlu1 %5009 }
0x1761   :  { %v5011_v28 = vmul.f32 0.03125, %v5010_v27 }
0x1763   :  { %v5012_v15 = vadd.f32 1e-05, %v5011_v28 }
0x1765   :  { %10431 = vrsqrt.f32 %v5012_v15 }
0x176f   :  { %v10432_v35 = vpop.eup %10431 }
0x1770   :  { %v5014_v31 = vmul.f32 %v10432_v35, %v5006_v3 }
0x1772   :  { %v5021_v18 = vmul.f32 %v8065_v29, %v5014_v31 }
0x1774   :  { %v5028_v40 = vadd.f32 %v8066_v17, %v5021_v18 }
0x1776   :  { %9201 = vmatmul.mubr.msk.f32.vlgmr.msra.gmra.mrb[62].mxu1 %vm597_vm0, %v5028_v40 }
0x1777   :  { %9210 = vmatprep.mubr.msk.f32.mxu1 %vm10489_vm6, %v10487_v5 }
0x1849   :  { %v13364_v41 = vpop.f32.mrb[62].mxu1 }
0x184a   :  { %v13368_v43 = vcombine.high %v13364_v41, %v13364_v41  ;;  %5108 = vrot.lane.b32.xlu0 %v13364_v41, %s14150_s6  ;;  %v9202_v44 = vpop.f32.mrb[63].mxu1 }
0x184c   :  { %5184 = vrot.lane.b32.xlu1 %v13368_v43, %s14150_s6 }
0x18bc   :  { %v5109_v45 = vpop.permute.xlu0 %5108 }
0x18bd   :  { %9204 = vmatpush3.xpose.msk.msra.mxu0 %vm778_vm1, %v5109_v45 }
0x18be   :  { %v5185_v46 = vpop.permute.xlu1 %5184  ;;  %9213 = vmatprep.subr.mxu0 %v10487_v5 }
0x18bf   :  { %9209 = vmatpush3.xpose.msk.msra.mxu1 %vm778_vm1, %v5185_v46 }
0x18c0   :  { %9206 = vmatmul.mubr.msk.f32.vlgmr.msra.gmra.mrb[62].mxu0 %vm778_vm1, %v13364_v41  ;;  %9218 = vmatprep.subr.mxu1 %v10487_v5 }
0x18c1   :  { %9215 = vmatprep.mubr.msk.f32.mxu0 %vm10489_vm6, %v10487_v5 }
0x18c2   :  { %9211 = vmatmul.mubr.msk.f32.vlgmr.msra.gmra.mrb[64].mxu1 %vm778_vm1, %v13368_v43 }
0x18c3   :  { %9220 = vmatprep.mubr.msk.f32.mxu1 %vm10489_vm6, %v10487_v5 }
0x1993   :  { %v5180_v47 = vpop.f32.mrb[62].mxu0 }
0x1994   :  { %v5260_v48 = vmul.f32 0.35355338, %v5180_v47  ;;  %v9207_v11 = vpop.f32.mrb[63].mxu0 }
0x1995   :  { %v5256_v16 = vpop.f32.mrb[64].mxu1 }
0x1996   :  { %v5261_v51 = vmul.f32 0.35355338, %v5256_v16  ;;  %v9212_v53 = vpop.f32.mrb[65].mxu1  ;;  %v5263_v54 = vsel %vm5262_vm7, %v5260_v48, -inf }
0x1997   :  { %5264 = vmax.xlane.f32.xlu1 %v5263_v54 }
0x1998   :  { %v5266_v55 = vsel %vm5262_vm7, %v5261_v51, -inf }
0x1999   :  { %5267 = vmax.xlane.f32.xlu0 %v5266_v55 }
0x19a8   :  { %5364 = vrot.lane.b32.xlu1 %v13368_v43, %s14151_s14 }
0x19ac   :  { %5443 = vrot.lane.b32.xlu1 %v13364_v41, %s14152_s13 }
0x19af   :  { %5285 = vrot.lane.b32.xlu0 %v13364_v41, %s14151_s14  ;;  %s14168_s14 = sld [smem:[#allocation19_spill]] }
0x19b0   :  { %5521 = vrot.lane.b32.xlu1 %v13368_v43, %s14152_s13 }
0x1a24   :  { %v5265_v61 = vpop.xlane.xlu1 %5264 }
0x1a25   :  { %v5269_v62 = vsub.f32 %v5260_v48, %v5265_v61 }
0x1a26   :  { %v5268_v24 = vpop.xlane.xlu0 %5267 }
0x1a27   :  { %v5271_v63 = vmul.f32 1.442695, %v5269_v62  ;;  %v5270_v25 = vsub.f32 %v5261_v51, %v5268_v24 }
0x1a28   :  { %v5365_v52 = vpop.permute.xlu1 %5364 }
0x1a29   :  { %10433 = vpow2.f32 %v5271_v63  ;;  %v5273_v56 = vmul.f32 1.442695, %v5270_v25  ;;  %9219 = vmatpush3.msk.msra.mxu1 %vm5291_vm8, %v5365_v52 }
0x1a2a   :  { %v5286_v0 = vpop.permute.xlu0 %5285  ;;  %9228 = vmatprep.subr.mxu1 %v10487_v5 }
0x1a2b   :  { %10435 = vpow2.f32 %v5273_v56  ;;  %9214 = vmatpush3.msk.msra.mxu0 %vm5291_vm8, %v5286_v0 }
0x1a2c   :  { %9223 = vmatprep.subr.mxu0 %v10487_v5  ;;  %v5444_v6 = vpop.permute.xlu1 %5443 }
0x1a30   :  { %v5522_v7 = vpop.permute.xlu1 %5521 }
0x1a33   :  { %v10434_v42 = vpop.eup %10433 }
0x1a34   :  { %v5275_v1 = vsel %vm5262_vm7, %v10434_v42, 0.0 }
0x1a35   :  { %v10436_v2 = vpop.eup %10435  ;;  %5276 = vadd.xlane.f32.xlu0 %v5275_v1 }
0x1a36   :  { %v5278_v60 = vsel %vm5262_vm7, %v10436_v2, 0.0 }
0x1a37   :  { %5279 = vadd.xlane.f32.xlu1 %v5278_v60 }
0x1a48   :  { %5519 = vrot.lane.b32.xlu1 %v13368_v43, %s14153_s23 }
0x1a4b   :  { %5441 = vrot.lane.b32.xlu0 %v13364_v41, %s14153_s23 }
0x1ac2   :  { %v5277_v59 = vpop.xlane.xlu0 %5276 }
0x1ac3   :  { %10437 = vrcp.f32 %v5277_v59 }
0x1ac4   :  { %v5280_v8 = vpop.xlane.xlu1 %5279 }
0x1ac5   :  { %10439 = vrcp.f32 %v5280_v8 }
0x1ac6   :  { %v5442_v37 = vpop.permute.xlu0 %5441 }
0x1ac8   :  { %v5520_v36 = vpop.permute.xlu1 %5519 }
0x1acd   :  { %v10438_v33 = vpop.eup %10437 }
0x1ace   :  { %v5282_v9 = vmul.f32 %v10438_v33, %v10434_v42 }
0x1acf   :  { %v10440_v10 = vpop.eup %10439 }
0x1ad0   :  { %v5284_v32 = vmul.f32 %v10440_v10, %v10436_v2  ;;  %9216 = vmatmul.mubr.msk.f32.vlgmr.msra.gmra.mrb[64].mxu0 %vm5287_vm9, %v5282_v9 }
0x1ad1   :  { %9224 = vmatpush3.xpose.msk.msra.mxu0 %vm778_vm1, %v5444_v6  ;;  %9225 = vmatprep.mubr.msk.f32.mxu0 %vm10489_vm6, %v10487_v5 }
0x1ad2   :  { %9221 = vmatmul.mubr.msk.f32.vlgmr.msra.gmra.mrb[66].mxu1 %vm5287_vm9, %v5284_v32  ;;  %9233 = vmatprep.subr.mxu0 %v10487_v5 }
0x1ad3   :  { %9229 = vmatpush3.xpose.msk.msra.mxu1 %vm778_vm1, %v5522_v7  ;;  %9230 = vmatprep.mubr.msk.f32.mxu1 %vm10489_vm6, %v10487_v5 }
0x1ad4   :  { %9226 = vmatmul.mubr.msk.f32.vlgmr.msra.gmra.mrb[66].mxu0 %vm778_vm1, %v5442_v37  ;;  %9238 = vmatprep.subr.mxu1 %v10487_v5 }
0x1ad5   :  { %9235 = vmatprep.mubr.msk.f32.mxu0 %vm10489_vm6, %v10487_v5 }
0x1ad6   :  { %9231 = vmatmul.mubr.msk.f32.vlgmr.msra.gmra.mrb[68].mxu1 %vm778_vm1, %v5520_v36 }
0x1ad7   :  { %9240 = vmatprep.mubr.msk.f32.mxu1 %vm10489_vm6, %v10487_v5 }
0x1ba3   :  { %v13422_v4 = vpop.f32.mrb[64].mxu0 }
0x1ba4   :  { %v9217_v3 = vpop.f32.mrb[65].mxu0 }
0x1ba5   :  { %v13424_v13 = vpop.f32.mrb[66].mxu1 }
0x1ba6   :  { %v9222_v14 = vpop.f32.mrb[67].mxu1 }
0x1ba7   :  { %v5515_v19 = vpop.f32.mrb[66].mxu0 }
0x1ba8   :  { %v5597_v21 = vmul.f32 0.35355338, %v5515_v19  ;;  %v9227_v38 = vpop.f32.mrb[67].mxu0 }
0x1ba9   :  { %v5593_v20 = vpop.f32.mrb[68].mxu1 }
0x1baa   :  { %v5598_v23 = vmul.f32 0.35355338, %v5593_v20  ;;  %v9232_v26 = vpop.f32.mrb[69].mxu1  ;;  %v5599_v27 = vsel %vm5262_vm7, %v5597_v21, -inf }
0x1bab   :  { %5600 = vmax.xlane.f32.xlu0 %v5599_v27 }
0x1bac   :  { %v5602_v28 = vsel %vm5262_vm7, %v5598_v23, -inf }
0x1bad   :  { %5603 = vmax.xlane.f32.xlu1 %v5602_v28 }
0x1bbe   :  { %5698 = vrot.lane.b32.xlu1 %v13368_v43, %s14154_s27 }
0x1bc1   :  { %5621 = vrot.lane.b32.xlu0 %v13364_v41, %s14154_s27 }
0x1bc2   :  { %5777 = vrot.lane.b32.xlu1 %v13364_v41, %s14155_s19 }
0x1bc6   :  { %5855 = vrot.lane.b32.xlu1 %v13368_v43, %s14155_s19 }
0x1bca   :  { %5853 = vrot.lane.b32.xlu1 %v13368_v43, %s14156_s25 }
0x1c38   :  { %v5601_v15 = vpop.xlane.xlu0 %5600 }
0x1c39   :  { %v5605_v35 = vsub.f32 %v5597_v21, %v5601_v15 }
0x1c3a   :  { %v5604_v29 = vpop.xlane.xlu1 %5603 }
0x1c3b   :  { %v5607_v31 = vmul.f32 1.442695, %v5605_v35  ;;  %v5606_v17 = vsub.f32 %v5598_v23, %v5604_v29 }
0x1c3c   :  { %v5622_v18 = vpop.permute.xlu0 %5621 }
0x1c3d   :  { %10441 = vpow2.f32 %v5607_v31  ;;  %v5609_v40 = vmul.f32 1.442695, %v5606_v17  ;;  %9234 = vmatpush3.msk.msra.mxu0 %vm5291_vm8, %v5622_v18 }
0x1c3e   :  { %v5699_v44 = vpop.permute.xlu1 %5698  ;;  %9243 = vmatprep.subr.mxu0 %v10487_v5 }
0x1c3f   :  { %10443 = vpow2.f32 %v5609_v40  ;;  %9239 = vmatpush3.msk.msra.mxu1 %vm5291_vm8, %v5699_v44 }
0x1c40   :  { %9248 = vmatprep.subr.mxu1 %v10487_v5 }
0x1c42   :  { %v5778_v51 = vpop.permute.xlu1 %5777 }
0x1c46   :  { %v5856_v61 = vpop.permute.xlu1 %5855 }
0x1c47   :  { %v10442_v45 = vpop.eup %10441 }
0x1c48   :  { %v5611_v46 = vsel %vm5262_vm7, %v10442_v45, 0.0 }
0x1c49   :  { %v10444_v47 = vpop.eup %10443  ;;  %5612 = vadd.xlane.f32.xlu0 %v5611_v46 }
0x1c4a   :  { %v5614_v48 = vsel %vm5262_vm7, %v10444_v47, 0.0  ;;  %v5854_v63 = vpop.permute.xlu1 %5853 }
0x1c4d   :  { %5615 = vadd.xlane.f32.xlu0 %v5614_v48 }
0x1c63   :  { %5775 = vrot.lane.b32.xlu0 %v13364_v41, %s14156_s25  ;;  %s14164_s25 = sld [smem:[#allocation15_spill]] }
0x1cd6   :  { %v5613_v11 = vpop.xlane.xlu0 %5612 }
0x1cd7   :  { %10445 = vrcp.f32 %v5613_v11 }
0x1cda   :  { %v5616_v16 = vpop.xlane.xlu0 %5615 }
0x1cdb   :  { %10447 = vrcp.f32 %v5616_v16 }
0x1cde   :  { %v5776_v24 = vpop.permute.xlu0 %5775 }
0x1ce1   :  { %v10446_v53 = vpop.eup %10445 }
0x1ce2   :  { %v5618_v54 = vmul.f32 %v10446_v53, %v10442_v45 }
0x1ce4   :  { %9236 = vmatmul.mubr.msk.f32.vlgmr.msra.gmra.mrb[68].mxu0 %vm5287_vm9, %v5618_v54 }
0x1ce5   :  { %v10448_v55 = vpop.eup %10447  ;;  %9244 = vmatpush3.xpose.msk.msra.mxu0 %vm778_vm1, %v5778_v51  ;;  %9245 = vmatprep.mubr.msk.f32.mxu0 %vm10489_vm6, %v10487_v5 }
0x1ce6   :  { %v5620_v62 = vmul.f32 %v10448_v55, %v10444_v47  ;;  %9253 = vmatprep.subr.mxu0 %v10487_v5 }
0x1ce8   :  { %9241 = vmatmul.mubr.msk.f32.vlgmr.msra.gmra.mrb[70].mxu1 %vm5287_vm9, %v5620_v62  ;;  %9246 = vmatmul.mubr.msk.f32.vlgmr.msra.gmra.mrb[70].mxu0 %vm778_vm1, %v5776_v24 }
0x1ce9   :  { %9249 = vmatpush3.xpose.msk.msra.mxu1 %vm778_vm1, %v5856_v61  ;;  %9250 = vmatprep.mubr.msk.f32.mxu1 %vm10489_vm6, %v10487_v5 }
0x1cea   :  { %9258 = vmatprep.subr.mxu1 %v10487_v5  ;;  %9255 = vmatprep.mubr.msk.f32.mxu0 %vm10489_vm6, %v10487_v5 }
0x1cec   :  { %9251 = vmatmul.mubr.msk.f32.vlgmr.msra.gmra.mrb[72].mxu1 %vm778_vm1, %v5854_v63 }
0x1ced   :  { %9260 = vmatprep.mubr.msk.f32.mxu1 %vm10489_vm6, %v10487_v5 }
0x1db7   :  { %v13462_v25 = vpop.f32.mrb[68].mxu0 }
0x1db8   :  { %v9237_v52 = vpop.f32.mrb[69].mxu0 }
0x1dbb   :  { %v13464_v56 = vpop.f32.mrb[70].mxu1  ;;  %v5849_v0 = vpop.f32.mrb[70].mxu0 }
0x1dbc   :  { %v5931_v42 = vmul.f32 0.35355338, %v5849_v0  ;;  %v9242_v1 = vpop.f32.mrb[71].mxu1  ;;  %v9247_v2 = vpop.f32.mrb[71].mxu0 }
0x1dbe   :  { %v5933_v60 = vsel %vm5262_vm7, %v5931_v42, -inf }
0x1dbf   :  { %5934 = vmax.xlane.f32.xlu0 %v5933_v60  ;;  %v5927_v6 = vpop.f32.mrb[72].mxu1 }
0x1dc0   :  { %v5932_v7 = vmul.f32 0.35355338, %v5927_v6  ;;  %v9252_v59 = vpop.f32.mrb[73].mxu1 }
0x1dc2   :  { %v5936_v8 = vsel %vm5262_vm7, %v5932_v7, -inf }
0x1dc3   :  { %5937 = vmax.xlane.f32.xlu1 %v5936_v8 }
0x1dd4   :  { %6032 = vrot.lane.b32.xlu1 %v13368_v43, %s14157_s22 }
0x1dd5   :  { %5955 = vrot.lane.b32.xlu0 %v13364_v41, %s14157_s22 }
0x1dd8   :  { %6111 = vrot.lane.b32.xlu1 %v13364_v41, %s14158_s5 }
0x1ddc   :  { %6189 = vrot.lane.b32.xlu1 %v13368_v43, %s14158_s5  ;;  %s14165_s5 = sld [smem:[#allocation16_spill]] }
0x1de0   :  { %6187 = vrot.lane.b32.xlu1 %v13368_v43, %s14159_s26 }
0x1e4c   :  { %v5935_v33 = vpop.xlane.xlu0 %5934 }
0x1e4d   :  { %v5939_v9 = vsub.f32 %v5931_v42, %v5935_v33  ;;  %v6473_v33 = vld [vmem:[%s14143_s29] sm:$0xff] }
0x1e4f   :  { %v5941_v10 = vmul.f32 1.442695, %v5939_v9  ;;  %v6474_v9 = vld [vmem:[%s14143_s29 + $0x8] sm:$0xff] }
0x1e50   :  { %v5956_v32 = vpop.permute.xlu0 %5955  ;;  %v5938_v37 = vpop.xlane.xlu1 %5937 }
0x1e51   :  { %10449 = vpow2.f32 %v5941_v10  ;;  %v5940_v36 = vsub.f32 %v5932_v7, %v5938_v37  ;;  %9254 = vmatpush3.msk.msra.mxu0 %vm5291_vm8, %v5956_v32  ;;  %v10115_v10 = vpack.c.bf16 %v6474_v9, %v6473_v33  ;;  %v6475_v32 = vld [vmem:[%s14143_s29 + $0x10] sm:$0xff]  ;;  %v6476_v37 = vld [vmem:[%s14143_s29 + $0x18] sm:$0xff]  ;;  %v6687_v33 = vld [vmem:[%s14148_s2 + $0x20] sm:$0xff] }
0x1e52   :  { %9263 = vmatprep.subr.mxu0 %v10487_v5  ;;  %v6688_v9 = vld [vmem:[%s14148_s2 + $0x28] sm:$0xff] }
0x1e53   :  { %v5943_v3 = vmul.f32 1.442695, %v5940_v36  ;;  %v10118_v36 = vpack.c.bf16 %v6476_v37, %v6475_v32  ;;  %v6689_v32 = vld [vmem:[%s14148_s2 + $0x30] sm:$0xff]  ;;  %v6690_v37 = vld [vmem:[%s14148_s2 + $0x38] sm:$0xff] }
0x1e54   :  { %v6033_v14 = vpop.permute.xlu1 %6032 }
0x1e55   :  { %10451 = vpow2.f32 %v5943_v3  ;;  %9259 = vmatpush3.msk.msra.mxu1 %vm5291_vm8, %v6033_v14 }
0x1e56   :  { %9268 = vmatprep.subr.mxu1 %v10487_v5 }
0x1e58   :  { %v6112_v27 = vpop.permute.xlu1 %6111 }
0x1e5b   :  { %v10450_v19 = vpop.eup %10449 }
0x1e5c   :  { %v5945_v21 = vsel %vm5262_vm7, %v10450_v19, 0.0  ;;  %v6190_v29 = vpop.permute.xlu1 %6189 }
0x1e5d   :  { %5946 = vadd.xlane.f32.xlu0 %v5945_v21 }
0x1e5f   :  { %v10452_v38 = vpop.eup %10451 }
0x1e60   :  { %v5948_v20 = vsel %vm5262_vm7, %v10452_v38, 0.0  ;;  %v6188_v18 = vpop.permute.xlu1 %6187 }
0x1e61   :  { %5949 = vadd.xlane.f32.xlu0 %v5948_v20 }
0x1e77   :  { %6109 = vrot.lane.b32.xlu0 %v13364_v41, %s14159_s26 }
0x1eea   :  { %v5947_v23 = vpop.xlane.xlu0 %5946 }
0x1eeb   :  { %10453 = vrcp.f32 %v5947_v23 }
0x1eee   :  { %v5950_v26 = vpop.xlane.xlu0 %5949 }
0x1eef   :  { %10455 = vrcp.f32 %v5950_v26 }
0x1ef2   :  { %v6110_v17 = vpop.permute.xlu0 %6109 }
0x1ef5   :  { %v10454_v28 = vpop.eup %10453 }
0x1ef6   :  { %v5952_v15 = vmul.f32 %v10454_v28, %v10450_v19 }
0x1ef8   :  { %9256 = vmatmul.mubr.msk.f32.vlgmr.msra.gmra.mrb[72].mxu0 %vm5287_vm9, %v5952_v15 }
0x1ef9   :  { %v10456_v35 = vpop.eup %10455  ;;  %9264 = vmatpush3.xpose.msk.msra.mxu0 %vm778_vm1, %v6112_v27  ;;  %9265 = vmatprep.mubr.msk.f32.mxu0 %vm10489_vm6, %v10487_v5 }
0x1efa   :  { %v5954_v31 = vmul.f32 %v10456_v35, %v10452_v38  ;;  %9273 = vmatprep.subr.mxu0 %v10487_v5 }
0x1efc   :  { %9261 = vmatmul.mubr.msk.f32.vlgmr.msra.gmra.mrb[74].mxu1 %vm5287_vm9, %v5954_v31  ;;  %9266 = vmatmul.mubr.msk.f32.vlgmr.msra.gmra.mrb[74].mxu0 %vm778_vm1, %v6110_v17 }
0x1efd   :  { %9269 = vmatpush3.xpose.msk.msra.mxu1 %vm778_vm1, %v6190_v29  ;;  %9270 = vmatprep.mubr.msk.f32.mxu1 %vm10489_vm6, %v10487_v5 }
0x1efe   :  { %9278 = vmatprep.subr.mxu1 %v10487_v5  ;;  %9275 = vmatprep.mubr.msk.f32.mxu0 %vm10489_vm6, %v10487_v5 }
0x1f00   :  { %9271 = vmatmul.mubr.msk.f32.vlgmr.msra.gmra.mrb[76].mxu1 %vm778_vm1, %v6188_v18 }
0x1f01   :  { %9280 = vmatprep.mubr.msk.f32.mxu1 %vm10489_vm6, %v10487_v5 }
0x1fcb   :  { %v6028_v40 = vpop.f32.mrb[72].mxu0 }
0x1fcc   :  { %v9257_v44 = vpop.f32.mrb[73].mxu0 }
0x1fcf   :  { %v6105_v45 = vpop.f32.mrb[74].mxu1  ;;  %v6183_v46 = vpop.f32.mrb[74].mxu0 }
0x1fd0   :  { %v6265_v47 = vmul.f32 0.35355338, %v6183_v46  ;;  %v9262_v48 = vpop.f32.mrb[75].mxu1  ;;  %v9267_v11 = vpop.f32.mrb[75].mxu0 }
0x1fd2   :  { %v6267_v16 = vsel %vm5262_vm7, %v6265_v47, -inf }
0x1fd3   :  { %6268 = vmax.xlane.f32.xlu0 %v6267_v16  ;;  %v6261_v51 = vpop.f32.mrb[76].mxu1 }
0x1fd4   :  { %v6266_v53 = vmul.f32 0.35355338, %v6261_v51  ;;  %v9272_v54 = vpop.f32.mrb[77].mxu1 }
0x1fd5   :  { %v6590_v54 = vld [vmem:[%s14145_s15] sm:$0xff] }
0x1fd6   :  { %v6270_v55 = vsel %vm5262_vm7, %v6266_v53, -inf }
0x1fd7   :  { %6271 = vmax.xlane.f32.xlu1 %v6270_v55 }
0x1fe8   :  { %6366 = vrot.lane.b32.xlu1 %v13368_v43, %s14160_s3 }
0x1fec   :  { %6445 = vrot.lane.b32.xlu1 %v13462_v25, %s14161_s4 }
0x1ff0   :  { %6447 = vrot.lane.b32.xlu1 %v13464_v56, %s14161_s4 }
0x1ff4   :  { %6455 = vrot.lane.b32.xlu1 %v6105_v45, %s14162_s28 }
0x2060   :  { %v6269_v61 = vpop.xlane.xlu0 %6268 }
0x2061   :  { %v6273_v62 = vsub.f32 %v6265_v47, %v6269_v61  ;;  %v6592_v61 = vld [vmem:[%s14145_s15 + $0x10] sm:$0xff] }
0x2063   :  { %v6275_v24 = vmul.f32 1.442695, %v6273_v62  ;;  %v6593_v62 = vld [vmem:[%s14145_s15 + $0x18] sm:$0xff] }
0x2064   :  { %v6272_v63 = vpop.xlane.xlu1 %6271 }
0x2065   :  { %10457 = vpow2.f32 %v6275_v24  ;;  %v6274_v52 = vsub.f32 %v6266_v53, %v6272_v63  ;;  %v10124_v24 = vpack.c.bf16 %v6593_v62, %v6592_v61 }
0x2067   :  { %v6277_v0 = vmul.f32 1.442695, %v6274_v52 }
0x2068   :  { %v6367_v42 = vpop.permute.xlu1 %6366 }
0x2069   :  { %10459 = vpow2.f32 %v6277_v0  ;;  %9279 = vmatpush3.msk.msra.mxu1 %vm5291_vm8, %v6367_v42 }
0x206a   :  { %10120 = vmatprep.subr.bf16.mxu1 %v10488_v34 }
0x206c   :  { %v6446_v38 = vpop.permute.xlu1 %6445 }
0x206d   :  { %v6467_v28 = vsel %vm778_vm1, %v13422_v4, %v6446_v38  ;;  %v8101_v4 = vld [vmem:[%s14144_s11] ss:$0 sm:$0xff] }
0x206f   :  { %v10458_v43 = vpop.eup %10457 }
0x2070   :  { %v6279_v25 = vsel %vm5262_vm7, %v10458_v43, 0.0  ;;  %v6448_v20 = vpop.permute.xlu1 %6447 }
0x2071   :  { %6280 = vadd.xlane.f32.xlu0 %v6279_v25  ;;  %v6468_v15 = vsel %vm778_vm1, %v13424_v13, %v6448_v20 }
0x2073   :  { %v10460_v56 = vpop.eup %10459 }
0x2074   :  { %v6282_v1 = vsel %vm5262_vm7, %v10460_v56, 0.0  ;;  %v6456_v26 = vpop.permute.xlu1 %6455 }
0x2075   :  { %6283 = vadd.xlane.f32.xlu0 %v6282_v1  ;;  %v6470_v35 = vsel %vm955_vm3, %v6468_v15, %v6456_v26 }
0x208b   :  { %6289 = vrot.lane.b32.xlu0 %v13364_v41, %s14160_s3 }
0x208f   :  { %6453 = vrot.lane.b32.xlu0 %v6028_v40, %s14162_s28 }
0x20fe   :  { %v6281_v2 = vpop.xlane.xlu0 %6280 }
0x20ff   :  { %10461 = vrcp.f32 %v6281_v2 }
0x2102   :  { %v6284_v60 = vpop.xlane.xlu0 %6283 }
0x2103   :  { %10463 = vrcp.f32 %v6284_v60  ;;  %v6683_v60 = vld [vmem:[%s14148_s2] sm:$0xff] }
0x2106   :  { %v6290_v6 = vpop.permute.xlu0 %6289 }
0x2107   :  { %9274 = vmatpush3.msk.msra.mxu0 %vm5291_vm8, %v6290_v6  ;;  %v6684_v6 = vld [vmem:[%s14148_s2 + $0x8] sm:$0xff] }
0x2108   :  { %10114 = vmatprep.subr.bf16.mxu0 %v10488_v34 }
0x2109   :  { %v10462_v7 = vpop.eup %10461 }
0x210a   :  { %v6286_v59 = vmul.f32 %v10462_v7, %v10458_v43  ;;  %v6454_v23 = vpop.permute.xlu0 %6453  ;;  %v8102_v43 = vld [vmem:[%s14146_s0] ss:$0 sm:$0xff]  ;;  %v10127_v7 = vpack.c.bf16 %v6684_v6, %v6683_v60  ;;  %v6842_v60 = vld [vmem:[%s14165_s5 + $0x28] sm:$0xff] }
0x210b   :  { %v6469_v29 = vsel %vm955_vm3, %v6467_v28, %v6454_v23 }
0x210c   :  { %9276 = vmatmul.mubr.msk.f32.vlgmr.msra.gmra.mrb[76].mxu0 %vm5287_vm9, %v6286_v59  ;;  %v6685_v59 = vld [vmem:[%s14148_s2 + $0x10] sm:$0xff] }
0x210d   :  { %v10464_v8 = vpop.eup %10463  ;;  %9291 = vmatprep.mubr.msk.f32.mxu0 %vm10489_vm6, %v10487_v5  ;;  %10116 = vmatpush3.bf16.msra.mxu0 %v10115_v10  ;;  %v10133_v10 = vpack.c.bf16 %v6688_v9, %v6687_v33  ;;  %v6841_v9 = vld [vmem:[%s14165_s5 + $0x20] sm:$0xff] }
0x210e   :  { %v6288_v41 = vmul.f32 %v10464_v8, %v10460_v56  ;;  %10117 = vmatprep.subr.bf16.mxu0 %v10488_v34  ;;  %v8103_v56 = vld [vmem:[%s14147_s1] ss:$0 sm:$0xff]  ;;  %v6686_v8 = vld [vmem:[%s14148_s2 + $0x18] sm:$0xff] }
0x2110   :  { %9281 = vmatmul.mubr.msk.f32.vlgmr.msra.gmra.mrb[78].mxu1 %vm5287_vm9, %v6288_v41  ;;  %v10130_v41 = vpack.c.bf16 %v6686_v8, %v6685_v59  ;;  %v6837_v59 = vld [vmem:[%s14165_s5] sm:$0xff] }
0x2111   :  { %9302 = vmatprep.mubr.msk.f32.mxu1 %vm10489_vm6, %v10487_v5  ;;  %10119 = vmatpush3.bf16.msra.mxu0 %v10118_v36  ;;  %v10136_v36 = vpack.c.bf16 %v6690_v37, %v6689_v32  ;;  %v6861_v8 = vld [vmem:[%s14165_s5 + $0xc0] sm:$0xff]  ;;  %v6886_v37 = vld [vmem:[%s14165_s5 + $0x188] sm:$0xff] }
0x2112   :  { %10126 = vmatprep.subr.bf16.mxu0 %v10488_v34  ;;  %v10140_v33 = vpack.c.bf16 %v6861_v8, %v6837_v59  ;;  %v6843_v59 = vld [vmem:[%s14165_s5 + $0x30] sm:$0xff] }
0x2113   :  { %v6867_v8 = vld [vmem:[%s14165_s5 + $0xf0] sm:$0xff] }
0x21df   :  { %v6362_v3 = vpop.f32.mrb[76].mxu0 }
0x21e0   :  { %6461 = vrot.lane.b32.xlu0 %v6362_v3, %s14163_s30  ;;  %v9277_v14 = vpop.f32.mrb[77].mxu0  ;;  %v8104_v3 = vld [vmem:[%s14149_s24] ss:$0 sm:$0xff]  ;;  %s14169_s24 = sld [smem:[#allocation20_spill]] }
0x21e3   :  { %v6439_v19 = vpop.f32.mrb[78].mxu1 }
0x21e4   :  { %6463 = vrot.lane.b32.xlu1 %v6439_v19, %s14163_s30  ;;  %v9282_v21 = vpop.f32.mrb[79].mxu1 }
0x2252   :  { %v6462_v27 = vpop.permute.xlu0 %6461 }
0x2253   :  { %v6471_v17 = vsel %vm2442_vm4, %v6469_v29, %v6462_v27 }
0x2256   :  { %v6464_v31 = vpop.permute.xlu1 %6463 }
0x2257   :  { %v6472_v18 = vsel %vm2442_vm4, %v6470_v35, %v6464_v31  ;;  %v8107_v31 = vld [vmem:[%s14056_s16] ss:$0 sm:$0xff] }
0x2258   :  { %v6479_v40 = vcombine.low %v6471_v17, %v6472_v18 }
0x225a   :  { %9292 = vmatmul.mubr.msk.f32.vlgmr.msra.gmra.mrb[78].mxu0 %vm597_vm0, %v6479_v40 }
0x225b   :  { %9321 = vmatprep.mubr.msk.f32.mxu0 %vm10489_vm6, %v10487_v5  ;;  %10128 = vmatpush3.bf16.msra.mxu0 %v10127_v7  ;;  %v6866_v7 = vld [vmem:[%s14165_s5 + $0xe8] sm:$0xff] }
0x225c   :  { %10129 = vmatprep.subr.bf16.mxu0 %v10488_v34 }
0x225f   :  { %10131 = vmatpush3.bf16.msra.mxu0 %v10130_v41  ;;  %v10154_v41 = vpack.c.bf16 %v6866_v7, %v6842_v60  ;;  %v6874_v60 = vld [vmem:[%s14165_s5 + $0x128] sm:$0xff] }
0x2260   :  { %10132 = vmatprep.subr.bf16.mxu0 %v10488_v34 }
0x2263   :  { %10134 = vmatpush3.bf16.msra.mxu0 %v10133_v10  ;;  %v6865_v10 = vld [vmem:[%s14165_s5 + $0xe0] sm:$0xff] }
0x2264   :  { %10135 = vmatprep.subr.bf16.mxu0 %v10488_v34  ;;  %v10156_v32 = vpack.c.bf16 %v6865_v10, %v6841_v9  ;;  %v6849_v9 = vld [vmem:[%s14165_s5 + $0x60] sm:$0xff] }
0x2265   :  { %v6873_v10 = vld [vmem:[%s14165_s5 + $0x120] sm:$0xff] }
0x2267   :  { %10137 = vmatpush3.bf16.msra.mxu0 %v10136_v36  ;;  %v6910_v36 = vld [vmem:[%s14165_s5 + $0x248] sm:$0xff] }
0x2268   :  { %10155 = vmatprep.subr.bf16.mxu0 %v10154_v41 }
0x232d   :  { %v6548_v44 = vpop.f32.mrb[78].mxu0 }
0x232e   :  { %v6552_v13 = vadd.f32 %v6548_v44, %v13330_v12  ;;  %v9293_v45 = vpop.f32.mrb[79].mxu0  ;;  %v6591_v12 = vld [vmem:[%s14145_s15 + $0x8] sm:$0xff] }
0x232f   :  { %v10121_v55 = vpack.c.bf16 %v6591_v12, %v6590_v54  ;;  %v8109_v12 = vld [vmem:[%s14164_s25] ss:$0 sm:$0xff] }
0x2330   :  { %v13557_v46 = vadd.f32 %v8101_v4, %v6552_v13 }
0x2331   :  { %10122 = vmatpush3.bf16.msra.mxu1 %v10121_v55 }
0x2332   :  { %v6563_v47 = vsel %vm597_vm0, %v13557_v46, 0.0  ;;  %10123 = vmatprep.subr.bf16.mxu1 %v10488_v34 }
0x2333   :  { %6564 = vadd.xlane.f32.xlu0 %v6563_v47 }
0x2335   :  { %10125 = vmatpush3.bf16.msra.mxu1 %v10124_v24 }
0x23c0   :  { %v6565_v48 = vpop.xlane.xlu0 %6564 }
0x23c1   :  { %v6566_v11 = vmul.f32 0.03125, %v6565_v48 }
0x23c3   :  { %v6567_v16 = vsub.f32 %v13557_v46, %v6566_v11 }
0x23c5   :  { %v6568_v51 = vmul.f32 %v6567_v16, %v6567_v16 }
0x23c7   :  { %v6569_v53 = vsel %vm597_vm0, %v6568_v51, 0.0 }
0x23c8   :  { %6570 = vadd.xlane.f32.xlu1 %v6569_v53 }
0x2455   :  { %v6571_v63 = vpop.xlane.xlu1 %6570 }
0x2456   :  { %v6572_v52 = vmul.f32 0.03125, %v6571_v63 }
0x2458   :  { %v6573_v0 = vadd.f32 1e-05, %v6572_v52 }
0x245a   :  { %10465 = vrsqrt.f32 %v6573_v0 }
0x2464   :  { %v10466_v42 = vpop.eup %10465 }
0x2465   :  { %v6575_v25 = vmul.f32 %v10466_v42, %v6567_v16 }
0x2467   :  { %v6582_v1 = vmul.f32 %v8102_v43, %v6575_v25 }
0x2469   :  { %v6589_v2 = vadd.f32 %v8103_v56, %v6582_v1  ;;  %v6838_v1 = vld [vmem:[%s14165_s5 + $0x8] sm:$0xff] }
0x246b   :  { %9303 = vmatmul.mubr.msk.f32.vlgmr.msra.gmra.mrb[80].mxu1 %vm597_vm0, %v6589_v2  ;;  %v6862_v2 = vld [vmem:[%s14165_s5 + $0xc8] sm:$0xff] }
0x246c   :  { %7126 = vmatprep.mubr.f32.mxu1 %v10487_v5  ;;  %v10138_v6 = vpack.c.bf16 %v6862_v2, %v6838_v1  ;;  %v6868_v1 = vld [vmem:[%s14165_s5 + $0xf8] sm:$0xff]  ;;  %v6850_v2 = vld [vmem:[%s14165_s5 + $0x68] sm:$0xff] }
0x246e   :  { %10139 = vmatprep.subr.bf16.mxu1 %v10138_v6 }
0x246f   :  { %10141 = vmatpush1.bf16.msra.mxu1 %v10140_v33  ;;  %v10186_v33 = vpack.c.bf16 %v6874_v60, %v6850_v2  ;;  %v6857_v60 = vld [vmem:[%s14165_s5 + $0xa0] sm:$0xff] }
0x253e   :  { %v6670_v14 = vpop.f32.mrb[80].mxu1 }
0x253f   :  { %v6671_v19 = vadd.f32 %v8104_v3, %v6670_v14  ;;  %v9304_v21 = vpop.f32.mrb[81].mxu1  ;;  %v6890_v3 = vld [vmem:[%s14165_s5 + $0x1a8] sm:$0xff]  ;;  %v10142_v14 = vpack.c.bf16 %v6910_v36, %v6886_v37  ;;  %v6916_v37 = vld [vmem:[%s14165_s5 + $0x278] sm:$0xff] }
0x2540   :  { %v6885_v21 = vld [vmem:[%s14165_s5 + $0x180] sm:$0xff]  ;;  %v6898_v36 = vld [vmem:[%s14165_s5 + $0x1e8] sm:$0xff] }
0x2541   :  { %v6675_v38 = vmul.f32 0.044715, %v6671_v19  ;;  %v6674_v15 = vmul.f32 0.5, %v6671_v19  ;;  %10143 = vmatprep.subr.bf16.mxu1 %v10142_v14  ;;  %v10164_v14 = vpack.c.bf16 %v6867_v8, %v6843_v59  ;;  %v6924_v59 = vld [vmem:[%s14165_s5 + $0x2b8] sm:$0xff]  ;;  %v6906_v8 = vld [vmem:[%s14165_s5 + $0x228] sm:$0xff] }
0x2543   :  { %v6676_v20 = vmul.f32 %v6675_v38, %v6671_v19  ;;  %v6909_v38 = vld [vmem:[%s14165_s5 + $0x240] sm:$0xff] }
0x2545   :  { %v6677_v23 = vmul.f32 %v6676_v20, %v6671_v19 }
0x2547   :  { %v6678_v26 = vadd.f32 %v6677_v23, %v6671_v19  ;;  %v6914_v19 = vld [vmem:[%s14165_s5 + $0x268] sm:$0xff]  ;;  %v10144_v23 = vpack.c.bf16 %v6909_v38, %v6885_v21  ;;  %v6891_v21 = vld [vmem:[%s14165_s5 + $0x1b0] sm:$0xff] }
0x2548   :  { %v10158_v20 = vpack.c.bf16 %v6914_v19, %v6890_v3  ;;  %v6922_v3 = vld [vmem:[%s14165_s5 + $0x2a8] sm:$0xff]  ;;  %v10188_v19 = vpack.c.bf16 %v6873_v10, %v6849_v9  ;;  %v6915_v38 = vld [vmem:[%s14165_s5 + $0x270] sm:$0xff] }
0x2549   :  { %v6679_v27 = vmul.f32 0.7978846, %v6678_v26  ;;  %v6889_v26 = vld [vmem:[%s14165_s5 + $0x1a0] sm:$0xff]  ;;  %10145 = vmatpush1.bf16.msra.mxu1 %v10144_v23  ;;  %v10190_v23 = vpack.c.bf16 %v6922_v3, %v6898_v36  ;;  %v6899_v10 = vld [vmem:[%s14165_s5 + $0x1f0] sm:$0xff] }
0x254a   :  { %v6923_v36 = vld [vmem:[%s14165_s5 + $0x2b0] sm:$0xff]  ;;  %v6905_v3 = vld [vmem:[%s14165_s5 + $0x220] sm:$0xff] }
0x254b   :  { %10467 = vtanh.f32 %v6679_v27  ;;  %v6913_v27 = vld [vmem:[%s14165_s5 + $0x260] sm:$0xff] }
0x2555   :  { %v10468_v28 = vpop.eup %10467 }
0x2556   :  { %v6681_v35 = vadd.f32 1.0, %v10468_v28  ;;  %v10160_v28 = vpack.c.bf16 %v6913_v27, %v6889_v26  ;;  %v6897_v26 = vld [vmem:[%s14165_s5 + $0x1e0] sm:$0xff] }
0x2557   :  { %v6921_v27 = vld [vmem:[%s14165_s5 + $0x2a0] sm:$0xff] }
0x2558   :  { %v6682_v29 = vmul.f32 %v6681_v35, %v6674_v15  ;;  %v6840_v15 = vld [vmem:[%s14165_s5 + $0x18] sm:$0xff] }
0x2559   :  { %v6864_v35 = vld [vmem:[%s14165_s5 + $0xd8] sm:$0xff] }
0x255a   :  { %9322 = vmatmul.mubr.msk.f32.vlgmr.msra.gmra.mrb[80].mxu0 %vm2789_vm5, %v6682_v29  ;;  %v6846_v29 = vld [vmem:[%s14165_s5 + $0x48] sm:$0xff] }
0x255b   :  { %7268 = vmatprep.mubr.f32.mxu0 %v10487_v5  ;;  %10157 = vmatpush1.bf16.msra.mxu0 %v10156_v32  ;;  %v6892_v32 = vld [vmem:[%s14165_s5 + $0x1b8] sm:$0xff] }
0x255c   :  { %10159 = vmatprep.subr.bf16.mxu0 %v10158_v20  ;;  %v10166_v20 = vpack.c.bf16 %v6916_v37, %v6892_v32 }
0x255f   :  { %10161 = vmatpush1.bf16.msra.mxu0 %v10160_v28  ;;  %v6848_v28 = vld [vmem:[%s14165_s5 + $0x58] sm:$0xff] }
0x262d   :  { %v6760_v34 = vpop.f32.mrb[80].mxu0 }
0x262e   :  { %v6764_v17 = vadd.f32 %v6760_v34, %v13557_v46  ;;  %v9323_v18 = vpop.f32.mrb[81].mxu0  ;;  %v8108_v46 = vld [vmem:[%s14057_s17] ss:$0 sm:$0xff]  ;;  %v10146_v34 = vpack.c.bf16 %v6864_v35, %v6840_v15  ;;  %v6872_v15 = vld [vmem:[%s14165_s5 + $0x118] sm:$0xff]  ;;  %v6854_v35 = vld [vmem:[%s14165_s5 + $0x88] sm:$0xff] }
0x2630   :  { %v6772_v40 = vadd.f32 %v8107_v31, %v6764_v17  ;;  %v6870_v31 = vld [vmem:[%s14165_s5 + $0x108] sm:$0xff]  ;;  %10147 = vmatprep.subr.bf16.mxu1 %v10146_v34  ;;  %v10168_v34 = vpack.c.bf16 %v6915_v38, %v6891_v21  ;;  %v6880_v21 = vld [vmem:[%s14165_s5 + $0x158] sm:$0xff]  ;;  %v10200_v38 = vpack.c.bf16 %v6923_v36, %v6899_v10 }
0x2631   :  { %v10170_v17 = vpack.c.bf16 %v6870_v31, %v6846_v29  ;;  %v6878_v29 = vld [vmem:[%s14165_s5 + $0x148] sm:$0xff]  ;;  %v10192_v31 = vpack.c.bf16 %v6921_v27, %v6897_v26  ;;  %v6855_v26 = vld [vmem:[%s14165_s5 + $0x90] sm:$0xff] }
0x2632   :  { %v6775_v44 = vsel %vm597_vm0, %v6772_v40, 0.0  ;;  %v6879_v27 = vld [vmem:[%s14165_s5 + $0x150] sm:$0xff] }
0x2633   :  { %6776 = vadd.xlane.f32.xlu0 %v6775_v44  ;;  %10171 = vmatprep.subr.bf16.mxu0 %v10170_v17  ;;  %v6847_v17 = vld [vmem:[%s14165_s5 + $0x50] sm:$0xff] }
0x26c0   :  { %v6777_v4 = vpop.xlane.xlu0 %6776 }
0x26c1   :  { %v6778_v13 = vmul.f32 0.03125, %v6777_v4  ;;  %v8110_v4 = vld [vmem:[%s14166_s18] ss:$0 sm:$0xff] }
0x26c3   :  { %v6779_v45 = vsub.f32 %v6772_v40, %v6778_v13 }
0x26c5   :  { %v6780_v47 = vmul.f32 %v6779_v45, %v6779_v45 }
0x26c7   :  { %v6781_v48 = vsel %vm597_vm0, %v6780_v47, 0.0  ;;  %v6839_v47 = vld [vmem:[%s14165_s5 + $0x10] sm:$0xff] }
0x26c8   :  { %6782 = vadd.xlane.f32.xlu0 %v6781_v48  ;;  %v6863_v48 = vld [vmem:[%s14165_s5 + $0xd0] sm:$0xff] }
0x2755   :  { %v6783_v11 = vpop.xlane.xlu0 %6782 }
0x2756   :  { %v6784_v16 = vmul.f32 0.03125, %v6783_v11 }
0x2758   :  { %v6785_v51 = vadd.f32 1e-05, %v6784_v16  ;;  %v6845_v16 = vld [vmem:[%s14165_s5 + $0x40] sm:$0xff] }
0x275a   :  { %10469 = vrsqrt.f32 %v6785_v51  ;;  %v6869_v51 = vld [vmem:[%s14165_s5 + $0x100] sm:$0xff] }
0x2764   :  { %v10470_v53 = vpop.eup %10469 }
0x2765   :  { %v6787_v54 = vmul.f32 %v10470_v53, %v6779_v45  ;;  %v8111_v45 = vld [vmem:[%s14167_s10] ss:$0 sm:$0xff]  ;;  %v6888_v53 = vld [vmem:[%s14165_s5 + $0x198] sm:$0xff] }
0x2767   :  { %v6794_v55 = vmul.f32 %v8108_v46, %v6787_v54  ;;  %v6912_v46 = vld [vmem:[%s14165_s5 + $0x258] sm:$0xff]  ;;  %v6894_v54 = vld [vmem:[%s14165_s5 + $0x1c8] sm:$0xff] }
0x2769   :  { %v6801_v61 = vadd.f32 %v8109_v12, %v6794_v55  ;;  %v6918_v12 = vld [vmem:[%s14165_s5 + $0x288] sm:$0xff] }
0x276b   :  { %v6803_v62 = vcombine.high %v6801_v61, %v6801_v61 }
0x276d   :  { %v6805_v24 = vadd.f32 %v6803_v62, %v6801_v61  ;;  %v10148_v61 = vpack.c.bf16 %v6863_v48, %v6839_v47  ;;  %v10172_v62 = vpack.c.bf16 %v6869_v51, %v6845_v16  ;;  %v6920_v47 = vld [vmem:[%s14165_s5 + $0x298] sm:$0xff]  ;;  %v6902_v48 = vld [vmem:[%s14165_s5 + $0x208] sm:$0xff] }
0x276f   :  { %v6806_v63 = vmul.f32 0.5, %v6805_v24  ;;  %v6887_v24 = vld [vmem:[%s14165_s5 + $0x190] sm:$0xff] }
0x2771   :  { %v6810_v52 = vsel %vm6809_vm10, %v6806_v63, 0.0 }
0x2772   :  { %6811 = vadd.xlane.f32.xlu0 %v6810_v52 }
0x27ff   :  { %v6812_v0 = vpop.xlane.xlu0 %6811 }
0x2800   :  { %v6813_v42 = vmul.f32 0.03125, %v6812_v0  ;;  %v10150_v0 = vpack.c.bf16 %v6912_v46, %v6888_v53  ;;  %v6895_v53 = vld [vmem:[%s14165_s5 + $0x1d0] sm:$0xff] }
0x2801   :  { %v6919_v46 = vld [vmem:[%s14165_s5 + $0x290] sm:$0xff] }
0x2802   :  { %v6814_v43 = vsub.f32 %v6806_v63, %v6813_v42  ;;  %v6911_v63 = vld [vmem:[%s14165_s5 + $0x250] sm:$0xff]  ;;  %v10174_v42 = vpack.c.bf16 %v6918_v12, %v6894_v54 }
0x2803   :  { %v10152_v6 = vpack.c.bf16 %v6911_v63, %v6887_v24  ;;  %v6876_v24 = vld [vmem:[%s14165_s5 + $0x138] sm:$0xff]  ;;  %v6858_v63 = vld [vmem:[%s14165_s5 + $0xa8] sm:$0xff] }
0x2804   :  { %v6815_v25 = vmul.f32 %v6814_v43, %v6814_v43 }
0x2806   :  { %v6816_v56 = vsel %vm6809_vm10, %v6815_v25, 0.0  ;;  %v6917_v25 = vld [vmem:[%s14165_s5 + $0x280] sm:$0xff] }
0x2807   :  { %6817 = vadd.xlane.f32.xlu1 %v6816_v56  ;;  %v6844_v56 = vld [vmem:[%s14165_s5 + $0x38] sm:$0xff] }
0x2808   :  { %v10162_v41 = vpack.c.bf16 %v6868_v1, %v6844_v56  ;;  %v6875_v56 = vld [vmem:[%s14165_s5 + $0x130] sm:$0xff] }
0x2894   :  { %v6818_v18 = vpop.xlane.xlu1 %6817 }
0x2895   :  { %v6819_v40 = vmul.f32 0.03125, %v6818_v18  ;;  %v6871_v18 = vld [vmem:[%s14165_s5 + $0x110] sm:$0xff] }
0x2896   :  { %v10180_v16 = vpack.c.bf16 %v6871_v18, %v6847_v17  ;;  %v6860_v17 = vld [vmem:[%s14165_s5 + $0xb8] sm:$0xff] }
0x2897   :  { %v6820_v44 = vadd.f32 1e-05, %v6819_v40  ;;  %v10178_v40 = vpack.c.bf16 %v6872_v15, %v6848_v28  ;;  %v6904_v28 = vld [vmem:[%s14165_s5 + $0x218] sm:$0xff] }
0x2898   :  { %v6928_v15 = vld [vmem:[%s14165_s5 + $0x2d8] sm:$0xff] }
0x2899   :  { %10471 = vrsqrt.f32 %v6820_v44  ;;  %v10202_v44 = vpack.c.bf16 %v6878_v29, %v6854_v35  ;;  %v10212_v35 = vpack.c.bf16 %v6879_v27, %v6855_v26  ;;  %v10214_v29 = vpack.c.bf16 %v6928_v15, %v6904_v28  ;;  %v6884_v18 = vld [vmem:[%s14165_s5 + $0x178] sm:$0xff] }
0x28a3   :  { %v10472_v13 = vpop.eup %10471 }
0x28a4   :  { %v6822_v11 = vmul.f32 %v10472_v13, %v6814_v43  ;;  %v6893_v43 = vld [vmem:[%s14165_s5 + $0x1c0] sm:$0xff] }
0x28a5   :  { %v10176_v7 = vpack.c.bf16 %v6917_v25, %v6893_v43  ;;  %v6877_v13 = vld [vmem:[%s14165_s5 + $0x140] sm:$0xff]  ;;  %v6851_v25 = vld [vmem:[%s14165_s5 + $0x70] sm:$0xff] }
0x28a6   :  { %v6829_v55 = vmul.f32 %v8110_v4, %v6822_v11  ;;  %v6853_v4 = vld [vmem:[%s14165_s5 + $0x80] sm:$0xff]  ;;  %v6926_v11 = vld [vmem:[%s14165_s5 + $0x2c8] sm:$0xff] }
0x28a7   :  { %v10204_v51 = vpack.c.bf16 %v6877_v13, %v6853_v4  ;;  %v10206_v12 = vpack.c.bf16 %v6926_v11, %v6902_v48  ;;  %v6859_v4 = vld [vmem:[%s14165_s5 + $0xb0] sm:$0xff] }
0x28a8   :  { %v13724_v52 = vadd.f32 %v8111_v45, %v6829_v55  ;;  %v6896_v45 = vld [vmem:[%s14165_s5 + $0x1d8] sm:$0xff]  ;;  %v6901_v55 = vld [vmem:[%s14165_s5 + $0x200] sm:$0xff]  ;;  %v6883_v13 = vld [vmem:[%s14165_s5 + $0x170] sm:$0xff] }
0x28a9   :  { %v10182_v54 = vpack.c.bf16 %v6920_v47, %v6896_v45  ;;  %v6908_v45 = vld [vmem:[%s14165_s5 + $0x238] sm:$0xff]  ;;  %v10228_v48 = vpack.c.bf16 %v6883_v13, %v6859_v4 }
0x28aa   :  { %8112 = vmatmul.mubr.msk.f32.vlgmr.msra.gmra.mrb[82].mxu1 %vm597_vm0, %v13724_v52  ;;  %8114 = vmatmul.mubr.msk.f32.vlgmr.msra.gmra.mrb[82].mxu0 %vm597_vm0, %v13724_v52  ;;  %v6932_v47 = vld [vmem:[%s14165_s5 + $0x2f8] sm:$0xff] }
0x28ab   :  { %10149 = vmatpush1.bf16.msra.mxu1 %v10148_v61  ;;  %10173 = vmatpush1.bf16.msra.mxu0 %v10172_v62  ;;  %v6925_v61 = vld [vmem:[%s14165_s5 + $0x2c0] sm:$0xff]  ;;  %v6852_v62 = vld [vmem:[%s14165_s5 + $0x78] sm:$0xff]  ;;  %v10230_v11 = vpack.c.bf16 %v6932_v47, %v6908_v45 }
0x28ac   :  { %10151 = vmatprep.subr.bf16.mxu1 %v10150_v0  ;;  %10175 = vmatprep.subr.bf16.mxu0 %v10174_v42  ;;  %v6882_v0 = vld [vmem:[%s14165_s5 + $0x168] sm:$0xff]  ;;  %v10184_v42 = vpack.c.bf16 %v6919_v46, %v6895_v53  ;;  %v10208_v43 = vpack.c.bf16 %v6925_v61, %v6901_v55  ;;  %v10194_v1 = vpack.c.bf16 %v6876_v24, %v6852_v62  ;;  %v6933_v46 = vld [vmem:[%s14168_s14] sm:$0xff] }
0x28ad   :  { %7197 = vmatprep.mubr.f32.mxu1 %v10487_v5  ;;  %7410 = vmatprep.mubr.f32.mxu0 %v10487_v5  ;;  %v10218_v2 = vpack.c.bf16 %v6882_v0, %v6858_v63  ;;  %v6946_v55 = vrot.slane %v6933_v46, %v12967_v57  ;;  %v6962_v61 = vrot.slane %v6933_v46, %v12970_v58 }
0x28af   :  { %10153 = vmatpush1.bf16.msra.mxu1 %v10152_v6  ;;  %10177 = vmatpush1.bf16.msra.mxu0 %v10176_v7  ;;  %v6881_v6 = vld [vmem:[%s14165_s5 + $0x160] sm:$0xff]  ;;  %v6900_v7 = vld [vmem:[%s14165_s5 + $0x1f8] sm:$0xff] }
0x28b0   :  { %10163 = vmatprep.subr.bf16.mxu1 %v10162_v41  ;;  %10187 = vmatprep.subr.bf16.mxu0 %v10186_v33  ;;  %v6930_v41 = vld [vmem:[%s14165_s5 + $0x2e8] sm:$0xff]  ;;  %v10196_v33 = vpack.c.bf16 %v6875_v56, %v6851_v25  ;;  %v10220_v9 = vpack.c.bf16 %v6881_v6, %v6857_v60  ;;  %v10198_v32 = vpack.c.bf16 %v6924_v59, %v6900_v7 }
0x28b1   :  { %v10222_v37 = vpack.c.bf16 %v6930_v41, %v6906_v8  ;;  %v13968_v25 = vld [vmem:[%s14168_s14 + $0x8] sm:$0xff]  ;;  %v6954_v6 = vrot.slane %v6933_v46, %v13032_v30 }
0x28b2   :  { %8113 = vmatmul.mubr.msk.f32.vlgmr.msra.gmra.mrb[84].mxu1 %vm597_vm0, %v13724_v52  ;;  %8116 = vmatmul.mubr.msk.f32.vlgmr.msra.gmra.mrb[84].mxu0 %vm597_vm0, %v13724_v52  ;;  %v6974_v60 = vrot.slane %v13968_v25, %v12950_v49  ;;  %v6978_v7 = vrot.slane %v13968_v25, %v12967_v57  ;;  %v6986_v4 = vrot.slane %v13968_v25, %v13032_v30 }
0x28b3   :  { %10165 = vmatpush1.bf16.msra.mxu1 %v10164_v14  ;;  %10189 = vmatpush1.bf16.msra.mxu0 %v10188_v19  ;;  %v6929_v14 = vld [vmem:[%s14165_s5 + $0x2e0] sm:$0xff]  ;;  %v6856_v19 = vld [vmem:[%s14165_s5 + $0x98] sm:$0xff] }
0x28b4   :  { %10167 = vmatprep.subr.bf16.mxu1 %v10166_v20  ;;  %10191 = vmatprep.subr.bf16.mxu0 %v10190_v23  ;;  %v10224_v20 = vpack.c.bf16 %v6929_v14, %v6905_v3  ;;  %v10210_v23 = vpack.c.bf16 %v6880_v21, %v6856_v19  ;;  %v13986_v3 = vsub.s32 7, %v12923_v39 }
0x28b5   :  { %7339 = vmatprep.mubr.f32.mxu1 %v10487_v5  ;;  %7552 = vmatprep.mubr.f32.mxu0 %v10487_v5 }
0x28b7   :  { %10169 = vmatpush1.bf16.msra.mxu1 %v10168_v34  ;;  %10193 = vmatpush1.bf16.msra.mxu0 %v10192_v31  ;;  %v6903_v34 = vld [vmem:[%s14165_s5 + $0x210] sm:$0xff] }
0x28b8   :  { %10179 = vmatprep.subr.bf16.mxu1 %v10178_v40  ;;  %10203 = vmatprep.subr.bf16.mxu0 %v10202_v44  ;;  %v6927_v31 = vld [vmem:[%s14165_s5 + $0x2d0] sm:$0xff]  ;;  %v10226_v44 = vpack.c.bf16 %v6884_v18, %v6860_v17 }
0x28b9   :  { %v10216_v40 = vpack.c.bf16 %v6927_v31, %v6903_v34  ;;  %v6935_v31 = vld [vmem:[%s14168_s14 + $0x10] sm:$0xff] }
0x28ba   :  { %8115 = vmatmul.mubr.msk.f32.vlgmr.msra.gmra.mrb[86].mxu1 %vm597_vm0, %v13724_v52  ;;  %8118 = vmatmul.mubr.msk.f32.vlgmr.msra.gmra.mrb[86].mxu0 %vm597_vm0, %v13724_v52  ;;  %v7010_v13 = vrot.slane %v6935_v31, %v12967_v57  ;;  %v7002_v57 = vrot.slane %v13968_v25, %v13986_v3 }
0x28bb   :  { %10181 = vmatpush1.bf16.msra.mxu1 %v10180_v16  ;;  %10205 = vmatpush1.bf16.msra.mxu0 %v10204_v51  ;;  %v6907_v16 = vld [vmem:[%s14165_s5 + $0x230] sm:$0xff] }
0x28bc   :  { %10183 = vmatprep.subr.bf16.mxu1 %v10182_v54  ;;  %10207 = vmatprep.subr.bf16.mxu0 %v10206_v12  ;;  %v6931_v51 = vld [vmem:[%s14165_s5 + $0x2f0] sm:$0xff]  ;;  %v6942_v54 = vrot.slane %v6933_v46, %v12950_v49  ;;  %v6958_v12 = vrot.slane %v6933_v46, %v12953_v50 }
0x28bd   :  { %7481 = vmatprep.mubr.f32.mxu1 %v10487_v5  ;;  %7694 = vmatprep.mubr.f32.mxu0 %v10487_v5  ;;  %v10232_v53 = vpack.c.bf16 %v6931_v51, %v6907_v16 }
0x28bf   :  { %10185 = vmatpush1.bf16.msra.mxu1 %v10184_v42  ;;  %10209 = vmatpush1.bf16.msra.mxu0 %v10208_v43 }
0x28c0   :  { %10195 = vmatprep.subr.bf16.mxu1 %v10194_v1  ;;  %10219 = vmatprep.subr.bf16.mxu0 %v10218_v2  ;;  %v6950_v2 = vrot.slane %v6933_v46, %v13023_v22 }
0x28c2   :  { %8117 = vmatmul.mubr.msk.f32.vlgmr.msra.gmra.mrb[88].mxu1 %vm597_vm0, %v13724_v52  ;;  %8120 = vmatmul.mubr.msk.f32.vlgmr.msra.gmra.mrb[88].mxu0 %vm597_vm0, %v13724_v52 }
0x28c3   :  { %10197 = vmatpush1.bf16.msra.mxu1 %v10196_v33  ;;  %10221 = vmatpush1.bf16.msra.mxu0 %v10220_v9 }
0x28c4   :  { %10199 = vmatprep.subr.bf16.mxu1 %v10198_v32  ;;  %10223 = vmatprep.subr.bf16.mxu0 %v10222_v37  ;;  %v13983_v32 = vsub.s32 6, %v12923_v39  ;;  %v6994_v39 = vrot.slane %v13968_v25, %v12970_v58 }
0x28c5   :  { %7623 = vmatprep.mubr.f32.mxu1 %v10487_v5  ;;  %7836 = vmatprep.mubr.f32.mxu0 %v10487_v5 }
0x28c6   :  { %v6966_v21 = vrot.slane %v6933_v46, %v13983_v32 }
0x28c7   :  { %10201 = vmatpush1.bf16.msra.mxu1 %v10200_v38  ;;  %10225 = vmatpush1.bf16.msra.mxu0 %v10224_v20  ;;  %v6990_v38 = vrot.slane %v13968_v25, %v12953_v50  ;;  %v6970_v20 = vrot.slane %v6933_v46, %v13986_v3 }
0x28c8   :  { %10211 = vmatprep.subr.bf16.mxu1 %v10210_v23 }
0x28ca   :  { %8119 = vmatmul.mubr.msk.f32.vlgmr.msra.gmra.mrb[90].mxu1 %vm597_vm0, %v13724_v52  ;;  %8122 = vmatmul.mubr.msk.f32.vlgmr.msra.gmra.mrb[90].mxu0 %vm597_vm0, %v13724_v52 }
0x28cb   :  { %10213 = vmatpush1.bf16.msra.mxu1 %v10212_v35  ;;  %7765 = vmatprep.mubr.f32.mxu1 %v10487_v5 }
0x28cc   :  { %10215 = vmatprep.subr.bf16.mxu1 %v10214_v29 }
0x28cf   :  { %10217 = vmatpush1.bf16.msra.mxu1 %v10216_v40  ;;  %v6982_v40 = vrot.slane %v13968_v25, %v13023_v22 }
0x28d0   :  { %10227 = vmatprep.subr.bf16.mxu1 %v10226_v44  ;;  %v7006_v44 = vrot.slane %v6935_v31, %v12950_v49 }
0x28d2   :  { %8121 = vmatmul.mubr.msk.f32.vlgmr.msra.gmra.mrb[92].mxu1 %vm597_vm0, %v13724_v52 }
0x28d3   :  { %10229 = vmatpush1.bf16.msra.mxu1 %v10228_v48  ;;  %7907 = vmatprep.mubr.f32.mxu1 %v10487_v5 }
0x28d4   :  { %10231 = vmatprep.subr.bf16.mxu1 %v10230_v11 }
0x28d7   :  { %10233 = vmatpush1.bf16.msra.mxu1 %v10232_v53 }
0x28da   :  { %8123 = vmatmul.mubr.msk.f32.vlgmr.msra.gmra.mrb[94].mxu1 %vm597_vm0, %v13724_v52 }
0x297d   :  { %v7128_v62 = vpop.f32.mrb[82].mxu1  ;;  %v7270_v24 = vpop.f32.mrb[82].mxu0 }
0x297e   :  { %v7129_v5 = vadd.f32 %v7128_v62, %v6942_v54  ;;  %v7271_v63 = vadd.f32 %v7270_v24, %v6958_v12  ;;  %v7130_v0 = vpop.f32.mrb[83].mxu1  ;;  %v7272_v42 = vpop.f32.mrb[83].mxu0  ;;  %v6998_v12 = vrot.slane %v13968_v25, %v13983_v32 }
0x297f   :  { %v7131_v43 = vadd.f32 %v7130_v0, %v6946_v55  ;;  %v7273_v52 = vadd.f32 %v7272_v42, %v6962_v61  ;;  %v7022_v55 = vrot.slane %v6935_v31, %v12953_v50  ;;  %v7026_v61 = vrot.slane %v6935_v31, %v12970_v58 }
0x2980   :  { %v7018_v58 = vrot.slane %v6935_v31, %v13032_v30 }
0x2981   :  { %v7938_v56 = vcombine.low %v7129_v5, %v7131_v43  ;;  %v7940_v1 = vcombine.low %v7271_v63, %v7273_v52 }
0x2983   :  { %7962 = vst [vmem:[%s14169_s24] sm:$0xff] %v7938_v56  ;;  %7964 = vst [vmem:[%s14169_s24 + $0x10] sm:$0xff] %v7940_v1  ;;  %v7014_v1 = vrot.slane %v6935_v31, %v13023_v22  ;;  %v7034_v22 = vrot.slane %v6935_v31, %v13986_v3 }
0x2985   :  { %v7199_v59 = vpop.f32.mrb[84].mxu1  ;;  %v7412_v8 = vpop.f32.mrb[84].mxu0 }
0x2986   :  { %v7200_v41 = vadd.f32 %v7199_v59, %v6950_v2  ;;  %v7413_v33 = vadd.f32 %v7412_v8, %v6974_v60  ;;  %v7201_v9 = vpop.f32.mrb[85].mxu1  ;;  %v7414_v10 = vpop.f32.mrb[85].mxu0  ;;  %v7030_v59 = vrot.slane %v6935_v31, %v13983_v32 }
0x2987   :  { %v7202_v37 = vadd.f32 %v7201_v9, %v6954_v6  ;;  %v7415_v36 = vadd.f32 %v7414_v10, %v6978_v7 }
0x2989   :  { %v7939_v14 = vcombine.low %v7200_v41, %v7202_v37  ;;  %v7942_v19 = vcombine.low %v7413_v33, %v7415_v36 }
0x298b   :  { %7963 = vst [vmem:[%s14169_s24 + $0x8] sm:$0xff] %v7939_v14  ;;  %7966 = vst [vmem:[%s14169_s24 + $0x20] sm:$0xff] %v7942_v19 }
0x298d   :  { %v7341_v23 = vpop.f32.mrb[86].mxu1  ;;  %v7554_v26 = vpop.f32.mrb[86].mxu0 }
0x298e   :  { %v7342_v27 = vadd.f32 %v7341_v23, %v6966_v21  ;;  %v7555_v28 = vadd.f32 %v7554_v26, %v6990_v38  ;;  %v7343_v15 = vpop.f32.mrb[87].mxu1  ;;  %v7556_v35 = vpop.f32.mrb[87].mxu0 }
0x298f   :  { %v7344_v29 = vadd.f32 %v7343_v15, %v6970_v20  ;;  %v7557_v34 = vadd.f32 %v7556_v35, %v6994_v39 }
0x2991   :  { %v7941_v17 = vcombine.low %v7342_v27, %v7344_v29  ;;  %v7944_v18 = vcombine.low %v7555_v28, %v7557_v34 }
0x2993   :  { %7965 = vst [vmem:[%s14169_s24 + $0x18] sm:$0xff] %v7941_v17  ;;  %7968 = vst [vmem:[%s14169_s24 + $0x30] sm:$0xff] %v7944_v18 }
0x2995   :  { %v7483_v45 = vpop.f32.mrb[88].mxu1  ;;  %v7696_v47 = vpop.f32.mrb[88].mxu0 }
0x2996   :  { %v7484_v48 = vadd.f32 %v7483_v45, %v6982_v40  ;;  %v7697_v11 = vadd.f32 %v7696_v47, %v7006_v44  ;;  %v7485_v16 = vpop.f32.mrb[89].mxu1  ;;  %v7698_v51 = vpop.f32.mrb[89].mxu0 }
0x2997   :  { %v7486_v49 = vadd.f32 %v7485_v16, %v6986_v4  ;;  %v7699_v53 = vadd.f32 %v7698_v51, %v7010_v13 }
0x2999   :  { %v7943_v46 = vcombine.low %v7484_v48, %v7486_v49  ;;  %v7946_v54 = vcombine.low %v7697_v11, %v7699_v53 }
0x299b   :  { %7967 = vst [vmem:[%s14169_s24 + $0x28] sm:$0xff] %v7943_v46  ;;  %7970 = vst [vmem:[%s14169_s24 + $0x40] sm:$0xff] %v7946_v54 }
0x299d   :  { %v7625_v62 = vpop.f32.mrb[90].mxu1  ;;  %v7838_v24 = vpop.f32.mrb[90].mxu0 }
0x299e   :  { %v7626_v5 = vadd.f32 %v7625_v62, %v6998_v12  ;;  %v7839_v63 = vadd.f32 %v7838_v24, %v7022_v55  ;;  %v7627_v0 = vpop.f32.mrb[91].mxu1  ;;  %v7840_v42 = vpop.f32.mrb[91].mxu0 }
0x299f   :  { %v7628_v50 = vadd.f32 %v7627_v0, %v7002_v57  ;;  %v7841_v43 = vadd.f32 %v7840_v42, %v7026_v61 }
0x29a1   :  { %v7945_v52 = vcombine.low %v7626_v5, %v7628_v50  ;;  %v7948_v56 = vcombine.low %v7839_v63, %v7841_v43 }
0x29a3   :  { %7969 = vst [vmem:[%s14169_s24 + $0x38] sm:$0xff] %v7945_v52  ;;  %7972 = vst [vmem:[%s14169_s24 + $0x50] sm:$0xff] %v7948_v56 }
0x29a5   :  { %v7767_v25 = vpop.f32.mrb[92].mxu1 }
0x29a6   :  { %v7768_v2 = vadd.f32 %v7767_v25, %v7014_v1  ;;  %v7769_v60 = vpop.f32.mrb[93].mxu1 }
0x29a7   :  { %v7770_v6 = vadd.f32 %v7769_v60, %v7018_v58 }
0x29a9   :  { %v7947_v7 = vcombine.low %v7768_v2, %v7770_v6 }
0x29ab   :  { %7971 = vst [vmem:[%s14169_s24 + $0x48] sm:$0xff] %v7947_v7 }
0x29ad   :  { %v7909_v8 = vpop.f32.mrb[94].mxu1 }
0x29ae   :  { %v7910_v41 = vadd.f32 %v7909_v8, %v7030_v59  ;;  %v7911_v33 = vpop.f32.mrb[95].mxu1 }
0x29af   :  { %v7912_v9 = vadd.f32 %v7911_v33, %v7034_v22 }
0x29b1   :  { %v7949_v10 = vcombine.low %v7910_v41, %v7912_v9 }
0x29b3   :  { %7973 = vst [vmem:[%s14169_s24 + $0x58] sm:$0xff] %v7949_v10 }

// kernel: multi_svit_forward.5
= control target key start
LH: loop header
LB: loop body
LE: loop exit
PB: predicated region body
PF: predicated region fallthrough
CT: control target
= control target key end

     0   :  { %v1282_v0 = vmov 0.0|0.0   ;;  %vm1283_vm0 = vmmov 0   ;;  %v1284_v4 = vmov 0.0   ;;  %vm125_vm1 = vcmask 523264   ;;  %s1778_s0 = inlined_call_operand.vmem [shape: f32[2,3,64,64], index: 0, kind: input, shape index: {}]   ;;  %s1779_s2 = inlined_call_operand.vmem [shape: f32[64,65], index: 2, kind: input, shape index: {}]   ;;  %s1780_s1 = inlined_call_operand.vmem [shape: f32[50,64], index: 1, kind: input, shape index: {}]   ;;  %s1781_s3 = inlined_call_operand.vmem [shape: f32[3,50,65], index: 3, kind: output, shape index: {}]  }
   0x1   :  { %1207 = vmatprep.subr.bf16.mxu0 %v1282_v0  ;;  %v14_v1 = vld [vmem:[%s1778_s0] sm:$0xff]  ;;  %v15_v2 = vld [vmem:[%s1778_s0 + $0x8] sm:$0xff]  ;;  %1001 = vmatprep.mubr.msk.f32.mxu0 %vm1283_vm0, %v1284_v4  ;;  %v16_v7 = vld [vmem:[%s1778_s0 + $0x10] sm:$0xff]  ;;  %vm368_vm2 = vcmask 531456   ;;  %vm375_vm3 = vcmask 525312  }
   0x2   :  { %v38_v3 = vld [vmem:[%s1778_s0 + $0xc0] sm:$0xff]  ;;  %v39_v5 = vld [vmem:[%s1778_s0 + $0xc8] sm:$0xff]  ;;  %v17_v8 = vld [vmem:[%s1778_s0 + $0x18] sm:$0xff]  ;;  %1219 = vmatprep.subr.bf16.mxu1 %v1282_v0  ;;  %1038 = vmatprep.mubr.msk.f32.mxu1 %vm1283_vm0, %v1284_v4 }
   0x3   :  { %v77_v6 = vadd.f32 %v38_v3, %v14_v1  ;;  %v78_v9 = vadd.f32 %v39_v5, %v15_v2  ;;  %v40_v10 = vld [vmem:[%s1778_s0 + $0xd0] sm:$0xff]  ;;  %v41_v11 = vld [vmem:[%s1778_s0 + $0xd8] sm:$0xff]  ;;  %v18_v12 = vld [vmem:[%s1778_s0 + $0x20] sm:$0xff] }
   0x4   :  { %v79_v14 = vadd.f32 %v40_v10, %v16_v7  ;;  %v80_v15 = vadd.f32 %v41_v11, %v17_v8  ;;  %v19_v16 = vld [vmem:[%s1778_s0 + $0x28] sm:$0xff]  ;;  %v42_v17 = vld [vmem:[%s1778_s0 + $0xe0] sm:$0xff]  ;;  %v20_v22 = vld [vmem:[%s1778_s0 + $0x30] sm:$0xff] }
   0x5   :  { %v101_v13 = vmul.f32 0.5, %v77_v6  ;;  %v43_v18 = vld [vmem:[%s1778_s0 + $0xe8] sm:$0xff]  ;;  %v102_v19 = vmul.f32 0.5, %v78_v9  ;;  %v81_v20 = vadd.f32 %v42_v17, %v18_v12  ;;  %v44_v23 = vld [vmem:[%s1778_s0 + $0xf0] sm:$0xff]  ;;  %v21_v26 = vld [vmem:[%s1778_s0 + $0x38] sm:$0xff] }
   0x6   :  { %v82_v21 = vadd.f32 %v43_v18, %v19_v16  ;;  %v103_v24 = vmul.f32 0.5, %v79_v14  ;;  %v104_v25 = vmul.f32 0.5, %v80_v15  ;;  %v45_v27 = vld [vmem:[%s1778_s0 + $0xf8] sm:$0xff]  ;;  %v83_v29 = vadd.f32 %v44_v23, %v20_v22  ;;  %v22_v34 = vld [vmem:[%s1778_s0 + $0x40] sm:$0xff]  ;;  %v23_v35 = vld [vmem:[%s1778_s0 + $0x48] sm:$0xff] }
   0x7   :  { %v1208_v28 = vpack.c.bf16 %v102_v19, %v101_v13  ;;  %v105_v31 = vmul.f32 0.5, %v81_v20  ;;  %v84_v33 = vadd.f32 %v45_v27, %v21_v26  ;;  %v46_v36 = vld [vmem:[%s1778_s0 + $0x100] sm:$0xff]  ;;  %v47_v37 = vld [vmem:[%s1778_s0 + $0x108] sm:$0xff]  ;;  %v24_v39 = vld [vmem:[%s1778_s0 + $0x50] sm:$0xff] }
   0x8   :  { %v1211_v30 = vpack.c.bf16 %v104_v25, %v103_v24  ;;  %v106_v32 = vmul.f32 0.5, %v82_v21  ;;  %v107_v38 = vmul.f32 0.5, %v83_v29  ;;  %v85_v42 = vadd.f32 %v46_v36, %v22_v34  ;;  %v25_v44 = vld [vmem:[%s1778_s0 + $0x58] sm:$0xff]  ;;  %v48_v45 = vld [vmem:[%s1778_s0 + $0x110] sm:$0xff]  ;;  %v26_v52 = vld [vmem:[%s1778_s0 + $0x60] sm:$0xff] }
   0x9   :  { %1209 = vmatpush3.bf16.msra.mxu0 %v1208_v28  ;;  %v108_v41 = vmul.f32 0.5, %v84_v33  ;;  %v86_v43 = vadd.f32 %v47_v37, %v23_v35  ;;  %v49_v46 = vld [vmem:[%s1778_s0 + $0x118] sm:$0xff]  ;;  %v87_v47 = vadd.f32 %v48_v45, %v24_v39  ;;  %v27_v53 = vld [vmem:[%s1778_s0 + $0x68] sm:$0xff]  ;;  %v50_v54 = vld [vmem:[%s1778_s0 + $0x120] sm:$0xff] }
   0xa   :  { %1210 = vmatprep.subr.bf16.mxu0 %v1282_v0  ;;  %v1214_v40 = vpack.c.bf16 %v106_v32, %v105_v31  ;;  %v88_v48 = vadd.f32 %v49_v46, %v25_v44  ;;  %v109_v50 = vmul.f32 0.5, %v85_v42  ;;  %v51_v55 = vld [vmem:[%s1778_s0 + $0x128] sm:$0xff]  ;;  %v69_v56 = vld [vmem:[%s1779_s2] sm:$0xff]  ;;  %v71_v60 = vld [vmem:[%s1779_s2 + $0x10] sm:$0xff]  ;;  %v89_v1 = vadd.f32 %v50_v54, %v26_v52 }
   0xb   :  { %v1217_v49 = vpack.c.bf16 %v108_v41, %v107_v38  ;;  %v110_v51 = vmul.f32 0.5, %v86_v43  ;;  %v70_v57 = vld [vmem:[%s1779_s2 + $0x8] sm:$0xff]  ;;  %v111_v58 = vmul.f32 0.5, %v87_v47  ;;  %v72_v61 = vld [vmem:[%s1779_s2 + $0x18] sm:$0xff]  ;;  %v1413_v62 = vld [vmem:[%s1780_s1] sm:$0xff]  ;;  %v90_v2 = vadd.f32 %v51_v55, %v27_v53 }
   0xc   :  { %v112_v59 = vmul.f32 0.5, %v88_v48  ;;  %v28_v3 = vld [vmem:[%s1778_s0 + $0x70] sm:$0xff]  ;;  %v1418_v5 = vpack.c.bf16 %v70_v57, %v69_v56  ;;  %v29_v6 = vld [vmem:[%s1778_s0 + $0x78] sm:$0xff]  ;;  %v1431_v9 = vpack.c.bf16 %v72_v61, %v71_v60  ;;  %v73_v11 = vld [vmem:[%s1779_s2 + $0x20] sm:$0xff]  ;;  %v113_v14 = vmul.f32 0.5, %v89_v1 }
   0xd   :  { %1212 = vmatpush3.bf16.msra.mxu0 %v1211_v30  ;;  %v1232_v63 = vpack.c.bf16 %v110_v51, %v109_v50  ;;  %v52_v7 = vld [vmem:[%s1778_s0 + $0x130] sm:$0xff]  ;;  %v53_v8 = vld [vmem:[%s1778_s0 + $0x138] sm:$0xff]  ;;  %v74_v12 = vld [vmem:[%s1779_s2 + $0x28] sm:$0xff]  ;;  %v114_v15 = vmul.f32 0.5, %v90_v2 }
   0xe   :  { %1213 = vmatprep.subr.bf16.mxu0 %v1282_v0  ;;  %1221 = vmatpush3.bf16.msra.mxu1 %v1418_v5  ;;  %v1235_v10 = vpack.c.bf16 %v112_v59, %v111_v58  ;;  %v1447_v13 = vld [vmem:[%s1780_s1 + $0x8] sm:$0xff]  ;;  %v91_v16 = vadd.f32 %v52_v7, %v28_v3  ;;  %v92_v17 = vadd.f32 %v53_v8, %v29_v6  ;;  %v75_v19 = vld [vmem:[%s1779_s2 + $0x30] sm:$0xff]  ;;  %v76_v20 = vld [vmem:[%s1779_s2 + $0x38] sm:$0xff] }
   0xf   :  { %1222 = vmatprep.subr.bf16.mxu1 %v1282_v0  ;;  %v1451_v18 = vpack.c.bf16 %v74_v12, %v73_v11  ;;  %v1467_v21 = vld [vmem:[%s1780_s1 + $0x10] sm:$0xff]  ;;  %v1238_v22 = vpack.c.bf16 %v114_v15, %v113_v14  ;;  %v1471_v25 = vpack.c.bf16 %v76_v20, %v75_v19  ;;  %v1481_v26 = vld [vmem:[%s1780_s1 + $0x18] sm:$0xff]  ;;  %v1493_v28 = vld [vmem:[%s1780_s1 + $0x20] sm:$0xff] }
  0x10   :  { %v115_v23 = vmul.f32 0.5, %v91_v16  ;;  %v116_v24 = vmul.f32 0.5, %v92_v17  ;;  %v30_v29 = vld [vmem:[%s1778_s0 + $0x80] sm:$0xff]  ;;  %v31_v30 = vld [vmem:[%s1778_s0 + $0x88] sm:$0xff]  ;;  %v32_v36 = vld [vmem:[%s1778_s0 + $0x90] sm:$0xff] }
  0x11   :  { %1215 = vmatpush3.bf16.msra.mxu0 %v1214_v40  ;;  %v54_v31 = vld [vmem:[%s1778_s0 + $0x140] sm:$0xff]  ;;  %v55_v32 = vld [vmem:[%s1778_s0 + $0x148] sm:$0xff]  ;;  %v33_v37 = vld [vmem:[%s1778_s0 + $0x98] sm:$0xff] }
  0x12   :  { %1216 = vmatprep.subr.bf16.mxu0 %v1282_v0  ;;  %1224 = vmatpush3.bf16.msra.mxu1 %v1431_v9  ;;  %v1241_v27 = vpack.c.bf16 %v116_v24, %v115_v23  ;;  %v1515_v33 = vld [vmem:[%s1780_s1 + $0x28] sm:$0xff]  ;;  %v93_v34 = vadd.f32 %v54_v31, %v30_v29  ;;  %v94_v35 = vadd.f32 %v55_v32, %v31_v30  ;;  %v56_v38 = vld [vmem:[%s1778_s0 + $0x150] sm:$0xff]  ;;  %v57_v39 = vld [vmem:[%s1778_s0 + $0x158] sm:$0xff] }
  0x13   :  { %1225 = vmatprep.subr.bf16.mxu1 %v1282_v0  ;;  %v68_v40 = vld [vmem:[%s1780_s1 + $0x30] sm:$0x3]  ;;  %v95_v43 = vadd.f32 %v56_v38, %v32_v36  ;;  %v96_v44 = vadd.f32 %v57_v39, %v33_v37  ;;  %v34_v45 = vld [vmem:[%s1778_s0 + $0xa0] sm:$0xff]  ;;  %v35_v47 = vld [vmem:[%s1778_s0 + $0xa8] sm:$0xff] }
  0x14   :  { %v117_v41 = vmul.f32 0.5, %v93_v34  ;;  %v118_v42 = vmul.f32 0.5, %v94_v35  ;;  %v58_v46 = vld [vmem:[%s1778_s0 + $0x160] sm:$0xff]  ;;  %v59_v48 = vld [vmem:[%s1778_s0 + $0x168] sm:$0xff]  ;;  %v36_v54 = vld [vmem:[%s1778_s0 + $0xb0] sm:$0xff] }
  0x15   :  { %1218 = vmatpush3.bf16.msra.mxu0 %v1217_v49  ;;  %v97_v49 = vadd.f32 %v58_v46, %v34_v45  ;;  %v119_v51 = vmul.f32 0.5, %v95_v43  ;;  %v120_v52 = vmul.f32 0.5, %v96_v44  ;;  %v98_v53 = vadd.f32 %v59_v48, %v35_v47  ;;  %v60_v55 = vld [vmem:[%s1778_s0 + $0x170] sm:$0xff]  ;;  %v37_v56 = vld [vmem:[%s1778_s0 + $0xb8] sm:$0xff] }
  0x16   :  { %1231 = vmatprep.subr.bf16.mxu0 %v1282_v0  ;;  %1227 = vmatpush3.bf16.msra.mxu1 %v1451_v18  ;;  %v1256_v50 = vpack.c.bf16 %v118_v42, %v117_v41  ;;  %v61_v57 = vld [vmem:[%s1778_s0 + $0x178] sm:$0xff]  ;;  %v99_v58 = vadd.f32 %v60_v55, %v36_v54 }
  0x17   :  { %1228 = vmatprep.subr.bf16.mxu1 %v1282_v0  ;;  %v1259_v59 = vpack.c.bf16 %v120_v52, %v119_v51  ;;  %v121_v60 = vmul.f32 0.5, %v97_v49  ;;  %v122_v61 = vmul.f32 0.5, %v98_v53 }
  0x18   :  { %1002 = vmatmul.mubr.msk.f32.vlgmr.msra.gmra.mrb[0].mxu0 %vm125_vm1, %v1413_v62  ;;  %v123_v2 = vmul.f32 0.5, %v99_v58 }
  0x19   :  { %1233 = vmatpush3.bf16.msra.mxu0 %v1232_v63  ;;  %1004 = vmatprep.mubr.msk.f32.mxu0 %vm1283_vm0, %v1284_v4  ;;  %v100_v63 = vadd.f32 %v61_v57, %v37_v56  ;;  %v1262_v1 = vpack.c.bf16 %v122_v61, %v121_v60 }
  0x1a   :  { %1234 = vmatprep.subr.bf16.mxu0 %v1282_v0  ;;  %1230 = vmatpush3.bf16.msra.mxu1 %v1471_v25 }
  0x1b   :  { %1243 = vmatprep.subr.bf16.mxu1 %v1282_v0  ;;  %v124_v3 = vmul.f32 0.5, %v100_v63 }
  0x1c   :  { %1005 = vmatmul.mubr.msk.f32.gmra.mrb[2].mxu0 %vm125_vm1, %v1447_v13 }
  0x1d   :  { %1007 = vmatprep.mubr.msk.f32.mxu0 %vm1283_vm0, %v1284_v4  ;;  %1236 = vmatpush3.bf16.msra.mxu0 %v1235_v10  ;;  %v1265_v6 = vpack.c.bf16 %v124_v3, %v123_v2 }
  0x1e   :  { %1237 = vmatprep.subr.bf16.mxu0 %v1282_v0 }
  0x20   :  { %1008 = vmatmul.mubr.msk.f32.gmra.mrb[4].mxu0 %vm125_vm1, %v1467_v21 }
  0x21   :  { %1010 = vmatprep.mubr.msk.f32.mxu0 %vm1283_vm0, %v1284_v4  ;;  %1239 = vmatpush3.bf16.msra.mxu0 %v1238_v22 }
  0x22   :  { %1240 = vmatprep.subr.bf16.mxu0 %v1282_v0 }
  0x24   :  { %1011 = vmatmul.mubr.msk.f32.gmra.mrb[6].mxu0 %vm125_vm1, %v1481_v26 }
  0x25   :  { %1013 = vmatprep.mubr.msk.f32.mxu0 %vm1283_vm0, %v1284_v4  ;;  %1242 = vmatpush3.bf16.msra.mxu0 %v1241_v27 }
  0x26   :  { %1255 = vmatprep.subr.bf16.mxu0 %v1282_v0 }
  0x28   :  { %1014 = vmatmul.mubr.msk.f32.gmra.mrb[8].mxu0 %vm125_vm1, %v1493_v28 }
  0x29   :  { %1016 = vmatprep.mubr.msk.f32.mxu0 %vm1283_vm0, %v1284_v4 }
  0x2c   :  { %1017 = vmatmul.mubr.msk.f32.gmra.mrb[10].mxu0 %vm125_vm1, %v1515_v33 }
  0x2d   :  { %1019 = vmatprep.mubr.msk.f32.mxu0 %vm1283_vm0, %v1284_v4 }
  0x30   :  { %1020 = vmatmul.mubr.msk.f32.gmra.mrb[12].mxu0 %vm125_vm1, %v68_v40 }
  0x31   :  { %1075 = vmatprep.mubr.msk.f32.mxu0 %vm1283_vm0, %v1284_v4 }
  0x34   :  { %1076 = vmatmul.mubr.msk.f32.vlgmr.msra.gmra.mrb[14].mxu0 %vm125_vm1, %v1413_v62 }
  0x35   :  { %1257 = vmatpush3.bf16.msra.mxu0 %v1256_v50  ;;  %1078 = vmatprep.mubr.msk.f32.mxu0 %vm1283_vm0, %v1284_v4 }
  0x36   :  { %1258 = vmatprep.subr.bf16.mxu0 %v1282_v0 }
  0x38   :  { %1079 = vmatmul.mubr.msk.f32.gmra.mrb[16].mxu0 %vm125_vm1, %v1447_v13 }
  0x39   :  { %1081 = vmatprep.mubr.msk.f32.mxu0 %vm1283_vm0, %v1284_v4  ;;  %1260 = vmatpush3.bf16.msra.mxu0 %v1259_v59 }
  0x3a   :  { %1261 = vmatprep.subr.bf16.mxu0 %v1282_v0 }
  0x3c   :  { %1082 = vmatmul.mubr.msk.f32.gmra.mrb[18].mxu0 %vm125_vm1, %v1467_v21 }
  0x3d   :  { %1084 = vmatprep.mubr.msk.f32.mxu0 %vm1283_vm0, %v1284_v4  ;;  %1263 = vmatpush3.bf16.msra.mxu0 %v1262_v1 }
  0x3e   :  { %1264 = vmatprep.subr.bf16.mxu0 %v1282_v0 }
  0x40   :  { %1085 = vmatmul.mubr.msk.f32.gmra.mrb[20].mxu0 %vm125_vm1, %v1481_v26 }
  0x41   :  { %1087 = vmatprep.mubr.msk.f32.mxu0 %vm1283_vm0, %v1284_v4  ;;  %1266 = vmatpush3.bf16.msra.mxu0 %v1265_v6 }
  0x44   :  { %1088 = vmatmul.mubr.msk.f32.gmra.mrb[22].mxu0 %vm125_vm1, %v1493_v28 }
  0x45   :  { %1090 = vmatprep.mubr.msk.f32.mxu0 %vm1283_vm0, %v1284_v4 }
  0x48   :  { %1091 = vmatmul.mubr.msk.f32.gmra.mrb[24].mxu0 %vm125_vm1, %v1515_v33 }
  0x49   :  { %1093 = vmatprep.mubr.msk.f32.mxu0 %vm1283_vm0, %v1284_v4 }
  0x4c   :  { %1094 = vmatmul.mubr.msk.f32.gmra.mrb[26].mxu0 %vm125_vm1, %v68_v40 }
  0x4d   :  { %1149 = vmatprep.mubr.msk.f32.mxu0 %vm1283_vm0, %v1284_v4 }
  0x50   :  { %1150 = vmatmul.mubr.msk.f32.vlgmr.msra.gmra.mrb[28].mxu0 %vm125_vm1, %v1413_v62 }
  0x51   :  { %1152 = vmatprep.mubr.msk.f32.mxu0 %vm1283_vm0, %v1284_v4 }
  0x54   :  { %1153 = vmatmul.mubr.msk.f32.gmra.mrb[30].mxu0 %vm125_vm1, %v1447_v13 }
  0x55   :  { %1155 = vmatprep.mubr.msk.f32.mxu0 %vm1283_vm0, %v1284_v4 }
  0x58   :  { %1156 = vmatmul.mubr.msk.f32.gmra.mrb[32].mxu0 %vm125_vm1, %v1467_v21 }
  0x59   :  { %1158 = vmatprep.mubr.msk.f32.mxu0 %vm1283_vm0, %v1284_v4 }
  0x5c   :  { %1159 = vmatmul.mubr.msk.f32.gmra.mrb[34].mxu0 %vm125_vm1, %v1481_v26 }
  0x5d   :  { %1161 = vmatprep.mubr.msk.f32.mxu0 %vm1283_vm0, %v1284_v4 }
  0x60   :  { %1162 = vmatmul.mubr.msk.f32.gmra.mrb[36].mxu0 %vm125_vm1, %v1493_v28 }
  0x61   :  { %1164 = vmatprep.mubr.msk.f32.mxu0 %vm1283_vm0, %v1284_v4 }
  0x64   :  { %1165 = vmatmul.mubr.msk.f32.gmra.mrb[38].mxu0 %vm125_vm1, %v1515_v33 }
  0x65   :  { %1167 = vmatprep.mubr.msk.f32.mxu0 %vm1283_vm0, %v1284_v4 }
  0x68   :  { %1168 = vmatmul.mubr.msk.f32.gmra.mrb[40].mxu0 %vm125_vm1, %v68_v40 }
  0xeb   :  { %v213_v62 = vpop.f32.mrb[0].mxu0 }
  0xec   :  { %v1003_v7 = vpop.f32.mrb[1].mxu0  ;;  %1039 = vmatmul.mubr.msk.f32.vlgmr.msra.gmra.mrb[0].mxu1 %vm125_vm1, %v213_v62 }
  0xed   :  { %1245 = vmatpush3.bf16.msra.mxu1 %v1418_v5  ;;  %1041 = vmatprep.mubr.msk.f32.mxu1 %vm1283_vm0, %v1284_v4 }
  0xee   :  { %1246 = vmatprep.subr.bf16.mxu1 %v1282_v0 }
  0xef   :  { %v218_v8 = vpop.f32.mrb[2].mxu0 }
  0xf0   :  { %v1006_v10 = vpop.f32.mrb[3].mxu0  ;;  %1042 = vmatmul.mubr.msk.f32.gmra.mrb[2].mxu1 %vm125_vm1, %v218_v8 }
  0xf1   :  { %1044 = vmatprep.mubr.msk.f32.mxu1 %vm1283_vm0, %v1284_v4  ;;  %1248 = vmatpush3.bf16.msra.mxu1 %v1431_v9 }
  0xf2   :  { %1249 = vmatprep.subr.bf16.mxu1 %v1282_v0 }
  0xf3   :  { %v223_v11 = vpop.f32.mrb[4].mxu0 }
  0xf4   :  { %v1009_v12 = vpop.f32.mrb[5].mxu0  ;;  %1045 = vmatmul.mubr.msk.f32.gmra.mrb[4].mxu1 %vm125_vm1, %v223_v11 }
  0xf5   :  { %1047 = vmatprep.mubr.msk.f32.mxu1 %vm1283_vm0, %v1284_v4  ;;  %1251 = vmatpush3.bf16.msra.mxu1 %v1451_v18 }
  0xf6   :  { %1252 = vmatprep.subr.bf16.mxu1 %v1282_v0 }
  0xf7   :  { %v228_v13 = vpop.f32.mrb[6].mxu0 }
  0xf8   :  { %v1012_v14 = vpop.f32.mrb[7].mxu0  ;;  %1048 = vmatmul.mubr.msk.f32.gmra.mrb[6].mxu1 %vm125_vm1, %v228_v13 }
  0xf9   :  { %1050 = vmatprep.mubr.msk.f32.mxu1 %vm1283_vm0, %v1284_v4  ;;  %1254 = vmatpush3.bf16.msra.mxu1 %v1471_v25 }
  0xfa   :  { %1267 = vmatprep.subr.bf16.mxu1 %v1282_v0 }
  0xfb   :  { %v233_v15 = vpop.f32.mrb[8].mxu0 }
  0xfc   :  { %v1015_v16 = vpop.f32.mrb[9].mxu0  ;;  %1051 = vmatmul.mubr.msk.f32.gmra.mrb[8].mxu1 %vm125_vm1, %v233_v15 }
  0xfd   :  { %1053 = vmatprep.mubr.msk.f32.mxu1 %vm1283_vm0, %v1284_v4 }
  0xff   :  { %v238_v17 = vpop.f32.mrb[10].mxu0 }
 0x100   :  { %v1018_v19 = vpop.f32.mrb[11].mxu0  ;;  %1054 = vmatmul.mubr.msk.f32.gmra.mrb[10].mxu1 %vm125_vm1, %v238_v17 }
 0x101   :  { %1056 = vmatprep.mubr.msk.f32.mxu1 %vm1283_vm0, %v1284_v4 }
 0x103   :  { %v243_v20 = vpop.f32.mrb[12].mxu0 }
 0x104   :  { %v1021_v21 = vpop.f32.mrb[13].mxu0  ;;  %1057 = vmatmul.mubr.msk.f32.gmra.mrb[12].mxu1 %vm125_vm1, %v243_v20 }
 0x105   :  { %1112 = vmatprep.mubr.msk.f32.mxu1 %vm1283_vm0, %v1284_v4 }
 0x107   :  { %v443_v22 = vpop.f32.mrb[14].mxu0 }
 0x108   :  { %v1077_v23 = vpop.f32.mrb[15].mxu0  ;;  %1113 = vmatmul.mubr.msk.f32.vlgmr.msra.gmra.mrb[14].mxu1 %vm125_vm1, %v443_v22 }
 0x109   :  { %1269 = vmatpush3.bf16.msra.mxu1 %v1418_v5  ;;  %1115 = vmatprep.mubr.msk.f32.mxu1 %vm1283_vm0, %v1284_v4 }
 0x10a   :  { %1270 = vmatprep.subr.bf16.mxu1 %v1282_v0 }
 0x10b   :  { %v448_v24 = vpop.f32.mrb[16].mxu0 }
 0x10c   :  { %v1080_v26 = vpop.f32.mrb[17].mxu0  ;;  %1116 = vmatmul.mubr.msk.f32.gmra.mrb[16].mxu1 %vm125_vm1, %v448_v24 }
 0x10d   :  { %1118 = vmatprep.mubr.msk.f32.mxu1 %vm1283_vm0, %v1284_v4  ;;  %1272 = vmatpush3.bf16.msra.mxu1 %v1431_v9 }
 0x10e   :  { %1273 = vmatprep.subr.bf16.mxu1 %v1282_v0 }
 0x10f   :  { %v453_v27 = vpop.f32.mrb[18].mxu0 }
 0x110   :  { %v1083_v28 = vpop.f32.mrb[19].mxu0  ;;  %1119 = vmatmul.mubr.msk.f32.gmra.mrb[18].mxu1 %vm125_vm1, %v453_v27 }
 0x111   :  { %1121 = vmatprep.mubr.msk.f32.mxu1 %vm1283_vm0, %v1284_v4  ;;  %1275 = vmatpush3.bf16.msra.mxu1 %v1451_v18 }
 0x112   :  { %1276 = vmatprep.subr.bf16.mxu1 %v1282_v0 }
 0x113   :  { %v458_v5 = vpop.f32.mrb[20].mxu0 }
 0x114   :  { %v1086_v29 = vpop.f32.mrb[21].mxu0  ;;  %1122 = vmatmul.mubr.msk.f32.gmra.mrb[20].mxu1 %vm125_vm1, %v458_v5 }
 0x115   :  { %1124 = vmatprep.mubr.msk.f32.mxu1 %vm1283_vm0, %v1284_v4  ;;  %1278 = vmatpush3.bf16.msra.mxu1 %v1471_v25 }
 0x117   :  { %v463_v9 = vpop.f32.mrb[22].mxu0 }
 0x118   :  { %v1089_v30 = vpop.f32.mrb[23].mxu0  ;;  %1125 = vmatmul.mubr.msk.f32.gmra.mrb[22].mxu1 %vm125_vm1, %v463_v9 }
 0x119   :  { %1127 = vmatprep.mubr.msk.f32.mxu1 %vm1283_vm0, %v1284_v4 }
 0x11b   :  { %v468_v31 = vpop.f32.mrb[24].mxu0 }
 0x11c   :  { %v1092_v18 = vpop.f32.mrb[25].mxu0  ;;  %1128 = vmatmul.mubr.msk.f32.gmra.mrb[24].mxu1 %vm125_vm1, %v468_v31 }
 0x11d   :  { %1130 = vmatprep.mubr.msk.f32.mxu1 %vm1283_vm0, %v1284_v4 }
 0x11f   :  { %v473_v0 = vpop.f32.mrb[26].mxu0 }
 0x120   :  { %v1095_v32 = vpop.f32.mrb[27].mxu0  ;;  %1131 = vmatmul.mubr.msk.f32.gmra.mrb[26].mxu1 %vm125_vm1, %v473_v0 }
 0x121   :  { %1186 = vmatprep.mubr.msk.f32.mxu1 %vm1283_vm0, %v1284_v4 }
 0x123   :  { %v672_v25 = vpop.f32.mrb[28].mxu0 }
 0x124   :  { %v1151_v33 = vpop.f32.mrb[29].mxu0  ;;  %1187 = vmatmul.mubr.msk.f32.vlgmr.msra.gmra.mrb[28].mxu1 %vm125_vm1, %v672_v25 }
 0x125   :  { %1189 = vmatprep.mubr.msk.f32.mxu1 %vm1283_vm0, %v1284_v4 }
 0x127   :  { %v677_v34 = vpop.f32.mrb[30].mxu0 }
 0x128   :  { %v1154_v35 = vpop.f32.mrb[31].mxu0  ;;  %1190 = vmatmul.mubr.msk.f32.gmra.mrb[30].mxu1 %vm125_vm1, %v677_v34 }
 0x129   :  { %1192 = vmatprep.mubr.msk.f32.mxu1 %vm1283_vm0, %v1284_v4 }
 0x12b   :  { %v682_v36 = vpop.f32.mrb[32].mxu0 }
 0x12c   :  { %v1157_v37 = vpop.f32.mrb[33].mxu0  ;;  %1193 = vmatmul.mubr.msk.f32.gmra.mrb[32].mxu1 %vm125_vm1, %v682_v36 }
 0x12d   :  { %1195 = vmatprep.mubr.msk.f32.mxu1 %vm1283_vm0, %v1284_v4 }
 0x12f   :  { %v687_v38 = vpop.f32.mrb[34].mxu0 }
 0x130   :  { %v1160_v39 = vpop.f32.mrb[35].mxu0  ;;  %1196 = vmatmul.mubr.msk.f32.gmra.mrb[34].mxu1 %vm125_vm1, %v687_v38 }
 0x131   :  { %1198 = vmatprep.mubr.msk.f32.mxu1 %vm1283_vm0, %v1284_v4 }
 0x133   :  { %v692_v40 = vpop.f32.mrb[36].mxu0 }
 0x134   :  { %v1163_v41 = vpop.f32.mrb[37].mxu0  ;;  %1199 = vmatmul.mubr.msk.f32.gmra.mrb[36].mxu1 %vm125_vm1, %v692_v40 }
 0x135   :  { %1201 = vmatprep.mubr.msk.f32.mxu1 %vm1283_vm0, %v1284_v4 }
 0x137   :  { %v697_v42 = vpop.f32.mrb[38].mxu0 }
 0x138   :  { %v1166_v43 = vpop.f32.mrb[39].mxu0  ;;  %1202 = vmatmul.mubr.msk.f32.gmra.mrb[38].mxu1 %vm125_vm1, %v697_v42 }
 0x139   :  { %1204 = vmatprep.mubr.msk.f32.mxu1 %vm1283_vm0, %v1284_v4 }
 0x13b   :  { %v702_v44 = vpop.f32.mrb[40].mxu0 }
 0x13c   :  { %v1169_v45 = vpop.f32.mrb[41].mxu0  ;;  %1205 = vmatmul.mubr.msk.f32.gmra.mrb[40].mxu1 %vm125_vm1, %v702_v44 }
 0x1bf   :  { %v334_v46 = vpop.f32.mrb[0].mxu1 }
 0x1c0   :  { %369 = vst.msk [vmem:[%s1781_s3] sm:$0xff] %vm368_vm2, %v334_v46  ;;  %v1040_v47 = vpop.f32.mrb[1].mxu1 }
 0x1c3   :  { %v339_v48 = vpop.f32.mrb[2].mxu1 }
 0x1c4   :  { %370 = vst.msk [vmem:[%s1781_s3 + $0x8] sm:$0xff] %vm368_vm2, %v339_v48  ;;  %v1043_v49 = vpop.f32.mrb[3].mxu1 }
 0x1c7   :  { %v344_v4 = vpop.f32.mrb[4].mxu1 }
 0x1c8   :  { %371 = vst.msk [vmem:[%s1781_s3 + $0x10] sm:$0xff] %vm368_vm2, %v344_v4  ;;  %v1046_v50 = vpop.f32.mrb[5].mxu1 }
 0x1cb   :  { %v349_v51 = vpop.f32.mrb[6].mxu1 }
 0x1cc   :  { %372 = vst.msk [vmem:[%s1781_s3 + $0x18] sm:$0xff] %vm368_vm2, %v349_v51  ;;  %v1049_v52 = vpop.f32.mrb[7].mxu1 }
 0x1cf   :  { %v354_v53 = vpop.f32.mrb[8].mxu1 }
 0x1d0   :  { %373 = vst.msk [vmem:[%s1781_s3 + $0x20] sm:$0xff] %vm368_vm2, %v354_v53  ;;  %v1052_v54 = vpop.f32.mrb[9].mxu1 }
 0x1d3   :  { %v359_v55 = vpop.f32.mrb[10].mxu1 }
 0x1d4   :  { %374 = vst.msk [vmem:[%s1781_s3 + $0x28] sm:$0xff] %vm368_vm2, %v359_v55  ;;  %v1055_v56 = vpop.f32.mrb[11].mxu1 }
 0x1d7   :  { %v364_v57 = vpop.f32.mrb[12].mxu1 }
 0x1d8   :  { %376 = vst.msk [vmem:[%s1781_s3 + $0x30] sm:$0x3] %vm375_vm3, %v364_v57  ;;  %v1058_v58 = vpop.f32.mrb[13].mxu1 }
 0x1db   :  { %v564_v59 = vpop.f32.mrb[14].mxu1 }
 0x1dc   :  { %867 = vst.msk [vmem:[%s1781_s3 + $0x38] sm:$0xff] %vm368_vm2, %v564_v59  ;;  %v1114_v60 = vpop.f32.mrb[15].mxu1 }
 0x1df   :  { %v569_v61 = vpop.f32.mrb[16].mxu1 }
 0x1e0   :  { %868 = vst.msk [vmem:[%s1781_s3 + $0x40] sm:$0xff] %vm368_vm2, %v569_v61  ;;  %v1117_v63 = vpop.f32.mrb[17].mxu1 }
 0x1e3   :  { %v574_v1 = vpop.f32.mrb[18].mxu1 }
 0x1e4   :  { %869 = vst.msk [vmem:[%s1781_s3 + $0x48] sm:$0xff] %vm368_vm2, %v574_v1  ;;  %v1120_v2 = vpop.f32.mrb[19].mxu1 }
 0x1e7   :  { %v579_v3 = vpop.f32.mrb[20].mxu1 }
 0x1e8   :  { %870 = vst.msk [vmem:[%s1781_s3 + $0x50] sm:$0xff] %vm368_vm2, %v579_v3  ;;  %v1123_v6 = vpop.f32.mrb[21].mxu1 }
 0x1eb   :  { %v584_v62 = vpop.f32.mrb[22].mxu1 }
 0x1ec   :  { %871 = vst.msk [vmem:[%s1781_s3 + $0x58] sm:$0xff] %vm368_vm2, %v584_v62  ;;  %v1126_v7 = vpop.f32.mrb[23].mxu1 }
 0x1ef   :  { %v589_v8 = vpop.f32.mrb[24].mxu1 }
 0x1f0   :  { %872 = vst.msk [vmem:[%s1781_s3 + $0x60] sm:$0xff] %vm368_vm2, %v589_v8  ;;  %v1129_v10 = vpop.f32.mrb[25].mxu1 }
 0x1f3   :  { %v594_v11 = vpop.f32.mrb[26].mxu1 }
 0x1f4   :  { %873 = vst.msk [vmem:[%s1781_s3 + $0x68] sm:$0x3] %vm375_vm3, %v594_v11  ;;  %v1132_v12 = vpop.f32.mrb[27].mxu1 }
 0x1f7   :  { %v793_v13 = vpop.f32.mrb[28].mxu1 }
 0x1f8   :  { %888 = vst.msk [vmem:[%s1781_s3 + $0x70] sm:$0xff] %vm368_vm2, %v793_v13  ;;  %v1188_v14 = vpop.f32.mrb[29].mxu1 }
 0x1fb   :  { %v798_v15 = vpop.f32.mrb[30].mxu1 }
 0x1fc   :  { %889 = vst.msk [vmem:[%s1781_s3 + $0x78] sm:$0xff] %vm368_vm2, %v798_v15  ;;  %v1191_v16 = vpop.f32.mrb[31].mxu1 }
 0x1ff   :  { %v803_v17 = vpop.f32.mrb[32].mxu1 }
 0x200   :  { %890 = vst.msk [vmem:[%s1781_s3 + $0x80] sm:$0xff] %vm368_vm2, %v803_v17  ;;  %v1194_v19 = vpop.f32.mrb[33].mxu1 }
 0x203   :  { %v808_v20 = vpop.f32.mrb[34].mxu1 }
 0x204   :  { %891 = vst.msk [vmem:[%s1781_s3 + $0x88] sm:$0xff] %vm368_vm2, %v808_v20  ;;  %v1197_v21 = vpop.f32.mrb[35].mxu1 }
 0x207   :  { %v813_v22 = vpop.f32.mrb[36].mxu1 }
 0x208   :  { %892 = vst.msk [vmem:[%s1781_s3 + $0x90] sm:$0xff] %vm368_vm2, %v813_v22  ;;  %v1200_v23 = vpop.f32.mrb[37].mxu1 }
 0x20b   :  { %v818_v24 = vpop.f32.mrb[38].mxu1 }
 0x20c   :  { %893 = vst.msk [vmem:[%s1781_s3 + $0x98] sm:$0xff] %vm368_vm2, %v818_v24  ;;  %v1203_v26 = vpop.f32.mrb[39].mxu1 }
 0x20f   :  { %v823_v27 = vpop.f32.mrb[40].mxu1 }
 0x210   :  { %894 = vst.msk [vmem:[%s1781_s3 + $0xa0] sm:$0x3] %vm375_vm3, %v823_v27  ;;  %v1206_v28 = vpop.f32.mrb[41].mxu1 }

</bundles_post_ra>
